<compile_context>
chip_gen: v7x
topology: tpu7x:2x2x1
jax: 0.10.0
libtpu: 0.0.40
codegen_flags: <defaults>
</compile_context>

<pallas_src>
import functools
import numpy as np
import jax
import jax.numpy as jnp
from jax.experimental import pallas as pl
from jax.experimental.pallas import tpu as pltpu

try:
    from scipy.optimize import linear_sum_assignment as _lsa
    _HAVE_SCIPY = True
except Exception:  # pragma: no cover
    _HAVE_SCIPY = False


def _round_up(x, m):
    return ((x + m - 1) // m) * m


# ----------------------------- Pallas kernels --------------------------------
def _class_kpts_cost(logits, pts, tptsT, *, alpha, gamma, class_w, coord_w):
    """Focal classification cost + L1 cdist (targets lane-dense on 128 lanes)."""
    prob = jax.nn.sigmoid(logits.astype(jnp.float32))                  # (TN, 1)
    neg = (1.0 - alpha) * prob ** gamma * (-jnp.log(1.0 - prob + 1e-8))
    pos = alpha * (1.0 - prob) ** gamma * (-jnp.log(prob + 1e-8))
    cost_class = pos - neg                                             # (TN, 1)

    a = pts.astype(jnp.float32)                                        # (TN, D)
    bT = tptsT.astype(jnp.float32)                                     # (D, Mpad)
    tn, d = a.shape
    mpad = bT.shape[1]
    cost_kpts = jnp.zeros((tn, mpad), jnp.float32)
    # Unrolled loop over the D coordinates: keeps Mpad on the 128-lane axis and
    # avoids materializing a (TN, Mpad, D) broadcast intermediate.
    for dd in range(d):
        cost_kpts = cost_kpts + jnp.abs(a[:, dd:dd + 1] - bT[dd:dd + 1, :])
    return class_w * cost_class + coord_w * cost_kpts                  # (TN, Mpad)


def _cost_kernel_nomask(logits_ref, pts_ref, tptsT_ref, c_ref, *,
                        alpha, gamma, class_w, coord_w):
    c = _class_kpts_cost(logits_ref[...], pts_ref[...], tptsT_ref[...],
                         alpha=alpha, gamma=gamma,
                         class_w=class_w, coord_w=coord_w)
    c_ref[...] = c.astype(c_ref.dtype)


def _cost_kernel_mask(logits_ref, pts_ref, tptsT_ref, tsum_ref,
                      omask_ref, tmaskT_ref, c_ref, acc_ref, *,
                      alpha, gamma, class_w, coord_w, mask_w, m_real):
    k = pl.program_id(1)

    @pl.when(k == 0)
    def _():
        acc_ref[...] = jnp.zeros_like(acc_ref)

    # Dice numerator chunk: sigmoid in f32, bf16 MXU operands, f32 accumulate.
    sig = jax.nn.sigmoid(omask_ref[...].astype(jnp.float32)).astype(jnp.bfloat16)
    acc_ref[...] += jnp.dot(sig, tmaskT_ref[...],
                            preferred_element_type=jnp.float32)        # (TN, Mpad)

    @pl.when(k == pl.num_programs(1) - 1)
    def _():
        acc = acc_ref[...]
        # Column `m_real` of the target-mask matrix is all ones over the real
        # sample points, so that accumulator column is sum(sigmoid(out_mask))
        # — produced by the same MXU pass, no extra XLU reduction per step.
        sig_sum = acc[:, m_real:m_real + 1]                            # (TN, 1)
        tsum = tsum_ref[...]                                           # (1, Mpad)
        dice = 1.0 - (2.0 * acc + 1.0) / (sig_sum + tsum + 1.0)
        c = _class_kpts_cost(logits_ref[...], pts_ref[...], tptsT_ref[...],
                             alpha=alpha, gamma=gamma,
                             class_w=class_w, coord_w=coord_w)
        c_ref[...] = (c + mask_w * dice).astype(c_ref.dtype)


# ----------------------------- Kernel wrapper ---------------------------------
def pallas_cost_matrix(logits, pts, tgt_pts_flat, out_samp, tgt_samp, *,
                       class_w, coord_w, mask_w, alpha, gamma, use_mask,
                       tile_n=128, chunk_p=1792):
    """Compute the (N, M) matching cost matrix with Pallas TPU kernels."""
    N, Lc = logits.shape
    M, D = tgt_pts_flat.shape

    # Pad query rows to a multiple of tile_n.
    n_pad = (-N) % tile_n
    Np = N + n_pad
    if n_pad:
        logits = jnp.pad(logits, ((0, n_pad), (0, 0)))
        pts = jnp.pad(pts, ((0, n_pad), (0, 0)))

    # Lane-dense target axis; +1 spare row reserved for the "ones row" trick.
    Mpad = _round_up(M + 1, 128)
    tptsT = jnp.pad(tgt_pts_flat, ((0, Mpad - M), (0, 0))).T           # (D, Mpad)

    common = dict(alpha=float(alpha), gamma=float(gamma),
                  class_w=float(class_w), coord_w=float(coord_w))

    if not use_mask:
        kern = functools.partial(_cost_kernel_nomask, **common)
        c = pl.pallas_call(
            kern,
            out_shape=jax.ShapeDtypeStruct((Np, Mpad), jnp.float32),
            grid=(Np // tile_n,),
            in_specs=[
                pl.BlockSpec((tile_n, Lc), lambda i: (i, 0)),
                pl.BlockSpec((tile_n, D), lambda i: (i, 0)),
                pl.BlockSpec((D, Mpad), lambda i: (0, 0)),
            ],
            out_specs=pl.BlockSpec((tile_n, Mpad), lambda i: (i, 0)),
            compiler_params=pltpu.CompilerParams(
                dimension_semantics=("parallel",)),
        )(logits.astype(jnp.float32), pts.astype(jnp.float32),
          tptsT.astype(jnp.float32))
        return c[:N, :M]

    P = out_samp.shape[1]
    # Target mask rows: real targets, one all-ones row at index M, zero pad.
    tmask_p = jnp.zeros((Mpad, P), jnp.float32)
    tmask_p = tmask_p.at[:M].set(tgt_samp.astype(jnp.float32))
    tmask_p = tmask_p.at[M].set(1.0)
    # Hoisted target-mask sums (computed once, outside the kernel).
    tsum = jnp.sum(tmask_p, axis=-1).astype(jnp.float32).reshape(1, Mpad)

    chunk_p = min(chunk_p, _round_up(P, 128))
    p_pad = (-P) % chunk_p
    Pp = P + p_pad

    omask_p = out_samp.astype(jnp.float32)
    if n_pad:
        omask_p = jnp.pad(omask_p, ((0, n_pad), (0, 0)))
    if p_pad:
        omask_p = jnp.pad(omask_p, ((0, 0), (0, p_pad)))
    tmaskT = tmask_p.T                                                 # (P, Mpad)
    if p_pad:
        tmaskT = jnp.pad(tmaskT, ((0, p_pad), (0, 0)))

    # bf16 mask operands: halves HBM/VMEM traffic; native bf16 MXU everywhere.
    omask_b = omask_p.astype(jnp.bfloat16)
    tmaskT_b = tmaskT.astype(jnp.bfloat16)

    kern = functools.partial(_cost_kernel_mask, mask_w=float(mask_w),
                             m_real=int(M), **common)
    c = pl.pallas_call(
        kern,
        out_shape=jax.ShapeDtypeStruct((Np, Mpad), jnp.float32),
        grid=(Np // tile_n, Pp // chunk_p),
        in_specs=[
            pl.BlockSpec((tile_n, Lc), lambda i, k: (i, 0)),
            pl.BlockSpec((tile_n, D), lambda i, k: (i, 0)),
            pl.BlockSpec((D, Mpad), lambda i, k: (0, 0)),
            pl.BlockSpec((1, Mpad), lambda i, k: (0, 0)),
            pl.BlockSpec((tile_n, chunk_p), lambda i, k: (i, k)),
            pl.BlockSpec((chunk_p, Mpad), lambda i, k: (k, 0)),
        ],
        out_specs=pl.BlockSpec((tile_n, Mpad), lambda i, k: (i, 0)),
        scratch_shapes=[pltpu.VMEM((tile_n, Mpad), jnp.float32)],
        compiler_params=pltpu.CompilerParams(
            dimension_semantics=("parallel", "arbitrary")),
    )(logits.astype(jnp.float32), pts.astype(jnp.float32),
      tptsT.astype(jnp.float32), tsum, omask_b, tmaskT_b)
    return c[:N, :M]


# ----------------------------- JAX glue --------------------------------------
def resize_nearest(masks, out_h, out_w):
    """torch F.interpolate(mode='nearest') on (N, Hin, Win)."""
    _, hin, win = masks.shape
    rows = jnp.floor(jnp.arange(out_h) * (hin / out_h)).astype(jnp.int32)
    cols = jnp.floor(jnp.arange(out_w) * (win / out_w)).astype(jnp.int32)
    return masks[:, rows][:, :, cols]


def point_sample(img, coords):
    """detectron2 point_sample: bilinear grid_sample, align_corners=False,
    zero padding. img: (B, H, W), coords: (B, Np, 2) in [0, 1] (x, y)."""
    B, H, W = img.shape
    gx = coords[..., 0] * 2.0 - 1.0
    gy = coords[..., 1] * 2.0 - 1.0
    ix = ((gx + 1.0) * W - 1.0) / 2.0
    iy = ((gy + 1.0) * H - 1.0) / 2.0
    ix0 = jnp.floor(ix)
    iy0 = jnp.floor(iy)
    ix1 = ix0 + 1.0
    iy1 = iy0 + 1.0
    wx1 = ix - ix0
    wx0 = 1.0 - wx1
    wy1 = iy - iy0
    wy0 = 1.0 - wy1
    flat = img.reshape(B, H * W)

    def gather(iyk, ixk):
        valid = (ixk >= 0) & (ixk <= W - 1) & (iyk >= 0) & (iyk <= H - 1)
        ixc = jnp.clip(ixk, 0, W - 1).astype(jnp.int32)
        iyc = jnp.clip(iyk, 0, H - 1).astype(jnp.int32)
        vals = jnp.take_along_axis(flat, iyc * W + ixc, axis=1)
        return jnp.where(valid, vals, 0.0)

    v00 = gather(iy0, ix0)
    v01 = gather(iy0, ix1)
    v10 = gather(iy1, ix0)
    v11 = gather(iy1, ix1)
    return v00 * wy0 * wx0 + v01 * wy0 * wx1 + v10 * wy1 * wx0 + v11 * wy1 * wx1


def _assign(cost):
    if _HAVE_SCIPY:
        return _lsa(cost)
    # TODO(synk): Hungarian (linear_sum_assignment) has no Pallas equivalent; greedy host fallback.
    cost = np.array(cost, dtype=np.float64, copy=True)
    nr, nc = cost.shape
    k = min(nr, nc)
    rows, cols = [], []
    for _ in range(k):
        r, c = np.unravel_index(np.argmin(cost), cost.shape)
        rows.append(r)
        cols.append(c)
        cost[r, :] = np.inf
        cost[:, c] = np.inf
    order = np.argsort(rows)
    return np.asarray(rows)[order], np.asarray(cols)[order]


def reference_cost(out_logits, out_pts, tgt_pts_flat, out_samp, tgt_samp,
                   use_mask, *, class_w, coord_w, mask_w, alpha, gamma):
    """Pure-JAX f32 reference of the PyTorch cost matrix (for validation)."""
    prob = jax.nn.sigmoid(out_logits)
    neg = (1.0 - alpha) * prob ** gamma * (-jnp.log(1.0 - prob + 1e-8))
    pos = alpha * (1.0 - prob) ** gamma * (-jnp.log(prob + 1e-8))
    cost_class = pos - neg
    cost_kpts = jnp.sum(jnp.abs(out_pts[:, None, :] - tgt_pts_flat[None, :, :]), -1)
    C = class_w * cost_class + coord_w * cost_kpts
    if use_mask:
        sig = jax.nn.sigmoid(out_samp)
        numer = 2.0 * sig @ tgt_samp.T
        denom = sig.sum(-1, keepdims=True) + tgt_samp.sum(-1)[None, :]
        C = C + mask_w * (1.0 - (numer + 1.0) / (denom + 1.0))
    return C


# ----------------------------- Matcher ---------------------------------------
class CtrlPointHungarianMatcher:
    def __init__(self, class_weight=1, coord_weight=1,
                 focal_alpha=0.25, focal_gamma=2.0):
        # Matches the PyTorch __init__ exactly (it hardcodes the weights).
        self.class_weight = 2.0
        self.coord_weight = 5.0
        self.mask_weight = 2.0
        self.alpha = focal_alpha
        self.gamma = focal_gamma
        self.num_points = 12544
        assert class_weight != 0 or coord_weight != 0, 'all costs cant be 0'

    def __call__(self, outputs, targets, lvl, rng_key):
        pred_logits = outputs['pred_logits']          # (B, Q, 1)
        pred_pts = outputs['pred_ctrl_points']        # (B, Q, Npts, 2)
        bs, num_queries = pred_logits.shape[:2]
        N = bs * num_queries

        out_logits = pred_logits.reshape(N, pred_logits.shape[-1]).astype(jnp.float32)
        out_pts = pred_pts.reshape(N, -1).astype(jnp.float32)
        tgt_pts = jnp.concatenate([t['ctrl_points'] for t in targets], axis=0)
        tgt_pts_flat = tgt_pts.reshape(tgt_pts.shape[0], -1).astype(jnp.float32)
        M = tgt_pts_flat.shape[0]
        sizes = [int(t['ctrl_points'].shape[0]) for t in targets]

        if M == 0:  # degenerate: no targets anywhere in the batch
            empty = np.array([], dtype=np.int64)
            return [(empty, empty) for _ in targets], jnp.zeros((N, 0), jnp.float32)

        use_mask = lvl < 2
        if use_mask:
            seg = outputs['pred_seg_mask']
            H, W = seg.shape[-2:]
            out_masks = seg.reshape(N, H, W)
            tgt_masks = jnp.concatenate(
                [t['segmentation_map'] for t in targets], axis=0).astype(jnp.float32)
            tgt_masks = resize_nearest(tgt_masks, H, W)
            point_coords = jax.random.uniform(
                rng_key, (1, self.num_points, 2), dtype=jnp.float32)
            tgt_samp = point_sample(tgt_masks, jnp.tile(point_coords, (M, 1, 1)))
            out_samp = point_sample(out_masks, jnp.tile(point_coords, (N, 1, 1)))
        else:
            out_samp = None
            tgt_samp = None

        C = pallas_cost_matrix(
            out_logits, out_pts, tgt_pts_flat, out_samp, tgt_samp,
            class_w=self.class_weight, coord_w=self.coord_weight,
            mask_w=self.mask_weight, alpha=self.alpha, gamma=self.gamma,
            use_mask=use_mask)

        C_host = np.asarray(jax.device_get(C)).reshape(bs, num_queries, -1)
        splits = np.cumsum(sizes)[:-1]
        chunks = np.split(C_host, splits, axis=-1)
        indices = []
        for i, c in enumerate(chunks):
            if c.shape[-1] == 0:
                indices.append((np.array([], np.int64), np.array([], np.int64)))
                continue
            r, col = _assign(c[i])
            indices.append((np.asarray(r, dtype=np.int64),
                            np.asarray(col, dtype=np.int64)))
        return indices, C


# ----------------------------- Demo -------------------------------------------
if __name__ == "__main__":
    key = jax.random.PRNGKey(0)
    keys = jax.random.split(key, 10)
    k1, k2, k3, k4, krand = keys[:5]
    ck = keys[5:]

    bs, nq, npts = 2, 8, 16
    H = W = 16          # predicted seg-mask resolution
    Ht = Wt = 32        # GT segmentation-map resolution

    # ---- standalone kernel correctness check vs pure-JAX f32 reference ------
    kN, kM, kD, kP = bs * nq, 5, npts * 2, 12544
    lg = jax.random.normal(ck[0], (kN, 1), jnp.float32)
    pp = jax.random.uniform(ck[1], (kN, kD), jnp.float32)
    tp = jax.random.uniform(ck[2], (kM, kD), jnp.float32)
    om = jax.random.normal(ck[3], (kN, kP), jnp.float32)
    tm = (jax.random.uniform(ck[4], (kM, kP)) > 0.5).astype(jnp.float32)
    wargs = dict(class_w=2.0, coord_w=5.0, mask_w=2.0, alpha=0.25, gamma=2.0)
    for um in (True, False):
        C_pal = pallas_cost_matrix(lg, pp, tp, om, tm, use_mask=um, **wargs)
        C_ref = reference_cost(lg, pp, tp, om, tm, um, **wargs)
        np.testing.assert_allclose(np.asarray(jax.device_get(C_pal)),
                                   np.asarray(jax.device_get(C_ref)),
                                   rtol=2e-2, atol=1e-1)

    # ---- full matcher forward ------------------------------------------------
    outputs = {
        'pred_logits': jax.random.normal(k1, (bs, nq, 1), jnp.float32),
        'pred_ctrl_points': jax.random.uniform(k2, (bs, nq, npts, 2), jnp.float32),
        'pred_seg_mask': jax.random.normal(k3, (bs, nq, H, W), jnp.float32),
    }

    sizes = [3, 2]
    tkeys = jax.random.split(k4, 2 * len(sizes))
    targets = []
    for bi, n in enumerate(sizes):
        targets.append({
            'ctrl_points': jax.random.uniform(tkeys[2 * bi], (n, npts, 2), jnp.float32),
            'segmentation_map': (jax.random.uniform(tkeys[2 * bi + 1], (n, Ht, Wt))
                                 > 0.5).astype(jnp.float32),
        })

    matcher = CtrlPointHungarianMatcher()
    indices, C_dev = matcher(outputs, targets, lvl=0, rng_key=krand)
    jax.block_until_ready(C_dev)

    C_np = np.asarray(C_dev)
    assert C_np.shape == (bs * nq, sum(sizes))
    assert np.all(np.isfinite(C_np))
    assert len(indices) == bs
    for (r, c), n in zip(indices, sizes):
        assert len(r) == len(c) == min(nq, n)

    print("KERNEL_OK")
</pallas_src>

<mosaic_0001>
module attributes {stable_mosaic.version = 11 : i64} {
  func.func @_cost_kernel_mask(%arg0: i32, %arg1: i32, %arg2: memref<128x1xf32, #tpu.memory_space<vmem>>, %arg3: memref<128x32xf32, #tpu.memory_space<vmem>>, %arg4: memref<32x128xf32, #tpu.memory_space<vmem>>, %arg5: memref<1x128xf32, #tpu.memory_space<vmem>>, %arg6: memref<128x1792xbf16, #tpu.memory_space<vmem>>, %arg7: memref<1792x128xbf16, #tpu.memory_space<vmem>>, %arg8: memref<128x128xf32, #tpu.memory_space<vmem>>, %arg9: memref<128x128xf32, #tpu.memory_space<vmem>>) attributes {dimension_semantics = [#tpu.dimension_semantics<parallel>, #tpu.dimension_semantics<arbitrary>], iteration_bounds = array<i64: 1, 7>, scalar_prefetch = 0 : i64, scratch_operands = 1 : i64, tpu.core_type = #tpu.core_type<tc>, window_params = [{transform_indices = @transform_0, window_bounds = array<i64: 128, 1>}, {transform_indices = @transform_1, window_bounds = array<i64: 128, 32>}, {pipeline_mode = #tpu.pipeline_mode<synchronous>, transform_indices = @transform_2, window_bounds = array<i64: 32, 128>}, {pipeline_mode = #tpu.pipeline_mode<synchronous>, transform_indices = @transform_3, window_bounds = array<i64: 1, 128>}, {transform_indices = @transform_4, window_bounds = array<i64: 128, 1792>}, {transform_indices = @transform_5, window_bounds = array<i64: 1792, 128>}, {transform_indices = @transform_6, window_bounds = array<i64: 128, 128>}]} {
    %c0_i32 = arith.constant 0 : i32
    %0 = arith.cmpi eq, %arg1, %c0_i32 : i32
    %1 = arith.extui %0 : i1 to i32
    %c0_i32_0 = arith.constant 0 : i32
    %2 = arith.cmpi ne, %1, %c0_i32_0 : i32
    scf.if %2 {
      %cst_10 = arith.constant 0.000000e+00 : f32
      %19 = vector.broadcast %cst_10 : f32 to vector<128x128xf32>
      %c0_11 = arith.constant 0 : index
      %c0_12 = arith.constant 0 : index
      %20 = vector.load %arg9[%c0_11, %c0_12] : memref<128x128xf32, #tpu.memory_space<vmem>>, vector<128x128xf32>
      tpu.vector_store %arg9[%c0_11, %c0_12], %19 {strides = array<i32>} : memref<128x128xf32, #tpu.memory_space<vmem>>, vector<128x128xf32>,
    } else {
    }
    %c0 = arith.constant 0 : index
    %c0_1 = arith.constant 0 : index
    %3 = vector.load %arg6[%c0, %c0_1] : memref<128x1792xbf16, #tpu.memory_space<vmem>>, vector<128x1792xbf16>
    %4 = arith.extf %3 : vector<128x1792xbf16> to vector<128x1792xf32>
    %5 = arith.negf %4 : vector<128x1792xf32>
    %6 = math.exp %5 : vector<128x1792xf32>
    %cst = arith.constant 1.000000e+00 : f32
    %7 = vector.broadcast %cst : f32 to vector<128x1792xf32>
    %8 = arith.addf %7, %6 : vector<128x1792xf32>
    %9 = arith.divf %7, %8 : vector<128x1792xf32>
    %10 = arith.truncf %9 : vector<128x1792xf32> to vector<128x1792xbf16>
    %c0_2 = arith.constant 0 : index
    %c0_3 = arith.constant 0 : index
    %11 = vector.load %arg9[%c0_2, %c0_3] : memref<128x128xf32, #tpu.memory_space<vmem>>, vector<128x128xf32>
    %c0_4 = arith.constant 0 : index
    %c0_5 = arith.constant 0 : index
    %12 = vector.load %arg7[%c0_4, %c0_5] : memref<1792x128xbf16, #tpu.memory_space<vmem>>, vector<1792x128xbf16>
    %cst_6 = arith.constant dense<0.000000e+00> : vector<128x128xf32>
    %13 = tpu.matmul %10, %12, %cst_6 {dimension_numbers = #tpu.dot_dimension_numbers<[1], [0], [0], [1], [0, 0, 1, 1], [], []>} : vector<128x1792xbf16>, vector<1792x128xbf16>, vector<128x128xf32> -> vector<128x128xf32>
    %14 = arith.addf %11, %13 : vector<128x128xf32>
    %c0_7 = arith.constant 0 : index
    %c0_8 = arith.constant 0 : index
    %15 = vector.load %arg9[%c0_7, %c0_8] : memref<128x128xf32, #tpu.memory_space<vmem>>, vector<128x128xf32>
    tpu.vector_store %arg9[%c0_7, %c0_8], %14 {strides = array<i32>} : memref<128x128xf32, #tpu.memory_space<vmem>>, vector<128x128xf32>,
    %c6_i32 = arith.constant 6 : i32
    %16 = arith.cmpi eq, %arg1, %c6_i32 : i32
    %17 = arith.extui %16 : i1 to i32
    %c0_i32_9 = arith.constant 0 : i32
    %18 = arith.cmpi ne, %17, %c0_i32_9 : i32
    scf.if %18 {
      %c0_10 = arith.constant 0 : index
      %c0_11 = arith.constant 0 : index
      %19 = vector.load %arg9[%c0_10, %c0_11] : memref<128x128xf32, #tpu.memory_space<vmem>>, vector<128x128xf32>
      %20 = vector.extract_strided_slice %19 {offsets = [0, 5], sizes = [128, 1], strides = [1, 1]} : vector<128x128xf32> to vector<128x1xf32>
      %c0_12 = arith.constant 0 : index
      %c0_13 = arith.constant 0 : index
      %21 = vector.load %arg5[%c0_12, %c0_13] : memref<1x128xf32, #tpu.memory_space<vmem>>, vector<1x128xf32>
      %cst_14 = arith.constant 2.000000e+00 : f32
      %22 = vector.broadcast %cst_14 : f32 to vector<128x128xf32>
      %23 = arith.mulf %22, %19 : vector<128x128xf32>
      %cst_15 = arith.constant 1.000000e+00 : f32
      %24 = vector.broadcast %cst_15 : f32 to vector<128x128xf32>
      %25 = arith.addf %23, %24 : vector<128x128xf32>
      %26 = vector.broadcast %20 : vector<128x1xf32> to vector<128x128xf32>
      %27 = vector.broadcast %21 : vector<1x128xf32> to vector<128x128xf32>
      %28 = arith.addf %26, %27 : vector<128x128xf32>
      %cst_16 = arith.constant 1.000000e+00 : f32
      %29 = vector.broadcast %cst_16 : f32 to vector<128x128xf32>
      %30 = arith.addf %28, %29 : vector<128x128xf32>
      %31 = arith.divf %25, %30 : vector<128x128xf32>
      %cst_17 = arith.constant 1.000000e+00 : f32
      %32 = vector.broadcast %cst_17 : f32 to vector<128x128xf32>
      %33 = arith.subf %32, %31 : vector<128x128xf32>
      %c0_18 = arith.constant 0 : index
      %c0_19 = arith.constant 0 : index
      %34 = vector.load %arg2[%c0_18, %c0_19] : memref<128x1xf32, #tpu.memory_space<vmem>>, vector<128x1xf32>
      %c0_20 = arith.constant 0 : index
      %c0_21 = arith.constant 0 : index
      %35 = vector.load %arg3[%c0_20, %c0_21] : memref<128x32xf32, #tpu.memory_space<vmem>>, vector<128x32xf32>
      %c0_22 = arith.constant 0 : index
      %c0_23 = arith.constant 0 : index
      %36 = vector.load %arg4[%c0_22, %c0_23] : memref<32x128xf32, #tpu.memory_space<vmem>>, vector<32x128xf32>
      %37 = arith.negf %34 : vector<128x1xf32>
      %38 = math.exp %37 : vector<128x1xf32>
      %cst_24 = arith.constant 1.000000e+00 : f32
      %39 = vector.broadcast %cst_24 : f32 to vector<128x1xf32>
      %40 = arith.addf %39, %38 : vector<128x1xf32>
      %41 = arith.divf %39, %40 : vector<128x1xf32>
      %cst_25 = arith.constant 2.000000e+00 : f32
      %42 = vector.broadcast %cst_25 : f32 to vector<128x1xf32>
      %43 = math.powf %41, %42 : vector<128x1xf32>
      %cst_26 = arith.constant 7.500000e-01 : f32
      %44 = vector.broadcast %cst_26 : f32 to vector<128x1xf32>
      %45 = arith.mulf %44, %43 : vector<128x1xf32>
      %cst_27 = arith.constant 1.000000e+00 : f32
      %46 = vector.broadcast %cst_27 : f32 to vector<128x1xf32>
      %47 = arith.subf %46, %41 : vector<128x1xf32>
      %cst_28 = arith.constant 9.99999993E-9 : f32
      %48 = vector.broadcast %cst_28 : f32 to vector<128x1xf32>
      %49 = arith.addf %47, %48 : vector<128x1xf32>
      %50 = math.log %49 : vector<128x1xf32>
      %cst_29 = arith.constant 0.000000e+00 : f32
      %51 = vector.broadcast %cst_29 : f32 to vector<128x1xf32>
      %52 = arith.subf %51, %50 : vector<128x1xf32>
      %53 = arith.mulf %45, %52 : vector<128x1xf32>
      %cst_30 = arith.constant 1.000000e+00 : f32
      %54 = vector.broadcast %cst_30 : f32 to vector<128x1xf32>
      %55 = arith.subf %54, %41 : vector<128x1xf32>
      %cst_31 = arith.constant 2.000000e+00 : f32
      %56 = vector.broadcast %cst_31 : f32 to vector<128x1xf32>
      %57 = math.powf %55, %56 : vector<128x1xf32>
      %cst_32 = arith.constant 2.500000e-01 : f32
      %58 = vector.broadcast %cst_32 : f32 to vector<128x1xf32>
      %59 = arith.mulf %58, %57 : vector<128x1xf32>
      %cst_33 = arith.constant 9.99999993E-9 : f32
      %60 = vector.broadcast %cst_33 : f32 to vector<128x1xf32>
      %61 = arith.addf %41, %60 : vector<128x1xf32>
      %62 = math.log %61 : vector<128x1xf32>
      %cst_34 = arith.constant 0.000000e+00 : f32
      %63 = vector.broadcast %cst_34 : f32 to vector<128x1xf32>
      %64 = arith.subf %63, %62 : vector<128x1xf32>
      %65 = arith.mulf %59, %64 : vector<128x1xf32>
      %66 = arith.subf %65, %53 : vector<128x1xf32>
      %cst_35 = arith.constant 0.000000e+00 : f32
      %67 = vector.broadcast %cst_35 : f32 to vector<128x128xf32>
      %68 = vector.extract_strided_slice %35 {offsets = [0, 0], sizes = [128, 1], strides = [1, 1]} : vector<128x32xf32> to vector<128x1xf32>
      %69 = vector.extract_strided_slice %36 {offsets = [0, 0], sizes = [1, 128], strides = [1, 1]} : vector<32x128xf32> to vector<1x128xf32>
      %70 = vector.broadcast %68 : vector<128x1xf32> to vector<128x128xf32>
      %71 = vector.broadcast %69 : vector<1x128xf32> to vector<128x128xf32>
      %72 = arith.subf %70, %71 : vector<128x128xf32>
      %73 = math.absf %72 : vector<128x128xf32>
      %74 = arith.addf %67, %73 : vector<128x128xf32>
      %75 = vector.extract_strided_slice %35 {offsets = [0, 1], sizes = [128, 1], strides = [1, 1]} : vector<128x32xf32> to vector<128x1xf32>
      %76 = vector.extract_strided_slice %36 {offsets = [1, 0], sizes = [1, 128], strides = [1, 1]} : vector<32x128xf32> to vector<1x128xf32>
      %77 = vector.broadcast %75 : vector<128x1xf32> to vector<128x128xf32>
      %78 = vector.broadcast %76 : vector<1x128xf32> to vector<128x128xf32>
      %79 = arith.subf %77, %78 : vector<128x128xf32>
      %80 = math.absf %79 : vector<128x128xf32>
      %81 = arith.addf %74, %80 : vector<128x128xf32>
      %82 = vector.extract_strided_slice %35 {offsets = [0, 2], sizes = [128, 1], strides = [1, 1]} : vector<128x32xf32> to vector<128x1xf32>
      %83 = vector.extract_strided_slice %36 {offsets = [2, 0], sizes = [1, 128], strides = [1, 1]} : vector<32x128xf32> to vector<1x128xf32>
      %84 = vector.broadcast %82 : vector<128x1xf32> to vector<128x128xf32>
      %85 = vector.broadcast %83 : vector<1x128xf32> to vector<128x128xf32>
      %86 = arith.subf %84, %85 : vector<128x128xf32>
      %87 = math.absf %86 : vector<128x128xf32>
      %88 = arith.addf %81, %87 : vector<128x128xf32>
      %89 = vector.extract_strided_slice %35 {offsets = [0, 3], sizes = [128, 1], strides = [1, 1]} : vector<128x32xf32> to vector<128x1xf32>
      %90 = vector.extract_strided_slice %36 {offsets = [3, 0], sizes = [1, 128], strides = [1, 1]} : vector<32x128xf32> to vector<1x128xf32>
      %91 = vector.broadcast %89 : vector<128x1xf32> to vector<128x128xf32>
      %92 = vector.broadcast %90 : vector<1x128xf32> to vector<128x128xf32>
      %93 = arith.subf %91, %92 : vector<128x128xf32>
      %94 = math.absf %93 : vector<128x128xf32>
      %95 = arith.addf %88, %94 : vector<128x128xf32>
      %96 = vector.extract_strided_slice %35 {offsets = [0, 4], sizes = [128, 1], strides = [1, 1]} : vector<128x32xf32> to vector<128x1xf32>
      %97 = vector.extract_strided_slice %36 {offsets = [4, 0], sizes = [1, 128], strides = [1, 1]} : vector<32x128xf32> to vector<1x128xf32>
      %98 = vector.broadcast %96 : vector<128x1xf32> to vector<128x128xf32>
      %99 = vector.broadcast %97 : vector<1x128xf32> to vector<128x128xf32>
      %100 = arith.subf %98, %99 : vector<128x128xf32>
      %101 = math.absf %100 : vector<128x128xf32>
      %102 = arith.addf %95, %101 : vector<128x128xf32>
      %103 = vector.extract_strided_slice %35 {offsets = [0, 5], sizes = [128, 1], strides = [1, 1]} : vector<128x32xf32> to vector<128x1xf32>
      %104 = vector.extract_strided_slice %36 {offsets = [5, 0], sizes = [1, 128], strides = [1, 1]} : vector<32x128xf32> to vector<1x128xf32>
      %105 = vector.broadcast %103 : vector<128x1xf32> to vector<128x128xf32>
      %106 = vector.broadcast %104 : vector<1x128xf32> to vector<128x128xf32>
      %107 = arith.subf %105, %106 : vector<128x128xf32>
      %108 = math.absf %107 : vector<128x128xf32>
      %109 = arith.addf %102, %108 : vector<128x128xf32>
      %110 = vector.extract_strided_slice %35 {offsets = [0, 6], sizes = [128, 1], strides = [1, 1]} : vector<128x32xf32> to vector<128x1xf32>
      %111 = vector.extract_strided_slice %36 {offsets = [6, 0], sizes = [1, 128], strides = [1, 1]} : vector<32x128xf32> to vector<1x128xf32>
      %112 = vector.broadcast %110 : vector<128x1xf32> to vector<128x128xf32>
      %113 = vector.broadcast %111 : vector<1x128xf32> to vector<128x128xf32>
      %114 = arith.subf %112, %113 : vector<128x128xf32>
      %115 = math.absf %114 : vector<128x128xf32>
      %116 = arith.addf %109, %115 : vector<128x128xf32>
      %117 = vector.extract_strided_slice %35 {offsets = [0, 7], sizes = [128, 1], strides = [1, 1]} : vector<128x32xf32> to vector<128x1xf32>
      %118 = vector.extract_strided_slice %36 {offsets = [7, 0], sizes = [1, 128], strides = [1, 1]} : vector<32x128xf32> to vector<1x128xf32>
      %119 = vector.broadcast %117 : vector<128x1xf32> to vector<128x128xf32>
      %120 = vector.broadcast %118 : vector<1x128xf32> to vector<128x128xf32>
      %121 = arith.subf %119, %120 : vector<128x128xf32>
      %122 = math.absf %121 : vector<128x128xf32>
      %123 = arith.addf %116, %122 : vector<128x128xf32>
      %124 = vector.extract_strided_slice %35 {offsets = [0, 8], sizes = [128, 1], strides = [1, 1]} : vector<128x32xf32> to vector<128x1xf32>
      %125 = vector.extract_strided_slice %36 {offsets = [8, 0], sizes = [1, 128], strides = [1, 1]} : vector<32x128xf32> to vector<1x128xf32>
      %126 = vector.broadcast %124 : vector<128x1xf32> to vector<128x128xf32>
      %127 = vector.broadcast %125 : vector<1x128xf32> to vector<128x128xf32>
      %128 = arith.subf %126, %127 : vector<128x128xf32>
      %129 = math.absf %128 : vector<128x128xf32>
      %130 = arith.addf %123, %129 : vector<128x128xf32>
      %131 = vector.extract_strided_slice %35 {offsets = [0, 9], sizes = [128, 1], strides = [1, 1]} : vector<128x32xf32> to vector<128x1xf32>
      %132 = vector.extract_strided_slice %36 {offsets = [9, 0], sizes = [1, 128], strides = [1, 1]} : vector<32x128xf32> to vector<1x128xf32>
      %133 = vector.broadcast %131 : vector<128x1xf32> to vector<128x128xf32>
      %134 = vector.broadcast %132 : vector<1x128xf32> to vector<128x128xf32>
      %135 = arith.subf %133, %134 : vector<128x128xf32>
      %136 = math.absf %135 : vector<128x128xf32>
      %137 = arith.addf %130, %136 : vector<128x128xf32>
      %138 = vector.extract_strided_slice %35 {offsets = [0, 10], sizes = [128, 1], strides = [1, 1]} : vector<128x32xf32> to vector<128x1xf32>
      %139 = vector.extract_strided_slice %36 {offsets = [10, 0], sizes = [1, 128], strides = [1, 1]} : vector<32x128xf32> to vector<1x128xf32>
      %140 = vector.broadcast %138 : vector<128x1xf32> to vector<128x128xf32>
      %141 = vector.broadcast %139 : vector<1x128xf32> to vector<128x128xf32>
      %142 = arith.subf %140, %141 : vector<128x128xf32>
      %143 = math.absf %142 : vector<128x128xf32>
      %144 = arith.addf %137, %143 : vector<128x128xf32>
      %145 = vector.extract_strided_slice %35 {offsets = [0, 11], sizes = [128, 1], strides = [1, 1]} : vector<128x32xf32> to vector<128x1xf32>
      %146 = vector.extract_strided_slice %36 {offsets = [11, 0], sizes = [1, 128], strides = [1, 1]} : vector<32x128xf32> to vector<1x128xf32>
      %147 = vector.broadcast %145 : vector<128x1xf32> to vector<128x128xf32>
      %148 = vector.broadcast %146 : vector<1x128xf32> to vector<128x128xf32>
      %149 = arith.subf %147, %148 : vector<128x128xf32>
      %150 = math.absf %149 : vector<128x128xf32>
      %151 = arith.addf %144, %150 : vector<128x128xf32>
      %152 = vector.extract_strided_slice %35 {offsets = [0, 12], sizes = [128, 1], strides = [1, 1]} : vector<128x32xf32> to vector<128x1xf32>
      %153 = vector.extract_strided_slice %36 {offsets = [12, 0], sizes = [1, 128], strides = [1, 1]} : vector<32x128xf32> to vector<1x128xf32>
      %154 = vector.broadcast %152 : vector<128x1xf32> to vector<128x128xf32>
      %155 = vector.broadcast %153 : vector<1x128xf32> to vector<128x128xf32>
      %156 = arith.subf %154, %155 : vector<128x128xf32>
      %157 = math.absf %156 : vector<128x128xf32>
      %158 = arith.addf %151, %157 : vector<128x128xf32>
      %159 = vector.extract_strided_slice %35 {offsets = [0, 13], sizes = [128, 1], strides = [1, 1]} : vector<128x32xf32> to vector<128x1xf32>
      %160 = vector.extract_strided_slice %36 {offsets = [13, 0], sizes = [1, 128], strides = [1, 1]} : vector<32x128xf32> to vector<1x128xf32>
      %161 = vector.broadcast %159 : vector<128x1xf32> to vector<128x128xf32>
      %162 = vector.broadcast %160 : vector<1x128xf32> to vector<128x128xf32>
      %163 = arith.subf %161, %162 : vector<128x128xf32>
      %164 = math.absf %163 : vector<128x128xf32>
      %165 = arith.addf %158, %164 : vector<128x128xf32>
      %166 = vector.extract_strided_slice %35 {offsets = [0, 14], sizes = [128, 1], strides = [1, 1]} : vector<128x32xf32> to vector<128x1xf32>
      %167 = vector.extract_strided_slice %36 {offsets = [14, 0], sizes = [1, 128], strides = [1, 1]} : vector<32x128xf32> to vector<1x128xf32>
      %168 = vector.broadcast %166 : vector<128x1xf32> to vector<128x128xf32>
      %169 = vector.broadcast %167 : vector<1x128xf32> to vector<128x128xf32>
      %170 = arith.subf %168, %169 : vector<128x128xf32>
      %171 = math.absf %170 : vector<128x128xf32>
      %172 = arith.addf %165, %171 : vector<128x128xf32>
      %173 = vector.extract_strided_slice %35 {offsets = [0, 15], sizes = [128, 1], strides = [1, 1]} : vector<128x32xf32> to vector<128x1xf32>
      %174 = vector.extract_strided_slice %36 {offsets = [15, 0], sizes = [1, 128], strides = [1, 1]} : vector<32x128xf32> to vector<1x128xf32>
      %175 = vector.broadcast %173 : vector<128x1xf32> to vector<128x128xf32>
      %176 = vector.broadcast %174 : vector<1x128xf32> to vector<128x128xf32>
      %177 = arith.subf %175, %176 : vector<128x128xf32>
      %178 = math.absf %177 : vector<128x128xf32>
      %179 = arith.addf %172, %178 : vector<128x128xf32>
      %180 = vector.extract_strided_slice %35 {offsets = [0, 16], sizes = [128, 1], strides = [1, 1]} : vector<128x32xf32> to vector<128x1xf32>
      %181 = vector.extract_strided_slice %36 {offsets = [16, 0], sizes = [1, 128], strides = [1, 1]} : vector<32x128xf32> to vector<1x128xf32>
      %182 = vector.broadcast %180 : vector<128x1xf32> to vector<128x128xf32>
      %183 = vector.broadcast %181 : vector<1x128xf32> to vector<128x128xf32>
      %184 = arith.subf %182, %183 : vector<128x128xf32>
      %185 = math.absf %184 : vector<128x128xf32>
      %186 = arith.addf %179, %185 : vector<128x128xf32>
      %187 = vector.extract_strided_slice %35 {offsets = [0, 17], sizes = [128, 1], strides = [1, 1]} : vector<128x32xf32> to vector<128x1xf32>
      %188 = vector.extract_strided_slice %36 {offsets = [17, 0], sizes = [1, 128], strides = [1, 1]} : vector<32x128xf32> to vector<1x128xf32>
      %189 = vector.broadcast %187 : vector<128x1xf32> to vector<128x128xf32>
      %190 = vector.broadcast %188 : vector<1x128xf32> to vector<128x128xf32>
      %191 = arith.subf %189, %190 : vector<128x128xf32>
      %192 = math.absf %191 : vector<128x128xf32>
      %193 = arith.addf %186, %192 : vector<128x128xf32>
      %194 = vector.extract_strided_slice %35 {offsets = [0, 18], sizes = [128, 1], strides = [1, 1]} : vector<128x32xf32> to vector<128x1xf32>
      %195 = vector.extract_strided_slice %36 {offsets = [18, 0], sizes = [1, 128], strides = [1, 1]} : vector<32x128xf32> to vector<1x128xf32>
      %196 = vector.broadcast %194 : vector<128x1xf32> to vector<128x128xf32>
      %197 = vector.broadcast %195 : vector<1x128xf32> to vector<128x128xf32>
      %198 = arith.subf %196, %197 : vector<128x128xf32>
      %199 = math.absf %198 : vector<128x128xf32>
      %200 = arith.addf %193, %199 : vector<128x128xf32>
      %201 = vector.extract_strided_slice %35 {offsets = [0, 19], sizes = [128, 1], strides = [1, 1]} : vector<128x32xf32> to vector<128x1xf32>
      %202 = vector.extract_strided_slice %36 {offsets = [19, 0], sizes = [1, 128], strides = [1, 1]} : vector<32x128xf32> to vector<1x128xf32>
      %203 = vector.broadcast %201 : vector<128x1xf32> to vector<128x128xf32>
      %204 = vector.broadcast %202 : vector<1x128xf32> to vector<128x128xf32>
      %205 = arith.subf %203, %204 : vector<128x128xf32>
      %206 = math.absf %205 : vector<128x128xf32>
      %207 = arith.addf %200, %206 : vector<128x128xf32>
      %208 = vector.extract_strided_slice %35 {offsets = [0, 20], sizes = [128, 1], strides = [1, 1]} : vector<128x32xf32> to vector<128x1xf32>
      %209 = vector.extract_strided_slice %36 {offsets = [20, 0], sizes = [1, 128], strides = [1, 1]} : vector<32x128xf32> to vector<1x128xf32>
      %210 = vector.broadcast %208 : vector<128x1xf32> to vector<128x128xf32>
      %211 = vector.broadcast %209 : vector<1x128xf32> to vector<128x128xf32>
      %212 = arith.subf %210, %211 : vector<128x128xf32>
      %213 = math.absf %212 : vector<128x128xf32>
      %214 = arith.addf %207, %213 : vector<128x128xf32>
      %215 = vector.extract_strided_slice %35 {offsets = [0, 21], sizes = [128, 1], strides = [1, 1]} : vector<128x32xf32> to vector<128x1xf32>
      %216 = vector.extract_strided_slice %36 {offsets = [21, 0], sizes = [1, 128], strides = [1, 1]} : vector<32x128xf32> to vector<1x128xf32>
      %217 = vector.broadcast %215 : vector<128x1xf32> to vector<128x128xf32>
      %218 = vector.broadcast %216 : vector<1x128xf32> to vector<128x128xf32>
      %219 = arith.subf %217, %218 : vector<128x128xf32>
      %220 = math.absf %219 : vector<128x128xf32>
      %221 = arith.addf %214, %220 : vector<128x128xf32>
      %222 = vector.extract_strided_slice %35 {offsets = [0, 22], sizes = [128, 1], strides = [1, 1]} : vector<128x32xf32> to vector<128x1xf32>
      %223 = vector.extract_strided_slice %36 {offsets = [22, 0], sizes = [1, 128], strides = [1, 1]} : vector<32x128xf32> to vector<1x128xf32>
      %224 = vector.broadcast %222 : vector<128x1xf32> to vector<128x128xf32>
      %225 = vector.broadcast %223 : vector<1x128xf32> to vector<128x128xf32>
      %226 = arith.subf %224, %225 : vector<128x128xf32>
      %227 = math.absf %226 : vector<128x128xf32>
      %228 = arith.addf %221, %227 : vector<128x128xf32>
      %229 = vector.extract_strided_slice %35 {offsets = [0, 23], sizes = [128, 1], strides = [1, 1]} : vector<128x32xf32> to vector<128x1xf32>
      %230 = vector.extract_strided_slice %36 {offsets = [23, 0], sizes = [1, 128], strides = [1, 1]} : vector<32x128xf32> to vector<1x128xf32>
      %231 = vector.broadcast %229 : vector<128x1xf32> to vector<128x128xf32>
      %232 = vector.broadcast %230 : vector<1x128xf32> to vector<128x128xf32>
      %233 = arith.subf %231, %232 : vector<128x128xf32>
      %234 = math.absf %233 : vector<128x128xf32>
      %235 = arith.addf %228, %234 : vector<128x128xf32>
      %236 = vector.extract_strided_slice %35 {offsets = [0, 24], sizes = [128, 1], strides = [1, 1]} : vector<128x32xf32> to vector<128x1xf32>
      %237 = vector.extract_strided_slice %36 {offsets = [24, 0], sizes = [1, 128], strides = [1, 1]} : vector<32x128xf32> to vector<1x128xf32>
      %238 = vector.broadcast %236 : vector<128x1xf32> to vector<128x128xf32>
      %239 = vector.broadcast %237 : vector<1x128xf32> to vector<128x128xf32>
      %240 = arith.subf %238, %239 : vector<128x128xf32>
      %241 = math.absf %240 : vector<128x128xf32>
      %242 = arith.addf %235, %241 : vector<128x128xf32>
      %243 = vector.extract_strided_slice %35 {offsets = [0, 25], sizes = [128, 1], strides = [1, 1]} : vector<128x32xf32> to vector<128x1xf32>
      %244 = vector.extract_strided_slice %36 {offsets = [25, 0], sizes = [1, 128], strides = [1, 1]} : vector<32x128xf32> to vector<1x128xf32>
      %245 = vector.broadcast %243 : vector<128x1xf32> to vector<128x128xf32>
      %246 = vector.broadcast %244 : vector<1x128xf32> to vector<128x128xf32>
      %247 = arith.subf %245, %246 : vector<128x128xf32>
      %248 = math.absf %247 : vector<128x128xf32>
      %249 = arith.addf %242, %248 : vector<128x128xf32>
      %250 = vector.extract_strided_slice %35 {offsets = [0, 26], sizes = [128, 1], strides = [1, 1]} : vector<128x32xf32> to vector<128x1xf32>
      %251 = vector.extract_strided_slice %36 {offsets = [26, 0], sizes = [1, 128], strides = [1, 1]} : vector<32x128xf32> to vector<1x128xf32>
      %252 = vector.broadcast %250 : vector<128x1xf32> to vector<128x128xf32>
      %253 = vector.broadcast %251 : vector<1x128xf32> to vector<128x128xf32>
      %254 = arith.subf %252, %253 : vector<128x128xf32>
      %255 = math.absf %254 : vector<128x128xf32>
      %256 = arith.addf %249, %255 : vector<128x128xf32>
      %257 = vector.extract_strided_slice %35 {offsets = [0, 27], sizes = [128, 1], strides = [1, 1]} : vector<128x32xf32> to vector<128x1xf32>
      %258 = vector.extract_strided_slice %36 {offsets = [27, 0], sizes = [1, 128], strides = [1, 1]} : vector<32x128xf32> to vector<1x128xf32>
      %259 = vector.broadcast %257 : vector<128x1xf32> to vector<128x128xf32>
      %260 = vector.broadcast %258 : vector<1x128xf32> to vector<128x128xf32>
      %261 = arith.subf %259, %260 : vector<128x128xf32>
      %262 = math.absf %261 : vector<128x128xf32>
      %263 = arith.addf %256, %262 : vector<128x128xf32>
      %264 = vector.extract_strided_slice %35 {offsets = [0, 28], sizes = [128, 1], strides = [1, 1]} : vector<128x32xf32> to vector<128x1xf32>
      %265 = vector.extract_strided_slice %36 {offsets = [28, 0], sizes = [1, 128], strides = [1, 1]} : vector<32x128xf32> to vector<1x128xf32>
      %266 = vector.broadcast %264 : vector<128x1xf32> to vector<128x128xf32>
      %267 = vector.broadcast %265 : vector<1x128xf32> to vector<128x128xf32>
      %268 = arith.subf %266, %267 : vector<128x128xf32>
      %269 = math.absf %268 : vector<128x128xf32>
      %270 = arith.addf %263, %269 : vector<128x128xf32>
      %271 = vector.extract_strided_slice %35 {offsets = [0, 29], sizes = [128, 1], strides = [1, 1]} : vector<128x32xf32> to vector<128x1xf32>
      %272 = vector.extract_strided_slice %36 {offsets = [29, 0], sizes = [1, 128], strides = [1, 1]} : vector<32x128xf32> to vector<1x128xf32>
      %273 = vector.broadcast %271 : vector<128x1xf32> to vector<128x128xf32>
      %274 = vector.broadcast %272 : vector<1x128xf32> to vector<128x128xf32>
      %275 = arith.subf %273, %274 : vector<128x128xf32>
      %276 = math.absf %275 : vector<128x128xf32>
      %277 = arith.addf %270, %276 : vector<128x128xf32>
      %278 = vector.extract_strided_slice %35 {offsets = [0, 30], sizes = [128, 1], strides = [1, 1]} : vector<128x32xf32> to vector<128x1xf32>
      %279 = vector.extract_strided_slice %36 {offsets = [30, 0], sizes = [1, 128], strides = [1, 1]} : vector<32x128xf32> to vector<1x128xf32>
      %280 = vector.broadcast %278 : vector<128x1xf32> to vector<128x128xf32>
      %281 = vector.broadcast %279 : vector<1x128xf32> to vector<128x128xf32>
      %282 = arith.subf %280, %281 : vector<128x128xf32>
      %283 = math.absf %282 : vector<128x128xf32>
      %284 = arith.addf %277, %283 : vector<128x128xf32>
      %285 = vector.extract_strided_slice %35 {offsets = [0, 31], sizes = [128, 1], strides = [1, 1]} : vector<128x32xf32> to vector<128x1xf32>
      %286 = vector.extract_strided_slice %36 {offsets = [31, 0], sizes = [1, 128], strides = [1, 1]} : vector<32x128xf32> to vector<1x128xf32>
      %287 = vector.broadcast %285 : vector<128x1xf32> to vector<128x128xf32>
      %288 = vector.broadcast %286 : vector<1x128xf32> to vector<128x128xf32>
      %289 = arith.subf %287, %288 : vector<128x128xf32>
      %290 = math.absf %289 : vector<128x128xf32>
      %291 = arith.addf %284, %290 : vector<128x128xf32>
      %cst_36 = arith.constant 2.000000e+00 : f32
      %292 = vector.broadcast %cst_36 : f32 to vector<128x1xf32>
      %293 = arith.mulf %292, %66 : vector<128x1xf32>
      %cst_37 = arith.constant 5.000000e+00 : f32
      %294 = vector.broadcast %cst_37 : f32 to vector<128x128xf32>
      %295 = arith.mulf %294, %291 : vector<128x128xf32>
      %296 = vector.broadcast %293 : vector<128x1xf32> to vector<128x128xf32>
      %297 = arith.addf %296, %295 : vector<128x128xf32>
      %cst_38 = arith.constant 2.000000e+00 : f32
      %298 = vector.broadcast %cst_38 : f32 to vector<128x128xf32>
      %299 = arith.mulf %298, %33 : vector<128x128xf32>
      %300 = arith.addf %297, %299 : vector<128x128xf32>
      %c0_39 = arith.constant 0 : index
      %c0_40 = arith.constant 0 : index
      %301 = vector.load %arg8[%c0_39, %c0_40] : memref<128x128xf32, #tpu.memory_space<vmem>>, vector<128x128xf32>
      tpu.vector_store %arg8[%c0_39, %c0_40], %300 {strides = array<i32>} : memref<128x128xf32, #tpu.memory_space<vmem>>, vector<128x128xf32>,
    } else {
    }
    return
  }
  func.func @transform_0(%arg0: i32, %arg1: i32) -> (i32, i32) {
    %c0_i32 = arith.constant 0 : i32
    %c0_i32_0 = arith.constant 0 : i32
    return %arg0, %c0_i32 : i32, i32
  }
  func.func @transform_1(%arg0: i32, %arg1: i32) -> (i32, i32) {
    %c0_i32 = arith.constant 0 : i32
    %c0_i32_0 = arith.constant 0 : i32
    return %arg0, %c0_i32 : i32, i32
  }
  func.func @transform_2(%arg0: i32, %arg1: i32) -> (i32, i32) {
    %c0_i32 = arith.constant 0 : i32
    %c0_i32_0 = arith.constant 0 : i32
    %c0_i32_1 = arith.constant 0 : i32
    return %c0_i32, %c0_i32_0 : i32, i32
  }
  func.func @transform_3(%arg0: i32, %arg1: i32) -> (i32, i32) {
    %c0_i32 = arith.constant 0 : i32
    %c0_i32_0 = arith.constant 0 : i32
    %c0_i32_1 = arith.constant 0 : i32
    return %c0_i32, %c0_i32_0 : i32, i32
  }
  func.func @transform_4(%arg0: i32, %arg1: i32) -> (i32, i32) {
    %c0_i32 = arith.constant 0 : i32
    return %arg0, %arg1 : i32, i32
  }
  func.func @transform_5(%arg0: i32, %arg1: i32) -> (i32, i32) {
    %c0_i32 = arith.constant 0 : i32
    %c0_i32_0 = arith.constant 0 : i32
    return %arg1, %c0_i32 : i32, i32
  }
  func.func @transform_6(%arg0: i32, %arg1: i32) -> (i32, i32) {
    %c0_i32 = arith.constant 0 : i32
    %c0_i32_0 = arith.constant 0 : i32
    return %arg0, %c0_i32 : i32, i32
  }
}

</mosaic_0001>

<bundles_post_ra>
// kernel: tpu_custom_call.1
= control target key start
LH: loop header
LB: loop body
LE: loop exit
PB: predicated region body
PF: predicated region fallthrough
CT: control target
= control target key end

     0   :  { %s16416_s0 = inlined_call_operand.vmem [shape: f32[128,1], index: 0, kind: input, shape index: {}]   ;;  %s16417_s1 = inlined_call_operand.vmem [shape: f32[128,32], index: 1, kind: input, shape index: {}]   ;;  %s16418_s2 = inlined_call_operand.hbm [shape: f32[32,128], index: 2, kind: input, shape index: {}]   ;;  %s16419_s3 = inlined_call_operand.hbm [shape: f32[1,128], index: 3, kind: input, shape index: {}]   ;;  %s16420_s4 = inlined_call_operand.hbm [shape: bf16[128,12544], index: 4, kind: input, shape index: {}]   ;;  %s16421_s5 = inlined_call_operand.hbm [shape: bf16[12544,128], index: 5, kind: input, shape index: {}]   ;;  %s16422_s6 = inlined_call_operand.hbm [shape: f32[128,128], index: 6, kind: output, shape index: {}]  }
   0x1   :  { %16512 = sst [smem:[#allocation302_spill]] %s16418_s2 }
   0x2   :  { %16513 = sst [smem:[#allocation303_spill]] %s16420_s4 }
   0x3   :  { %11 = vsyncpa [#allocation4], 0 }
   0x4   :  { %12 = vsyncpa [#allocation7], 0 }
   0x5   :  { %13 = vsyncpa [#allocation5], 0  ;;  %s11089_s21 = smov 0   ;;  %s11091_s22 = smov 0  }
   0x6   :  { %s11093_s23 = smov 0   ;;  %s11095_s24 = smov 0  }
   0x7   :  { %s11097_s25 = smov 0   ;;  %s11099_s26 = smov 0  }
   0x8 LB: > { %16514 = sst [smem:[#allocation15_spill]] %s10993_s23  ;;  %s11118_s27 = sadd.s32 4294967295, %s11005_s26   ;;  %s11005_s26 = sphi %s11099_s26, %s19_s26   ;;  %s11001_s25 = sphi %s11097_s25, %s17553_s25   ;;  %s10997_s24 = sphi %s11095_s24, %s17552_s24   ;;  %s10993_s23 = sphi %s11093_s23, %s17548_s23   ;;  %s10989_s22 = sphi %s11091_s22, %s17551_s22   ;;  %s10985_s21 = sphi %s11089_s21, %s17550_s21  }
   0x9   : > { %16515 = sst [smem:[#allocation16_spill]] %s11005_s26  ;;  %p141_p0 = scmp.ne.s32.totalorder %s10993_s23, %s10989_s22 }
   0xa   : > { %p142_p1 = scmp.eq.s32.totalorder %s11005_s26, 0  ;;  %p147_p2 = scmp.ne.s32.totalorder %s10989_s22, %s10985_s21 }
   0xb   : > { %p16423_p3 = scmp.eq.s32.totalorder %s11118_s27, 0  ;;  %p8483_p5 = scmp.ge.s32.totalorder %s11005_s26, 1 }
   0xc   : > { %p143_p4 = por %p142_p1, %p141_p0  ;;  %p210_p7 = scmp.lt.s32.totalorder %s11005_s26, 8 }
   0xd   : > { %p11129_p6 = por %p16423_p3, %p147_p2  ;;  %s11007_s7 = smov [#allocation3]  }
   0xe   : > { %p11134_p8 = pnand %p8483_p5, %p210_p7  ;;  %s240_s8 = sshll.u32 %s11007_s7, 4  ;;  %s241_s8 = int_to_ptr.vmem [resolvable:$true] %s240_s8 }
   0xf   : > { %s16516_s29 = scalar_select %p11129_p6, 1, 0 }
  0x10   : > { %s16517_s30 = scalar_select %p11134_p8, 1, 0 }
  0x11   : > { %p9370_p9 = pneg %p11134_p8  ;;  %p9386_p10 = scmp.lt.s32.totalorder %s11005_s26, 7 }
  0x12   : > { %s28_s11 = sadd.s32 1, %s11001_s25  ;;  %s16520_s2 = sld [smem:[#allocation302_spill]] }
  0x13   : > { %p11143_p11 = pnand %p9370_p9, %p16423_p3  ;;  %p11147_p12 = pnand %p9386_p10, %p143_p4 }
  0x15   : > { %s16519_s10 = scalar_select %p11147_p12, 1, 0 }
  0x16   : > { %p16427_p0 = pneg %p11143_p11 }
  0x18   : > { %s10801_s14 = scalar_lea.hbm %s16520_s2, 512 }
  0x19   : > { %p10802_p13 = scmp.ne.s32.totalorder %s16520_s2, %s10801_s14  ;;  %p10808_p4 = scmp.lt.u32.totalorder %s10801_s14, %s16520_s2 }
  0x1b   : > { %p10804_p1 = pnand %p16427_p0, %p10802_p13 }
  0x1d   : > { %p10805_p2 = pneg %p10804_p1 }
  0x1f   : > { %p10810_p5 = pnand %p10808_p4, %p10805_p2 }
  0x21   : > { %10813 = shalt.err (!%p10810_p5)
}
  0x22   : > { %s10814_s19 = scalar_lea.vmem %s241_s8, 512  ;;  %p10822_p3 = scmp.lt.s32.totalorder %s241_s8, %s241_s8 }
  0x23   : > { %p10815_p7 = scmp.ne.s32.totalorder %s241_s8, %s10814_s19  ;;  %p10823_p6 = scmp.lt.s32.totalorder %s10814_s19, %s10814_s19 }
  0x25   : > { %p10817_p9 = pnand %p10815_p7, %p16427_p0  ;;  %p10824_p8 = por %p10823_p6, %p10822_p3 }
  0x27   : > { %p10818_p10 = pneg %p10817_p9 }
  0x29   : > { %p10825_p12 = pnand %p10824_p8, %p10818_p10 }
  0x2b   : > { %10828 = shalt.err (!%p10825_p12)
}
  0x2c   : > { %s11008_s20 = smov 128   ;;  %s11009_s21 = smov 8  }
  0x2d   : > { %9373 = dma.hbm_to_vmem [thread:$0]  (!%p11143_p11), %s16520_s2, 512, %s241_s8, [#allocation4], %s11008_s20, %s11008_s20, %s11009_s21  }
  0x2e   : > { %p29_p13 = scmp.ge.s32.totalorder %s28_s11, 7  ;;  %s265_s13 = sand.u32 1, %s11005_s26  }
  0x2f   : > { %s267_s14 = sand.u32 1, %s10993_s23   ;;  %s8853_s17 = smul.u32 896, %s11001_s25 }
  0x30   : > { %s17555_s11 = smov (%p29_p13, %s28_s11), 0  ;;  %s11178_s15 = smul.u32 896, %s267_s14 }
  0x31   : > { %16521 = sst [smem:[#allocation17_spill]] %s17555_s11  ;;  %s130_s16 = ssub.s32 %s11001_s25, %s17555_s11 }
  0x32   : > { %p132_p3 = scmp.eq.s32.totalorder %s130_s16, 0  ;;  %s16522_s4 = sld [smem:[#allocation303_spill]] }
  0x33   : > { %s269_s8 = scalar_lea.vmem [#allocation8], %s11178_s15  ;;  %s16523_s21 = sadd.s32 1, %s10993_s23 }
  0x34   : > { %s279_s20 = sshll.u32 %s269_s8, 4  ;;  %s11196_s12 = scalar_lea.sflag [#allocation4], %s265_s13  ;;  %s11194_s20 = int_to_ptr.vmem [resolvable:$true] %s279_s20 }
  0x35   : > { %s11192_s7 = scalar_select %p132_p3, %s10993_s23, %s16523_s21  }
  0x36   : > { %p16525_p8 = scmp.ne.s32.totalorder %s16519_s10, 0 }
  0x37   : > { %16524 = sst [smem:[#allocation18_spill]] %s11192_s7 }
  0x38   : > { %s11186_s28 = scalar_lea.hbm %s16522_s4, %s8853_s17  ;;  %p16431_p12 = pneg %p16525_p8 }
  0x39   : > { %s10829_s14 = scalar_lea.hbm %s11186_s28, 14336  ;;  %s10834_s18 = scalar_lea.hbm %s16522_s4, 100352 }
  0x3a   : > { %p10830_p6 = scmp.ne.s32.totalorder %s11186_s28, %s10829_s14  ;;  %p10835_p4 = scmp.lt.u32.totalorder %s11186_s28, %s16522_s4 }
  0x3b   : > { %p10836_p5 = scmp.lt.u32.totalorder %s10834_s18, %s10829_s14  ;;  %p10838_p9 = scmp.lt.u32.totalorder %s10829_s14, %s11186_s28 }
  0x3c   : > { %p10832_p1 = pnand %p16431_p12, %p10830_p6 }
  0x3d   : > { %p10837_p7 = por %p10836_p5, %p10835_p4 }
  0x3e   : > { %p10833_p2 = pneg %p10832_p1 }
  0x3f   : > { %p10839_p10 = por %p10838_p9, %p10837_p7 }
  0x41   : > { %p10840_p13 = pnand %p10839_p10, %p10833_p2 }
  0x43   : > { %10843 = shalt.err (!%p10840_p13)
}
  0x44   : > { %s10844_s13 = scalar_lea.vmem %s11194_s20, 14336  ;;  %s11010_s21 = smov [#allocation8]  }
  0x45   : > { %p10845_p3 = scmp.ne.s32.totalorder %s11194_s20, %s10844_s13  ;;  %s10849_s16 = sshll.u32 %s11010_s21, 4  ;;  %s10850_s16 = int_to_ptr.vmem [resolvable:$false] %s10849_s16 }
  0x46   : > { %s10851_s17 = scalar_lea.vmem %s10850_s16, 28672  ;;  %p10852_p0 = scmp.lt.s32.totalorder %s11194_s20, %s10850_s16 }
  0x47   : > { %p10847_p6 = pnand %p10845_p3, %p16431_p12  ;;  %p10853_p4 = scmp.lt.s32.totalorder %s10851_s17, %s10844_s13 }
  0x49   : > { %p10848_p1 = pneg %p10847_p6  ;;  %p10854_p5 = por %p10853_p4, %p10852_p0 }
  0x4b   : > { %p10855_p7 = pnand %p10854_p5, %p10848_p1 }
  0x4d   : > { %10858 = shalt.err (!%p10855_p7)
}
  0x4e   : > { %s11011_s14 = smov 6272   ;;  %s11012_s18 = smov 896  }
  0x4f   : > { %s11013_s19 = smov 56   ;;  %s11014_s8 = smov [#allocation6]  }
  0x50   : > { %9380 = dma.hbm_to_vmem [thread:$0]  (!%p16525_p8), %s11186_s28, 14336, %s11194_s20, %s11196_s12, %s11011_s14, %s11012_s18, %s11013_s19  }
  0x51   : > { %s254_s21 = sshll.u32 %s11014_s8, 4  ;;  %s8854_s2 = smul.u32 14336, %s11001_s25  ;;  %s255_s21 = int_to_ptr.vmem [resolvable:$true] %s254_s21 }
  0x52   : > { %s293_s13 = scalar_lea.vmem [#allocation9], %s11178_s15  ;;  %s10859_s11 = scalar_lea.hbm %s16419_s3, 16 }
  0x53   : > { %s300_s16 = sshll.u32 %s293_s13, 4  ;;  %p10860_p0 = scmp.ne.s32.totalorder %s16419_s3, %s10859_s11  ;;  %s11251_s16 = int_to_ptr.vmem [resolvable:$true] %s300_s16 }
  0x54   : > { %p16526_p2 = pneg %p11143_p11  ;;  %p10866_p13 = scmp.lt.u32.totalorder %s10859_s11, %s16419_s3 }
  0x56   : > { %p10862_p9 = pnand %p10860_p0, %p16526_p2 }
  0x58   : > { %p10863_p10 = pneg %p10862_p9 }
  0x5a   : > { %p10868_p3 = pnand %p10866_p13, %p10863_p10 }
  0x5c   : > { %10871 = shalt.err (!%p10868_p3)
}
  0x5d   : > { %s10872_s15 = scalar_lea.vmem %s255_s21, 16  ;;  %p16527_p1 = pmov %p16526_p2 }
  0x5e   : > { %p10873_p6 = scmp.ne.s32.totalorder %s255_s21, %s10872_s15  ;;  %s10879_s4 = scalar_lea.vmem %s255_s21, 32 }
  0x5f   : > { %p10880_p7 = scmp.lt.s32.totalorder %s255_s21, %s255_s21  ;;  %p10881_p12 = scmp.lt.s32.totalorder %s10879_s4, %s10872_s15 }
  0x60   : > { %p10875_p4 = pnand %p10873_p6, %p16527_p1 }
  0x61   : > { %p10882_p8 = por %p10881_p12, %p10880_p7 }
  0x62   : > { %p10876_p5 = pneg %p10875_p4 }
  0x64   : > { %p10883_p0 = pnand %p10882_p8, %p10876_p5 }
  0x66   : > { %10886 = shalt.err (!%p10883_p0)
}
  0x67   : > { %9376 = dma.hbm_to_vmem [thread:$0]  (!%p11143_p11), %s16419_s3, 16, %s255_s21, [#allocation7]  }
  0x68   : > { %s11249_s7 = scalar_lea.hbm %s16421_s5, %s8854_s2  ;;  %p16528_p12 = scmp.ne.s32.totalorder %s16519_s10, 0 }
  0x69   : > { %s10887_s14 = scalar_lea.hbm %s11249_s7, 14336  ;;  %s10892_s19 = scalar_lea.hbm %s16421_s5, 100352 }
  0x6a   : > { %p10888_p8 = scmp.ne.s32.totalorder %s11249_s7, %s10887_s14  ;;  %p16529_p2 = pneg %p16528_p12 }
  0x6b   : > { %p10893_p11 = scmp.lt.u32.totalorder %s11249_s7, %s16421_s5  ;;  %p10894_p13 = scmp.lt.u32.totalorder %s10892_s19, %s10887_s14 }
  0x6c   : > { %p10890_p9 = pnand %p10888_p8, %p16529_p2  ;;  %p10896_p6 = scmp.lt.u32.totalorder %s10887_s14, %s11249_s7 }
  0x6d   : > { %p10895_p3 = por %p10894_p13, %p10893_p11 }
  0x6e   : > { %p10891_p10 = pneg %p10890_p9 }
  0x6f   : > { %p10897_p1 = por %p10896_p6, %p10895_p3 }
  0x71   : > { %p10898_p4 = pnand %p10897_p1, %p10891_p10 }
  0x73   : > { %10901 = shalt.err (!%p10898_p4)
}
  0x74   : > { %s10902_s2 = scalar_lea.vmem %s11251_s16, 14336  ;;  %p16530_p7 = pmov %p16529_p2 }
  0x75   : > { %p10903_p5 = scmp.ne.s32.totalorder %s11251_s16, %s10902_s2  ;;  %s11015_s13 = smov [#allocation9]  }
  0x76   : > { %s10907_s17 = sshll.u32 %s11015_s13, 4  ;;  %s10908_s17 = int_to_ptr.vmem [resolvable:$false] %s10907_s17 }
  0x77   : > { %p10905_p0 = pnand %p10903_p5, %p16530_p7  ;;  %s10909_s28 = scalar_lea.vmem %s10908_s17, 28672 }
  0x78   : > { %p10910_p2 = scmp.lt.s32.totalorder %s11251_s16, %s10908_s17  ;;  %p10911_p9 = scmp.lt.s32.totalorder %s10909_s28, %s10902_s2 }
  0x79   : > { %p10906_p8 = pneg %p10905_p0 }
  0x7a   : > { %p10912_p11 = por %p10911_p9, %p10910_p2 }
  0x7c   : > { %p10913_p13 = pnand %p10912_p11, %p10906_p8 }
  0x7e   : > { %10916 = shalt.err (!%p10913_p13)
}
  0x7f   : > { %s11016_s15 = smov 64   ;;  %s11017_s4 = smov 4  }
  0x80   : > { %9383 = dma.hbm_to_vmem [thread:$0]  (!%p16528_p12), %s11249_s7, 14336, %s11251_s16, %s11196_s12, %s11016_s15, %s11016_s15, %s11017_s4  }
  0x81   : > { %p16531_p10 = scmp.ne.s32.totalorder %s16517_s30, 0 }
  0x82   : > { %p16532_p3 = scmp.eq.s32.totalorder (!%p16531_p10), %s11118_s27, 0 }
  0x83   : > { %312 = sbr.rel (%p16531_p10) target bundleno = 2209 (0x8a1), region = 44 }
  0x8a   : > { %10968 = dma.done.wait (%p16532_p3), [#allocation4], 512   ;;  %p16533_p6 = pmov %p16532_p3 }
  0x8b   : > { %p16534_p1 = pmov %p16532_p3 }
  0x8c   : > { %10970 = vsyncadd (%p16533_p6), [#allocation4], 4294966784 }
  0x8d   : > { %10972 = dma.done.wait (%p16534_p1), [#allocation7], 16   ;;  %p16535_p4 = pmov %p16534_p1 }
  0x8e   : > { %s322_s10 = sand.u32 1, %s11118_s27   ;;  %s324_s12 = sand.u32 1, %s10989_s22  }
  0x8f   : > { %10974 = vsyncadd (%p16535_p4), [#allocation7], 4294967280  ;;  %s9321_s16 = smul.u32 896, %s324_s12  ;;  %s323_s30 = scalar_lea.sflag [#allocation4], %s322_s10 }
  0x90   : > { %p16536_p12 = scmp.ne.s32.totalorder %s16516_s29, 0 }
  0x91   : > { %s11289_s23 = scalar_lea.vmem [#allocation8], %s9321_s16 }
  0x92   : > { %10976 = dma.done.wait (%p16536_p12), %s323_s30, 28672  }
  0x93   : > { %10978 = vsyncadd (%p16536_p12), %s323_s30, 4294938624  ;;  %s11295_s26 = scalar_lea.vmem [#allocation9], %s9321_s16  ;;  %p8494_p5 = scmp.ne.s32.totalorder %s10997_s24, 0 }
  0x94   : > { %v11018_v0 = vmov (!%p8494_p5), 0.0  }
  0x95   : > { %394 = sbr.rel (%p8494_p5) target bundleno = 157 (0x9d), region = 64  ;;  %395 = vst [vmem:[#allocation2] sm:$0xff] (!%p8494_p5), %v11018_v0  ;;  %396 = vst [vmem:[#allocation2 + $0x8] sm:$0xff] (!%p8494_p5), %v11018_v0 }
  0x96   : > { %397 = vst [vmem:[#allocation2 + $0x10] sm:$0xff] (!%p8494_p5), %v11018_v0  ;;  %398 = vst [vmem:[#allocation2 + $0x18] sm:$0xff] (!%p8494_p5), %v11018_v0 }
  0x97   : > { %399 = vst [vmem:[#allocation2 + $0x20] sm:$0xff] (!%p8494_p5), %v11018_v0  ;;  %400 = vst [vmem:[#allocation2 + $0x28] sm:$0xff] (!%p8494_p5), %v11018_v0 }
  0x98   : > { %401 = vst [vmem:[#allocation2 + $0x30] sm:$0xff] (!%p8494_p5), %v11018_v0  ;;  %402 = vst [vmem:[#allocation2 + $0x38] sm:$0xff] (!%p8494_p5), %v11018_v0 }
  0x99   : > { %403 = vst [vmem:[#allocation2 + $0x40] sm:$0xff] (!%p8494_p5), %v11018_v0  ;;  %404 = vst [vmem:[#allocation2 + $0x48] sm:$0xff] (!%p8494_p5), %v11018_v0 }
  0x9a   : > { %405 = vst [vmem:[#allocation2 + $0x50] sm:$0xff] (!%p8494_p5), %v11018_v0  ;;  %406 = vst [vmem:[#allocation2 + $0x58] sm:$0xff] (!%p8494_p5), %v11018_v0 }
  0x9b   : > { %407 = vst [vmem:[#allocation2 + $0x60] sm:$0xff] (!%p8494_p5), %v11018_v0  ;;  %408 = vst [vmem:[#allocation2 + $0x68] sm:$0xff] (!%p8494_p5), %v11018_v0 }
  0x9c   : > { %409 = vst [vmem:[#allocation2 + $0x70] sm:$0xff] %v11018_v0  ;;  %410 = vst [vmem:[#allocation2 + $0x78] sm:$0xff] %v11018_v0 }
  0x9d PF: > { %v9484_v1 = vld [vmem:[%s11295_s26 + $0x40] sm:$0xff]   ;;  %v9486_v3 = vld [vmem:[%s11295_s26 + $0x48] sm:$0xff]   ;;  %v9488_v5 = vld [vmem:[%s11295_s26 + $0x50] sm:$0xff]   ;;  %p8831_p7 = scmp.ne.s32.totalorder %s10997_s24, 6 }
  0x9e   : > { %v9485_v2 = vld [vmem:[%s11295_s26] sm:$0xff]   ;;  %8855 = vmatprep.subr.bf16.mxu0 %v9484_v1  ;;  %9303 = vmatprep.subr.bf16.mxu1 %v9484_v1  ;;  %v9487_v4 = vld [vmem:[%s11295_s26 + $0x8] sm:$0xff]   ;;  %v9489_v6 = vld [vmem:[%s11295_s26 + $0x10] sm:$0xff]  }
  0x9f   : > { %8856 = vmatpush3.bf16.msra.mxu0 %v9485_v2  ;;  %9311 = vmatpush3.bf16.msra.mxu1 %v9485_v2  ;;  %v9490_v7 = vld [vmem:[%s11295_s26 + $0x58] sm:$0xff]   ;;  %v9492_v9 = vld [vmem:[%s11295_s26 + $0x60] sm:$0xff]   ;;  %v9494_v11 = vld [vmem:[%s11295_s26 + $0x68] sm:$0xff]  }
  0xa0   : > { %8857 = vmatprep.subr.bf16.mxu0 %v9486_v3  ;;  %9304 = vmatprep.subr.bf16.mxu1 %v9486_v3  ;;  %v9491_v8 = vld [vmem:[%s11295_s26 + $0x18] sm:$0xff]   ;;  %v9493_v10 = vld [vmem:[%s11295_s26 + $0x20] sm:$0xff]   ;;  %v9495_v22 = vld [vmem:[%s11295_s26 + $0x28] sm:$0xff]  }
  0xa1   : > { %v411_v12 = vld [vmem:[%s11289_s23] sm:$0xff]  ;;  %v418_v13 = vld [vmem:[%s11289_s23 + $0x38] sm:$0xff]  ;;  %v9496_v25 = vld [vmem:[%s11295_s26 + $0x70] sm:$0xff]  }
  0xa2   : > { %v467_v14 = vld [vmem:[%s11289_s23 + $0x1c0] sm:$0xff]  ;;  %v523_v15 = vunpack.c.l.bf16 %v411_v12  ;;  %v524_v16 = vunpack.c.h.bf16 %v411_v12  ;;  %v537_v17 = vunpack.c.l.bf16 %v418_v13  ;;  %v538_v18 = vunpack.c.h.bf16 %v418_v13  ;;  %v474_v19 = vld [vmem:[%s11289_s23 + $0x1f8] sm:$0xff]  ;;  %v9497_v29 = vld [vmem:[%s11295_s26 + $0x30] sm:$0xff]  }
  0xa3   : > { %8858 = vmatpush3.bf16.msra.mxu0 %v9487_v4  ;;  %9312 = vmatpush3.bf16.msra.mxu1 %v9487_v4  ;;  %v636_v20 = vunpack.c.h.bf16 %v467_v14  ;;  %v650_v21 = vunpack.c.h.bf16 %v474_v19  ;;  %v635_v24 = vunpack.c.l.bf16 %v467_v14  ;;  %v649_v27 = vunpack.c.l.bf16 %v474_v19  ;;  %v9498_v33 = vld [vmem:[%s11295_s26 + $0x78] sm:$0xff]   ;;  %v9500_v37 = vld [vmem:[%s11295_s26 + $0xc0] sm:$0xff]   ;;  %v425_v39 = vld [vmem:[%s11289_s23 + $0x70] sm:$0xff] }
  0xa4   : > { %8859 = vmatprep.subr.bf16.mxu0 %v9488_v5  ;;  %9305 = vmatprep.subr.bf16.mxu1 %v9488_v5  ;;  %v8496_v23 = vmul.f32 -1.442695, %v524_v16  ;;  %v8510_v26 = vmul.f32 -1.442695, %v538_v18  ;;  %v8495_v30 = vmul.f32 -1.442695, %v523_v15  ;;  %v552_v41 = vunpack.c.h.bf16 %v425_v39 }
  0xa5   : > { %v8608_v28 = vmul.f32 -1.442695, %v636_v20  ;;  %v8509_v31 = vmul.f32 -1.442695, %v537_v17  ;;  %v8622_v32 = vmul.f32 -1.442695, %v650_v21  ;;  %v551_v62 = vunpack.c.l.bf16 %v425_v39 }
  0xa6   : > { %9596 = vpow2.f32 %v8496_v23  ;;  %v8607_v34 = vmul.f32 -1.442695, %v635_v24  ;;  %v8621_v35 = vmul.f32 -1.442695, %v649_v27  ;;  %v9499_v36 = vld [vmem:[%s11295_s26 + $0x38] sm:$0xff]   ;;  %v9501_v38 = vld [vmem:[%s11295_s26 + $0x140] sm:$0xff]  }
  0xa7   : > { %8860 = vmatpush3.bf16.msra.mxu0 %v9489_v6  ;;  %9313 = vmatpush3.bf16.msra.mxu1 %v9489_v6  ;;  %9598 = vpow2.f32 %v8510_v26  ;;  %v432_v40 = vld [vmem:[%s11289_s23 + $0xa8] sm:$0xff]  ;;  %v481_v42 = vld [vmem:[%s11289_s23 + $0x230] sm:$0xff]  ;;  %v8524_v47 = vmul.f32 -1.442695, %v552_v41  ;;  %v439_v6 = vld [vmem:[%s11289_s23 + $0xe0] sm:$0xff] }
  0xa8   : > { %8861 = vmatprep.subr.bf16.mxu0 %v9490_v7  ;;  %9306 = vmatprep.subr.bf16.mxu1 %v9490_v7  ;;  %9600 = vpow2.f32 %v8608_v28  ;;  %v488_v43 = vld [vmem:[%s11289_s23 + $0x268] sm:$0xff]  ;;  %v566_v44 = vunpack.c.h.bf16 %v432_v40  ;;  %v664_v45 = vunpack.c.h.bf16 %v481_v42  ;;  %v565_v3 = vunpack.c.l.bf16 %v432_v40  ;;  %v11332_v14 = vld [vmem:[%s11289_s23 + $0x2d8] sm:$0xff] }
  0xa9   : > { %9602 = vpow2.f32 %v8622_v32  ;;  %v678_v46 = vunpack.c.h.bf16 %v488_v43  ;;  %v663_v5 = vunpack.c.l.bf16 %v481_v42  ;;  %v8523_v7 = vmul.f32 -1.442695, %v551_v62  ;;  %v11349_v62 = vld [vmem:[%s11289_s23 + $0x150] sm:$0xff] }
  0xaa   : > { %9604 = vpow2.f32 %v8495_v30  ;;  %v8538_v49 = vmul.f32 -1.442695, %v566_v44  ;;  %v8636_v52 = vmul.f32 -1.442695, %v664_v45  ;;  %v8537_v12 = vmul.f32 -1.442695, %v565_v3 }
  0xab   : > { %8862 = vmatpush3.bf16.msra.mxu0 %v9491_v8  ;;  %9314 = vmatpush3.bf16.msra.mxu1 %v9491_v8  ;;  %9606 = vpow2.f32 %v8509_v31  ;;  %v8650_v55 = vmul.f32 -1.442695, %v678_v46  ;;  %v677_v8 = vunpack.c.l.bf16 %v488_v43  ;;  %v580_v13 = vunpack.c.h.bf16 %v439_v6  ;;  %v9503_v30 = vld [vmem:[%s11295_s26 + $0x100] sm:$0xff]   ;;  %v9513_v3 = vld [vmem:[%s11295_s26 + $0x158] sm:$0xff]  }
  0xac   : > { %8863 = vmatprep.subr.bf16.mxu0 %v9492_v9  ;;  %9307 = vmatprep.subr.bf16.mxu1 %v9492_v9  ;;  %9608 = vpow2.f32 %v8607_v34  ;;  %v11326_v9 = vld [vmem:[%s11289_s23 + $0x118] sm:$0xff]  ;;  %v8635_v17 = vmul.f32 -1.442695, %v663_v5  ;;  %v706_v24 = vunpack.c.h.bf16 %v11332_v14  ;;  %v579_v28 = vunpack.c.l.bf16 %v439_v6  ;;  %v9505_v34 = vld [vmem:[%s11295_s26 + $0x148] sm:$0xff]   ;;  %v9502_v43 = vld [vmem:[%s11295_s26 + $0x80] sm:$0xff]  }
  0xad   : > { %9610 = vpow2.f32 %v8621_v35  ;;  %v594_v18 = vunpack.c.h.bf16 %v11326_v9  ;;  %v8649_v21 = vmul.f32 -1.442695, %v677_v8  ;;  %v8552_v27 = vmul.f32 -1.442695, %v580_v13  ;;  %v9510_v6 = vld [vmem:[%s11295_s26 + $0x90] sm:$0xff]   ;;  %v11355_v8 = vld [vmem:[%s11289_s23 + $0x188] sm:$0xff] }
  0xae   : > { %9612 = vpow2.f32 %v8524_v47  ;;  %v593_v40 = vunpack.c.l.bf16 %v11326_v9  ;;  %v8551_v41 = vmul.f32 -1.442695, %v579_v28  ;;  %v9504_v47 = vld [vmem:[%s11295_s26 + $0xc8] sm:$0xff]   ;;  %v608_v13 = vunpack.c.h.bf16 %v11349_v62  ;;  %v9516_v28 = vld [vmem:[%s11295_s26 + $0xe0] sm:$0xff]  }
  0xaf   : > { %8864 = vmatpush3.bf16.msra.mxu0 %v9493_v10  ;;  %9315 = vmatpush3.bf16.msra.mxu1 %v9493_v10  ;;  %9614 = vpow2.f32 %v8538_v49  ;;  %v11329_v10 = vld [vmem:[%s11289_s23 + $0x2a0] sm:$0xff]  ;;  %v8566_v31 = vmul.f32 -1.442695, %v594_v18  ;;  %v9507_v49 = vld [vmem:[%s11295_s26 + $0x108] sm:$0xff]  }
  0xb0   : > { %8865 = vmatprep.subr.bf16.mxu0 %v9494_v11  ;;  %9308 = vmatprep.subr.bf16.mxu1 %v9494_v11  ;;  %v9597_v48 = vpop.eup %9596  ;;  %v691_v44 = vunpack.c.l.bf16 %v11329_v10  ;;  %v9517_v18 = vld [vmem:[%s11295_s26 + $0x160] sm:$0xff]  }
  0xb1   : > { %v9599_v50 = vpop.eup %9598  ;;  %v1420_v51 = vadd.f32 1.0, %v9597_v48 }
  0xb2   : > { %v9601_v53 = vpop.eup %9600  ;;  %v1434_v54 = vadd.f32 1.0, %v9599_v50 }
  0xb3   : > { %8866 = vmatpush3.bf16.msra.mxu0 %v9495_v22  ;;  %9316 = vmatpush3.bf16.msra.mxu1 %v9495_v22  ;;  %v9603_v56 = vpop.eup %9602  ;;  %9616 = vrcp.f32 %v1420_v51  ;;  %v1532_v57 = vadd.f32 1.0, %v9601_v53  ;;  %v692_v22 = vunpack.c.h.bf16 %v11329_v10  ;;  %v9509_v53 = vld [vmem:[%s11295_s26 + $0x150] sm:$0xff]  }
  0xb4   : > { %8867 = vmatprep.subr.bf16.mxu0 %v9496_v25  ;;  %9309 = vmatprep.subr.bf16.mxu1 %v9496_v25  ;;  %v9605_v58 = vpop.eup %9604  ;;  %9618 = vrcp.f32 %v1434_v54  ;;  %v1546_v59 = vadd.f32 1.0, %v9603_v56  ;;  %v8565_v54 = vmul.f32 -1.442695, %v593_v40  ;;  %v9506_v56 = vld [vmem:[%s11295_s26 + $0x88] sm:$0xff]   ;;  %v9518_v40 = vld [vmem:[%s11295_s26 + $0xa0] sm:$0xff]  }
  0xb5   : > { %v9607_v60 = vpop.eup %9606  ;;  %9620 = vrcp.f32 %v1532_v57  ;;  %v1419_v61 = vadd.f32 1.0, %v9605_v58  ;;  %v8664_v35 = vmul.f32 -1.442695, %v692_v22  ;;  %v9508_v58 = vld [vmem:[%s11295_s26 + $0xd0] sm:$0xff]  }
  0xb6   : > { %v9609_v63 = vpop.eup %9608  ;;  %9622 = vrcp.f32 %v1546_v59  ;;  %v1433_v0 = vadd.f32 1.0, %v9607_v60  ;;  %v8663_v59 = vmul.f32 -1.442695, %v691_v44  ;;  %v11364_v22 = vld [vmem:[%s11289_s23 + $0x310] sm:$0xff]  ;;  %v621_v44 = vunpack.c.l.bf16 %v11355_v8 }
  0xb7   : > { %8868 = vmatpush3.bf16.msra.mxu0 %v9497_v29  ;;  %9317 = vmatpush3.bf16.msra.mxu1 %v9497_v29  ;;  %v9611_v1 = vpop.eup %9610  ;;  %9624 = vrcp.f32 %v1419_v61  ;;  %v1531_v2 = vadd.f32 1.0, %v9609_v63  ;;  %v9511_v61 = vld [vmem:[%s11295_s26 + $0x110] sm:$0xff]  }
  0xb8   : > { %8869 = vmatprep.subr.bf16.mxu0 %v9498_v33  ;;  %9310 = vmatprep.subr.bf16.mxu1 %v9498_v33  ;;  %9626 = vrcp.f32 %v1433_v0  ;;  %v1545_v4 = vadd.f32 1.0, %v9611_v1  ;;  %v9613_v11 = vpop.eup %9612 }
  0xb9   : > { %9628 = vrcp.f32 %v1531_v2  ;;  %v9615_v15 = vpop.eup %9614  ;;  %v1448_v16 = vadd.f32 1.0, %v9613_v11  ;;  %v9515_v11 = vld [vmem:[%s11295_s26 + $0x118] sm:$0xff]  }
  0xba   : > { %9630 = vrcp.f32 %v1545_v4  ;;  %v1462_v20 = vadd.f32 1.0, %v9615_v15 }
  0xbb   : > { %8870 = vmatpush3.bf16.msra.mxu0 %v9499_v36  ;;  %9318 = vmatpush3.bf16.msra.mxu1 %v9499_v36  ;;  %9632 = vpow2.f32 %v8636_v52 }
  0xbc   : > { %8919 = vmatprep.subr.bf16.mxu1 %v9500_v37  ;;  %8983 = vmatprep.subr.bf16.mxu0 %v9501_v38  ;;  %9634 = vpow2.f32 %v8650_v55  ;;  %v8678_v37 = vmul.f32 -1.442695, %v706_v24  ;;  %v11367_v24 = vld [vmem:[%s11289_s23 + $0x348] sm:$0xff] }
  0xbd   : > { %v9617_v19 = vpop.eup %9616  ;;  %9636 = vpow2.f32 %v8523_v7  ;;  %v9512_v7 = vld [vmem:[%s11295_s26 + $0xd8] sm:$0xff]  }
  0xbe   : > { %v9619_v23 = vpop.eup %9618  ;;  %9638 = vrcp.f32 %v1448_v16  ;;  %v9514_v16 = vld [vmem:[%s11295_s26 + $0x98] sm:$0xff]  }
  0xbf   : > { %v9621_v25 = vpop.eup %9620  ;;  %v2092_v26 = vpack.c.bf16 %v9619_v23, %v9617_v19  ;;  %9640 = vrcp.f32 %v1462_v20 }
  0xc0   : > { %v9623_v29 = vpop.eup %9622  ;;  %9642 = vpow2.f32 %v8537_v12  ;;  %v705_v12 = vunpack.c.l.bf16 %v11332_v14 }
  0xc1   : > { %v9625_v32 = vpop.eup %9624  ;;  %3147 = vmatprep.mubr.bf16.mxu0 %v2092_v26  ;;  %v2148_v33 = vpack.c.bf16 %v9623_v29, %v9621_v25  ;;  %9644 = vpow2.f32 %v8635_v17  ;;  %v8580_v29 = vmul.f32 -1.442695, %v608_v13 }
  0xc2   : > { %v9627_v36 = vpop.eup %9626  ;;  %9646 = vpow2.f32 %v8649_v21  ;;  %v622_v21 = vunpack.c.h.bf16 %v11355_v8 }
  0xc3   : > { %v9629_v38 = vpop.eup %9628  ;;  %3179 = vmatprep.mubr.bf16.mxu1 %v2148_v33  ;;  %v2091_v39 = vpack.c.bf16 %v9627_v36, %v9625_v32  ;;  %9648 = vpow2.f32 %v8552_v27  ;;  %v8677_v27 = vmul.f32 -1.442695, %v705_v12  ;;  %v9519_v32 = vld [vmem:[%s11295_s26 + $0x120] sm:$0xff]   ;;  %v720_v33 = vunpack.c.h.bf16 %v11364_v22 }
  0xc4   : > { %v9631_v42 = vpop.eup %9630  ;;  %9650 = vpow2.f32 %v8566_v31  ;;  %v8594_v36 = vmul.f32 -1.442695, %v622_v21 }
  0xc5   : > { %v9633_v45 = vpop.eup %9632  ;;  %3148 = vmatmul.mubr.bf16.vlgmr.msra.gmra.mrb[0].mxu0 %v2091_v39  ;;  %v2147_v46 = vpack.c.bf16 %v9631_v42, %v9629_v38  ;;  %9652 = vpow2.f32 %v8664_v35  ;;  %v9521_v35 = vld [vmem:[%s11295_s26 + $0x168] sm:$0xff]   ;;  %v607_v42 = vunpack.c.l.bf16 %v11349_v62  ;;  %v8593_v62 = vmul.f32 -1.442695, %v621_v44 }
  0xc6   : > { %v9635_v48 = vpop.eup %9634  ;;  %8984 = vmatpush3.bf16.msra.mxu0 %v9503_v30  ;;  %v1560_v50 = vadd.f32 1.0, %v9633_v45  ;;  %9654 = vpow2.f32 %v8678_v37  ;;  %v734_v37 = vunpack.c.h.bf16 %v11367_v24  ;;  %v412_v45 = vld [vmem:[%s11289_s23 + $0x8] sm:$0xff] }
  0xc7   : > { %v9637_v51 = vpop.eup %9636  ;;  %3180 = vmatmul.mubr.bf16.vlgmr.msra.gmra.mrb[0].mxu1 %v2147_v46  ;;  %8985 = vmatprep.subr.bf16.mxu0 %v9505_v34  ;;  %v1574_v52 = vadd.f32 1.0, %v9635_v48  ;;  %9656 = vpow2.f32 %v8551_v41  ;;  %v9520_v41 = vld [vmem:[%s11295_s26 + $0xe8] sm:$0xff]   ;;  %v8692_v48 = vmul.f32 -1.442695, %v720_v33  ;;  %v9532_v33 = vld [vmem:[%s11295_s26 + $0x1c0] sm:$0xff]  }
  0xc8   : > { %v9639_v55 = vpop.eup %9638  ;;  %8920 = vmatpush3.bf16.msra.mxu1 %v9502_v43  ;;  %9658 = vrcp.f32 %v1560_v50  ;;  %v1447_v57 = vadd.f32 1.0, %v9637_v51 }
  0xc9   : > { %v9641_v60 = vpop.eup %9640  ;;  %8921 = vmatprep.subr.bf16.mxu1 %v9504_v47  ;;  %9660 = vrcp.f32 %v1574_v52  ;;  %v9523_v52 = vld [vmem:[%s11295_s26 + $0x128] sm:$0xff]  }
  0xca   : > { %v9643_v63 = vpop.eup %9642  ;;  %8986 = vmatpush3.bf16.msra.mxu0 %v9507_v49  ;;  %v2106_v0 = vpack.c.bf16 %v9641_v60, %v9639_v55  ;;  %9662 = vrcp.f32 %v1447_v57  ;;  %v719_v49 = vunpack.c.l.bf16 %v11364_v22  ;;  %v9522_v57 = vld [vmem:[%s11295_s26 + $0xa8] sm:$0xff]   ;;  %v525_v60 = vunpack.c.l.bf16 %v412_v45  ;;  %v9531_v22 = vld [vmem:[%s11295_s26 + $0x138] sm:$0xff]  }
  0xcb   : > { %v9645_v1 = vpop.eup %9644  ;;  %v1461_v2 = vadd.f32 1.0, %v9643_v63  ;;  %8987 = vmatprep.subr.bf16.mxu0 %v9509_v53  ;;  %9664 = vpow2.f32 %v8565_v54  ;;  %v8706_v53 = vmul.f32 -1.442695, %v734_v37  ;;  %v733_v54 = vunpack.c.l.bf16 %v11367_v24  ;;  %v9524_v63 = vld [vmem:[%s11295_s26 + $0xf0] sm:$0xff]   ;;  %v9530_v24 = vld [vmem:[%s11295_s26 + $0xb8] sm:$0xff]   ;;  %v420_v37 = vld [vmem:[%s11289_s23 + $0x48] sm:$0xff] }
  0xcc   : > { %v9647_v4 = vpop.eup %9646  ;;  %8922 = vmatpush3.bf16.msra.mxu1 %v9506_v56  ;;  %3155 = vmatprep.mubr.bf16.mxu0 %v2106_v0  ;;  %v1559_v5 = vadd.f32 1.0, %v9645_v1  ;;  %9666 = vpow2.f32 %v8663_v59  ;;  %v9525_v59 = vld [vmem:[%s11295_s26 + $0x170] sm:$0xff]   ;;  %v419_v0 = vld [vmem:[%s11289_s23 + $0x40] sm:$0xff]  ;;  %v526_v1 = vunpack.c.h.bf16 %v412_v45  ;;  %v8497_v12 = vmul.f32 -1.442695, %v525_v60 }
  0xcd   : > { %v9649_v9 = vpop.eup %9648  ;;  %9668 = vrcp.f32 %v1461_v2  ;;  %v1573_v10 = vadd.f32 1.0, %v9647_v4  ;;  %8923 = vmatprep.subr.bf16.mxu1 %v9508_v58  ;;  %v8579_v58 = vmul.f32 -1.442695, %v607_v42  ;;  %v8691_v4 = vmul.f32 -1.442695, %v719_v49  ;;  %v433_v60 = vld [vmem:[%s11289_s23 + $0xb0] sm:$0xff] }
  0xce   : > { %v9651_v15 = vpop.eup %9650  ;;  %9670 = vrcp.f32 %v1559_v5  ;;  %8988 = vmatpush3.bf16.msra.mxu0 %v9511_v61  ;;  %v1476_v17 = vadd.f32 1.0, %v9649_v9 }
  0xcf   : > { %v9653_v19 = vpop.eup %9652  ;;  %9672 = vrcp.f32 %v1573_v10  ;;  %8989 = vmatprep.subr.bf16.mxu0 %v9513_v3  ;;  %v1490_v20 = vadd.f32 1.0, %v9651_v15  ;;  %v9529_v10 = vld [vmem:[%s11295_s26 + $0x178] sm:$0xff]   ;;  %v9526_v15 = vld [vmem:[%s11295_s26 + $0xb0] sm:$0xff]  }
  0xd0   : > { %v9655_v23 = vpop.eup %9654  ;;  %8924 = vmatpush3.bf16.msra.mxu1 %v9510_v6  ;;  %9674 = vrcp.f32 %v1476_v17  ;;  %v1588_v14 = vadd.f32 1.0, %v9653_v19  ;;  %v8705_v6 = vmul.f32 -1.442695, %v733_v54  ;;  %v8498_v17 = vmul.f32 -1.442695, %v526_v1  ;;  %v11402_v1 = vld [vmem:[%s11289_s23 + $0xb8] sm:$0xff] }
  0xd1   : > { %v9657_v25 = vpop.eup %9656  ;;  %8925 = vmatprep.subr.bf16.mxu1 %v9512_v7  ;;  %9676 = vrcp.f32 %v1490_v20  ;;  %v1602_v26 = vadd.f32 1.0, %v9655_v23  ;;  %v9527_v7 = vld [vmem:[%s11295_s26 + $0x130] sm:$0xff]   ;;  %v540_v20 = vunpack.c.h.bf16 %v419_v0 }
  0xd2   : > { %v9659_v30 = vpop.eup %9658  ;;  %8990 = vmatpush3.bf16.msra.mxu0 %v9515_v11  ;;  %9678 = vrcp.f32 %v1588_v14  ;;  %v1475_v31 = vadd.f32 1.0, %v9657_v25  ;;  %v539_v11 = vunpack.c.l.bf16 %v419_v0 }
  0xd3   : > { %v9661_v34 = vpop.eup %9660  ;;  %9680 = vrcp.f32 %v1602_v26  ;;  %8991 = vmatprep.subr.bf16.mxu0 %v9517_v18  ;;  %v9534_v26 = vld [vmem:[%s11295_s26 + $0x240] sm:$0xff]  }
  0xd4   : > { %v9663_v38 = vpop.eup %9662  ;;  %v2162_v39 = vpack.c.bf16 %v9661_v34, %v9659_v30  ;;  %8926 = vmatpush3.bf16.msra.mxu1 %v9514_v16  ;;  %9682 = vrcp.f32 %v1475_v31  ;;  %v9528_v16 = vld [vmem:[%s11295_s26 + $0xf8] sm:$0xff]   ;;  %v8511_v25 = vmul.f32 -1.442695, %v539_v11 }
  0xd5   : > { %v9665_v43 = vpop.eup %9664  ;;  %9684 = vpow2.f32 %v8677_v27  ;;  %8927 = vmatprep.subr.bf16.mxu1 %v9516_v28 }
  0xd6   : > { %v9667_v46 = vpop.eup %9666  ;;  %3187 = vmatprep.mubr.bf16.mxu1 %v2162_v39  ;;  %v1489_v47 = vadd.f32 1.0, %v9665_v43  ;;  %8992 = vmatpush3.bf16.msra.mxu0 %v9519_v32  ;;  %9686 = vpow2.f32 %v8580_v29  ;;  %v413_v29 = vld [vmem:[%s11289_s23 + $0x10] sm:$0xff]  ;;  %v8512_v32 = vmul.f32 -1.442695, %v540_v20 }
  0xd7   : > { %v9669_v50 = vpop.eup %9668  ;;  %v1587_v51 = vadd.f32 1.0, %v9667_v46  ;;  %8993 = vmatprep.subr.bf16.mxu0 %v9521_v35  ;;  %9688 = vpow2.f32 %v8594_v36  ;;  %v528_v43 = vunpack.c.h.bf16 %v413_v29  ;;  %v541_v46 = vunpack.c.l.bf16 %v420_v37 }
  0xd8   : > { %v9671_v55 = vpop.eup %9670  ;;  %v2105_v56 = vpack.c.bf16 %v9669_v50, %v9663_v38  ;;  %9690 = vrcp.f32 %v1489_v47  ;;  %8928 = vmatpush3.bf16.msra.mxu1 %v9518_v40  ;;  %v527_v38 = vunpack.c.l.bf16 %v413_v29  ;;  %v542_v47 = vunpack.c.h.bf16 %v420_v37  ;;  %v11407_v29 = vld [vmem:[%s11289_s23 + $0xe8] sm:$0xff] }
  0xd9   : > { %v9673_v61 = vpop.eup %9672  ;;  %9692 = vrcp.f32 %v1587_v51  ;;  %8929 = vmatprep.subr.bf16.mxu1 %v9520_v41  ;;  %v426_v51 = vld [vmem:[%s11289_s23 + $0x78] sm:$0xff] }
  0xda   : > { %v9675_v2 = vpop.eup %9674  ;;  %3156 = vmatmul.mubr.bf16.gmra.mrb[4].mxu0 %v2105_v56  ;;  %v2161_v3 = vpack.c.bf16 %v9673_v61, %v9671_v55  ;;  %9694 = vpow2.f32 %v8692_v48  ;;  %v8499_v50 = vmul.f32 -1.442695, %v527_v38  ;;  %v8500_v56 = vmul.f32 -1.442695, %v528_v43 }
  0xdb   : > { %v9677_v5 = vpop.eup %9676  ;;  %8994 = vmatpush3.bf16.msra.mxu0 %v9523_v52  ;;  %9696 = vpow2.f32 %v8706_v53  ;;  %v554_v61 = vunpack.c.h.bf16 %v426_v51  ;;  %v582_v38 = vunpack.c.h.bf16 %v11407_v29 }
  0xdc   : > { %v9679_v8 = vpop.eup %9678  ;;  %3188 = vmatmul.mubr.bf16.gmra.mrb[4].mxu1 %v2161_v3  ;;  %v2120_v9 = vpack.c.bf16 %v9677_v5, %v9675_v2  ;;  %9698 = vpow2.f32 %v8579_v58  ;;  %8995 = vmatprep.subr.bf16.mxu0 %v9525_v59  ;;  %v8513_v58 = vmul.f32 -1.442695, %v541_v46  ;;  %v8514_v59 = vmul.f32 -1.442695, %v542_v47  ;;  %v11413_v47 = vld [vmem:[%s11289_s23 + $0x120] sm:$0xff] }
  0xdd   : > { %v9681_v13 = vpop.eup %9680  ;;  %8930 = vmatpush3.bf16.msra.mxu1 %v9522_v57  ;;  %9700 = vpow2.f32 %v8593_v62  ;;  %v11399_v62 = vld [vmem:[%s11289_s23 + $0x80] sm:$0xff] }
  0xde   : > { %v9683_v18 = vpop.eup %9682  ;;  %3163 = vmatprep.mubr.bf16.mxu0 %v2120_v9  ;;  %v2176_v19 = vpack.c.bf16 %v9681_v13, %v9679_v8  ;;  %9702 = vpow2.f32 %v8691_v4  ;;  %8931 = vmatprep.subr.bf16.mxu1 %v9524_v63  ;;  %v8526_v9 = vmul.f32 -1.442695, %v554_v61  ;;  %v570_v13 = vunpack.c.h.bf16 %v11402_v1 }
  0xdf   : > { %v9685_v21 = vpop.eup %9684  ;;  %9704 = vpow2.f32 %v8705_v6  ;;  %8996 = vmatpush3.bf16.msra.mxu0 %v9527_v7  ;;  %v568_v6 = vunpack.c.h.bf16 %v433_v60 }
  0xe0   : > { %v9687_v23 = vpop.eup %9686  ;;  %3195 = vmatprep.mubr.bf16.mxu1 %v2176_v19  ;;  %v1601_v14 = vadd.f32 1.0, %v9685_v21  ;;  %8997 = vmatprep.subr.bf16.mxu0 %v9529_v10  ;;  %9706 = vpow2.f32 %v8497_v12  ;;  %v556_v10 = vunpack.c.h.bf16 %v11399_v62 }
  0xe1   : > { %v9689_v27 = vpop.eup %9688  ;;  %v1504_v28 = vadd.f32 1.0, %v9687_v23  ;;  %8932 = vmatpush3.bf16.msra.mxu1 %v9526_v15  ;;  %9708 = vpow2.f32 %v8498_v17  ;;  %v553_v17 = vunpack.c.l.bf16 %v426_v51  ;;  %v8540_v19 = vmul.f32 -1.442695, %v568_v6 }
  0xe2   : > { %v9691_v30 = vpop.eup %9690  ;;  %9710 = vrcp.f32 %v1601_v14  ;;  %v1518_v31 = vadd.f32 1.0, %v9689_v27  ;;  %8933 = vmatprep.subr.bf16.mxu1 %v9528_v16  ;;  %v567_v23 = vunpack.c.l.bf16 %v433_v60 }
  0xe3   : > { %v9693_v34 = vpop.eup %9692  ;;  %v2119_v35 = vpack.c.bf16 %v9691_v30, %v9683_v18  ;;  %9712 = vrcp.f32 %v1504_v28  ;;  %8998 = vmatpush3.bf16.msra.mxu0 %v9531_v22  ;;  %v8528_v22 = vmul.f32 -1.442695, %v556_v10  ;;  %v8525_v27 = vmul.f32 -1.442695, %v553_v17  ;;  %v9541_v17 = vld [vmem:[%s11295_s26 + $0x190] sm:$0xff]  }
  0xe4   : > { %v9695_v36 = vpop.eup %9694  ;;  %9714 = vrcp.f32 %v1518_v31  ;;  %9111 = vmatprep.subr.bf16.mxu0 %v9534_v26 }
  0xe5   : > { %v9697_v39 = vpop.eup %9696  ;;  %3164 = vmatmul.mubr.bf16.gmra.mrb[8].mxu0 %v2119_v35  ;;  %v1616_v40 = vadd.f32 1.0, %v9695_v36  ;;  %8934 = vmatpush3.bf16.msra.mxu1 %v9530_v24  ;;  %9716 = vpow2.f32 %v8511_v25  ;;  %v8542_v24 = vmul.f32 -1.442695, %v570_v13  ;;  %v569_v36 = vunpack.c.l.bf16 %v11402_v1 }
  0xe6   : > { %v9699_v41 = vpop.eup %9698  ;;  %v1630_v42 = vadd.f32 1.0, %v9697_v39  ;;  %9718 = vpow2.f32 %v8512_v32  ;;  %9047 = vmatprep.subr.bf16.mxu1 %v9532_v33  ;;  %v8539_v32 = vmul.f32 -1.442695, %v567_v23  ;;  %v555_v33 = vunpack.c.l.bf16 %v11399_v62 }
  0xe7   : > { %v9701_v44 = vpop.eup %9700  ;;  %9720 = vrcp.f32 %v1616_v40  ;;  %v1503_v45 = vadd.f32 1.0, %v9699_v41  ;;  %v8541_v46 = vmul.f32 -1.442695, %v569_v36 }
  0xe8   : > { %v9703_v48 = vpop.eup %9702  ;;  %9722 = vrcp.f32 %v1630_v42  ;;  %v1517_v49 = vadd.f32 1.0, %v9701_v44  ;;  %v8527_v43 = vmul.f32 -1.442695, %v555_v33 }
  0xe9   : > { %v9705_v52 = vpop.eup %9704  ;;  %9724 = vrcp.f32 %v1503_v45  ;;  %v1615_v53 = vadd.f32 1.0, %v9703_v48 }
  0xea   : > { %v9707_v54 = vpop.eup %9706  ;;  %9726 = vrcp.f32 %v1517_v49  ;;  %v1629_v55 = vadd.f32 1.0, %v9705_v52  ;;  %v8554_v49 = vmul.f32 -1.442695, %v582_v38  ;;  %v9533_v52 = vld [vmem:[%s11295_s26 + $0x180] sm:$0xff]  }
  0xeb   : > { %v9709_v57 = vpop.eup %9708  ;;  %9728 = vrcp.f32 %v1615_v53  ;;  %v1421_v5 = vadd.f32 1.0, %v9707_v54  ;;  %v11417_v53 = vld [vmem:[%s11289_s23 + $0xf0] sm:$0xff] }
  0xec   : > { %v9711_v63 = vpop.eup %9710  ;;  %9730 = vrcp.f32 %v1629_v55  ;;  %v1422_v0 = vadd.f32 1.0, %v9709_v57  ;;  %v596_v57 = vunpack.c.h.bf16 %v11413_v47 }
  0xed   : > { %v9713_v2 = vpop.eup %9712  ;;  %v2175_v3 = vpack.c.bf16 %v9711_v63, %v9693_v34  ;;  %9732 = vpow2.f32 %v8499_v50  ;;  %v584_v63 = vunpack.c.h.bf16 %v11417_v53 }
  0xee   : > { %v9715_v4 = vpop.eup %9714  ;;  %9734 = vrcp.f32 %v1422_v0  ;;  %v8568_v6 = vmul.f32 -1.442695, %v596_v57 }
  0xef   : > { %v9717_v7 = vpop.eup %9716  ;;  %3196 = vmatmul.mubr.bf16.gmra.mrb[8].mxu1 %v2175_v3  ;;  %v2134_v8 = vpack.c.bf16 %v9715_v4, %v9713_v2  ;;  %9736 = vpow2.f32 %v8500_v56  ;;  %v9536_v56 = vld [vmem:[%s11295_s26 + $0x1c8] sm:$0xff]  }
  0xf0   : > { %v9719_v11 = vpop.eup %9718  ;;  %9738 = vpow2.f32 %v8513_v58  ;;  %v1435_v12 = vadd.f32 1.0, %v9717_v7  ;;  %v11422_v58 = vld [vmem:[%s11289_s23 + $0x128] sm:$0xff]  ;;  %v581_v7 = vunpack.c.l.bf16 %v11407_v29 }
  0xf1   : > { %v9721_v15 = vpop.eup %9720  ;;  %3171 = vmatprep.mubr.bf16.mxu0 %v2134_v8  ;;  %v1436_v16 = vadd.f32 1.0, %v9719_v11  ;;  %9740 = vpow2.f32 %v8514_v59  ;;  %v9537_v2 = vld [vmem:[%s11295_s26 + $0x188] sm:$0xff]   ;;  %v598_v3 = vunpack.c.h.bf16 %v11422_v58  ;;  %v9540_v8 = vld [vmem:[%s11295_s26 + $0x1d0] sm:$0xff]  }
  0xf2   : > { %v9723_v18 = vpop.eup %9722  ;;  %9742 = vrcp.f32 %v1421_v5  ;;  %v9538_v29 = vld [vmem:[%s11295_s26 + $0x248] sm:$0xff]  }
  0xf3   : > { %v9725_v20 = vpop.eup %9724  ;;  %v2190_v21 = vpack.c.bf16 %v9723_v18, %v9721_v15  ;;  %9744 = vrcp.f32 %v1436_v16  ;;  %v8570_v16 = vmul.f32 -1.442695, %v598_v3 }
  0xf4   : > { %v9727_v14 = vpop.eup %9726  ;;  %9746 = vrcp.f32 %v1435_v12  ;;  %v8556_v12 = vmul.f32 -1.442695, %v584_v63 }
  0xf5   : > { %v9729_v25 = vpop.eup %9728  ;;  %3203 = vmatprep.mubr.bf16.mxu1 %v2190_v21  ;;  %v2133_v26 = vpack.c.bf16 %v9727_v14, %v9725_v20  ;;  %9748 = vpow2.f32 %v8526_v9  ;;  %v8553_v20 = vmul.f32 -1.442695, %v581_v7  ;;  %v11432_v21 = vld [vmem:[%s11289_s23 + $0x158] sm:$0xff] }
  0xf6   : > { %v9731_v28 = vpop.eup %9730  ;;  %9750 = vpow2.f32 %v8540_v19  ;;  %v595_v19 = vunpack.c.l.bf16 %v11413_v47  ;;  %v610_v33 = vunpack.c.h.bf16 %v11432_v21  ;;  %v11451_v47 = vld [vmem:[%s11289_s23 + $0x198] sm:$0xff] }
  0xf7   : > { %v9733_v30 = vpop.eup %9732  ;;  %3172 = vmatmul.mubr.bf16.gmra.mrb[12].mxu0 %v2133_v26  ;;  %v2189_v31 = vpack.c.bf16 %v9731_v28, %v9729_v25  ;;  %9752 = vpow2.f32 %v8528_v22  ;;  %v9544_v22 = vld [vmem:[%s11295_s26 + $0x1d8] sm:$0xff]   ;;  %v11437_v25 = vld [vmem:[%s11289_s23 + $0x190] sm:$0xff]  ;;  %v9535_v28 = vld [vmem:[%s11295_s26 + $0x200] sm:$0xff]  }
  0xf8   : > { %v9735_v34 = vpop.eup %9734  ;;  %v1423_v35 = vadd.f32 1.0, %v9733_v30  ;;  %9754 = vpow2.f32 %v8542_v24  ;;  %v583_v24 = vunpack.c.l.bf16 %v11417_v53  ;;  %v597_v30 = vunpack.c.l.bf16 %v11422_v58 }
  0xf9   : > { %v9737_v37 = vpop.eup %9736  ;;  %3204 = vmatmul.mubr.bf16.gmra.mrb[12].mxu1 %v2189_v31  ;;  %9756 = vpow2.f32 %v8525_v27  ;;  %v8567_v38 = vmul.f32 -1.442695, %v595_v19  ;;  %v626_v58 = vunpack.c.h.bf16 %v11451_v47 }
  0xfa   : > { %v9739_v39 = vpop.eup %9738  ;;  %v1424_v40 = vadd.f32 1.0, %v9737_v37  ;;  %9758 = vrcp.f32 %v1423_v35  ;;  %v9545_v35 = vld [vmem:[%s11295_s26 + $0x198] sm:$0xff]  }
  0xfb   : > { %v9741_v41 = vpop.eup %9740  ;;  %v1437_v42 = vadd.f32 1.0, %v9739_v39  ;;  %9760 = vpow2.f32 %v8539_v32  ;;  %v624_v39 = vunpack.c.h.bf16 %v11437_v25 }
  0xfc   : > { %v9743_v44 = vpop.eup %9742  ;;  %v1438_v45 = vadd.f32 1.0, %v9741_v41  ;;  %9762 = vrcp.f32 %v1424_v40  ;;  %v9548_v40 = vld [vmem:[%s11295_s26 + $0x1e0] sm:$0xff]  }
  0xfd   : > { %v9745_v48 = vpop.eup %9744  ;;  %9764 = vrcp.f32 %v1437_v42 }
  0xfe   : > { %v9747_v50 = vpop.eup %9746  ;;  %v2094_v51 = vpack.c.bf16 %v9745_v48, %v9735_v34  ;;  %9766 = vrcp.f32 %v1438_v45  ;;  %v11444_v34 = vld [vmem:[%s11289_s23 + $0x160] sm:$0xff]  ;;  %v9539_v45 = vld [vmem:[%s11295_s26 + $0x208] sm:$0xff]  }
  0xff   : > { %v9749_v54 = vpop.eup %9748  ;;  %v2093_v55 = vpack.c.bf16 %v9747_v50, %v9743_v44  ;;  %9768 = vpow2.f32 %v8527_v43  ;;  %v8555_v43 = vmul.f32 -1.442695, %v583_v24  ;;  %v612_v48 = vunpack.c.h.bf16 %v11444_v34 }
 0x100   : > { %v9751_v59 = vpop.eup %9750  ;;  %3244 = vmatprep.mubr.bf16.mxu1 %v2094_v51  ;;  %v1450_v60 = vadd.f32 1.0, %v9749_v54  ;;  %9770 = vpow2.f32 %v8541_v46  ;;  %v8569_v46 = vmul.f32 -1.442695, %v597_v30  ;;  %v9542_v51 = vld [vmem:[%s11295_s26 + $0x250] sm:$0xff]   ;;  %v8596_v54 = vmul.f32 -1.442695, %v624_v39 }
 0x101   : > { %v9753_v61 = vpop.eup %9752  ;;  %3245 = vmatmul.mubr.bf16.vlgmr.msra.gmra.mrb[16].mxu1 %v2093_v55  ;;  %v1464_v62 = vadd.f32 1.0, %v9751_v59  ;;  %9772 = vpow2.f32 %v8554_v49  ;;  %v9549_v55 = vld [vmem:[%s11295_s26 + $0x1a0] sm:$0xff]   ;;  %v9552_v59 = vld [vmem:[%s11295_s26 + $0x1e8] sm:$0xff]   ;;  %v611_v24 = vunpack.c.l.bf16 %v11444_v34 }
 0x102   : > { %v9755_v0 = vpop.eup %9754  ;;  %9048 = vmatpush3.bf16.msra.mxu1 %v9533_v52  ;;  %9774 = vrcp.f32 %v1450_v60  ;;  %v1452_v1 = vadd.f32 1.0, %v9753_v61  ;;  %v8582_v52 = vmul.f32 -1.442695, %v610_v33  ;;  %v9543_v61 = vld [vmem:[%s11295_s26 + $0x210] sm:$0xff]  }
 0x103   : > { %v9757_v4 = vpop.eup %9756  ;;  %9776 = vrcp.f32 %v1464_v62  ;;  %v1466_v5 = vadd.f32 1.0, %v9755_v0  ;;  %9049 = vmatprep.subr.bf16.mxu1 %v9536_v56  ;;  %v8584_v62 = vmul.f32 -1.442695, %v612_v48  ;;  %v8583_v39 = vmul.f32 -1.442695, %v611_v24 }
 0x104   : > { %v9759_v9 = vpop.eup %9758  ;;  %9778 = vrcp.f32 %v1452_v1  ;;  %v1449_v10 = vadd.f32 1.0, %v9757_v4  ;;  %v609_v1 = vunpack.c.l.bf16 %v11432_v21  ;;  %v11467_v21 = vld [vmem:[%s11289_s23 + $0x1c8] sm:$0xff] }
 0x105   : > { %v9761_v11 = vpop.eup %9760  ;;  %9780 = vrcp.f32 %v1466_v5  ;;  %v623_v5 = vunpack.c.l.bf16 %v11437_v25  ;;  %v11472_v25 = vld [vmem:[%s11289_s23 + $0x200] sm:$0xff] }
 0x106   : > { %v9763_v13 = vpop.eup %9762  ;;  %v1463_v15 = vadd.f32 1.0, %v9761_v11  ;;  %9782 = vrcp.f32 %v1449_v10  ;;  %9050 = vmatpush3.bf16.msra.mxu1 %v9537_v2  ;;  %v9546_v2 = vld [vmem:[%s11295_s26 + $0x258] sm:$0xff]   ;;  %v9556_v10 = vld [vmem:[%s11295_s26 + $0x1f0] sm:$0xff]  }
 0x107   : > { %v9765_v18 = vpop.eup %9764  ;;  %9784 = vpow2.f32 %v8568_v6  ;;  %9051 = vmatprep.subr.bf16.mxu1 %v9540_v8  ;;  %v9553_v6 = vld [vmem:[%s11295_s26 + $0x1a8] sm:$0xff]  }
 0x108   : > { %v9767_v23 = vpop.eup %9766  ;;  %v2095_v14 = vpack.c.bf16 %v9765_v18, %v9759_v9  ;;  %9786 = vrcp.f32 %v1463_v15  ;;  %v8598_v9 = vmul.f32 -1.442695, %v626_v58  ;;  %v9550_v18 = vld [vmem:[%s11295_s26 + $0x260] sm:$0xff]  }
 0x109   : > { %v9769_v26 = vpop.eup %9768  ;;  %v2096_v27 = vpack.c.bf16 %v9767_v23, %v9763_v13  ;;  %9788 = vpow2.f32 %v8556_v12  ;;  %v9547_v13 = vld [vmem:[%s11295_s26 + $0x218] sm:$0xff]  }
 0x10a   : > { %v9771_v31 = vpop.eup %9770  ;;  %v1451_v32 = vadd.f32 1.0, %v9769_v26  ;;  %9790 = vpow2.f32 %v8570_v16  ;;  %9052 = vmatpush3.bf16.msra.mxu1 %v9541_v17  ;;  %v8581_v17 = vmul.f32 -1.442695, %v609_v1  ;;  %v9560_v26 = vld [vmem:[%s11295_s26 + $0x1f8] sm:$0xff]  }
 0x10b   : > { %v9773_v36 = vpop.eup %9772  ;;  %3341 = vmatprep.mubr.bf16.mxu0 %v2096_v27  ;;  %v1465_v37 = vadd.f32 1.0, %v9771_v31  ;;  %9792 = vpow2.f32 %v8553_v20  ;;  %9053 = vmatprep.subr.bf16.mxu1 %v9544_v22  ;;  %v8595_v20 = vmul.f32 -1.442695, %v623_v5  ;;  %v9557_v22 = vld [vmem:[%s11295_s26 + $0x1b0] sm:$0xff]   ;;  %v625_v31 = vunpack.c.l.bf16 %v11451_v47 }
 0x10c   : > { %v9775_v41 = vpop.eup %9774  ;;  %3342 = vmatmul.mubr.bf16.vlgmr.msra.gmra.mrb[16].mxu0 %v2095_v14  ;;  %9794 = vrcp.f32 %v1451_v32  ;;  %v1478_v42 = vadd.f32 1.0, %v9773_v36  ;;  %v9554_v32 = vld [vmem:[%s11295_s26 + $0x268] sm:$0xff]   ;;  %v9561_v36 = vld [vmem:[%s11295_s26 + $0x1b8] sm:$0xff]  }
 0x10d   : > { %v9777_v44 = vpop.eup %9776  ;;  %9112 = vmatpush3.bf16.msra.mxu0 %v9535_v28  ;;  %9796 = vrcp.f32 %v1465_v37  ;;  %v9551_v28 = vld [vmem:[%s11295_s26 + $0x220] sm:$0xff]  }
 0x10e   : > { %v9779_v49 = vpop.eup %9778  ;;  %v2108_v50 = vpack.c.bf16 %v9777_v44, %v9775_v41  ;;  %9113 = vmatprep.subr.bf16.mxu0 %v9538_v29  ;;  %9798 = vrcp.f32 %v1478_v42  ;;  %9054 = vmatpush3.bf16.msra.mxu1 %v9545_v35  ;;  %v638_v35 = vunpack.c.h.bf16 %v11467_v21  ;;  %v11482_v41 = vld [vmem:[%s11289_s23 + $0x1d0] sm:$0xff]  ;;  %v9564_v42 = vld [vmem:[%s11295_s26 + $0x2c0] sm:$0xff]  }
 0x10f   : > { %v9781_v53 = vpop.eup %9780  ;;  %9800 = vpow2.f32 %v8567_v38  ;;  %9055 = vmatprep.subr.bf16.mxu1 %v9548_v40  ;;  %v652_v40 = vunpack.c.h.bf16 %v11472_v25 }
 0x110   : > { %v9783_v56 = vpop.eup %9782  ;;  %3252 = vmatprep.mubr.bf16.mxu1 %v2108_v50  ;;  %v2110_v57 = vpack.c.bf16 %v9781_v53, %v9779_v49  ;;  %9802 = vpow2.f32 %v8555_v43  ;;  %v8597_v49 = vmul.f32 -1.442695, %v625_v31  ;;  %v9558_v50 = vld [vmem:[%s11295_s26 + $0x270] sm:$0xff]   ;;  %v8610_v53 = vmul.f32 -1.442695, %v638_v35 }
 0x111   : > { %v9785_v60 = vpop.eup %9784  ;;  %9114 = vmatpush3.bf16.msra.mxu0 %v9539_v45  ;;  %9804 = vpow2.f32 %v8569_v46  ;;  %v11486_v45 = vld [vmem:[%s11289_s23 + $0x208] sm:$0xff] }
 0x112   : > { %v9787_v63 = vpop.eup %9786  ;;  %3349 = vmatprep.mubr.bf16.mxu0 %v2110_v57  ;;  %v1492_v0 = vadd.f32 1.0, %v9785_v60  ;;  %9115 = vmatprep.subr.bf16.mxu0 %v9542_v51  ;;  %9806 = vpow2.f32 %v8582_v52  ;;  %v9555_v46 = vld [vmem:[%s11295_s26 + $0x228] sm:$0xff]   ;;  %v8624_v57 = vmul.f32 -1.442695, %v652_v40  ;;  %v654_v58 = vunpack.c.h.bf16 %v11486_v45 }
 0x113   : > { %v9789_v3 = vpop.eup %9788  ;;  %v2107_v4 = vpack.c.bf16 %v9787_v63, %v9783_v56  ;;  %9808 = vpow2.f32 %v8596_v54  ;;  %9056 = vmatpush3.bf16.msra.mxu1 %v9549_v55  ;;  %v640_v54 = vunpack.c.h.bf16 %v11482_v41  ;;  %v637_v60 = vunpack.c.l.bf16 %v11467_v21 }
 0x114   : > { %v9791_v7 = vpop.eup %9790  ;;  %9810 = vrcp.f32 %v1492_v0  ;;  %v1480_v8 = vadd.f32 1.0, %v9789_v3  ;;  %9057 = vmatprep.subr.bf16.mxu1 %v9552_v59  ;;  %v9562_v0 = vld [vmem:[%s11295_s26 + $0x278] sm:$0xff]   ;;  %v8626_v5 = vmul.f32 -1.442695, %v654_v58 }
 0x115   : > { %v9793_v11 = vpop.eup %9792  ;;  %3253 = vmatmul.mubr.bf16.gmra.mrb[20].mxu1 %v2107_v4  ;;  %v1494_v12 = vadd.f32 1.0, %v9791_v7  ;;  %9116 = vmatpush3.bf16.msra.mxu0 %v9543_v61  ;;  %9812 = vpow2.f32 %v8584_v62  ;;  %v9559_v61 = vld [vmem:[%s11295_s26 + $0x230] sm:$0xff]  }
 0x116   : > { %v9795_v15 = vpop.eup %9794  ;;  %9814 = vrcp.f32 %v1480_v8  ;;  %v1477_v16 = vadd.f32 1.0, %v9793_v11  ;;  %9117 = vmatprep.subr.bf16.mxu0 %v9546_v2  ;;  %v8612_v2 = vmul.f32 -1.442695, %v640_v54  ;;  %v9563_v11 = vld [vmem:[%s11295_s26 + $0x238] sm:$0xff]  }
 0x117   : > { %v9797_v19 = vpop.eup %9796  ;;  %9816 = vrcp.f32 %v1494_v12  ;;  %9058 = vmatpush3.bf16.msra.mxu1 %v9553_v6  ;;  %v651_v6 = vunpack.c.l.bf16 %v11472_v25  ;;  %v11507_v25 = vld [vmem:[%s11289_s23 + $0x240] sm:$0xff] }
 0x118   : > { %v9799_v23 = vpop.eup %9798  ;;  %v2109_v14 = vpack.c.bf16 %v9797_v19, %v9795_v15  ;;  %9818 = vrcp.f32 %v1477_v16  ;;  %9059 = vmatprep.subr.bf16.mxu1 %v9556_v10  ;;  %v639_v10 = vunpack.c.l.bf16 %v11482_v41  ;;  %v11499_v15 = vld [vmem:[%s11289_s23 + $0x238] sm:$0xff]  ;;  %v9566_v16 = vld [vmem:[%s11295_s26 + $0x340] sm:$0xff]   ;;  %v653_v19 = vunpack.c.l.bf16 %v11486_v45 }
 0x119   : > { %v9801_v27 = vpop.eup %9800  ;;  %9820 = vpow2.f32 %v8598_v9  ;;  %9118 = vmatpush3.bf16.msra.mxu0 %v9547_v13  ;;  %v8609_v9 = vmul.f32 -1.442695, %v637_v60 }
 0x11a   : > { %v9803_v29 = vpop.eup %9802  ;;  %3350 = vmatmul.mubr.bf16.gmra.mrb[20].mxu0 %v2109_v14  ;;  %v1491_v30 = vadd.f32 1.0, %v9801_v27  ;;  %9822 = vpow2.f32 %v8581_v17  ;;  %9119 = vmatprep.subr.bf16.mxu0 %v9550_v18  ;;  %v8611_v24 = vmul.f32 -1.442695, %v639_v10  ;;  %v666_v27 = vunpack.c.h.bf16 %v11499_v15 }
 0x11b   : > { %v9805_v33 = vpop.eup %9804  ;;  %v1479_v34 = vadd.f32 1.0, %v9803_v29  ;;  %9824 = vpow2.f32 %v8595_v20  ;;  %9060 = vmatpush3.bf16.msra.mxu1 %v9557_v22  ;;  %v11504_v20 = vld [vmem:[%s11289_s23 + $0x270] sm:$0xff]  ;;  %v8623_v22 = vmul.f32 -1.442695, %v651_v6 }
 0x11c   : > { %v9807_v37 = vpop.eup %9806  ;;  %9826 = vrcp.f32 %v1491_v30  ;;  %v1493_v38 = vadd.f32 1.0, %v9805_v33  ;;  %9061 = vmatprep.subr.bf16.mxu1 %v9560_v26  ;;  %v8625_v30 = vmul.f32 -1.442695, %v653_v19  ;;  %v680_v31 = vunpack.c.h.bf16 %v11504_v20 }
 0x11d   : > { %v9809_v43 = vpop.eup %9808  ;;  %9828 = vrcp.f32 %v1479_v34  ;;  %v1506_v44 = vadd.f32 1.0, %v9807_v37  ;;  %9120 = vmatpush3.bf16.msra.mxu0 %v9551_v28  ;;  %v668_v34 = vunpack.c.h.bf16 %v11507_v25  ;;  %v8638_v40 = vmul.f32 -1.442695, %v666_v27 }
 0x11e   : > { %v9811_v47 = vpop.eup %9810  ;;  %9830 = vrcp.f32 %v1493_v38  ;;  %v1520_v48 = vadd.f32 1.0, %v9809_v43  ;;  %9121 = vmatprep.subr.bf16.mxu0 %v9554_v32  ;;  %v8652_v41 = vmul.f32 -1.442695, %v680_v31  ;;  %v679_v60 = vunpack.c.l.bf16 %v11504_v20 }
 0x11f   : > { %v9813_v51 = vpop.eup %9812  ;;  %v2122_v52 = vpack.c.bf16 %v9811_v47, %v9799_v23  ;;  %9832 = vrcp.f32 %v1506_v44  ;;  %9062 = vmatpush3.bf16.msra.mxu1 %v9561_v36  ;;  %v8640_v45 = vmul.f32 -1.442695, %v668_v34 }
 0x120   : > { %v9815_v55 = vpop.eup %9814  ;;  %9834 = vrcp.f32 %v1520_v48  ;;  %v1508_v56 = vadd.f32 1.0, %v9813_v51  ;;  %9175 = vmatprep.subr.bf16.mxu1 %v9564_v42  ;;  %v490_v42 = vld [vmem:[%s11289_s23 + $0x278] sm:$0xff]  ;;  %v8651_v10 = vmul.f32 -1.442695, %v679_v60 }
 0x121   : > { %v9817_v59 = vpop.eup %9816  ;;  %3260 = vmatprep.mubr.bf16.mxu1 %v2122_v52  ;;  %9836 = vpow2.f32 %v8583_v39  ;;  %9122 = vmatpush3.bf16.msra.mxu0 %v9555_v46  ;;  %v665_v52 = vunpack.c.l.bf16 %v11499_v15  ;;  %v681_v6 = vunpack.c.l.bf16 %v490_v42 }
 0x122   : > { %v9819_v62 = vpop.eup %9818  ;;  %v2124_v63 = vpack.c.bf16 %v9817_v59, %v9815_v55  ;;  %9838 = vrcp.f32 %v1508_v56  ;;  %9123 = vmatprep.subr.bf16.mxu0 %v9558_v50 }
 0x123   : > { %v9821_v1 = vpop.eup %9820  ;;  %9840 = vpow2.f32 %v8597_v49  ;;  %v682_v49 = vunpack.c.h.bf16 %v490_v42 }
 0x124   : > { %v9823_v3 = vpop.eup %9822  ;;  %3357 = vmatprep.mubr.bf16.mxu0 %v2124_v63  ;;  %v1522_v4 = vadd.f32 1.0, %v9821_v1  ;;  %9842 = vpow2.f32 %v8610_v53  ;;  %v667_v1 = vunpack.c.l.bf16 %v11507_v25 }
 0x125   : > { %v9825_v7 = vpop.eup %9824  ;;  %v1505_v8 = vadd.f32 1.0, %v9823_v3  ;;  %9844 = vpow2.f32 %v8624_v57  ;;  %9124 = vmatpush3.bf16.msra.mxu0 %v9559_v61  ;;  %v8654_v59 = vmul.f32 -1.442695, %v682_v49  ;;  %v11516_v61 = vld [vmem:[%s11289_s23 + $0x2a8] sm:$0xff] }
 0x126   : > { %v9827_v12 = vpop.eup %9826  ;;  %9846 = vrcp.f32 %v1522_v4  ;;  %v1519_v13 = vadd.f32 1.0, %v9825_v7  ;;  %9125 = vmatprep.subr.bf16.mxu0 %v9562_v0  ;;  %v8637_v0 = vmul.f32 -1.442695, %v665_v52  ;;  %v11520_v4 = vld [vmem:[%s11289_s23 + $0x2e0] sm:$0xff]  ;;  %v694_v7 = vunpack.c.h.bf16 %v11516_v61 }
 0x127   : > { %v9829_v17 = vpop.eup %9828  ;;  %v2121_v18 = vpack.c.bf16 %v9827_v12, %v9819_v62  ;;  %9848 = vrcp.f32 %v1505_v8  ;;  %v8639_v15 = vmul.f32 -1.442695, %v667_v1  ;;  %v511_v1 = vld [vmem:[%s11289_s23 + $0x320] sm:$0xff] }
 0x128   : > { %v9831_v21 = vpop.eup %9830  ;;  %9850 = vrcp.f32 %v1519_v13 }
 0x129   : > { %v9833_v23 = vpop.eup %9832  ;;  %3261 = vmatmul.mubr.bf16.gmra.mrb[24].mxu1 %v2121_v18  ;;  %v2123_v14 = vpack.c.bf16 %v9831_v21, %v9829_v17  ;;  %9852 = vpow2.f32 %v8612_v2  ;;  %9126 = vmatpush3.bf16.msra.mxu0 %v9563_v11  ;;  %v11524_v11 = vld [vmem:[%s11289_s23 + $0x2b0] sm:$0xff]  ;;  %v708_v17 = vunpack.c.h.bf16 %v11520_v4  ;;  %v504_v18 = vld [vmem:[%s11289_s23 + $0x2e8] sm:$0xff]  ;;  %v8653_v21 = vmul.f32 -1.442695, %v681_v6 }
 0x12a   : > { %v9835_v26 = vpop.eup %9834  ;;  %9854 = vpow2.f32 %v8626_v5  ;;  %9239 = vmatprep.subr.bf16.mxu0 %v9566_v16  ;;  %v710_v27 = vunpack.c.h.bf16 %v504_v18 }
 0x12b   : > { %v9837_v28 = vpop.eup %9836  ;;  %3358 = vmatmul.mubr.bf16.gmra.mrb[24].mxu0 %v2123_v14  ;;  %v2136_v29 = vpack.c.bf16 %v9835_v26, %v9833_v23  ;;  %9856 = vpow2.f32 %v8609_v9  ;;  %v8680_v31 = vmul.f32 -1.442695, %v708_v17 }
 0x12c   : > { %v9839_v32 = vpop.eup %9838  ;;  %v1507_v33 = vadd.f32 1.0, %v9837_v28  ;;  %9858 = vpow2.f32 %v8623_v22  ;;  %v8666_v22 = vmul.f32 -1.442695, %v694_v7 }
 0x12d   : > { %v9841_v35 = vpop.eup %9840  ;;  %3268 = vmatprep.mubr.bf16.mxu1 %v2136_v29  ;;  %9860 = vpow2.f32 %v8611_v24  ;;  %v696_v24 = vunpack.c.h.bf16 %v11524_v11 }
 0x12e   : > { %v9843_v36 = vpop.eup %9842  ;;  %v1521_v37 = vadd.f32 1.0, %v9841_v35  ;;  %9862 = vrcp.f32 %v1507_v33 }
 0x12f   : > { %v9845_v38 = vpop.eup %9844  ;;  %v1534_v39 = vadd.f32 1.0, %v9843_v36  ;;  %9864 = vpow2.f32 %v8625_v30  ;;  %v8668_v35 = vmul.f32 -1.442695, %v696_v24 }
 0x130   : > { %v9847_v43 = vpop.eup %9846  ;;  %9866 = vrcp.f32 %v1521_v37  ;;  %v1548_v44 = vadd.f32 1.0, %v9845_v38  ;;  %v8682_v37 = vmul.f32 -1.442695, %v710_v27 }
 0x131   : > { %v9849_v46 = vpop.eup %9848  ;;  %v2138_v47 = vpack.c.bf16 %v9847_v43, %v9839_v32  ;;  %9868 = vrcp.f32 %v1534_v39  ;;  %v693_v32 = vunpack.c.l.bf16 %v11516_v61 }
 0x132   : > { %v9851_v48 = vpop.eup %9850  ;;  %9870 = vrcp.f32 %v1548_v44 }
 0x133   : > { %v9853_v50 = vpop.eup %9852  ;;  %3365 = vmatprep.mubr.bf16.mxu0 %v2138_v47  ;;  %v2135_v51 = vpack.c.bf16 %v9851_v48, %v9849_v46  ;;  %9872 = vpow2.f32 %v8638_v40  ;;  %v8665_v42 = vmul.f32 -1.442695, %v693_v32  ;;  %v709_v48 = vunpack.c.l.bf16 %v504_v18 }
 0x134   : > { %v9855_v53 = vpop.eup %9854  ;;  %v1536_v54 = vadd.f32 1.0, %v9853_v50  ;;  %9874 = vpow2.f32 %v8652_v41  ;;  %v707_v41 = vunpack.c.l.bf16 %v11520_v4  ;;  %v518_v4 = vld [vmem:[%s11289_s23 + $0x358] sm:$0xff] }
 0x135   : > { %v9857_v55 = vpop.eup %9856  ;;  %3269 = vmatmul.mubr.bf16.gmra.mrb[28].mxu1 %v2135_v51  ;;  %v1550_v56 = vadd.f32 1.0, %v9855_v53  ;;  %9876 = vpow2.f32 %v8640_v45  ;;  %v695_v45 = vunpack.c.l.bf16 %v11524_v11 }
 0x136   : > { %v9859_v57 = vpop.eup %9858  ;;  %9878 = vrcp.f32 %v1536_v54  ;;  %v1533_v58 = vadd.f32 1.0, %v9857_v55  ;;  %v8679_v53 = vmul.f32 -1.442695, %v707_v41 }
 0x137   : > { %v9861_v62 = vpop.eup %9860  ;;  %9880 = vrcp.f32 %v1550_v56  ;;  %v1547_v63 = vadd.f32 1.0, %v9859_v57  ;;  %v8667_v56 = vmul.f32 -1.442695, %v695_v45  ;;  %v510_v57 = vld [vmem:[%s11289_s23 + $0x318] sm:$0xff] }
 0x138   : > { %v9863_v2 = vpop.eup %9862  ;;  %9882 = vrcp.f32 %v1533_v58  ;;  %v1535_v3 = vadd.f32 1.0, %v9861_v62  ;;  %v517_v62 = vld [vmem:[%s11289_s23 + $0x350] sm:$0xff] }
 0x139   : > { %v9865_v5 = vpop.eup %9864  ;;  %9884 = vrcp.f32 %v1547_v63  ;;  %v736_v7 = vunpack.c.h.bf16 %v517_v62 }
 0x13a   : > { %v9867_v8 = vpop.eup %9866  ;;  %v1549_v9 = vadd.f32 1.0, %v9865_v5  ;;  %9886 = vrcp.f32 %v1535_v3 }
 0x13b   : > { %v9869_v12 = vpop.eup %9868  ;;  %v2137_v13 = vpack.c.bf16 %v9867_v8, %v9863_v2  ;;  %9888 = vpow2.f32 %v8654_v59  ;;  %v8681_v59 = vmul.f32 -1.442695, %v709_v48  ;;  %v421_v48 = vld [vmem:[%s11289_s23 + $0x50] sm:$0xff] }
 0x13c   : > { %v9871_v16 = vpop.eup %9870  ;;  %9890 = vrcp.f32 %v1549_v9 }
 0x13d   : > { %v9873_v19 = vpop.eup %9872  ;;  %3366 = vmatmul.mubr.bf16.gmra.mrb[28].mxu0 %v2137_v13  ;;  %v2150_v20 = vpack.c.bf16 %v9871_v16, %v9869_v12  ;;  %9892 = vpow2.f32 %v8637_v0  ;;  %v722_v0 = vunpack.c.h.bf16 %v510_v57 }
 0x13e   : > { %v9875_v23 = vpop.eup %9874  ;;  %v1562_v14 = vadd.f32 1.0, %v9873_v19  ;;  %9894 = vpow2.f32 %v8651_v10  ;;  %v724_v10 = vunpack.c.h.bf16 %v511_v1 }
 0x13f   : > { %v9877_v25 = vpop.eup %9876  ;;  %3276 = vmatprep.mubr.bf16.mxu1 %v2150_v20  ;;  %v1576_v26 = vadd.f32 1.0, %v9875_v23  ;;  %9896 = vpow2.f32 %v8639_v15  ;;  %v8694_v13 = vmul.f32 -1.442695, %v722_v0  ;;  %v738_v15 = vunpack.c.h.bf16 %v518_v4 }
 0x140   : > { %v9879_v28 = vpop.eup %9878  ;;  %9898 = vrcp.f32 %v1562_v14  ;;  %v1564_v29 = vadd.f32 1.0, %v9877_v25  ;;  %v8708_v20 = vmul.f32 -1.442695, %v736_v7  ;;  %v8696_v23 = vmul.f32 -1.442695, %v724_v10  ;;  %v422_v7 = vld [vmem:[%s11289_s23 + $0x58] sm:$0xff] }
 0x141   : > { %v9881_v30 = vpop.eup %9880  ;;  %9900 = vrcp.f32 %v1576_v26  ;;  %v8710_v24 = vmul.f32 -1.442695, %v738_v15  ;;  %v721_v25 = vunpack.c.l.bf16 %v510_v57 }
 0x142   : > { %v9883_v33 = vpop.eup %9882  ;;  %v2152_v34 = vpack.c.bf16 %v9881_v30, %v9879_v28  ;;  %9902 = vrcp.f32 %v1564_v29  ;;  %v735_v28 = vunpack.c.l.bf16 %v517_v62  ;;  %v414_v29 = vld [vmem:[%s11289_s23 + $0x18] sm:$0xff] }
 0x143   : > { %v9885_v36 = vpop.eup %9884  ;;  %9904 = vpow2.f32 %v8653_v21  ;;  %v530_v45 = vunpack.c.h.bf16 %v414_v29 }
 0x144   : > { %v9887_v38 = vpop.eup %9886  ;;  %3373 = vmatprep.mubr.bf16.mxu0 %v2152_v34  ;;  %v2149_v39 = vpack.c.bf16 %v9885_v36, %v9883_v33  ;;  %9906 = vpow2.f32 %v8666_v22  ;;  %v737_v34 = vunpack.c.l.bf16 %v518_v4  ;;  %v8707_v41 = vmul.f32 -1.442695, %v735_v28 }
 0x145   : > { %v9889_v40 = vpop.eup %9888  ;;  %9908 = vpow2.f32 %v8680_v31  ;;  %v723_v31 = vunpack.c.l.bf16 %v511_v1  ;;  %v8502_v57 = vmul.f32 -1.442695, %v530_v45 }
 0x146   : > { %v9891_v43 = vpop.eup %9890  ;;  %3277 = vmatmul.mubr.bf16.gmra.mrb[32].mxu1 %v2149_v39  ;;  %v1578_v44 = vadd.f32 1.0, %v9889_v40  ;;  %9910 = vpow2.f32 %v8668_v35 }
 0x147   : > { %v9893_v46 = vpop.eup %9892  ;;  %v2151_v47 = vpack.c.bf16 %v9891_v43, %v9887_v38  ;;  %9912 = vpow2.f32 %v8682_v37  ;;  %v8693_v37 = vmul.f32 -1.442695, %v721_v25  ;;  %v529_v38 = vunpack.c.l.bf16 %v414_v29 }
 0x148   : > { %v9895_v49 = vpop.eup %9894  ;;  %9914 = vrcp.f32 %v1578_v44  ;;  %v1561_v50 = vadd.f32 1.0, %v9893_v46  ;;  %v8695_v44 = vmul.f32 -1.442695, %v723_v31 }
 0x149   : > { %v9897_v51 = vpop.eup %9896  ;;  %3374 = vmatmul.mubr.bf16.gmra.mrb[32].mxu0 %v2151_v47  ;;  %v1575_v52 = vadd.f32 1.0, %v9895_v49  ;;  %9916 = vpow2.f32 %v8665_v42  ;;  %v8709_v47 = vmul.f32 -1.442695, %v737_v34 }
 0x14a   : > { %v9899_v54 = vpop.eup %9898  ;;  %9918 = vrcp.f32 %v1561_v50  ;;  %v1563_v55 = vadd.f32 1.0, %v9897_v51  ;;  %v8501_v51 = vmul.f32 -1.442695, %v529_v38 }
 0x14b   : > { %v9901_v58 = vpop.eup %9900  ;;  %9920 = vrcp.f32 %v1575_v52 }
 0x14c   : > { %v9903_v60 = vpop.eup %9902  ;;  %v2164_v61 = vpack.c.bf16 %v9901_v58, %v9899_v54  ;;  %9922 = vrcp.f32 %v1563_v55 }
 0x14d   : > { %v9905_v63 = vpop.eup %9904  ;;  %9924 = vpow2.f32 %v8679_v53  ;;  %v415_v53 = vld [vmem:[%s11289_s23 + $0x20] sm:$0xff] }
 0x14e   : > { %v9907_v2 = vpop.eup %9906  ;;  %3284 = vmatprep.mubr.bf16.mxu1 %v2164_v61  ;;  %v1577_v3 = vadd.f32 1.0, %v9905_v63  ;;  %9926 = vpow2.f32 %v8667_v56  ;;  %v543_v56 = vunpack.c.l.bf16 %v421_v48  ;;  %v531_v62 = vunpack.c.l.bf16 %v415_v53 }
 0x14f   : > { %v9909_v5 = vpop.eup %9908  ;;  %v1590_v6 = vadd.f32 1.0, %v9907_v2  ;;  %9928 = vpow2.f32 %v8681_v59 }
 0x150   : > { %v9911_v8 = vpop.eup %9910  ;;  %9930 = vrcp.f32 %v1577_v3  ;;  %v1604_v9 = vadd.f32 1.0, %v9909_v5  ;;  %v8515_v3 = vmul.f32 -1.442695, %v543_v56  ;;  %v8503_v10 = vmul.f32 -1.442695, %v531_v62 }
 0x151   : > { %v9913_v11 = vpop.eup %9912  ;;  %9932 = vrcp.f32 %v1590_v6  ;;  %v1592_v12 = vadd.f32 1.0, %v9911_v8 }
 0x152   : > { %v9915_v16 = vpop.eup %9914  ;;  %9934 = vrcp.f32 %v1604_v9  ;;  %v1606_v17 = vadd.f32 1.0, %v9913_v11 }
 0x153   : > { %v9917_v18 = vpop.eup %9916  ;;  %v2166_v19 = vpack.c.bf16 %v9915_v16, %v9903_v60  ;;  %9936 = vrcp.f32 %v1592_v12  ;;  %v544_v60 = vunpack.c.h.bf16 %v421_v48  ;;  %v532_v12 = vunpack.c.h.bf16 %v415_v53 }
 0x154   : > { %v9919_v21 = vpop.eup %9918  ;;  %9938 = vrcp.f32 %v1606_v17  ;;  %v1589_v22 = vadd.f32 1.0, %v9917_v18  ;;  %v545_v16 = vunpack.c.l.bf16 %v422_v7 }
 0x155   : > { %v9921_v14 = vpop.eup %9920  ;;  %3381 = vmatprep.mubr.bf16.mxu0 %v2166_v19  ;;  %9940 = vpow2.f32 %v8694_v13  ;;  %v8516_v6 = vmul.f32 -1.442695, %v544_v60  ;;  %v428_v19 = vld [vmem:[%s11289_s23 + $0x88] sm:$0xff] }
 0x156   : > { %v9923_v26 = vpop.eup %9922  ;;  %v2163_v27 = vpack.c.bf16 %v9921_v14, %v9919_v21  ;;  %9942 = vrcp.f32 %v1589_v22  ;;  %v546_v22 = vunpack.c.h.bf16 %v422_v7  ;;  %v558_v28 = vunpack.c.h.bf16 %v428_v19 }
 0x157   : > { %v9925_v30 = vpop.eup %9924  ;;  %9944 = vpow2.f32 %v8708_v20 }
 0x158   : > { %v9927_v32 = vpop.eup %9926  ;;  %3285 = vmatmul.mubr.bf16.gmra.mrb[36].mxu1 %v2163_v27  ;;  %v1603_v33 = vadd.f32 1.0, %v9925_v30  ;;  %9946 = vpow2.f32 %v8696_v23  ;;  %v8517_v27 = vmul.f32 -1.442695, %v545_v16  ;;  %v435_v30 = vld [vmem:[%s11289_s23 + $0xc0] sm:$0xff] }
 0x159   : > { %v9929_v35 = vpop.eup %9928  ;;  %v1591_v36 = vadd.f32 1.0, %v9927_v32  ;;  %9948 = vpow2.f32 %v8710_v24  ;;  %v8504_v24 = vmul.f32 -1.442695, %v532_v12  ;;  %v8518_v32 = vmul.f32 -1.442695, %v546_v22 }
 0x15a   : > { %v9931_v39 = vpop.eup %9930  ;;  %9950 = vrcp.f32 %v1603_v33  ;;  %v1605_v40 = vadd.f32 1.0, %v9929_v35  ;;  %v429_v33 = vld [vmem:[%s11289_s23 + $0x90] sm:$0xff] }
 0x15b   : > { %v9933_v42 = vpop.eup %9932  ;;  %v2165_v43 = vpack.c.bf16 %v9931_v39, %v9923_v26  ;;  %9952 = vrcp.f32 %v1591_v36 }
 0x15c   : > { %v9935_v46 = vpop.eup %9934  ;;  %9954 = vrcp.f32 %v1605_v40  ;;  %v572_v40 = vunpack.c.h.bf16 %v435_v30 }
 0x15d   : > { %v9937_v49 = vpop.eup %9936  ;;  %3382 = vmatmul.mubr.bf16.gmra.mrb[36].mxu0 %v2165_v43  ;;  %v2178_v50 = vpack.c.bf16 %v9935_v46, %v9933_v42  ;;  %9956 = vpow2.f32 %v8693_v37  ;;  %v11544_v37 = vld [vmem:[%s11289_s23 + $0xc8] sm:$0xff]  ;;  %v560_v43 = vunpack.c.h.bf16 %v429_v33 }
 0x15e   : > { %v9939_v52 = vpop.eup %9938  ;;  %9958 = vpow2.f32 %v8707_v41  ;;  %v8530_v41 = vmul.f32 -1.442695, %v558_v28  ;;  %v574_v46 = vunpack.c.h.bf16 %v11544_v37  ;;  %v573_v7 = vunpack.c.l.bf16 %v11544_v37  ;;  %v9565_v28 = vld [vmem:[%s11295_s26 + $0x280] sm:$0xff]  }
 0x15f   : > { %v9941_v54 = vpop.eup %9940  ;;  %3292 = vmatprep.mubr.bf16.mxu1 %v2178_v50  ;;  %v2180_v55 = vpack.c.bf16 %v9939_v52, %v9937_v49  ;;  %9960 = vpow2.f32 %v8695_v44  ;;  %v557_v49 = vunpack.c.l.bf16 %v428_v19  ;;  %v8544_v52 = vmul.f32 -1.442695, %v572_v40  ;;  %v11557_v19 = vld [vmem:[%s11289_s23 + $0x100] sm:$0xff]  ;;  %v9569_v40 = vld [vmem:[%s11295_s26 + $0x288] sm:$0xff]  }
 0x160   : > { %v9943_v58 = vpop.eup %9942  ;;  %v1618_v59 = vadd.f32 1.0, %v9941_v54  ;;  %9962 = vpow2.f32 %v8709_v47 }
 0x161   : > { %v9945_v61 = vpop.eup %9944  ;;  %3389 = vmatprep.mubr.bf16.mxu0 %v2180_v55  ;;  %9964 = vpow2.f32 %v8501_v51  ;;  %v8532_v55 = vmul.f32 -1.442695, %v560_v43 }
 0x162   : > { %v9947_v63 = vpop.eup %9946  ;;  %v1632_v0 = vadd.f32 1.0, %v9945_v61  ;;  %9966 = vrcp.f32 %v1618_v59  ;;  %v8529_v61 = vmul.f32 -1.442695, %v557_v49 }
 0x163   : > { %v9949_v1 = vpop.eup %9948  ;;  %v1620_v2 = vadd.f32 1.0, %v9947_v63  ;;  %9968 = vpow2.f32 %v8502_v57  ;;  %v8546_v57 = vmul.f32 -1.442695, %v574_v46  ;;  %v559_v63 = vunpack.c.l.bf16 %v429_v33  ;;  %v9572_v46 = vld [vmem:[%s11295_s26 + $0x2d0] sm:$0xff]  }
 0x164   : > { %v9951_v4 = vpop.eup %9950  ;;  %9970 = vrcp.f32 %v1632_v0  ;;  %v1634_v5 = vadd.f32 1.0, %v9949_v1  ;;  %v11548_v0 = vld [vmem:[%s11289_s23 + $0xf8] sm:$0xff] }
 0x165   : > { %v9953_v8 = vpop.eup %9952  ;;  %v2177_v9 = vpack.c.bf16 %v9951_v4, %v9943_v58  ;;  %9972 = vrcp.f32 %v1620_v2  ;;  %v571_v58 = vunpack.c.l.bf16 %v435_v30  ;;  %v8531_v12 = vmul.f32 -1.442695, %v559_v63 }
 0x166   : > { %v9955_v11 = vpop.eup %9954  ;;  %9974 = vrcp.f32 %v1634_v5  ;;  %v585_v37 = vunpack.c.l.bf16 %v11548_v0 }
 0x167   : > { %v9957_v13 = vpop.eup %9956  ;;  %3293 = vmatmul.mubr.bf16.gmra.mrb[40].mxu1 %v2177_v9  ;;  %v2179_v15 = vpack.c.bf16 %v9955_v11, %v9953_v8  ;;  %9976 = vpow2.f32 %v8515_v3  ;;  %v11551_v3 = vld [vmem:[%s11289_s23 + $0x130] sm:$0xff] }
 0x168   : > { %v9959_v17 = vpop.eup %9958  ;;  %v1617_v18 = vadd.f32 1.0, %v9957_v13  ;;  %9978 = vpow2.f32 %v8516_v6  ;;  %v8543_v6 = vmul.f32 -1.442695, %v571_v58  ;;  %v600_v13 = vunpack.c.h.bf16 %v11551_v3 }
 0x169   : > { %v9961_v20 = vpop.eup %9960  ;;  %3390 = vmatmul.mubr.bf16.gmra.mrb[40].mxu0 %v2179_v15  ;;  %v1631_v21 = vadd.f32 1.0, %v9959_v17  ;;  %9980 = vpow2.f32 %v8503_v10  ;;  %v586_v10 = vunpack.c.h.bf16 %v11548_v0  ;;  %v8557_v49 = vmul.f32 -1.442695, %v585_v37  ;;  %v9570_v0 = vld [vmem:[%s11295_s26 + $0x348] sm:$0xff]  }
 0x16a   : > { %v9963_v23 = vpop.eup %9962  ;;  %9982 = vrcp.f32 %v1617_v18  ;;  %v1619_v14 = vadd.f32 1.0, %v9961_v20  ;;  %v8545_v18 = vmul.f32 -1.442695, %v573_v7  ;;  %v11585_v7 = vld [vmem:[%s11289_s23 + $0x170] sm:$0xff] }
 0x16b   : > { %v9965_v25 = vpop.eup %9964  ;;  %9984 = vrcp.f32 %v1631_v21  ;;  %v1633_v26 = vadd.f32 1.0, %v9963_v23  ;;  %v8558_v22 = vmul.f32 -1.442695, %v586_v10  ;;  %v11560_v23 = vld [vmem:[%s11289_s23 + $0x138] sm:$0xff]  ;;  %v9571_v10 = vld [vmem:[%s11295_s26 + $0x308] sm:$0xff]  }
 0x16c   : > { %v9967_v29 = vpop.eup %9966  ;;  %9986 = vrcp.f32 %v1619_v14  ;;  %v1425_v36 = vadd.f32 1.0, %v9965_v25  ;;  %v8572_v25 = vmul.f32 -1.442695, %v600_v13 }
 0x16d   : > { %v9969_v31 = vpop.eup %9968  ;;  %9988 = vrcp.f32 %v1633_v26 }
 0x16e   : > { %v9971_v34 = vpop.eup %9970  ;;  %v1426_v35 = vadd.f32 1.0, %v9969_v31  ;;  %9990 = vpow2.f32 %v8504_v24  ;;  %v9568_v31 = vld [vmem:[%s11295_s26 + $0x2c8] sm:$0xff]  }
 0x16f   : > { %v9973_v38 = vpop.eup %9972  ;;  %v2192_v39 = vpack.c.bf16 %v9971_v34, %v9967_v29  ;;  %9992 = vpow2.f32 %v8517_v27  ;;  %v588_v29 = vunpack.c.h.bf16 %v11557_v19 }
 0x170   : > { %v9975_v42 = vpop.eup %9974  ;;  %9994 = vrcp.f32 %v1426_v35 }
 0x171   : > { %v9977_v44 = vpop.eup %9976  ;;  %3300 = vmatprep.mubr.bf16.mxu1 %v2192_v39  ;;  %v2194_v45 = vpack.c.bf16 %v9975_v42, %v9973_v38  ;;  %9996 = vpow2.f32 %v8518_v32  ;;  %v602_v32 = vunpack.c.h.bf16 %v11560_v23 }
 0x172   : > { %v9979_v47 = vpop.eup %9978  ;;  %v1439_v48 = vadd.f32 1.0, %v9977_v44  ;;  %9998 = vrcp.f32 %v1425_v36 }
 0x173   : > { %v9981_v50 = vpop.eup %9980  ;;  %3397 = vmatprep.mubr.bf16.mxu0 %v2194_v45  ;;  %v1440_v51 = vadd.f32 1.0, %v9979_v47  ;;  %10000 = vpow2.f32 %v8530_v41  ;;  %v8560_v41 = vmul.f32 -1.442695, %v588_v29  ;;  %v8574_v44 = vmul.f32 -1.442695, %v602_v32  ;;  %v9578_v32 = vld [vmem:[%s11295_s26 + $0x358] sm:$0xff]  }
 0x174   : > { %v9983_v53 = vpop.eup %9982  ;;  %10002 = vrcp.f32 %v1439_v48  ;;  %v1427_v54 = vadd.f32 1.0, %v9981_v50  ;;  %v599_v45 = vunpack.c.l.bf16 %v11551_v3 }
 0x175   : > { %v9985_v56 = vpop.eup %9984  ;;  %10004 = vrcp.f32 %v1440_v51 }
 0x176   : > { %v9987_v59 = vpop.eup %9986  ;;  %v2191_v60 = vpack.c.bf16 %v9985_v56, %v9983_v53  ;;  %10006 = vrcp.f32 %v1427_v54  ;;  %v9573_v53 = vld [vmem:[%s11295_s26 + $0x290] sm:$0xff]   ;;  %v11572_v54 = vld [vmem:[%s11289_s23 + $0x168] sm:$0xff]  ;;  %v8571_v58 = vmul.f32 -1.442695, %v599_v45  ;;  %v9579_v45 = vld [vmem:[%s11295_s26 + $0x318] sm:$0xff]  }
 0x177   : > { %v9989_v62 = vpop.eup %9988  ;;  %10008 = vpow2.f32 %v8544_v52  ;;  %v614_v3 = vunpack.c.h.bf16 %v11572_v54 }
 0x178   : > { %v9991_v1 = vpop.eup %9990  ;;  %3301 = vmatmul.mubr.bf16.gmra.mrb[44].mxu1 %v2191_v60  ;;  %v2193_v2 = vpack.c.bf16 %v9989_v62, %v9987_v59  ;;  %10010 = vpow2.f32 %v8532_v55  ;;  %v587_v59 = vunpack.c.l.bf16 %v11557_v19  ;;  %v11577_v60 = vld [vmem:[%s11289_s23 + $0x1a0] sm:$0xff] }
 0x179   : > { %v9993_v4 = vpop.eup %9992  ;;  %v1428_v5 = vadd.f32 1.0, %v9991_v1  ;;  %10012 = vpow2.f32 %v8546_v57  ;;  %v9567_v57 = vld [vmem:[%s11295_s26 + $0x300] sm:$0xff]   ;;  %v601_v1 = vunpack.c.l.bf16 %v11560_v23  ;;  %v616_v23 = vunpack.c.h.bf16 %v11585_v7 }
 0x17a   : > { %v9995_v8 = vpop.eup %9994  ;;  %3398 = vmatmul.mubr.bf16.gmra.mrb[44].mxu0 %v2193_v2  ;;  %v1441_v9 = vadd.f32 1.0, %v9993_v4  ;;  %10014 = vpow2.f32 %v8529_v61  ;;  %v9576_v61 = vld [vmem:[%s11295_s26 + $0x2d8] sm:$0xff]   ;;  %v9580_v19 = vld [vmem:[%s11295_s26 + $0x2e0] sm:$0xff]  }
 0x17b   : > { %v9997_v11 = vpop.eup %9996  ;;  %10016 = vrcp.f32 %v1428_v5 }
 0x17c   : > { %v9999_v15 = vpop.eup %9998  ;;  %v1442_v16 = vadd.f32 1.0, %v9997_v11  ;;  %10018 = vrcp.f32 %v1441_v9 }
 0x17d   : > { %v10001_v17 = vpop.eup %10000  ;;  %10020 = vpow2.f32 %v8543_v6  ;;  %v628_v6 = vunpack.c.h.bf16 %v11577_v60 }
 0x17e   : > { %v10003_v20 = vpop.eup %10002  ;;  %10022 = vrcp.f32 %v1442_v16  ;;  %v1454_v21 = vadd.f32 1.0, %v10001_v17  ;;  %v8573_v16 = vmul.f32 -1.442695, %v601_v1  ;;  %v9574_v17 = vld [vmem:[%s11295_s26 + $0x350] sm:$0xff]   ;;  %v9592_v1 = vld [vmem:[%s11295_s26 + $0x2f8] sm:$0xff]  }
 0x17f   : > { %v10005_v14 = vpop.eup %10004  ;;  %v2097_v24 = vpack.c.bf16 %v10003_v20, %v9999_v15  ;;  %10024 = vpow2.f32 %v8531_v12  ;;  %v8559_v12 = vmul.f32 -1.442695, %v587_v59 }
 0x180   : > { %v10007_v26 = vpop.eup %10006  ;;  %v2098_v27 = vpack.c.bf16 %v10005_v14, %v9995_v8  ;;  %10026 = vrcp.f32 %v1454_v21  ;;  %v9577_v8 = vld [vmem:[%s11295_s26 + $0x298] sm:$0xff]  }
 0x181   : > { %v10009_v30 = vpop.eup %10008  ;;  %10028 = vpow2.f32 %v8545_v18  ;;  %v11591_v18 = vld [vmem:[%s11289_s23 + $0x1a8] sm:$0xff] }
 0x182   : > { %v10011_v33 = vpop.eup %10010  ;;  %3438 = vmatprep.mubr.bf16.mxu1 %v2098_v27  ;;  %v1468_v34 = vadd.f32 1.0, %v10009_v30  ;;  %10030 = vpow2.f32 %v8558_v22  ;;  %v8586_v22 = vmul.f32 -1.442695, %v614_v3  ;;  %v630_v29 = vunpack.c.h.bf16 %v11591_v18  ;;  %v9584_v30 = vld [vmem:[%s11295_s26 + $0x2e8] sm:$0xff]  }
 0x183   : > { %v10013_v35 = vpop.eup %10012  ;;  %3439 = vmatmul.mubr.bf16.vlgmr.msra.gmra.mrb[48].mxu1 %v2097_v24  ;;  %v1456_v36 = vadd.f32 1.0, %v10011_v33  ;;  %10032 = vpow2.f32 %v8572_v25  ;;  %v8600_v24 = vmul.f32 -1.442695, %v628_v6  ;;  %v9581_v25 = vld [vmem:[%s11295_s26 + $0x2a0] sm:$0xff]  }
 0x184   : > { %v10015_v38 = vpop.eup %10014  ;;  %9176 = vmatpush3.bf16.msra.mxu1 %v9565_v28  ;;  %10034 = vrcp.f32 %v1468_v34  ;;  %v1470_v39 = vadd.f32 1.0, %v10013_v35  ;;  %v9575_v28 = vld [vmem:[%s11295_s26 + $0x310] sm:$0xff]   ;;  %v8588_v35 = vmul.f32 -1.442695, %v616_v23  ;;  %v11628_v23 = vld [vmem:[%s11289_s23 + $0x218] sm:$0xff] }
 0x185   : > { %v10017_v42 = vpop.eup %10016  ;;  %10036 = vrcp.f32 %v1456_v36  ;;  %v1453_v43 = vadd.f32 1.0, %v10015_v38  ;;  %9177 = vmatprep.subr.bf16.mxu1 %v9568_v31  ;;  %v613_v36 = vunpack.c.l.bf16 %v11572_v54 }
 0x186   : > { %v10019_v47 = vpop.eup %10018  ;;  %10038 = vrcp.f32 %v1470_v39  ;;  %v627_v39 = vunpack.c.l.bf16 %v11577_v60  ;;  %v9583_v60 = vld [vmem:[%s11295_s26 + $0x320] sm:$0xff]  }
 0x187   : > { %v10021_v48 = vpop.eup %10020  ;;  %10040 = vrcp.f32 %v1453_v43  ;;  %v2099_v51 = vpack.c.bf16 %v10019_v47, %v10007_v26  ;;  %v8602_v43 = vmul.f32 -1.442695, %v630_v29  ;;  %v9594_v29 = vld [vmem:[%s11295_s26 + $0x378] sm:$0xff]  }
 0x188   : > { %v10023_v50 = vpop.eup %10022  ;;  %v1467_v52 = vadd.f32 1.0, %v10021_v48  ;;  %9178 = vmatpush3.bf16.msra.mxu1 %v9569_v40  ;;  %10042 = vpow2.f32 %v8560_v41  ;;  %v9585_v40 = vld [vmem:[%s11295_s26 + $0x2a8] sm:$0xff]   ;;  %v8599_v54 = vmul.f32 -1.442695, %v627_v39  ;;  %v9595_v39 = vld [vmem:[%s11295_s26 + $0x338] sm:$0xff]  }
 0x189   : > { %v10025_v55 = vpop.eup %10024  ;;  %v2100_v56 = vpack.c.bf16 %v10023_v50, %v10017_v42  ;;  %10044 = vpow2.f32 %v8574_v44  ;;  %9179 = vmatprep.subr.bf16.mxu1 %v9572_v46  ;;  %v615_v44 = vunpack.c.l.bf16 %v11585_v7  ;;  %v9588_v46 = vld [vmem:[%s11295_s26 + $0x2f0] sm:$0xff]   ;;  %v11620_v7 = vld [vmem:[%s11289_s23 + $0x1e0] sm:$0xff] }
 0x18a   : > { %v10027_v62 = vpop.eup %10026  ;;  %10046 = vrcp.f32 %v1467_v52  ;;  %v1455_v63 = vadd.f32 1.0, %v10025_v55  ;;  %v11608_v55 = vld [vmem:[%s11289_s23 + $0x1d8] sm:$0xff] }
 0x18b   : > { %v10029_v2 = vpop.eup %10028  ;;  %3535 = vmatprep.mubr.bf16.mxu0 %v2100_v56  ;;  %10048 = vpow2.f32 %v8557_v49  ;;  %v9582_v49 = vld [vmem:[%s11295_s26 + $0x360] sm:$0xff]   ;;  %v9589_v56 = vld [vmem:[%s11295_s26 + $0x2b0] sm:$0xff]   ;;  %v8587_v59 = vmul.f32 -1.442695, %v615_v44 }
 0x18c   : > { %v10031_v4 = vpop.eup %10030  ;;  %3536 = vmatmul.mubr.bf16.vlgmr.msra.gmra.mrb[48].mxu0 %v2099_v51  ;;  %v1469_v5 = vadd.f32 1.0, %v10029_v2  ;;  %10050 = vrcp.f32 %v1455_v63  ;;  %9180 = vmatpush3.bf16.msra.mxu1 %v9573_v53  ;;  %v8585_v51 = vmul.f32 -1.442695, %v613_v36  ;;  %v11614_v63 = vld [vmem:[%s11289_s23 + $0x210] sm:$0xff] }
 0x18d   : > { %v10033_v9 = vpop.eup %10032  ;;  %9240 = vmatpush3.bf16.msra.mxu0 %v9567_v57  ;;  %v1482_v11 = vadd.f32 1.0, %v10031_v4  ;;  %10052 = vpow2.f32 %v8571_v58  ;;  %9181 = vmatprep.subr.bf16.mxu1 %v9576_v61  ;;  %v642_v4 = vunpack.c.h.bf16 %v11608_v55 }
 0x18e   : > { %v10035_v13 = vpop.eup %10034  ;;  %10054 = vrcp.f32 %v1469_v5  ;;  %9241 = vmatprep.subr.bf16.mxu0 %v9570_v0  ;;  %v1496_v15 = vadd.f32 1.0, %v10033_v9  ;;  %v9586_v0 = vld [vmem:[%s11295_s26 + $0x368] sm:$0xff]  }
 0x18f   : > { %v10037_v20 = vpop.eup %10036  ;;  %v2112_v21 = vpack.c.bf16 %v10035_v13, %v10027_v62  ;;  %10056 = vrcp.f32 %v1482_v11  ;;  %v629_v62 = vunpack.c.l.bf16 %v11591_v18  ;;  %v656_v11 = vunpack.c.h.bf16 %v11614_v63 }
 0x190   : > { %v10039_v14 = vpop.eup %10038  ;;  %10058 = vrcp.f32 %v1496_v15  ;;  %9182 = vmatpush3.bf16.msra.mxu1 %v9577_v8  ;;  %v9593_v8 = vld [vmem:[%s11295_s26 + $0x2b8] sm:$0xff]  }
 0x191   : > { %v10041_v26 = vpop.eup %10040  ;;  %3446 = vmatprep.mubr.bf16.mxu1 %v2112_v21  ;;  %v2114_v27 = vpack.c.bf16 %v10039_v14, %v10037_v20  ;;  %9242 = vmatpush3.bf16.msra.mxu0 %v9571_v10  ;;  %10060 = vpow2.f32 %v8559_v12  ;;  %v9587_v12 = vld [vmem:[%s11295_s26 + $0x328] sm:$0xff]   ;;  %v8614_v20 = vmul.f32 -1.442695, %v642_v4  ;;  %v644_v21 = vunpack.c.h.bf16 %v11620_v7 }
 0x192   : > { %v10043_v31 = vpop.eup %10042  ;;  %10062 = vpow2.f32 %v8573_v16  ;;  %9243 = vmatprep.subr.bf16.mxu0 %v9574_v17  ;;  %9183 = vmatprep.subr.bf16.mxu1 %v9580_v19  ;;  %v8601_v16 = vmul.f32 -1.442695, %v629_v62  ;;  %v9590_v17 = vld [vmem:[%s11295_s26 + $0x370] sm:$0xff]   ;;  %v11647_v62 = vld [vmem:[%s11289_s23 + $0x288] sm:$0xff] }
 0x193   : > { %v10045_v33 = vpop.eup %10044  ;;  %3543 = vmatprep.mubr.bf16.mxu0 %v2114_v27  ;;  %v1484_v34 = vadd.f32 1.0, %v10043_v31  ;;  %10064 = vpow2.f32 %v8586_v22  ;;  %v658_v31 = vunpack.c.h.bf16 %v11628_v23 }
 0x194   : > { %v10047_v37 = vpop.eup %10046  ;;  %v1498_v38 = vadd.f32 1.0, %v10045_v33  ;;  %10066 = vpow2.f32 %v8600_v24  ;;  %9184 = vmatpush3.bf16.msra.mxu1 %v9581_v25  ;;  %v8628_v25 = vmul.f32 -1.442695, %v656_v11 }
 0x195   : > { %v10049_v41 = vpop.eup %10048  ;;  %v2111_v42 = vpack.c.bf16 %v10047_v37, %v10041_v26  ;;  %10068 = vrcp.f32 %v1484_v34  ;;  %9244 = vmatpush3.bf16.msra.mxu0 %v9575_v28  ;;  %9185 = vmatprep.subr.bf16.mxu1 %v9584_v30  ;;  %v9591_v26 = vld [vmem:[%s11295_s26 + $0x330] sm:$0xff]  }
 0x196   : > { %v10051_v47 = vpop.eup %10050  ;;  %10070 = vrcp.f32 %v1498_v38  ;;  %v1481_v48 = vadd.f32 1.0, %v10049_v41  ;;  %9245 = vmatprep.subr.bf16.mxu0 %v9578_v32  ;;  %v8616_v32 = vmul.f32 -1.442695, %v644_v21  ;;  %v655_v38 = vunpack.c.l.bf16 %v11614_v63 }
 0x197   : > { %v10053_v50 = vpop.eup %10052  ;;  %3447 = vmatmul.mubr.bf16.gmra.mrb[52].mxu1 %v2111_v42  ;;  %10072 = vpow2.f32 %v8588_v35  ;;  %v641_v35 = vunpack.c.l.bf16 %v11608_v55  ;;  %v643_v42 = vunpack.c.l.bf16 %v11620_v7 }
 0x198   : > { %v10055_v52 = vpop.eup %10054  ;;  %v1495_v53 = vadd.f32 1.0, %v10053_v50  ;;  %10074 = vrcp.f32 %v1481_v48  ;;  %9186 = vmatpush3.bf16.msra.mxu1 %v9585_v40 }
 0x199   : > { %v10057_v57 = vpop.eup %10056  ;;  %v2113_v58 = vpack.c.bf16 %v10055_v52, %v10051_v47  ;;  %10076 = vpow2.f32 %v8602_v43  ;;  %9246 = vmatpush3.bf16.msra.mxu0 %v9579_v45  ;;  %9187 = vmatprep.subr.bf16.mxu1 %v9588_v46  ;;  %v8630_v45 = vmul.f32 -1.442695, %v658_v31  ;;  %v8613_v48 = vmul.f32 -1.442695, %v641_v35 }
 0x19a   : > { %v10059_v61 = vpop.eup %10058  ;;  %10078 = vrcp.f32 %v1495_v53  ;;  %9247 = vmatprep.subr.bf16.mxu0 %v9582_v49  ;;  %v11638_v49 = vld [vmem:[%s11289_s23 + $0x248] sm:$0xff]  ;;  %v657_v52 = vunpack.c.l.bf16 %v11628_v23  ;;  %v8615_v55 = vmul.f32 -1.442695, %v643_v42  ;;  %v685_v35 = vunpack.c.l.bf16 %v11647_v62 }
 0x19b   : > { %v10061_v2 = vpop.eup %10060  ;;  %3544 = vmatmul.mubr.bf16.gmra.mrb[52].mxu0 %v2113_v58  ;;  %v2126_v3 = vpack.c.bf16 %v10059_v61, %v10057_v57  ;;  %10080 = vpow2.f32 %v8585_v51  ;;  %v8627_v51 = vmul.f32 -1.442695, %v655_v38  ;;  %v670_v58 = vunpack.c.h.bf16 %v11638_v49  ;;  %v498_v38 = vld [vmem:[%s11289_s23 + $0x2b8] sm:$0xff] }
 0x19c   : > { %v10063_v5 = vpop.eup %10062  ;;  %v1483_v6 = vadd.f32 1.0, %v10061_v2  ;;  %10082 = vpow2.f32 %v8599_v54  ;;  %9188 = vmatpush3.bf16.msra.mxu1 %v9589_v56  ;;  %v491_v56 = vld [vmem:[%s11289_s23 + $0x280] sm:$0xff] }
 0x19d   : > { %v10065_v9 = vpop.eup %10064  ;;  %3454 = vmatprep.mubr.bf16.mxu1 %v2126_v3  ;;  %v1497_v10 = vadd.f32 1.0, %v10063_v5  ;;  %10084 = vpow2.f32 %v8587_v59  ;;  %9248 = vmatpush3.bf16.msra.mxu0 %v9583_v60  ;;  %v11644_v59 = vld [vmem:[%s11289_s23 + $0x250] sm:$0xff]  ;;  %v684_v2 = vunpack.c.h.bf16 %v491_v56  ;;  %v8642_v7 = vmul.f32 -1.442695, %v670_v58 }
 0x19e   : > { %v10067_v13 = vpop.eup %10066  ;;  %10086 = vrcp.f32 %v1483_v6  ;;  %v1510_v15 = vadd.f32 1.0, %v10065_v9  ;;  %9249 = vmatprep.subr.bf16.mxu0 %v9586_v0  ;;  %9189 = vmatprep.subr.bf16.mxu1 %v9592_v1  ;;  %v8629_v1 = vmul.f32 -1.442695, %v657_v52  ;;  %v672_v5 = vunpack.c.h.bf16 %v11644_v59 }
 0x19f   : > { %v10069_v18 = vpop.eup %10068  ;;  %10088 = vrcp.f32 %v1497_v10  ;;  %v1524_v19 = vadd.f32 1.0, %v10067_v13  ;;  %v8656_v13 = vmul.f32 -1.442695, %v684_v2 }
 0x1a0   : > { %v10071_v22 = vpop.eup %10070  ;;  %10090 = vrcp.f32 %v1510_v15  ;;  %9190 = vmatpush3.bf16.msra.mxu1 %v9593_v8  ;;  %v686_v8 = vunpack.c.h.bf16 %v11647_v62 }
 0x1a1   : > { %v10073_v14 = vpop.eup %10072  ;;  %v2128_v24 = vpack.c.bf16 %v10071_v22, %v10069_v18  ;;  %10092 = vrcp.f32 %v1524_v19  ;;  %9250 = vmatpush3.bf16.msra.mxu0 %v9587_v12  ;;  %v669_v22 = vunpack.c.l.bf16 %v11638_v49  ;;  %v11660_v49 = vld [vmem:[%s11289_s23 + $0x2f8] sm:$0xff] }
 0x1a2   : > { %v10075_v27 = vpop.eup %10074  ;;  %v1512_v28 = vadd.f32 1.0, %v10073_v14  ;;  %10094 = vpow2.f32 %v8601_v16  ;;  %9251 = vmatprep.subr.bf16.mxu0 %v9590_v17  ;;  %v8644_v17 = vmul.f32 -1.442695, %v672_v5  ;;  %v8658_v19 = vmul.f32 -1.442695, %v686_v8 }
 0x1a3   : > { %v10077_v30 = vpop.eup %10076  ;;  %3551 = vmatprep.mubr.bf16.mxu0 %v2128_v24  ;;  %10096 = vpow2.f32 %v8614_v20  ;;  %v683_v14 = vunpack.c.l.bf16 %v491_v56  ;;  %v8641_v31 = vmul.f32 -1.442695, %v669_v22 }
 0x1a4   : > { %v10079_v33 = vpop.eup %10078  ;;  %v1526_v34 = vadd.f32 1.0, %v10077_v30  ;;  %10098 = vrcp.f32 %v1512_v28  ;;  %v671_v28 = vunpack.c.l.bf16 %v11644_v59 }
 0x1a5   : > { %v10081_v36 = vpop.eup %10080  ;;  %v2125_v37 = vpack.c.bf16 %v10079_v33, %v10075_v27  ;;  %10100 = vpow2.f32 %v8628_v25  ;;  %9252 = vmatpush3.bf16.msra.mxu0 %v9591_v26 }
 0x1a6   : > { %v10083_v40 = vpop.eup %10082  ;;  %10102 = vrcp.f32 %v1526_v34  ;;  %v1509_v41 = vadd.f32 1.0, %v10081_v36  ;;  %9253 = vmatprep.subr.bf16.mxu0 %v9594_v29  ;;  %v8655_v34 = vmul.f32 -1.442695, %v683_v14 }
 0x1a7   : > { %v10085_v43 = vpop.eup %10084  ;;  %3455 = vmatmul.mubr.bf16.gmra.mrb[56].mxu1 %v2125_v37  ;;  %v1523_v44 = vadd.f32 1.0, %v10083_v40  ;;  %10104 = vpow2.f32 %v8616_v32  ;;  %v8643_v40 = vmul.f32 -1.442695, %v671_v28 }
 0x1a8   : > { %v10087_v46 = vpop.eup %10086  ;;  %10106 = vrcp.f32 %v1509_v41  ;;  %v1511_v47 = vadd.f32 1.0, %v10085_v43  ;;  %v505_v41 = vld [vmem:[%s11289_s23 + $0x2f0] sm:$0xff] }
 0x1a9   : > { %v10089_v50 = vpop.eup %10088  ;;  %10108 = vrcp.f32 %v1523_v44  ;;  %9254 = vmatpush3.bf16.msra.mxu0 %v9595_v39  ;;  %v11657_v44 = vld [vmem:[%s11289_s23 + $0x2c0] sm:$0xff]  ;;  %v712_v52 = vunpack.c.h.bf16 %v505_v41  ;;  %v711_v8 = vunpack.c.l.bf16 %v505_v41 }
 0x1aa   : > { %v10091_v53 = vpop.eup %10090  ;;  %v2127_v54 = vpack.c.bf16 %v10089_v50, %v10087_v46  ;;  %10110 = vrcp.f32 %v1511_v47  ;;  %v8657_v47 = vmul.f32 -1.442695, %v685_v35 }
 0x1ab   : > { %v10093_v57 = vpop.eup %10092  ;;  %10112 = vpow2.f32 %v8630_v45 }
 0x1ac   : > { %v10095_v60 = vpop.eup %10094  ;;  %3552 = vmatmul.mubr.bf16.gmra.mrb[56].mxu0 %v2127_v54  ;;  %v2140_v61 = vpack.c.bf16 %v10093_v57, %v10091_v53  ;;  %10114 = vpow2.f32 %v8613_v48  ;;  %v698_v48 = vunpack.c.h.bf16 %v498_v38  ;;  %v700_v54 = vunpack.c.h.bf16 %v11657_v44 }
 0x1ad   : > { %v10097_v63 = vpop.eup %10096  ;;  %v1525_v0 = vadd.f32 1.0, %v10095_v60  ;;  %10116 = vpow2.f32 %v8627_v51  ;;  %v714_v57 = vunpack.c.h.bf16 %v11660_v49 }
 0x1ae   : > { %v10099_v3 = vpop.eup %10098  ;;  %3462 = vmatprep.mubr.bf16.mxu1 %v2140_v61  ;;  %v1538_v4 = vadd.f32 1.0, %v10097_v63  ;;  %10118 = vpow2.f32 %v8615_v55  ;;  %v8670_v60 = vmul.f32 -1.442695, %v698_v48  ;;  %v8684_v63 = vmul.f32 -1.442695, %v712_v52 }
 0x1af   : > { %v10101_v6 = vpop.eup %10100  ;;  %10120 = vrcp.f32 %v1525_v0  ;;  %v8672_v2 = vmul.f32 -1.442695, %v700_v54  ;;  %v8686_v5 = vmul.f32 -1.442695, %v714_v57 }
 0x1b0   : > { %v10103_v9 = vpop.eup %10102  ;;  %v1552_v10 = vadd.f32 1.0, %v10101_v6  ;;  %10122 = vrcp.f32 %v1538_v4 }
 0x1b1   : > { %v10105_v11 = vpop.eup %10104  ;;  %v2142_v12 = vpack.c.bf16 %v10103_v9, %v10099_v3  ;;  %10124 = vpow2.f32 %v8629_v1  ;;  %v697_v3 = vunpack.c.l.bf16 %v498_v38 }
 0x1b2   : > { %v10107_v15 = vpop.eup %10106  ;;  %10126 = vrcp.f32 %v1552_v10  ;;  %v1540_v16 = vadd.f32 1.0, %v10105_v11  ;;  %v11665_v10 = vld [vmem:[%s11289_s23 + $0x328] sm:$0xff] }
 0x1b3   : > { %v10109_v18 = vpop.eup %10108  ;;  %3559 = vmatprep.mubr.bf16.mxu0 %v2142_v12  ;;  %10128 = vpow2.f32 %v8642_v7  ;;  %v726_v22 = vunpack.c.h.bf16 %v11665_v10 }
 0x1b4   : > { %v10111_v20 = vpop.eup %10110  ;;  %v2139_v21 = vpack.c.bf16 %v10109_v18, %v10107_v15  ;;  %10130 = vrcp.f32 %v1540_v16  ;;  %v699_v15 = vunpack.c.l.bf16 %v11657_v44  ;;  %v713_v18 = vunpack.c.l.bf16 %v11660_v49 }
 0x1b5   : > { %v10113_v23 = vpop.eup %10112  ;;  %10132 = vpow2.f32 %v8656_v13  ;;  %v8669_v13 = vmul.f32 -1.442695, %v697_v3 }
 0x1b6   : > { %v10115_v24 = vpop.eup %10114  ;;  %3463 = vmatmul.mubr.bf16.gmra.mrb[60].mxu1 %v2139_v21  ;;  %v1554_v25 = vadd.f32 1.0, %v10113_v23  ;;  %10134 = vpow2.f32 %v8644_v17  ;;  %v8683_v21 = vmul.f32 -1.442695, %v711_v8 }
 0x1b7   : > { %v10117_v26 = vpop.eup %10116  ;;  %v1537_v27 = vadd.f32 1.0, %v10115_v24  ;;  %10136 = vpow2.f32 %v8658_v19 }
 0x1b8   : > { %v10119_v29 = vpop.eup %10118  ;;  %10138 = vrcp.f32 %v1554_v25  ;;  %v1551_v30 = vadd.f32 1.0, %v10117_v26  ;;  %v8671_v25 = vmul.f32 -1.442695, %v699_v15  ;;  %v11671_v26 = vld [vmem:[%s11289_s23 + $0x360] sm:$0xff] }
 0x1b9   : > { %v10121_v32 = vpop.eup %10120  ;;  %10140 = vrcp.f32 %v1537_v27  ;;  %v1539_v33 = vadd.f32 1.0, %v10119_v29  ;;  %v8685_v29 = vmul.f32 -1.442695, %v713_v18  ;;  %v740_v35 = vunpack.c.h.bf16 %v11671_v26 }
 0x1ba   : > { %v10123_v36 = vpop.eup %10122  ;;  %v2141_v37 = vpack.c.bf16 %v10121_v32, %v10111_v20  ;;  %10142 = vrcp.f32 %v1551_v30  ;;  %v11674_v30 = vld [vmem:[%s11289_s23 + $0x330] sm:$0xff] }
 0x1bb   : > { %v10125_v39 = vpop.eup %10124  ;;  %10144 = vrcp.f32 %v1539_v33  ;;  %v8698_v33 = vmul.f32 -1.442695, %v726_v22 }
 0x1bc   : > { %v10127_v42 = vpop.eup %10126  ;;  %3560 = vmatmul.mubr.bf16.gmra.mrb[60].mxu0 %v2141_v37  ;;  %v1553_v43 = vadd.f32 1.0, %v10125_v39  ;;  %10146 = vpow2.f32 %v8641_v31  ;;  %v728_v39 = vunpack.c.h.bf16 %v11674_v30 }
 0x1bd   : > { %v10129_v45 = vpop.eup %10128  ;;  %v2154_v46 = vpack.c.bf16 %v10127_v42, %v10123_v36  ;;  %10148 = vpow2.f32 %v8655_v34  ;;  %v520_v36 = vld [vmem:[%s11289_s23 + $0x368] sm:$0xff] }
 0x1be   : > { %v10131_v50 = vpop.eup %10130  ;;  %10150 = vrcp.f32 %v1553_v43  ;;  %v1566_v51 = vadd.f32 1.0, %v10129_v45  ;;  %v742_v44 = vunpack.c.h.bf16 %v520_v36  ;;  %v741_v3 = vunpack.c.l.bf16 %v520_v36 }
 0x1bf   : > { %v10133_v53 = vpop.eup %10132  ;;  %3470 = vmatprep.mubr.bf16.mxu1 %v2154_v46  ;;  %10152 = vpow2.f32 %v8643_v40 }
 0x1c0   : > { %v10135_v55 = vpop.eup %10134  ;;  %v1580_v56 = vadd.f32 1.0, %v10133_v53  ;;  %10154 = vrcp.f32 %v1566_v51  ;;  %v725_v51 = vunpack.c.l.bf16 %v11665_v10 }
 0x1c1   : > { %v10137_v58 = vpop.eup %10136  ;;  %v1568_v59 = vadd.f32 1.0, %v10135_v55  ;;  %10156 = vpow2.f32 %v8657_v47  ;;  %v8712_v47 = vmul.f32 -1.442695, %v740_v35  ;;  %v8714_v55 = vmul.f32 -1.442695, %v742_v44 }
 0x1c2   : > { %v10139_v61 = vpop.eup %10138  ;;  %10158 = vrcp.f32 %v1580_v56  ;;  %v1582_v62 = vadd.f32 1.0, %v10137_v58 }
 0x1c3   : > { %v10141_v0 = vpop.eup %10140  ;;  %v2156_v1 = vpack.c.bf16 %v10139_v61, %v10131_v50  ;;  %10160 = vrcp.f32 %v1568_v59  ;;  %v8700_v50 = vmul.f32 -1.442695, %v728_v39  ;;  %v739_v59 = vunpack.c.l.bf16 %v11671_v26  ;;  %v416_v61 = vld [vmem:[%s11289_s23 + $0x28] sm:$0xff] }
 0x1c4   : > { %v10143_v4 = vpop.eup %10142  ;;  %10162 = vrcp.f32 %v1582_v62 }
 0x1c5   : > { %v10145_v6 = vpop.eup %10144  ;;  %3567 = vmatprep.mubr.bf16.mxu0 %v2156_v1  ;;  %v2153_v7 = vpack.c.bf16 %v10143_v4, %v10141_v0  ;;  %10164 = vpow2.f32 %v8670_v60  ;;  %v8697_v60 = vmul.f32 -1.442695, %v725_v51  ;;  %v727_v0 = vunpack.c.l.bf16 %v11674_v30 }
 0x1c6   : > { %v10147_v9 = vpop.eup %10146  ;;  %10166 = vpow2.f32 %v8684_v63 }
 0x1c7   : > { %v10149_v11 = vpop.eup %10148  ;;  %3471 = vmatmul.mubr.bf16.gmra.mrb[64].mxu1 %v2153_v7  ;;  %v1565_v12 = vadd.f32 1.0, %v10147_v9  ;;  %10168 = vpow2.f32 %v8672_v2  ;;  %v8711_v9 = vmul.f32 -1.442695, %v739_v59  ;;  %v8871_v59 = vpop.f32.mrb[0].mxu0 }
 0x1c8   : > { %v10151_v16 = vpop.eup %10150  ;;  %v1579_v17 = vadd.f32 1.0, %v10149_v11  ;;  %10170 = vpow2.f32 %v8686_v5 }
 0x1c9   : > { %v10153_v19 = vpop.eup %10152  ;;  %v2155_v20 = vpack.c.bf16 %v10151_v16, %v10145_v6  ;;  %10172 = vrcp.f32 %v1565_v12  ;;  %v533_v6 = vunpack.c.l.bf16 %v416_v61  ;;  %v8699_v12 = vmul.f32 -1.442695, %v727_v0 }
 0x1ca   : > { %v10155_v23 = vpop.eup %10154  ;;  %10174 = vrcp.f32 %v1579_v17  ;;  %v1567_v14 = vadd.f32 1.0, %v10153_v19  ;;  %v8713_v16 = vmul.f32 -1.442695, %v741_v3  ;;  %v534_v17 = vunpack.c.h.bf16 %v416_v61 }
 0x1cb   : > { %v10157_v24 = vpop.eup %10156  ;;  %3568 = vmatmul.mubr.bf16.gmra.mrb[64].mxu0 %v2155_v20  ;;  %10176 = vpow2.f32 %v8669_v13  ;;  %v423_v13 = vld [vmem:[%s11289_s23 + $0x60] sm:$0xff]  ;;  %v8505_v20 = vmul.f32 -1.442695, %v533_v6 }
 0x1cc   : > { %v10159_v27 = vpop.eup %10158  ;;  %v1581_v28 = vadd.f32 1.0, %v10157_v24  ;;  %10178 = vrcp.f32 %v1567_v14  ;;  %v547_v22 = vunpack.c.l.bf16 %v423_v13 }
 0x1cd   : > { %v10161_v31 = vpop.eup %10160  ;;  %v2168_v32 = vpack.c.bf16 %v10159_v27, %v10155_v23  ;;  %10180 = vpow2.f32 %v8683_v21  ;;  %v417_v23 = vld [vmem:[%s11289_s23 + $0x30] sm:$0xff]  ;;  %v548_v27 = vunpack.c.h.bf16 %v423_v13 }
 0x1ce   : > { %v10163_v34 = vpop.eup %10162  ;;  %10182 = vrcp.f32 %v1581_v28  ;;  %v8506_v28 = vmul.f32 -1.442695, %v534_v17 }
 0x1cf   : > { %v10165_v37 = vpop.eup %10164  ;;  %3478 = vmatprep.mubr.bf16.mxu1 %v2168_v32  ;;  %v2170_v38 = vpack.c.bf16 %v10163_v34, %v10161_v31  ;;  %10184 = vpow2.f32 %v8671_v25  ;;  %v535_v31 = vunpack.c.l.bf16 %v417_v23  ;;  %v536_v34 = vunpack.c.h.bf16 %v417_v23 }
 0x1d0   : > { %v10167_v40 = vpop.eup %10166  ;;  %v1594_v41 = vadd.f32 1.0, %v10165_v37  ;;  %10186 = vpow2.f32 %v8685_v29  ;;  %v424_v37 = vld [vmem:[%s11289_s23 + $0x68] sm:$0xff] }
 0x1d1   : > { %v10169_v42 = vpop.eup %10168  ;;  %3575 = vmatprep.mubr.bf16.mxu0 %v2170_v38  ;;  %v1608_v43 = vadd.f32 1.0, %v10167_v40  ;;  %10188 = vpow2.f32 %v8698_v33  ;;  %v8519_v33 = vmul.f32 -1.442695, %v547_v22  ;;  %v8520_v40 = vmul.f32 -1.442695, %v548_v27 }
 0x1d2   : > { %v10171_v45 = vpop.eup %10170  ;;  %10190 = vrcp.f32 %v1594_v41  ;;  %v1596_v46 = vadd.f32 1.0, %v10169_v42 }
 0x1d3   : > { %v10173_v48 = vpop.eup %10172  ;;  %10192 = vrcp.f32 %v1608_v43  ;;  %v1610_v49 = vadd.f32 1.0, %v10171_v45  ;;  %v8507_v43 = vmul.f32 -1.442695, %v535_v31  ;;  %v549_v45 = vunpack.c.l.bf16 %v424_v37 }
 0x1d4   : > { %v10175_v52 = vpop.eup %10174  ;;  %10194 = vrcp.f32 %v1596_v46  ;;  %v8508_v46 = vmul.f32 -1.442695, %v536_v34 }
 0x1d5   : > { %v10177_v53 = vpop.eup %10176  ;;  %v2167_v54 = vpack.c.bf16 %v10175_v52, %v10173_v48  ;;  %10196 = vrcp.f32 %v1610_v49  ;;  %v550_v49 = vunpack.c.h.bf16 %v424_v37  ;;  %v11690_v52 = vld [vmem:[%s11289_s23 + $0xd0] sm:$0xff] }
 0x1d6   : > { %v10179_v56 = vpop.eup %10178  ;;  %v1593_v57 = vadd.f32 1.0, %v10177_v53  ;;  %10198 = vpow2.f32 %v8712_v47  ;;  %v576_v0 = vunpack.c.h.bf16 %v11690_v52  ;;  %v575_v34 = vunpack.c.l.bf16 %v11690_v52 }
 0x1d7   : > { %v10181_v58 = vpop.eup %10180  ;;  %3479 = vmatmul.mubr.bf16.gmra.mrb[68].mxu1 %v2167_v54  ;;  %10200 = vpow2.f32 %v8700_v50  ;;  %v11687_v50 = vld [vmem:[%s11289_s23 + $0x98] sm:$0xff] }
 0x1d8   : > { %v10183_v62 = vpop.eup %10182  ;;  %v1607_v63 = vadd.f32 1.0, %v10181_v58  ;;  %10202 = vrcp.f32 %v1593_v57  ;;  %v8521_v57 = vmul.f32 -1.442695, %v549_v45  ;;  %v562_v58 = vunpack.c.h.bf16 %v11687_v50  ;;  %v11719_v45 = vld [vmem:[%s11289_s23 + $0x148] sm:$0xff] }
 0x1d9   : > { %v10185_v1 = vpop.eup %10184  ;;  %v2169_v2 = vpack.c.bf16 %v10183_v62, %v10179_v56  ;;  %10204 = vpow2.f32 %v8714_v55 }
 0x1da   : > { %v10187_v4 = vpop.eup %10186  ;;  %10206 = vrcp.f32 %v1607_v63  ;;  %v1595_v5 = vadd.f32 1.0, %v10185_v1  ;;  %v8522_v63 = vmul.f32 -1.442695, %v550_v49  ;;  %v8872_v1 = vpop.f32.mrb[1].mxu0  ;;  %v8534_v17 = vmul.f32 -1.442695, %v562_v58 }
 0x1db   : > { %v10189_v7 = vpop.eup %10188  ;;  %3576 = vmatmul.mubr.bf16.gmra.mrb[68].mxu0 %v2169_v2  ;;  %v1609_v8 = vadd.f32 1.0, %v10187_v4  ;;  %10208 = vpow2.f32 %v8697_v60  ;;  %v8895_v60 = vpop.f32.mrb[0].mxu1  ;;  %v11697_v6 = vadd.f32 %v8872_v1, %v8871_v59 }
 0x1dc   : > { %v10191_v10 = vpop.eup %10190  ;;  %10210 = vrcp.f32 %v1595_v5  ;;  %v1622_v11 = vadd.f32 1.0, %v10189_v7  ;;  %v8896_v2 = vpop.f32.mrb[1].mxu1  ;;  %v11695_v5 = vld [vmem:[%s11289_s23 + $0xa0] sm:$0xff] }
 0x1dd   : > { %v10193_v15 = vpop.eup %10192  ;;  %10212 = vrcp.f32 %v1609_v8  ;;  %v11699_v7 = vadd.f32 %v8896_v2, %v8895_v60  ;;  %v8874_v8 = vpop.f32.mrb[2].mxu0  ;;  %v564_v22 = vunpack.c.h.bf16 %v11695_v5 }
 0x1de   : > { %v10195_v18 = vpop.eup %10194  ;;  %v2182_v19 = vpack.c.bf16 %v10193_v15, %v10191_v10  ;;  %10214 = vrcp.f32 %v1622_v11  ;;  %v8875_v13 = vpop.f32.mrb[3].mxu0 }
 0x1df   : > { %v10197_v21 = vpop.eup %10196  ;;  %10216 = vpow2.f32 %v8711_v9  ;;  %v8898_v9 = vpop.f32.mrb[2].mxu1 }
 0x1e0   : > { %v10199_v14 = vpop.eup %10198  ;;  %3486 = vmatprep.mubr.bf16.mxu1 %v2182_v19  ;;  %v2184_v24 = vpack.c.bf16 %v10197_v21, %v10195_v18  ;;  %10218 = vpow2.f32 %v8699_v12  ;;  %v438_v12 = vld [vmem:[%s11289_s23 + $0xd8] sm:$0xff]  ;;  %v8899_v15 = vpop.f32.mrb[3].mxu1  ;;  %v11702_v18 = vadd.f32 %v8875_v13, %v8874_v8 }
 0x1e1   : > { %v10201_v25 = vpop.eup %10200  ;;  %v1636_v26 = vadd.f32 1.0, %v10199_v14  ;;  %10220 = vpow2.f32 %v8713_v16  ;;  %v11704_v19 = vadd.f32 %v8899_v15, %v8898_v9 }
 0x1e2   : > { %v10203_v29 = vpop.eup %10202  ;;  %3583 = vmatprep.mubr.bf16.mxu0 %v2184_v24  ;;  %v1624_v30 = vadd.f32 1.0, %v10201_v25  ;;  %10222 = vpow2.f32 %v8505_v20  ;;  %v8548_v24 = vmul.f32 -1.442695, %v576_v0  ;;  %v578_v25 = vunpack.c.h.bf16 %v438_v12 }
 0x1e3   : > { %v10205_v32 = vpop.eup %10204  ;;  %10224 = vrcp.f32 %v1636_v26 }
 0x1e4   : > { %v10207_v35 = vpop.eup %10206  ;;  %v1638_v36 = vadd.f32 1.0, %v10205_v32  ;;  %10226 = vrcp.f32 %v1624_v30  ;;  %v11709_v30 = vld [vmem:[%s11289_s23 + $0x108] sm:$0xff]  ;;  %v8550_v37 = vmul.f32 -1.442695, %v578_v25 }
 0x1e5   : > { %v10209_v38 = vpop.eup %10208  ;;  %v2181_v39 = vpack.c.bf16 %v10207_v35, %v10203_v29  ;;  %10228 = vpow2.f32 %v8506_v28  ;;  %v561_v29 = vunpack.c.l.bf16 %v11687_v50  ;;  %v8547_v50 = vmul.f32 -1.442695, %v575_v34 }
 0x1e6   : > { %v10211_v41 = vpop.eup %10210  ;;  %10230 = vrcp.f32 %v1638_v36  ;;  %v1621_v42 = vadd.f32 1.0, %v10209_v38  ;;  %v563_v38 = vunpack.c.l.bf16 %v11695_v5  ;;  %v8901_v5 = vpop.f32.mrb[4].mxu1 }
 0x1e7   : > { %v10213_v44 = vpop.eup %10212  ;;  %3487 = vmatmul.mubr.bf16.gmra.mrb[72].mxu1 %v2181_v39  ;;  %10232 = vpow2.f32 %v8519_v33  ;;  %v8536_v33 = vmul.f32 -1.442695, %v564_v22  ;;  %v451_v39 = vld [vmem:[%s11289_s23 + $0x140] sm:$0xff]  ;;  %v8902_v13 = vpop.f32.mrb[5].mxu1 }
 0x1e8   : > { %v10215_v47 = vpop.eup %10214  ;;  %v2183_v48 = vpack.c.bf16 %v10213_v44, %v10211_v41  ;;  %10234 = vrcp.f32 %v1621_v42  ;;  %v590_v44 = vunpack.c.h.bf16 %v11709_v30  ;;  %v603_v0 = vunpack.c.l.bf16 %v451_v39 }
 0x1e9   : > { %v10217_v51 = vpop.eup %10216  ;;  %10236 = vpow2.f32 %v8520_v40  ;;  %v11715_v40 = vld [vmem:[%s11289_s23 + $0x110] sm:$0xff] }
 0x1ea   : > { %v10219_v53 = vpop.eup %10218  ;;  %3584 = vmatmul.mubr.bf16.gmra.mrb[72].mxu0 %v2183_v48  ;;  %v1635_v54 = vadd.f32 1.0, %v10217_v51  ;;  %10238 = vpow2.f32 %v8507_v43  ;;  %v577_v43 = vunpack.c.l.bf16 %v438_v12  ;;  %v8533_v48 = vmul.f32 -1.442695, %v561_v29 }
 0x1eb   : > { %v10221_v55 = vpop.eup %10220  ;;  %v1623_v56 = vadd.f32 1.0, %v10219_v53  ;;  %10240 = vpow2.f32 %v8508_v46  ;;  %v604_v51 = vunpack.c.h.bf16 %v451_v39  ;;  %v592_v52 = vunpack.c.h.bf16 %v11715_v40 }
 0x1ec   : > { %v10223_v61 = vpop.eup %10222  ;;  %10242 = vrcp.f32 %v1635_v54  ;;  %v1637_v62 = vadd.f32 1.0, %v10221_v55  ;;  %v8535_v55 = vmul.f32 -1.442695, %v563_v38  ;;  %v8549_v59 = vmul.f32 -1.442695, %v577_v43 }
 0x1ed   : > { %v10225_v3 = vpop.eup %10224  ;;  %10244 = vrcp.f32 %v1623_v56  ;;  %v1429_v4 = vadd.f32 1.0, %v10223_v61  ;;  %v606_v56 = vunpack.c.h.bf16 %v11719_v45  ;;  %v8562_v60 = vmul.f32 -1.442695, %v590_v44 }
 0x1ee   : > { %v10227_v10 = vpop.eup %10226  ;;  %v2196_v11 = vpack.c.bf16 %v10225_v3, %v10215_v47  ;;  %10246 = vrcp.f32 %v1637_v62  ;;  %v8576_v2 = vmul.f32 -1.442695, %v604_v51  ;;  %v11726_v3 = vmul.f32 -1.442695, %v592_v52 }
 0x1ef   : > { %v10229_v16 = vpop.eup %10228  ;;  %10248 = vpow2.f32 %v8521_v57  ;;  %v11728_v9 = vmul.f32 -1.442695, %v606_v56 }
 0x1f0   : > { %v10231_v20 = vpop.eup %10230  ;;  %3494 = vmatprep.mubr.bf16.mxu1 %v2196_v11  ;;  %v1430_v21 = vadd.f32 1.0, %v10229_v16  ;;  %10250 = vpow2.f32 %v8522_v63  ;;  %v589_v63 = vunpack.c.l.bf16 %v11709_v30  ;;  %v605_v11 = vunpack.c.l.bf16 %v11719_v45 }
 0x1f1   : > { %v10233_v23 = vpop.eup %10232  ;;  %v2198_v14 = vpack.c.bf16 %v10231_v20, %v10227_v10  ;;  %10252 = vrcp.f32 %v1429_v4  ;;  %v8877_v4 = vpop.f32.mrb[4].mxu0  ;;  %v591_v10 = vunpack.c.l.bf16 %v11715_v40 }
 0x1f2   : > { %v10235_v26 = vpop.eup %10234  ;;  %10254 = vrcp.f32 %v1430_v21  ;;  %v1443_v27 = vadd.f32 1.0, %v10233_v23  ;;  %v8878_v12 = vpop.f32.mrb[5].mxu0  ;;  %v11737_v21 = vadd.f32 %v8902_v13, %v8901_v5  ;;  %v11740_v25 = vmul.f32 -1.442695, %v589_v63 }
 0x1f3   : > { %v10237_v28 = vpop.eup %10236  ;;  %3591 = vmatprep.mubr.bf16.mxu0 %v2198_v14  ;;  %10256 = vpow2.f32 %v8534_v17  ;;  %v11733_v17 = vld [vmem:[%s11289_s23 + $0x178] sm:$0xff]  ;;  %v11735_v20 = vadd.f32 %v8878_v12, %v8877_v4  ;;  %v8880_v22 = vpop.f32.mrb[6].mxu0  ;;  %v11759_v40 = vmul.f32 -1.442695, %v591_v10  ;;  %v11762_v45 = vmul.f32 -1.442695, %v605_v11 }
 0x1f4   : > { %v10239_v31 = vpop.eup %10238  ;;  %v1444_v32 = vadd.f32 1.0, %v10237_v28  ;;  %10258 = vrcp.f32 %v1443_v27  ;;  %v8904_v23 = vpop.f32.mrb[6].mxu1 }
 0x1f5   : > { %v10241_v35 = vpop.eup %10240  ;;  %v1431_v36 = vadd.f32 1.0, %v10239_v31  ;;  %10260 = vpow2.f32 %v8548_v24  ;;  %v8881_v27 = vpop.f32.mrb[7].mxu0  ;;  %v11745_v31 = vld [vmem:[%s11289_s23 + $0x1b0] sm:$0xff] }
 0x1f6   : > { %v10243_v41 = vpop.eup %10242  ;;  %10262 = vrcp.f32 %v1444_v32  ;;  %v1432_v42 = vadd.f32 1.0, %v10241_v35  ;;  %v8905_v28 = vpop.f32.mrb[7].mxu1  ;;  %v11748_v32 = vld [vmem:[%s11289_s23 + $0x180] sm:$0xff]  ;;  %v11753_v34 = vadd.f32 %v8881_v27, %v8880_v22  ;;  %v632_v51 = vunpack.c.h.bf16 %v11745_v31 }
 0x1f7   : > { %v10245_v46 = vpop.eup %10244  ;;  %v2195_v47 = vpack.c.bf16 %v10243_v41, %v10235_v26  ;;  %10264 = vrcp.f32 %v1431_v36  ;;  %v11742_v26 = vmul.f32 -1.442695, %v603_v0  ;;  %v11755_v35 = vadd.f32 %v8905_v28, %v8904_v23  ;;  %v8883_v36 = vpop.f32.mrb[8].mxu0 }
 0x1f8   : > { %v10247_v49 = vpop.eup %10246  ;;  %10266 = vrcp.f32 %v1432_v42  ;;  %v618_v41 = vunpack.c.h.bf16 %v11733_v17  ;;  %v8884_v42 = vpop.f32.mrb[9].mxu0  ;;  %v620_v52 = vunpack.c.h.bf16 %v11748_v32 }
 0x1f9   : > { %v10249_v53 = vpop.eup %10248  ;;  %3495 = vmatmul.mubr.bf16.gmra.mrb[76].mxu1 %v2195_v47  ;;  %v2197_v54 = vpack.c.bf16 %v10247_v49, %v10245_v46  ;;  %10268 = vpow2.f32 %v8536_v33  ;;  %v11751_v33 = vld [vmem:[%s11289_s23 + $0x1b8] sm:$0xff]  ;;  %v11764_v46 = vadd.f32 %v8884_v42, %v8883_v36 }
 0x1fa   : > { %v10251_v57 = vpop.eup %10250  ;;  %v1445_v58 = vadd.f32 1.0, %v10249_v53  ;;  %10270 = vpow2.f32 %v8550_v37  ;;  %v8907_v37 = vpop.f32.mrb[8].mxu1  ;;  %v634_v53 = vunpack.c.h.bf16 %v11751_v33  ;;  %v11776_v0 = vmul.f32 -1.442695, %v618_v41 }
 0x1fb   : > { %v11723_v61 = vpop.eup %10252  ;;  %3592 = vmatmul.mubr.bf16.gmra.mrb[76].mxu0 %v2197_v54  ;;  %v1446_v62 = vadd.f32 1.0, %v10251_v57  ;;  %10272 = vpow2.f32 %v8533_v48  ;;  %v8908_v43 = vpop.f32.mrb[9].mxu1  ;;  %v11786_v22 = vmul.f32 -1.442695, %v620_v52  ;;  %v631_v52 = vunpack.c.l.bf16 %v11745_v31 }
 0x1fc   : > { %v10255_v1 = vpop.eup %10254  ;;  %10274 = vrcp.f32 %v1445_v58  ;;  %v11766_v47 = vadd.f32 %v8908_v43, %v8907_v37  ;;  %v8886_v48 = vpop.f32.mrb[10].mxu0  ;;  %v633_v31 = vunpack.c.l.bf16 %v11751_v33 }
 0x1fd   : > { %v10257_v8 = vpop.eup %10256  ;;  %10276 = vrcp.f32 %v1446_v62  ;;  %v8910_v49 = vpop.f32.mrb[10].mxu1 }
 0x1fe   : > { %v10259_v15 = vpop.eup %10258  ;;  %v1458_v16 = vadd.f32 1.0, %v10257_v8  ;;  %10278 = vpow2.f32 %v8547_v50  ;;  %v8887_v54 = vpop.f32.mrb[11].mxu0 }
 0x1ff   : > { %v10261_v14 = vpop.eup %10260  ;;  %v2101_v24 = vpack.c.bf16 %v10259_v15, %v11723_v61  ;;  %10280 = vpow2.f32 %v8535_v55  ;;  %v8911_v55 = vpop.f32.mrb[11].mxu1  ;;  %v11771_v58 = vadd.f32 %v8887_v54, %v8886_v48 }
 0x200   : > { %v10263_v29 = vpop.eup %10262  ;;  %v1472_v30 = vadd.f32 1.0, %v10261_v14  ;;  %10282 = vrcp.f32 %v1458_v16  ;;  %v8889_v61 = vpop.f32.mrb[12].mxu0 }
 0x201   : > { %v11757_v38 = vpop.eup %10264  ;;  %v2102_v39 = vpack.c.bf16 %v10263_v29, %v10255_v1  ;;  %10284 = vpow2.f32 %v8549_v59  ;;  %v11773_v59 = vadd.f32 %v8911_v55, %v8910_v49  ;;  %v8913_v62 = vpop.f32.mrb[12].mxu1  ;;  %v617_v1 = vunpack.c.l.bf16 %v11733_v17 }
 0x202   : > { %v10267_v44 = vpop.eup %10266  ;;  %10286 = vrcp.f32 %v1472_v30  ;;  %v8890_v4 = vpop.f32.mrb[13].mxu0 }
 0x203   : > { %v10269_v50 = vpop.eup %10268  ;;  %3632 = vmatprep.mubr.bf16.mxu1 %v2102_v39  ;;  %10288 = vpow2.f32 %v8562_v60  ;;  %v8914_v5 = vpop.f32.mrb[13].mxu1  ;;  %v11797_v54 = vmul.f32 -1.442695, %v617_v1 }
 0x204   : > { %v10271_v56 = vpop.eup %10270  ;;  %3633 = vmatmul.mubr.bf16.vlgmr.msra.gmra.mrb[80].mxu1 %v2101_v24  ;;  %v1460_v57 = vadd.f32 1.0, %v10269_v50  ;;  %10290 = vpow2.f32 %v8576_v2  ;;  %v11779_v2 = vadd.f32 %v8890_v4, %v8889_v61  ;;  %v11781_v11 = vadd.f32 %v8914_v5, %v8913_v62  ;;  %v8892_v12 = vpop.f32.mrb[14].mxu0 }
 0x205   : > { %v10273_v63 = vpop.eup %10272  ;;  %v1474_v60 = vadd.f32 1.0, %v10271_v56  ;;  %10292 = vpow2.f32 %v11726_v3  ;;  %v8916_v13 = vpop.f32.mrb[14].mxu1  ;;  %v11784_v3 = vmul.f32 -1.442695, %v632_v51 }
 0x206   : > { %v10275_v8 = vpop.eup %10274  ;;  %10294 = vrcp.f32 %v1460_v57  ;;  %v1457_v10 = vadd.f32 1.0, %v10273_v63  ;;  %v8893_v17 = vpop.f32.mrb[15].mxu0 }
 0x207   : > { %v10277_v15 = vpop.eup %10276  ;;  %v2103_v16 = vpack.c.bf16 %v10275_v8, %v11757_v38  ;;  %10296 = vrcp.f32 %v1474_v60  ;;  %v8917_v23 = vpop.f32.mrb[15].mxu1  ;;  %v11788_v27 = vadd.f32 %v8893_v17, %v8892_v12  ;;  %v11793_v38 = vmul.f32 -1.442695, %v634_v53 }
 0x208   : > { %v10279_v14 = vpop.eup %10278  ;;  %v2104_v24 = vpack.c.bf16 %v10277_v15, %v10267_v44  ;;  %10298 = vrcp.f32 %v1457_v10  ;;  %v11790_v28 = vadd.f32 %v8917_v23, %v8916_v13  ;;  %v8935_v29 = vpop.f32.mrb[16].mxu1 }
 0x209   : > { %v8999_v30 = vpop.f32.mrb[16].mxu0  ;;  %v10281_v36 = vpop.eup %10280  ;;  %v1471_v37 = vadd.f32 1.0, %v10279_v14  ;;  %10300 = vpow2.f32 %v11728_v9  ;;  %v619_v9 = vunpack.c.l.bf16 %v11748_v32 }
 0x20a   : > { %v8936_v39 = vpop.f32.mrb[17].mxu1  ;;  %v9000_v41 = vpop.f32.mrb[17].mxu0  ;;  %3729 = vmatprep.mubr.bf16.mxu0 %v2104_v24  ;;  %v1459_v43 = vadd.f32 1.0, %v10281_v36  ;;  %10302 = vpow2.f32 %v11740_v25 }
 0x20b   : > { %v10283_v42 = vpop.eup %10282  ;;  %v8937_v44 = vadd.f32 %v8936_v39, %v8935_v29  ;;  %v9001_v48 = vadd.f32 %v9000_v41, %v8999_v30  ;;  %v8938_v49 = vpop.f32.mrb[18].mxu1  ;;  %3730 = vmatmul.mubr.bf16.vlgmr.msra.gmra.mrb[80].mxu0 %v2103_v16  ;;  %10304 = vrcp.f32 %v1471_v37 }
 0x20c   : > { %v9002_v50 = vpop.f32.mrb[18].mxu0  ;;  %v10285_v51 = vpop.eup %10284  ;;  %10306 = vrcp.f32 %v1459_v43 }
 0x20d   : > { %v8939_v53 = vpop.f32.mrb[19].mxu1  ;;  %v9003_v55 = vpop.f32.mrb[19].mxu0  ;;  %v1473_v57 = vadd.f32 1.0, %v10285_v51  ;;  %v3247_v25 = vadd.f32 %v8937_v44, %v11697_v6  ;;  %10308 = vpow2.f32 %v11742_v26 }
 0x20e   : > { %v10287_v56 = vpop.eup %10286  ;;  %v8940_v61 = vadd.f32 %v8939_v53, %v8938_v49  ;;  %v8941_v62 = vpop.f32.mrb[20].mxu1  ;;  %v9004_v1 = vadd.f32 %v9003_v55, %v9002_v50 }
 0x20f   : > { %v9005_v63 = vpop.f32.mrb[20].mxu0  ;;  %v10289_v60 = vpop.eup %10288  ;;  %v2116_v4 = vpack.c.bf16 %v10287_v56, %v10283_v42  ;;  %10310 = vrcp.f32 %v1473_v57  ;;  %v11803_v12 = vadd.f32 %v9001_v48, %v3247_v25  ;;  %v11809_v42 = vmul.f32 -1.442695, %v631_v52 }
 0x210   : > { %v8942_v5 = vpop.f32.mrb[21].mxu1  ;;  %v9006_v8 = vpop.f32.mrb[21].mxu0  ;;  %v1486_v10 = vadd.f32 1.0, %v10289_v60  ;;  %v3250_v13 = vadd.f32 %v8940_v61, %v11702_v18  ;;  %10312 = vpow2.f32 %v11759_v40  ;;  %v11814_v25 = vmul.f32 -1.442695, %v619_v9 }
 0x211   : > { %v10291_v32 = vpop.eup %10290  ;;  %v8944_v6 = vpop.f32.mrb[22].mxu1  ;;  %3640 = vmatprep.mubr.bf16.mxu1 %v2116_v4  ;;  %v8943_v26 = vadd.f32 %v8942_v5, %v8941_v62  ;;  %v9007_v23 = vadd.f32 %v9006_v8, %v9005_v63  ;;  %v11820_v4 = vld [vmem:[%s11289_s23 + $0x1e8] sm:$0xff] }
 0x212   : > { %v9008_v15 = vpop.f32.mrb[22].mxu0  ;;  %v10293_v16 = vpop.eup %10292  ;;  %v1500_v17 = vadd.f32 1.0, %v10291_v32  ;;  %10314 = vrcp.f32 %v1486_v10  ;;  %v11807_v36 = vadd.f32 %v9004_v1, %v3250_v13 }
 0x213   : > { %v8945_v14 = vpop.f32.mrb[23].mxu1  ;;  %v9009_v24 = vpop.f32.mrb[23].mxu0  ;;  %v1488_v30 = vadd.f32 1.0, %v10293_v16  ;;  %v3255_v43 = vadd.f32 %v8943_v26, %v11735_v20 }
 0x214   : > { %v10295_v29 = vpop.eup %10294  ;;  %v8946_v37 = vadd.f32 %v8945_v14, %v8944_v6  ;;  %v8947_v39 = vpop.f32.mrb[24].mxu1  ;;  %10316 = vrcp.f32 %v1500_v17  ;;  %v9010_v44 = vadd.f32 %v9009_v24, %v9008_v15  ;;  %v646_v14 = vunpack.c.h.bf16 %v11820_v4 }
 0x215   : > { %v9011_v41 = vpop.f32.mrb[24].mxu0  ;;  %v10297_v18 = vpop.eup %10296  ;;  %10318 = vrcp.f32 %v1488_v30  ;;  %v11816_v52 = vadd.f32 %v9007_v23, %v3255_v43 }
 0x216   : > { %v8948_v40 = vpop.f32.mrb[25].mxu1  ;;  %v9012_v48 = vpop.f32.mrb[25].mxu0  ;;  %v2118_v50 = vpack.c.bf16 %v10297_v18, %v10295_v29  ;;  %v3258_v51 = vadd.f32 %v8946_v37, %v11753_v34  ;;  %10320 = vpow2.f32 %v11762_v45 }
 0x217   : > { %v10299_v49 = vpop.eup %10298  ;;  %v8949_v53 = vadd.f32 %v8948_v40, %v8947_v39  ;;  %v8950_v55 = vpop.f32.mrb[26].mxu1  ;;  %v9013_v20 = vadd.f32 %v9012_v48, %v9011_v41  ;;  %10322 = vpow2.f32 %v11776_v0  ;;  %v11832_v41 = vld [vmem:[%s11289_s23 + $0x220] sm:$0xff] }
 0x218   : > { %v9014_v56 = vpop.f32.mrb[26].mxu0  ;;  %v10301_v57 = vpop.eup %10300  ;;  %3737 = vmatprep.mubr.bf16.mxu0 %v2118_v50  ;;  %v11822_v34 = vadd.f32 %v9010_v44, %v3258_v51  ;;  %10324 = vpow2.f32 %v11784_v3 }
 0x219   : > { %v8951_v61 = vpop.f32.mrb[27].mxu1  ;;  %v9015_v62 = vpop.f32.mrb[27].mxu0  ;;  %v1502_v60 = vadd.f32 1.0, %v10301_v57  ;;  %v3263_v1 = vadd.f32 %v8949_v53, %v11764_v46  ;;  %v11839_v53 = vld [vmem:[%s11289_s23 + $0x1f0] sm:$0xff]  ;;  %v660_v57 = vunpack.c.h.bf16 %v11832_v41 }
 0x21a   : > { %v10303_v63 = vpop.eup %10302  ;;  %v8953_v5 = vpop.f32.mrb[28].mxu1  ;;  %v8952_v32 = vadd.f32 %v8951_v61, %v8950_v55  ;;  %v9016_v10 = vadd.f32 %v9015_v62, %v9014_v56 }
 0x21b   : > { %v9017_v45 = vpop.f32.mrb[28].mxu0  ;;  %v10305_v9 = vpop.eup %10304  ;;  %v1485_v8 = vadd.f32 1.0, %v10303_v63  ;;  %10326 = vrcp.f32 %v1502_v60  ;;  %v11826_v0 = vadd.f32 %v9013_v20, %v3263_v1 }
 0x21c   : > { %v8954_v13 = vpop.f32.mrb[29].mxu1  ;;  %v9018_v6 = vpop.f32.mrb[29].mxu0  ;;  %v2115_v16 = vpack.c.bf16 %v10305_v9, %v10299_v49  ;;  %v3266_v24 = vadd.f32 %v8952_v32, %v11771_v58  ;;  %v8618_v32 = vmul.f32 -1.442695, %v646_v14 }
 0x21d   : > { %v10307_v15 = vpop.eup %10306  ;;  %v8955_v17 = vadd.f32 %v8954_v13, %v8953_v5  ;;  %v8956_v26 = vpop.f32.mrb[30].mxu1  ;;  %10328 = vrcp.f32 %v1485_v8  ;;  %v9019_v3 = vadd.f32 %v9018_v6, %v9017_v45 }
 0x21e   : > { %v9020_v23 = vpop.f32.mrb[30].mxu0  ;;  %v10309_v46 = vpop.eup %10308  ;;  %3641 = vmatmul.mubr.bf16.gmra.mrb[84].mxu1 %v2115_v16  ;;  %10330 = vpow2.f32 %v11786_v22  ;;  %v11836_v48 = vadd.f32 %v9016_v10, %v3266_v24  ;;  %v11855_v10 = vld [vmem:[%s11289_s23 + $0x228] sm:$0xff] }
 0x21f   : > { %v8957_v29 = vpop.f32.mrb[31].mxu1  ;;  %v9021_v30 = vpop.f32.mrb[31].mxu0  ;;  %v1499_v39 = vadd.f32 1.0, %v10309_v46  ;;  %v3271_v18 = vadd.f32 %v8955_v17, %v11779_v2  ;;  %10332 = vpow2.f32 %v11793_v38  ;;  %v8605_v38 = vmul.f32 -1.442695, %v633_v31 }
 0x220   : > { %v10311_v37 = vpop.eup %10310  ;;  %v8958_v43 = vadd.f32 %v8957_v29, %v8956_v26  ;;  %v9022_v58 = vadd.f32 %v9021_v30, %v9020_v23  ;;  %v8959_v49 = vpop.f32.mrb[32].mxu1  ;;  %v662_v14 = vunpack.c.h.bf16 %v11855_v10 }
 0x221   : > { %v10313_v44 = vpop.eup %10312  ;;  %v2117_v40 = vpack.c.bf16 %v10311_v37, %v10307_v15  ;;  %10334 = vrcp.f32 %v1499_v39  ;;  %v11841_v55 = vadd.f32 %v9019_v3, %v3271_v18  ;;  %v8960_v56 = vpop.f32.mrb[33].mxu1 }
 0x222   : > { %v10315_v50 = vpop.eup %10314  ;;  %v1487_v51 = vadd.f32 1.0, %v10313_v44  ;;  %v3274_v22 = vadd.f32 %v8958_v43, %v11788_v27  ;;  %10336 = vpow2.f32 %v11797_v54  ;;  %v8961_v20 = vadd.f32 %v8960_v56, %v8959_v49  ;;  %v8962_v61 = vpop.f32.mrb[34].mxu1 }
 0x223   : > { %v10317_v2 = vpop.eup %10316  ;;  %3738 = vmatmul.mubr.bf16.gmra.mrb[84].mxu0 %v2117_v40  ;;  %v9023_v1 = vpop.f32.mrb[32].mxu0  ;;  %v648_v54 = vunpack.c.h.bf16 %v11839_v53  ;;  %v645_v49 = vunpack.c.l.bf16 %v11820_v4 }
 0x224   : > { %v10319_v62 = vpop.eup %10318  ;;  %v2130_v63 = vpack.c.bf16 %v10317_v2, %v10315_v50  ;;  %10338 = vrcp.f32 %v1487_v51  ;;  %v11848_v60 = vadd.f32 %v9022_v58, %v3274_v22  ;;  %v8963_v27 = vpop.f32.mrb[35].mxu1  ;;  %v3279_v33 = vadd.f32 %v8961_v20, %v11699_v7 }
 0x225   : > { %v10321_v5 = vpop.eup %10320  ;;  %10340 = vpow2.f32 %v11809_v42  ;;  %v9024_v31 = vpop.f32.mrb[33].mxu0  ;;  %v8964_v45 = vadd.f32 %v8963_v27, %v8962_v61  ;;  %v8632_v42 = vmul.f32 -1.442695, %v660_v57  ;;  %v8634_v58 = vmul.f32 -1.442695, %v662_v14 }
 0x226   : > { %v10323_v9 = vpop.eup %10322  ;;  %3648 = vmatprep.mubr.bf16.mxu1 %v2130_v63  ;;  %v1501_v8 = vadd.f32 1.0, %v10321_v5  ;;  %10342 = vpow2.f32 %v11814_v25  ;;  %v9025_v13 = vadd.f32 %v9024_v31, %v9023_v1  ;;  %v9026_v6 = vpop.f32.mrb[34].mxu0  ;;  %v659_v22 = vunpack.c.l.bf16 %v11832_v41  ;;  %v11871_v1 = vld [vmem:[%s11289_s23 + $0x290] sm:$0xff] }
 0x227   : > { %v10325_v15 = vpop.eup %10324  ;;  %v1514_v16 = vadd.f32 1.0, %v10323_v9  ;;  %10344 = vpow2.f32 %v8605_v38  ;;  %v3282_v17 = vadd.f32 %v8964_v45, %v11704_v19  ;;  %v9027_v26 = vpop.f32.mrb[35].mxu0  ;;  %v8620_v19 = vmul.f32 -1.442695, %v648_v54  ;;  %v11867_v38 = vld [vmem:[%s11289_s23 + $0x258] sm:$0xff]  ;;  %v11875_v54 = vld [vmem:[%s11289_s23 + $0x260] sm:$0xff] }
 0x228   : > { %v10327_v7 = vpop.eup %10326  ;;  %10346 = vrcp.f32 %v1501_v8  ;;  %v1528_v23 = vadd.f32 1.0, %v10325_v15  ;;  %v11858_v46 = vadd.f32 %v9025_v13, %v3279_v33  ;;  %v9028_v24 = vadd.f32 %v9027_v26, %v9026_v6  ;;  %v11878_v9 = vld [vmem:[%s11289_s23 + $0x298] sm:$0xff] }
 0x229   : > { %v10329_v3 = vpop.eup %10328  ;;  %v2132_v25 = vpack.c.bf16 %v10327_v7, %v10319_v62  ;;  %10348 = vrcp.f32 %v1514_v16  ;;  %v647_v2 = vunpack.c.l.bf16 %v11839_v53  ;;  %v661_v61 = vunpack.c.l.bf16 %v11855_v10 }
 0x22a   : > { %v10331_v29 = vpop.eup %10330  ;;  %10350 = vrcp.f32 %v1528_v23  ;;  %v11861_v30 = vadd.f32 %v9028_v24, %v3282_v17  ;;  %v8617_v63 = vmul.f32 -1.442695, %v645_v49  ;;  %v8631_v5 = vmul.f32 -1.442695, %v659_v22 }
 0x22b   : > { %v10333_v37 = vpop.eup %10332  ;;  %3745 = vmatprep.mubr.bf16.mxu0 %v2132_v25  ;;  %v1516_v39 = vadd.f32 1.0, %v10331_v29  ;;  %10352 = vpow2.f32 %v8618_v32  ;;  %v674_v53 = vunpack.c.h.bf16 %v11867_v38  ;;  %v8619_v45 = vmul.f32 -1.442695, %v647_v2  ;;  %v8965_v8 = vpop.f32.mrb[36].mxu1 }
 0x22c   : > { %v10335_v18 = vpop.eup %10334  ;;  %v1530_v43 = vadd.f32 1.0, %v10333_v37  ;;  %10354 = vpow2.f32 %v8632_v42  ;;  %v8633_v10 = vmul.f32 -1.442695, %v661_v61  ;;  %v688_v13 = vunpack.c.h.bf16 %v11871_v1  ;;  %v8966_v6 = vpop.f32.mrb[37].mxu1 }
 0x22d   : > { %v10337_v44 = vpop.eup %10336  ;;  %v2129_v40 = vpack.c.bf16 %v10335_v18, %v10329_v3  ;;  %10356 = vrcp.f32 %v1516_v39  ;;  %v676_v42 = vunpack.c.h.bf16 %v11875_v54  ;;  %v8967_v17 = vadd.f32 %v8966_v6, %v8965_v8  ;;  %v8968_v26 = vpop.f32.mrb[38].mxu1 }
 0x22e   : > { %v10339_v50 = vpop.eup %10338  ;;  %10358 = vrcp.f32 %v1530_v43  ;;  %v1513_v51 = vadd.f32 1.0, %v10337_v44  ;;  %v8646_v24 = vmul.f32 -1.442695, %v674_v53  ;;  %v690_v3 = vunpack.c.h.bf16 %v11878_v9  ;;  %v8969_v25 = vpop.f32.mrb[39].mxu1 }
 0x22f   : > { %v10341_v56 = vpop.eup %10340  ;;  %3649 = vmatmul.mubr.bf16.gmra.mrb[88].mxu1 %v2129_v40  ;;  %10360 = vpow2.f32 %v8620_v19  ;;  %v3287_v37 = vadd.f32 %v8967_v17, %v11737_v21  ;;  %v8970_v39 = vadd.f32 %v8969_v25, %v8968_v26  ;;  %v673_v18 = vunpack.c.l.bf16 %v11867_v38  ;;  %v11897_v26 = vld [vmem:[%s11289_s23 + $0x300] sm:$0xff] }
 0x230   : > { %v10343_v57 = vpop.eup %10342  ;;  %v1527_v20 = vadd.f32 1.0, %v10341_v56  ;;  %10362 = vrcp.f32 %v1513_v51  ;;  %v9029_v43 = vpop.f32.mrb[36].mxu0  ;;  %v8648_v21 = vmul.f32 -1.442695, %v676_v42 }
 0x231   : > { %v10345_v4 = vpop.eup %10344  ;;  %v1515_v62 = vadd.f32 1.0, %v10343_v57  ;;  %10364 = vpow2.f32 %v8634_v58  ;;  %v8660_v58 = vmul.f32 -1.442695, %v688_v13  ;;  %v9030_v49 = vpop.f32.mrb[37].mxu0  ;;  %v11893_v13 = vld [vmem:[%s11289_s23 + $0x2c8] sm:$0xff] }
 0x232   : > { %v10347_v41 = vpop.eup %10346  ;;  %10366 = vrcp.f32 %v1527_v20  ;;  %v1529_v27 = vadd.f32 1.0, %v10345_v4  ;;  %v9031_v56 = vadd.f32 %v9030_v49, %v9029_v43  ;;  %v9032_v2 = vpop.f32.mrb[38].mxu0  ;;  %v8662_v20 = vmul.f32 -1.442695, %v690_v3 }
 0x233   : > { %v10349_v33 = vpop.eup %10348  ;;  %v2131_v31 = vpack.c.bf16 %v10347_v41, %v10339_v50  ;;  %10368 = vrcp.f32 %v1515_v62  ;;  %v3290_v50 = vadd.f32 %v8970_v39, %v11755_v35  ;;  %v9033_v61 = vpop.f32.mrb[39].mxu0 }
 0x234   : > { %v10351_v32 = vpop.eup %10350  ;;  %10370 = vrcp.f32 %v1529_v27  ;;  %v11886_v62 = vadd.f32 %v9031_v56, %v3287_v37  ;;  %v687_v27 = vunpack.c.l.bf16 %v11871_v1 }
 0x235   : > { %v10353_v15 = vpop.eup %10352  ;;  %3746 = vmatmul.mubr.bf16.gmra.mrb[88].mxu0 %v2131_v31  ;;  %v2144_v16 = vpack.c.bf16 %v10351_v32, %v10349_v33  ;;  %10372 = vpow2.f32 %v8617_v63  ;;  %v9034_v63 = vadd.f32 %v9033_v61, %v9032_v2  ;;  %v675_v33 = vunpack.c.l.bf16 %v11875_v54 }
 0x236   : > { %v10355_v7 = vpop.eup %10354  ;;  %v1542_v23 = vadd.f32 1.0, %v10353_v15  ;;  %10374 = vpow2.f32 %v8631_v5  ;;  %v8645_v5 = vmul.f32 -1.442695, %v673_v18  ;;  %v8659_v15 = vmul.f32 -1.442695, %v687_v27 }
 0x237   : > { %v10357_v14 = vpop.eup %10356  ;;  %3656 = vmatprep.mubr.bf16.mxu1 %v2144_v16  ;;  %v1556_v29 = vadd.f32 1.0, %v10355_v7  ;;  %10376 = vpow2.f32 %v8619_v45  ;;  %v11890_v31 = vadd.f32 %v9034_v63, %v3290_v50  ;;  %v689_v54 = vunpack.c.l.bf16 %v11878_v9 }
 0x238   : > { %v10359_v19 = vpop.eup %10358  ;;  %10378 = vrcp.f32 %v1542_v23  ;;  %v8647_v17 = vmul.f32 -1.442695, %v675_v33 }
 0x239   : > { %v10361_v44 = vpop.eup %10360  ;;  %v2146_v40 = vpack.c.bf16 %v10359_v19, %v10357_v14  ;;  %10380 = vrcp.f32 %v1556_v29  ;;  %v11901_v29 = vld [vmem:[%s11289_s23 + $0x2d0] sm:$0xff]  ;;  %v8661_v43 = vmul.f32 -1.442695, %v689_v54 }
 0x23a   : > { %v10363_v51 = vpop.eup %10362  ;;  %v1544_v22 = vadd.f32 1.0, %v10361_v44  ;;  %10382 = vpow2.f32 %v8633_v10  ;;  %v8971_v7 = vpop.f32.mrb[40].mxu1  ;;  %v716_v44 = vunpack.c.h.bf16 %v11897_v26 }
 0x23b   : > { %v10365_v57 = vpop.eup %10364  ;;  %3753 = vmatprep.mubr.bf16.mxu0 %v2146_v40  ;;  %10384 = vpow2.f32 %v8646_v24  ;;  %v702_v24 = vunpack.c.h.bf16 %v11893_v13  ;;  %v8972_v3 = vpop.f32.mrb[41].mxu1 }
 0x23c   : > { %v10367_v38 = vpop.eup %10366  ;;  %v1558_v4 = vadd.f32 1.0, %v10365_v57  ;;  %10386 = vrcp.f32 %v1544_v22  ;;  %v9035_v37 = vpop.f32.mrb[40].mxu0  ;;  %v8973_v9 = vadd.f32 %v8972_v3, %v8971_v7 }
 0x23d   : > { %v10369_v41 = vpop.eup %10368  ;;  %v2143_v35 = vpack.c.bf16 %v10367_v38, %v10363_v51  ;;  %10388 = vpow2.f32 %v8660_v58  ;;  %v8974_v39 = vpop.f32.mrb[42].mxu1  ;;  %v11905_v51 = vld [vmem:[%s11289_s23 + $0x308] sm:$0xff] }
 0x23e   : > { %v10371_v53 = vpop.eup %10370  ;;  %10390 = vrcp.f32 %v1558_v4  ;;  %v9036_v40 = vpop.f32.mrb[41].mxu0  ;;  %v3295_v22 = vadd.f32 %v8973_v9, %v11766_v47  ;;  %v718_v47 = vunpack.c.h.bf16 %v11905_v51 }
 0x23f   : > { %v10373_v45 = vpop.eup %10372  ;;  %3657 = vmatmul.mubr.bf16.gmra.mrb[92].mxu1 %v2143_v35  ;;  %v2145_v8 = vpack.c.bf16 %v10371_v53, %v10369_v41  ;;  %10392 = vpow2.f32 %v8648_v21  ;;  %v8975_v58 = vpop.f32.mrb[43].mxu1  ;;  %v9037_v56 = vadd.f32 %v9036_v40, %v9035_v37  ;;  %v8674_v21 = vmul.f32 -1.442695, %v702_v24  ;;  %v11918_v24 = vld [vmem:[%s11289_s23 + $0x338] sm:$0xff] }
 0x240   : > { %v10375_v32 = vpop.eup %10374  ;;  %v1541_v10 = vadd.f32 1.0, %v10373_v45  ;;  %10394 = vpow2.f32 %v8662_v20  ;;  %v9038_v2 = vpop.f32.mrb[42].mxu0  ;;  %v704_v20 = vunpack.c.h.bf16 %v11901_v29  ;;  %v8976_v61 = vadd.f32 %v8975_v58, %v8974_v39 }
 0x241   : > { %v10377_v6 = vpop.eup %10376  ;;  %3754 = vmatmul.mubr.bf16.gmra.mrb[92].mxu0 %v2145_v8  ;;  %v1555_v1 = vadd.f32 1.0, %v10375_v32  ;;  %10396 = vpow2.f32 %v8645_v5  ;;  %v9039_v38 = vpop.f32.mrb[43].mxu0  ;;  %v11909_v41 = vadd.f32 %v9037_v56, %v3295_v22  ;;  %v717_v39 = vunpack.c.l.bf16 %v11905_v51 }
 0x242   : > { %v10379_v16 = vpop.eup %10378  ;;  %10398 = vrcp.f32 %v1541_v10  ;;  %v1543_v42 = vadd.f32 1.0, %v10377_v6  ;;  %v9040_v35 = vadd.f32 %v9039_v38, %v9038_v2  ;;  %v3298_v53 = vadd.f32 %v8976_v61, %v11773_v59  ;;  %v11931_v38 = vld [vmem:[%s11289_s23 + $0x378] sm:$0xff] }
 0x243   : > { %v10381_v23 = vpop.eup %10380  ;;  %10400 = vrcp.f32 %v1555_v1  ;;  %v8688_v10 = vmul.f32 -1.442695, %v716_v44  ;;  %v8676_v54 = vmul.f32 -1.442695, %v704_v20  ;;  %v8690_v59 = vmul.f32 -1.442695, %v718_v47 }
 0x244   : > { %v10383_v25 = vpop.eup %10382  ;;  %v2158_v14 = vpack.c.bf16 %v10381_v23, %v10379_v16  ;;  %10402 = vrcp.f32 %v1543_v42  ;;  %v11913_v6 = vadd.f32 %v9040_v35, %v3298_v53  ;;  %v701_v16 = vunpack.c.l.bf16 %v11893_v13 }
 0x245   : > { %v10385_v19 = vpop.eup %10384  ;;  %v1557_v18 = vadd.f32 1.0, %v10383_v25  ;;  %10404 = vpow2.f32 %v8659_v15  ;;  %v703_v25 = vunpack.c.l.bf16 %v11901_v29  ;;  %v8689_v2 = vmul.f32 -1.442695, %v717_v39 }
 0x246   : > { %v10387_v49 = vpop.eup %10386  ;;  %3664 = vmatprep.mubr.bf16.mxu1 %v2158_v14  ;;  %v1570_v50 = vadd.f32 1.0, %v10385_v19  ;;  %10406 = vpow2.f32 %v8647_v17  ;;  %v715_v17 = vunpack.c.l.bf16 %v11897_v26  ;;  %v11922_v14 = vld [vmem:[%s11289_s23 + $0x370] sm:$0xff]  ;;  %v8673_v13 = vmul.f32 -1.442695, %v701_v16 }
 0x247   : > { %v10389_v57 = vpop.eup %10388  ;;  %10408 = vrcp.f32 %v1557_v18  ;;  %v744_v29 = vunpack.c.h.bf16 %v11922_v14 }
 0x248   : > { %v10391_v4 = vpop.eup %10390  ;;  %v1584_v63 = vadd.f32 1.0, %v10389_v57  ;;  %10410 = vrcp.f32 %v1570_v50  ;;  %v8687_v18 = vmul.f32 -1.442695, %v715_v17  ;;  %v11928_v50 = vld [vmem:[%s11289_s23 + $0x340] sm:$0xff] }
 0x249   : > { %v10393_v27 = vpop.eup %10392  ;;  %v2160_v5 = vpack.c.bf16 %v10391_v4, %v10387_v49  ;;  %10412 = vpow2.f32 %v8661_v43  ;;  %v730_v43 = vunpack.c.h.bf16 %v11918_v24  ;;  %v8675_v49 = vmul.f32 -1.442695, %v703_v25 }
 0x24a   : > { %v10395_v33 = vpop.eup %10394  ;;  %10414 = vrcp.f32 %v1584_v63  ;;  %v1572_v45 = vadd.f32 1.0, %v10393_v27  ;;  %v8716_v47 = vmul.f32 -1.442695, %v744_v29  ;;  %v732_v53 = vunpack.c.h.bf16 %v11928_v50 }
 0x24b   : > { %v10397_v8 = vpop.eup %10396  ;;  %3761 = vmatprep.mubr.bf16.mxu0 %v2160_v5  ;;  %v1586_v32 = vadd.f32 1.0, %v10395_v33  ;;  %10416 = vpow2.f32 %v8674_v21  ;;  %v8977_v22 = vpop.f32.mrb[44].mxu1  ;;  %v8702_v61 = vmul.f32 -1.442695, %v730_v43 }
 0x24c   : > { %v10399_v1 = vpop.eup %10398  ;;  %10418 = vrcp.f32 %v1572_v45  ;;  %v1569_v15 = vadd.f32 1.0, %v10397_v8  ;;  %v8978_v57 = vpop.f32.mrb[45].mxu1  ;;  %v8704_v39 = vmul.f32 -1.442695, %v732_v53 }
 0x24d   : > { %v10401_v42 = vpop.eup %10400  ;;  %10420 = vrcp.f32 %v1586_v32  ;;  %v9041_v4 = vpop.f32.mrb[44].mxu0  ;;  %v8979_v63 = vadd.f32 %v8978_v57, %v8977_v22 }
 0x24e   : > { %v10403_v7 = vpop.eup %10402  ;;  %v2157_v23 = vpack.c.bf16 %v10401_v42, %v10399_v1  ;;  %10422 = vrcp.f32 %v1569_v15  ;;  %v8980_v35 = vpop.f32.mrb[46].mxu1  ;;  %v746_v42 = vunpack.c.h.bf16 %v11931_v38 }
 0x24f   : > { %v10405_v3 = vpop.eup %10404  ;;  %10424 = vpow2.f32 %v8688_v10  ;;  %v9042_v33 = vpop.f32.mrb[45].mxu0  ;;  %v3303_v32 = vadd.f32 %v8979_v63, %v11781_v11  ;;  %v729_v11 = vunpack.c.l.bf16 %v11918_v24  ;;  %v745_v63 = vunpack.c.l.bf16 %v11931_v38 }
 0x250   : > { %v10407_v37 = vpop.eup %10406  ;;  %3665 = vmatmul.mubr.bf16.gmra.mrb[96].mxu1 %v2157_v23  ;;  %v1583_v9 = vadd.f32 1.0, %v10405_v3  ;;  %10426 = vpow2.f32 %v8676_v54  ;;  %v8981_v45 = vpop.f32.mrb[47].mxu1  ;;  %v9043_v10 = vadd.f32 %v9042_v33, %v9041_v4  ;;  %v8718_v43 = vmul.f32 -1.442695, %v746_v42 }
 0x251   : > { %v10409_v26 = vpop.eup %10408  ;;  %v1571_v19 = vadd.f32 1.0, %v10407_v37  ;;  %10428 = vpow2.f32 %v8690_v59  ;;  %v9044_v1 = vpop.f32.mrb[46].mxu0  ;;  %v8982_v15 = vadd.f32 %v8981_v45, %v8980_v35  ;;  %v8701_v22 = vmul.f32 -1.442695, %v729_v11 }
 0x252   : > { %v10411_v44 = vpop.eup %10410  ;;  %v2159_v40 = vpack.c.bf16 %v10409_v26, %v10403_v7  ;;  %10430 = vrcp.f32 %v1583_v9  ;;  %v9045_v59 = vpop.f32.mrb[47].mxu0  ;;  %v11936_v7 = vadd.f32 %v9043_v10, %v3303_v32  ;;  %v731_v4 = vunpack.c.l.bf16 %v11928_v50 }
 0x253   : > { %v10413_v58 = vpop.eup %10412  ;;  %10432 = vrcp.f32 %v1571_v19  ;;  %v3306_v23 = vadd.f32 %v8982_v15, %v11790_v28  ;;  %v9046_v3 = vadd.f32 %v9045_v59, %v9044_v1 }
 0x254   : > { %v10415_v56 = vpop.eup %10414  ;;  %3762 = vmatmul.mubr.bf16.gmra.mrb[96].mxu0 %v2159_v40  ;;  %v1585_v51 = vadd.f32 1.0, %v10413_v58  ;;  %10434 = vpow2.f32 %v8673_v13  ;;  %v8703_v50 = vmul.f32 -1.442695, %v731_v4 }
 0x255   : > { %v10417_v21 = vpop.eup %10416  ;;  %v2172_v20 = vpack.c.bf16 %v10415_v56, %v10411_v44  ;;  %10436 = vpow2.f32 %v8687_v18  ;;  %v11940_v26 = vadd.f32 %v9046_v3, %v3306_v23  ;;  %v743_v44 = vunpack.c.l.bf16 %v11922_v14 }
 0x256   : > { %v10419_v27 = vpop.eup %10418  ;;  %10438 = vrcp.f32 %v1585_v51  ;;  %v1598_v5 = vadd.f32 1.0, %v10417_v21  ;;  %v9063_v58 = vpop.f32.mrb[48].mxu1 }
 0x257   : > { %v10421_v8 = vpop.eup %10420  ;;  %3672 = vmatprep.mubr.bf16.mxu1 %v2172_v20  ;;  %10440 = vpow2.f32 %v8675_v49  ;;  %v9064_v56 = vpop.f32.mrb[49].mxu1  ;;  %v8715_v57 = vmul.f32 -1.442695, %v743_v44 }
 0x258   : > { %v10423_v54 = vpop.eup %10422  ;;  %v2174_v16 = vpack.c.bf16 %v10421_v8, %v10419_v27  ;;  %10442 = vrcp.f32 %v1598_v5  ;;  %v9065_v21 = vadd.f32 %v9064_v56, %v9063_v58  ;;  %v9066_v20 = vpop.f32.mrb[50].mxu1 }
 0x259   : > { %v10425_v17 = vpop.eup %10424  ;;  %10444 = vpow2.f32 %v8689_v2  ;;  %v9067_v35 = vpop.f32.mrb[51].mxu1 }
 0x25a   : > { %v10427_v25 = vpop.eup %10426  ;;  %3769 = vmatprep.mubr.bf16.mxu0 %v2174_v16  ;;  %v1612_v37 = vadd.f32 1.0, %v10425_v17  ;;  %10446 = vpow2.f32 %v8702_v61  ;;  %v9068_v53 = vadd.f32 %v9067_v35, %v9066_v20 }
 0x25b   : > { %v10429_v9 = vpop.eup %10428  ;;  %v1600_v13 = vadd.f32 1.0, %v10427_v25  ;;  %10448 = vpow2.f32 %v8716_v47  ;;  %v3441_v47 = vadd.f32 %v9065_v21, %v11803_v12 }
 0x25c   : > { %v10431_v19 = vpop.eup %10430  ;;  %10450 = vrcp.f32 %v1612_v37  ;;  %v1614_v18 = vadd.f32 1.0, %v10429_v9  ;;  %v3444_v32 = vadd.f32 %v9068_v53, %v11807_v36 }
 0x25d   : > { %v10433_v28 = vpop.eup %10432  ;;  %v2171_v40 = vpack.c.bf16 %v10431_v19, %v10423_v54  ;;  %10452 = vrcp.f32 %v1600_v13  ;;  %v8717_v54 = vmul.f32 -1.442695, %v745_v63 }
 0x25e   : > { %v10435_v29 = vpop.eup %10434  ;;  %10454 = vrcp.f32 %v1614_v18 }
 0x25f   : > { %v10437_v49 = vpop.eup %10436  ;;  %3673 = vmatmul.mubr.bf16.gmra.mrb[100].mxu1 %v2171_v40  ;;  %v1597_v24 = vadd.f32 1.0, %v10435_v29  ;;  %10456 = vpow2.f32 %v8704_v39  ;;  %v9127_v12 = vpop.f32.mrb[48].mxu0 }
 0x260   : > { %v10439_v51 = vpop.eup %10438  ;;  %v1611_v2 = vadd.f32 1.0, %v10437_v49  ;;  %10458 = vpow2.f32 %v8718_v43  ;;  %v9128_v17 = vpop.f32.mrb[49].mxu0 }
 0x261   : > { %v10441_v61 = vpop.eup %10440  ;;  %v2173_v14 = vpack.c.bf16 %v10439_v51, %v10433_v28  ;;  %10460 = vrcp.f32 %v1597_v24  ;;  %v9129_v36 = vadd.f32 %v9128_v17, %v9127_v12  ;;  %v9130_v25 = vpop.f32.mrb[50].mxu0 }
 0x262   : > { %v10443_v27 = vpop.eup %10442  ;;  %10462 = vrcp.f32 %v1611_v2  ;;  %v1599_v5 = vadd.f32 1.0, %v10441_v61  ;;  %v9131_v9 = vpop.f32.mrb[51].mxu0 }
 0x263   : > { %v10445_v33 = vpop.eup %10444  ;;  %3770 = vmatmul.mubr.bf16.gmra.mrb[100].mxu0 %v2173_v14  ;;  %10464 = vpow2.f32 %v8701_v22  ;;  %v11947_v19 = vadd.f32 %v9129_v36, %v3441_v47  ;;  %v9132_v18 = vadd.f32 %v9131_v9, %v9130_v25 }
 0x264   : > { %v10447_v45 = vpop.eup %10446  ;;  %v1613_v8 = vadd.f32 1.0, %v10445_v33  ;;  %10466 = vrcp.f32 %v1599_v5 }
 0x265   : > { %v10449_v10 = vpop.eup %10448  ;;  %v1626_v1 = vadd.f32 1.0, %v10447_v45  ;;  %10468 = vpow2.f32 %v8715_v57  ;;  %v11949_v40 = vadd.f32 %v9132_v18, %v3444_v32 }
 0x266   : > { %v10451_v38 = vpop.eup %10450  ;;  %10470 = vrcp.f32 %v1613_v8  ;;  %v1640_v15 = vadd.f32 1.0, %v10449_v10 }
 0x267   : > { %v10453_v16 = vpop.eup %10452  ;;  %v2186_v42 = vpack.c.bf16 %v10451_v38, %v10443_v27  ;;  %10472 = vrcp.f32 %v1626_v1 }
 0x268   : > { %v10455_v59 = vpop.eup %10454  ;;  %10474 = vrcp.f32 %v1640_v15 }
 0x269   : > { %v10457_v23 = vpop.eup %10456  ;;  %3680 = vmatprep.mubr.bf16.mxu1 %v2186_v42  ;;  %v2188_v3 = vpack.c.bf16 %v10455_v59, %v10453_v16  ;;  %10476 = vpow2.f32 %v8703_v50 }
 0x26a   : > { %v10459_v37 = vpop.eup %10458  ;;  %v1628_v11 = vadd.f32 1.0, %v10457_v23  ;;  %10478 = vpow2.f32 %v8717_v54  ;;  %v9069_v57 = vpop.f32.mrb[52].mxu1 }
 0x26b   : > { %v10461_v13 = vpop.eup %10460  ;;  %3777 = vmatprep.mubr.bf16.mxu0 %v2188_v3  ;;  %v1642_v39 = vadd.f32 1.0, %v10459_v37  ;;  %v9070_v61 = vpop.f32.mrb[53].mxu1 }
 0x26c   : > { %v10463_v43 = vpop.eup %10462  ;;  %10480 = vrcp.f32 %v1628_v11  ;;  %v9071_v63 = vadd.f32 %v9070_v61, %v9069_v57  ;;  %v9072_v35 = vpop.f32.mrb[54].mxu1 }
 0x26d   : > { %v10465_v44 = vpop.eup %10464  ;;  %v2185_v28 = vpack.c.bf16 %v10463_v43, %v10461_v13  ;;  %10482 = vrcp.f32 %v1642_v39  ;;  %v9073_v5 = vpop.f32.mrb[55].mxu1 }
 0x26e   : > { %v10467_v29 = vpop.eup %10466  ;;  %v1625_v58 = vadd.f32 1.0, %v10465_v44  ;;  %v9133_v53 = vpop.f32.mrb[52].mxu0  ;;  %v3449_v33 = vadd.f32 %v9071_v63, %v11816_v52  ;;  %v9074_v45 = vadd.f32 %v9073_v5, %v9072_v35 }
 0x26f   : > { %v10469_v49 = vpop.eup %10468  ;;  %3681 = vmatmul.mubr.bf16.gmra.mrb[104].mxu1 %v2185_v28  ;;  %v9134_v32 = vpop.f32.mrb[53].mxu0 }
 0x270   : > { %v10471_v24 = vpop.eup %10470  ;;  %v1639_v22 = vadd.f32 1.0, %v10469_v49  ;;  %10484 = vrcp.f32 %v1625_v58  ;;  %v9135_v1 = vadd.f32 %v9134_v32, %v9133_v53  ;;  %v9136_v50 = vpop.f32.mrb[54].mxu0  ;;  %v3452_v38 = vadd.f32 %v9074_v45, %v11822_v34 }
 0x271   : > { %v10473_v56 = vpop.eup %10472  ;;  %v2187_v51 = vpack.c.bf16 %v10471_v24, %v10467_v29  ;;  %v9137_v15 = vpop.f32.mrb[55].mxu0 }
 0x272   : > { %v10475_v2 = vpop.eup %10474  ;;  %10486 = vrcp.f32 %v1639_v22  ;;  %v11953_v16 = vadd.f32 %v9135_v1, %v3449_v33  ;;  %v9138_v42 = vadd.f32 %v9137_v15, %v9136_v50 }
 0x273   : > { %v10477_v21 = vpop.eup %10476  ;;  %3778 = vmatmul.mubr.bf16.gmra.mrb[104].mxu0 %v2187_v51  ;;  %v2200_v20 = vpack.c.bf16 %v10475_v2, %v10473_v56 }
 0x274   : > { %v10479_v14 = vpop.eup %10478  ;;  %v1627_v4 = vadd.f32 1.0, %v10477_v21  ;;  %v11955_v59 = vadd.f32 %v9138_v42, %v3452_v38 }
 0x275   : > { %3688 = vmatprep.mubr.bf16.mxu1 %v2200_v20  ;;  %v1641_v27 = vadd.f32 1.0, %v10479_v14 }
 0x276   : > { %v10481_v47 = vpop.eup %10480  ;;  %10488 = vrcp.f32 %v1627_v4 }
 0x277   : > { %v10483_v8 = vpop.eup %10482  ;;  %10490 = vrcp.f32 %v1641_v27 }
 0x278   : > { %v2202_v10 = vpack.c.bf16 %v10483_v8, %v10481_v47 }
 0x27a   : > { %v10485_v54 = vpop.eup %10484  ;;  %3785 = vmatprep.mubr.bf16.mxu0 %v2202_v10  ;;  %v9075_v36 = vpop.f32.mrb[56].mxu1 }
 0x27b   : > { %v9076_v25 = vpop.f32.mrb[57].mxu1 }
 0x27c   : > { %v10487_v12 = vpop.eup %10486  ;;  %v9077_v37 = vadd.f32 %v9076_v25, %v9075_v36  ;;  %v9078_v11 = vpop.f32.mrb[58].mxu1 }
 0x27d   : > { %v2199_v17 = vpack.c.bf16 %v10487_v12, %v10485_v54  ;;  %v9079_v34 = vpop.f32.mrb[59].mxu1 }
 0x27e   : > { %v3457_v9 = vadd.f32 %v9077_v37, %v11826_v0  ;;  %v9080_v13 = vadd.f32 %v9079_v34, %v9078_v11 }
 0x27f   : > { %3689 = vmatmul.mubr.bf16.gmra.mrb[108].mxu1 %v2199_v17  ;;  %v9139_v39 = vpop.f32.mrb[56].mxu0 }
 0x280   : > { %v10489_v52 = vpop.eup %10488  ;;  %v9140_v18 = vpop.f32.mrb[57].mxu0  ;;  %v3460_v43 = vadd.f32 %v9080_v13, %v11836_v48 }
 0x281   : > { %v10491_v23 = vpop.eup %10490  ;;  %v9141_v44 = vadd.f32 %v9140_v18, %v9139_v39  ;;  %v9142_v28 = vpop.f32.mrb[58].mxu0 }
 0x282   : > { %v2201_v3 = vpack.c.bf16 %v10491_v23, %v10489_v52  ;;  %v9143_v29 = vpop.f32.mrb[59].mxu0 }
 0x283   : > { %v11959_v58 = vadd.f32 %v9141_v44, %v3457_v9  ;;  %v9144_v49 = vadd.f32 %v9143_v29, %v9142_v28 }
 0x284   : > { %3786 = vmatmul.mubr.bf16.gmra.mrb[108].mxu0 %v2201_v3 }
 0x285   : > { %v11961_v24 = vadd.f32 %v9144_v49, %v3460_v43 }
 0x289   : > { %v9081_v22 = vpop.f32.mrb[60].mxu1 }
 0x28a   : > { %v9082_v56 = vpop.f32.mrb[61].mxu1 }
 0x28b   : > { %v9083_v51 = vadd.f32 %v9082_v56, %v9081_v22  ;;  %v9084_v2 = vpop.f32.mrb[62].mxu1 }
 0x28c   : > { %v9085_v57 = vpop.f32.mrb[63].mxu1 }
 0x28d   : > { %v3465_v0 = vadd.f32 %v9083_v51, %v11841_v55  ;;  %v9086_v21 = vadd.f32 %v9085_v57, %v9084_v2 }
 0x28f   : > { %v9145_v20 = vpop.f32.mrb[60].mxu0  ;;  %v3468_v61 = vadd.f32 %v9086_v21, %v11848_v60 }
 0x290   : > { %v9146_v48 = vpop.f32.mrb[61].mxu0 }
 0x291   : > { %v9147_v14 = vadd.f32 %v9146_v48, %v9145_v20  ;;  %v9148_v4 = vpop.f32.mrb[62].mxu0 }
 0x292   : > { %v9149_v63 = vpop.f32.mrb[63].mxu0 }
 0x293   : > { %v11965_v35 = vadd.f32 %v9147_v14, %v3465_v0  ;;  %v9150_v27 = vadd.f32 %v9149_v63, %v9148_v4 }
 0x295   : > { %v11967_v5 = vadd.f32 %v9150_v27, %v3468_v61 }
 0x29a   : > { %v9087_v47 = vpop.f32.mrb[64].mxu1 }
 0x29b   : > { %v9088_v53 = vpop.f32.mrb[65].mxu1 }
 0x29c   : > { %v9089_v33 = vadd.f32 %v9088_v53, %v9087_v47  ;;  %v9090_v45 = vpop.f32.mrb[66].mxu1 }
 0x29d   : > { %v9091_v8 = vpop.f32.mrb[67].mxu1 }
 0x29e   : > { %v9151_v32 = vpop.f32.mrb[64].mxu0  ;;  %v3473_v55 = vadd.f32 %v9089_v33, %v11858_v46  ;;  %v9092_v10 = vadd.f32 %v9091_v8, %v9090_v45 }
 0x29f   : > { %v9152_v1 = vpop.f32.mrb[65].mxu0 }
 0x2a0   : > { %v9153_v60 = vadd.f32 %v9152_v1, %v9151_v32  ;;  %v9154_v50 = vpop.f32.mrb[66].mxu0  ;;  %v3476_v38 = vadd.f32 %v9092_v10, %v11861_v30 }
 0x2a1   : > { %v9155_v15 = vpop.f32.mrb[67].mxu0 }
 0x2a2   : > { %v11971_v54 = vadd.f32 %v9153_v60, %v3473_v55  ;;  %v9156_v42 = vadd.f32 %v9155_v15, %v9154_v50 }
 0x2a4   : > { %v11973_v12 = vadd.f32 %v9156_v42, %v3476_v38 }
 0x2aa   : > { %v9093_v17 = vpop.f32.mrb[68].mxu1 }
 0x2ab   : > { %v9094_v52 = vpop.f32.mrb[69].mxu1 }
 0x2ac   : > { %v9095_v23 = vadd.f32 %v9094_v52, %v9093_v17  ;;  %v9096_v3 = vpop.f32.mrb[70].mxu1 }
 0x2ad   : > { %v9097_v36 = vpop.f32.mrb[71].mxu1 }
 0x2ae   : > { %v9157_v25 = vpop.f32.mrb[68].mxu0  ;;  %v3481_v46 = vadd.f32 %v9095_v23, %v11886_v62  ;;  %v9098_v37 = vadd.f32 %v9097_v36, %v9096_v3 }
 0x2af   : > { %v9158_v11 = vpop.f32.mrb[69].mxu0 }
 0x2b0   : > { %v9159_v34 = vadd.f32 %v9158_v11, %v9157_v25  ;;  %v9160_v9 = vpop.f32.mrb[70].mxu0  ;;  %v3484_v30 = vadd.f32 %v9098_v37, %v11890_v31  ;;  %v2203_v37 = vld [vmem:[#allocation2] sm:$0xff] }
 0x2b1   : > { %v9161_v13 = vpop.f32.mrb[71].mxu0 }
 0x2b2   : > { %v11977_v39 = vadd.f32 %v9159_v34, %v3481_v46  ;;  %v9162_v18 = vadd.f32 %v9161_v13, %v9160_v9  ;;  %v2204_v9 = vld [vmem:[#allocation2 + $0x8] sm:$0xff] }
 0x2b4   : > { %v11979_v43 = vadd.f32 %v9162_v18, %v3484_v30 }
 0x2ba   : > { %v9099_v44 = vpop.f32.mrb[72].mxu1 }
 0x2bb   : > { %v9100_v28 = vpop.f32.mrb[73].mxu1 }
 0x2bc   : > { %v9101_v29 = vadd.f32 %v9100_v28, %v9099_v44  ;;  %v9102_v49 = vpop.f32.mrb[74].mxu1 }
 0x2bd   : > { %v9163_v22 = vpop.f32.mrb[72].mxu0  ;;  %v9103_v56 = vpop.f32.mrb[75].mxu1 }
 0x2be   : > { %v3489_v62 = vadd.f32 %v9101_v29, %v11909_v41  ;;  %v9164_v51 = vpop.f32.mrb[73].mxu0  ;;  %v9104_v2 = vadd.f32 %v9103_v56, %v9102_v49 }
 0x2bf   : > { %v9165_v57 = vadd.f32 %v9164_v51, %v9163_v22  ;;  %v9166_v0 = vpop.f32.mrb[74].mxu0 }
 0x2c0   : > { %v3492_v31 = vadd.f32 %v9104_v2, %v11913_v6  ;;  %v9167_v21 = vpop.f32.mrb[75].mxu0 }
 0x2c1   : > { %v11983_v20 = vadd.f32 %v9165_v57, %v3489_v62  ;;  %v9168_v61 = vadd.f32 %v9167_v21, %v9166_v0  ;;  %v2205_v57 = vld [vmem:[#allocation2 + $0x10] sm:$0xff] }
 0x2c3   : > { %v11985_v48 = vadd.f32 %v9168_v61, %v3492_v31 }
 0x2cc   : > { %v9105_v14 = vpop.f32.mrb[76].mxu1 }
 0x2cd   : > { %v9106_v4 = vpop.f32.mrb[77].mxu1 }
 0x2ce   : > { %v9169_v63 = vpop.f32.mrb[76].mxu0  ;;  %v9107_v27 = vadd.f32 %v9106_v4, %v9105_v14  ;;  %v9108_v47 = vpop.f32.mrb[78].mxu1  ;;  %v2206_v14 = vld [vmem:[#allocation2 + $0x18] sm:$0xff] }
 0x2cf   : > { %v9170_v53 = vpop.f32.mrb[77].mxu0  ;;  %v9109_v33 = vpop.f32.mrb[79].mxu1 }
 0x2d0   : > { %v3497_v41 = vadd.f32 %v9107_v27, %v11936_v7  ;;  %v9171_v45 = vadd.f32 %v9170_v53, %v9169_v63  ;;  %v9172_v8 = vpop.f32.mrb[78].mxu0  ;;  %v9110_v32 = vadd.f32 %v9109_v33, %v9108_v47 }
 0x2d1   : > { %v9173_v55 = vpop.f32.mrb[79].mxu0 }
 0x2d2   : > { %v11988_v6 = vadd.f32 %v9171_v45, %v3497_v41  ;;  %v3500_v10 = vadd.f32 %v9110_v32, %v11940_v26  ;;  %v9174_v1 = vadd.f32 %v9173_v55, %v9172_v8 }
 0x2d4   : > { %v11991_v60 = vadd.f32 %v9174_v1, %v3500_v10 }
 0x2d7   : > { %v9191_v50 = vpop.f32.mrb[80].mxu1 }
 0x2d8   : > { %v9192_v38 = vpop.f32.mrb[81].mxu1 }
 0x2d9   : > { %v9193_v15 = vadd.f32 %v9192_v38, %v9191_v50  ;;  %v9194_v42 = vpop.f32.mrb[82].mxu1  ;;  %v2207_v50 = vld [vmem:[#allocation2 + $0x20] sm:$0xff] }
 0x2da   : > { %v9195_v17 = vpop.f32.mrb[83].mxu1 }
 0x2db   : > { %v3635_v52 = vadd.f32 %v9193_v15, %v11947_v19  ;;  %v9196_v23 = vadd.f32 %v9195_v17, %v9194_v42  ;;  %v2208_v17 = vld [vmem:[#allocation2 + $0x28] sm:$0xff] }
 0x2dd   : > { %v3638_v7 = vadd.f32 %v9196_v23, %v11949_v40 }
 0x2de   : > { %v9255_v3 = vpop.f32.mrb[80].mxu0 }
 0x2df   : > { %v9256_v36 = vpop.f32.mrb[81].mxu0 }
 0x2e0   : > { %v9257_v25 = vadd.f32 %v9256_v36, %v9255_v3  ;;  %v9258_v46 = vpop.f32.mrb[82].mxu0 }
 0x2e1   : > { %v9259_v11 = vpop.f32.mrb[83].mxu0 }
 0x2e2   : > { %v3732_v26 = vadd.f32 %v9257_v25, %v3635_v52  ;;  %v9260_v34 = vadd.f32 %v9259_v11, %v9258_v46 }
 0x2e4   : > { %v3794_v30 = vadd.f32 %v3732_v26, %v2203_v37  ;;  %v3735_v13 = vadd.f32 %v9260_v34, %v3638_v7 }
 0x2e6   : > { %3810 = vst [vmem:[#allocation2] sm:$0xff] %v3794_v30  ;;  %v3795_v18 = vadd.f32 %v3735_v13, %v2204_v9  ;;  %v2209_v30 = vld [vmem:[#allocation2 + $0x30] sm:$0xff] }
 0x2e8   : > { %3811 = vst [vmem:[#allocation2 + $0x8] sm:$0xff] %v3795_v18 }
 0x2f1   : > { %v9197_v44 = vpop.f32.mrb[84].mxu1 }
 0x2f2   : > { %v9198_v28 = vpop.f32.mrb[85].mxu1 }
 0x2f3   : > { %v9199_v19 = vadd.f32 %v9198_v28, %v9197_v44  ;;  %v9200_v29 = vpop.f32.mrb[86].mxu1 }
 0x2f4   : > { %v9201_v40 = vpop.f32.mrb[87].mxu1 }
 0x2f5   : > { %v3643_v22 = vadd.f32 %v9199_v19, %v11953_v16  ;;  %v9202_v62 = vadd.f32 %v9201_v40, %v9200_v29  ;;  %v2210_v19 = vld [vmem:[#allocation2 + $0x38] sm:$0xff] }
 0x2f6   : > { %v9261_v49 = vpop.f32.mrb[84].mxu0 }
 0x2f7   : > { %v9262_v56 = vpop.f32.mrb[85].mxu0  ;;  %v3646_v0 = vadd.f32 %v9202_v62, %v11955_v59 }
 0x2f8   : > { %v9263_v51 = vadd.f32 %v9262_v56, %v9261_v49  ;;  %v9264_v2 = vpop.f32.mrb[86].mxu0 }
 0x2f9   : > { %v9265_v31 = vpop.f32.mrb[87].mxu0 }
 0x2fa   : > { %v3740_v21 = vadd.f32 %v9263_v51, %v3643_v22  ;;  %v9266_v61 = vadd.f32 %v9265_v31, %v9264_v2 }
 0x2fc   : > { %v3796_v4 = vadd.f32 %v3740_v21, %v2205_v57  ;;  %v3743_v63 = vadd.f32 %v9266_v61, %v3646_v0 }
 0x2fe   : > { %3812 = vst [vmem:[#allocation2 + $0x10] sm:$0xff] %v3796_v4  ;;  %v3797_v27 = vadd.f32 %v3743_v63, %v2206_v14  ;;  %v2211_v14 = vld [vmem:[#allocation2 + $0x40] sm:$0xff] }
 0x300   : > { %3813 = vst [vmem:[#allocation2 + $0x18] sm:$0xff] %v3797_v27 }
 0x302   : > { %v9203_v47 = vpop.f32.mrb[88].mxu1 }
 0x303   : > { %v9204_v53 = vpop.f32.mrb[89].mxu1 }
 0x304   : > { %v9205_v33 = vadd.f32 %v9204_v53, %v9203_v47  ;;  %v9206_v16 = vpop.f32.mrb[90].mxu1  ;;  %v2212_v47 = vld [vmem:[#allocation2 + $0x48] sm:$0xff] }
 0x305   : > { %v9207_v41 = vpop.f32.mrb[91].mxu1 }
 0x306   : > { %v3651_v45 = vadd.f32 %v9205_v33, %v11959_v58  ;;  %v9208_v8 = vadd.f32 %v9207_v41, %v9206_v16 }
 0x308   : > { %v9267_v32 = vpop.f32.mrb[88].mxu0  ;;  %v3654_v59 = vadd.f32 %v9208_v8, %v11961_v24 }
 0x309   : > { %v9268_v55 = vpop.f32.mrb[89].mxu0 }
 0x30a   : > { %v9269_v10 = vadd.f32 %v9268_v55, %v9267_v32  ;;  %v9270_v1 = vpop.f32.mrb[90].mxu0 }
 0x30b   : > { %v9271_v38 = vpop.f32.mrb[91].mxu0 }
 0x30c   : > { %v3748_v15 = vadd.f32 %v9269_v10, %v3651_v45  ;;  %v9272_v42 = vadd.f32 %v9271_v38, %v9270_v1 }
 0x30e   : > { %v3798_v52 = vadd.f32 %v3748_v15, %v2207_v50  ;;  %v3751_v23 = vadd.f32 %v9272_v42, %v3654_v59  ;;  %v2213_v15 = vld [vmem:[#allocation2 + $0x50] sm:$0xff] }
 0x310   : > { %3814 = vst [vmem:[#allocation2 + $0x20] sm:$0xff] %v3798_v52  ;;  %v3799_v7 = vadd.f32 %v3751_v23, %v2208_v17  ;;  %v2214_v23 = vld [vmem:[#allocation2 + $0x58] sm:$0xff] }
 0x312   : > { %3815 = vst [vmem:[#allocation2 + $0x28] sm:$0xff] %v3799_v7  ;;  %v9209_v3 = vpop.f32.mrb[92].mxu1 }
 0x313   : > { %v9210_v36 = vpop.f32.mrb[93].mxu1 }
 0x314   : > { %v9273_v58 = vpop.f32.mrb[92].mxu0  ;;  %v9211_v25 = vadd.f32 %v9210_v36, %v9209_v3  ;;  %v9212_v46 = vpop.f32.mrb[94].mxu1 }
 0x315   : > { %v9274_v37 = vpop.f32.mrb[93].mxu0  ;;  %v9213_v24 = vpop.f32.mrb[95].mxu1 }
 0x316   : > { %v3659_v11 = vadd.f32 %v9211_v25, %v11965_v35  ;;  %v9275_v26 = vadd.f32 %v9274_v37, %v9273_v58  ;;  %v9276_v34 = vpop.f32.mrb[94].mxu0  ;;  %v9214_v9 = vadd.f32 %v9213_v24, %v9212_v46 }
 0x317   : > { %v9277_v13 = vpop.f32.mrb[95].mxu0 }
 0x318   : > { %v3756_v18 = vadd.f32 %v9275_v26, %v3659_v11  ;;  %v3662_v44 = vadd.f32 %v9214_v9, %v11967_v5  ;;  %v9278_v28 = vadd.f32 %v9277_v13, %v9276_v34  ;;  %v2215_v13 = vld [vmem:[#allocation2 + $0x60] sm:$0xff] }
 0x31a   : > { %v3800_v29 = vadd.f32 %v3756_v18, %v2209_v30  ;;  %v3759_v49 = vadd.f32 %v9278_v28, %v3662_v44 }
 0x31c   : > { %3816 = vst [vmem:[#allocation2 + $0x30] sm:$0xff] %v3800_v29  ;;  %v3801_v40 = vadd.f32 %v3759_v49, %v2210_v19  ;;  %v2216_v19 = vld [vmem:[#allocation2 + $0x68] sm:$0xff] }
 0x31e   : > { %3817 = vst [vmem:[#allocation2 + $0x38] sm:$0xff] %v3801_v40 }
 0x323   : > { %v9215_v22 = vpop.f32.mrb[96].mxu1 }
 0x324   : > { %v9216_v56 = vpop.f32.mrb[97].mxu1 }
 0x325   : > { %v9217_v62 = vadd.f32 %v9216_v56, %v9215_v22  ;;  %v9218_v51 = vpop.f32.mrb[98].mxu1 }
 0x326   : > { %v9219_v35 = vpop.f32.mrb[99].mxu1 }
 0x327   : > { %v9279_v2 = vpop.f32.mrb[96].mxu0  ;;  %v3667_v57 = vadd.f32 %v9217_v62, %v11971_v54  ;;  %v9220_v0 = vadd.f32 %v9219_v35, %v9218_v51 }
 0x328   : > { %v9280_v31 = vpop.f32.mrb[97].mxu0 }
 0x329   : > { %v9281_v21 = vadd.f32 %v9280_v31, %v9279_v2  ;;  %v9282_v61 = vpop.f32.mrb[98].mxu0  ;;  %v3670_v5 = vadd.f32 %v9220_v0, %v11973_v12 }
 0x32a   : > { %v9283_v4 = vpop.f32.mrb[99].mxu0 }
 0x32b   : > { %v3764_v63 = vadd.f32 %v9281_v21, %v3667_v57  ;;  %v9284_v27 = vadd.f32 %v9283_v4, %v9282_v61  ;;  %v2217_v61 = vld [vmem:[#allocation2 + $0x70] sm:$0xff] }
 0x32d   : > { %v3802_v53 = vadd.f32 %v3764_v63, %v2211_v14  ;;  %v3767_v33 = vadd.f32 %v9284_v27, %v3670_v5  ;;  %v2218_v63 = vld [vmem:[#allocation2 + $0x78] sm:$0xff] }
 0x32f   : > { %3818 = vst [vmem:[#allocation2 + $0x40] sm:$0xff] %v3802_v53  ;;  %v3803_v16 = vadd.f32 %v3767_v33, %v2212_v47 }
 0x331   : > { %3819 = vst [vmem:[#allocation2 + $0x48] sm:$0xff] %v3803_v16 }
 0x332   : > { %v9221_v41 = vpop.f32.mrb[100].mxu1 }
 0x333   : > { %v9222_v45 = vpop.f32.mrb[101].mxu1 }
 0x334   : > { %v9223_v8 = vadd.f32 %v9222_v45, %v9221_v41  ;;  %v9224_v54 = vpop.f32.mrb[102].mxu1 }
 0x335   : > { %v9225_v32 = vpop.f32.mrb[103].mxu1 }
 0x336   : > { %v9285_v59 = vpop.f32.mrb[100].mxu0  ;;  %v3675_v55 = vadd.f32 %v9223_v8, %v11977_v39  ;;  %v9226_v10 = vadd.f32 %v9225_v32, %v9224_v54 }
 0x337   : > { %v9286_v12 = vpop.f32.mrb[101].mxu0 }
 0x338   : > { %v9287_v1 = vadd.f32 %v9286_v12, %v9285_v59  ;;  %v9288_v50 = vpop.f32.mrb[102].mxu0  ;;  %v3678_v38 = vadd.f32 %v9226_v10, %v11979_v43 }
 0x339   : > { %v9289_v42 = vpop.f32.mrb[103].mxu0 }
 0x33a   : > { %v3772_v17 = vadd.f32 %v9287_v1, %v3675_v55  ;;  %v9290_v52 = vadd.f32 %v9289_v42, %v9288_v50 }
 0x33c   : > { %v3804_v7 = vadd.f32 %v3772_v17, %v2213_v15  ;;  %v3775_v3 = vadd.f32 %v9290_v52, %v3678_v38 }
 0x33e   : > { %3820 = vst [vmem:[#allocation2 + $0x50] sm:$0xff] %v3804_v7  ;;  %v3805_v36 = vadd.f32 %v3775_v3, %v2214_v23 }
 0x340   : > { %3821 = vst [vmem:[#allocation2 + $0x58] sm:$0xff] %v3805_v36 }
 0x342   : > { %v9227_v58 = vpop.f32.mrb[104].mxu1 }
 0x343   : > { %v9228_v25 = vpop.f32.mrb[105].mxu1 }
 0x344   : > { %v9229_v46 = vadd.f32 %v9228_v25, %v9227_v58  ;;  %v9230_v39 = vpop.f32.mrb[106].mxu1 }
 0x345   : > { %v9231_v37 = vpop.f32.mrb[107].mxu1 }
 0x346   : > { %v9291_v24 = vpop.f32.mrb[104].mxu0  ;;  %v3683_v11 = vadd.f32 %v9229_v46, %v11983_v20  ;;  %v9232_v26 = vadd.f32 %v9231_v37, %v9230_v39 }
 0x347   : > { %v9292_v43 = vpop.f32.mrb[105].mxu0 }
 0x348   : > { %v9293_v34 = vadd.f32 %v9292_v43, %v9291_v24  ;;  %v9294_v9 = vpop.f32.mrb[106].mxu0  ;;  %v3686_v30 = vadd.f32 %v9232_v26, %v11985_v48 }
 0x349   : > { %v9295_v18 = vpop.f32.mrb[107].mxu0 }
 0x34a   : > { %v3780_v44 = vadd.f32 %v9293_v34, %v3683_v11  ;;  %v9296_v28 = vadd.f32 %v9295_v18, %v9294_v9 }
 0x34c   : > { %v3806_v29 = vadd.f32 %v3780_v44, %v2215_v13  ;;  %v3783_v49 = vadd.f32 %v9296_v28, %v3686_v30 }
 0x34e   : > { %3822 = vst [vmem:[#allocation2 + $0x60] sm:$0xff] %v3806_v29  ;;  %v3807_v40 = vadd.f32 %v3783_v49, %v2216_v19 }
 0x350   : > { %3823 = vst [vmem:[#allocation2 + $0x68] sm:$0xff] %v3807_v40 }
 0x352   : > { %v9233_v22 = vpop.f32.mrb[108].mxu1 }
 0x353   : > { %v9234_v56 = vpop.f32.mrb[109].mxu1 }
 0x354   : > { %v9235_v62 = vadd.f32 %v9234_v56, %v9233_v22  ;;  %v9236_v20 = vpop.f32.mrb[110].mxu1 }
 0x355   : > { %v9237_v51 = vpop.f32.mrb[111].mxu1 }
 0x356   : > { %v3691_v35 = vadd.f32 %v9235_v62, %v11988_v6  ;;  %v9238_v2 = vadd.f32 %v9237_v51, %v9236_v20 }
 0x357   : > { %v9297_v57 = vpop.f32.mrb[108].mxu0 }
 0x358   : > { %v9298_v48 = vpop.f32.mrb[109].mxu0  ;;  %v3694_v0 = vadd.f32 %v9238_v2, %v11991_v60 }
 0x359   : > { %v9299_v31 = vadd.f32 %v9298_v48, %v9297_v57  ;;  %v9300_v21 = vpop.f32.mrb[110].mxu0 }
 0x35a   : > { %v9301_v5 = vpop.f32.mrb[111].mxu0 }
 0x35b   : > { %v3788_v14 = vadd.f32 %v9299_v31, %v3691_v35  ;;  %v9302_v4 = vadd.f32 %v9301_v5, %v9300_v21  ;;  %3829 = sbr.rel (%p8831_p7) target bundleno = 2183 (0x887), region = 68 }
 0x35d   : > { %v3808_v27 = vadd.f32 %v3788_v14, %v2217_v61  ;;  %v3791_v47 = vadd.f32 %v9302_v4, %v3694_v0 }
 0x35f   : > { %3824 = vst [vmem:[#allocation2 + $0x70] sm:$0xff] %v3808_v27  ;;  %v3809_v53 = vadd.f32 %v3791_v47, %v2218_v63 }
 0x361   : > { %3825 = vst [vmem:[#allocation2 + $0x78] sm:$0xff] %v3809_v53 }
 0x362   : > { %v12013_v6 = vld [vmem:[%s16417_s1] sm:$0xff]  ;;  %v3832_v60 = vld [vmem:[#allocation2 + $0x10] sm:$0xff]  ;;  %v16433_v33 = vmov 0   ;;  %v11020_v16 = vmov 5   ;;  %v12021_v41 = vld [vmem:[%s16417_s1 + $0x18] sm:$0xff]  ;;  %v11021_v52 = vmov 1  }
 0x363   : > { %10493 = vset.pattern.permute.xlu0 %v16433_v33  ;;  %10492 = vset.pattern.permute.xlu1 %v11020_v16  ;;  %v3833_v45 = vld [vmem:[#allocation2 + $0x18] sm:$0xff]  ;;  %v12027_v8 = vld [vmem:[%s16417_s1 + $0x28] sm:$0xff]  ;;  %v12071_v23 = vld [vmem:[%s16417_s1 + $0x20] sm:$0xff]  ;;  %v11022_v39 = vmov 2   ;;  %v11023_v37 = vmov 3   ;;  %v11024_v24 = vmov 4  }
 0x364   : > { %4435 = vperm.xlu0 %10493, %v12013_v6   ;;  %3891 = vperm.xlu1 %10492, %v3832_v60   ;;  %v3835_v54 = vld [vmem:[#allocation2 + $0x28] sm:$0xff]  ;;  %v12033_v32 = vld [vmem:[%s16417_s1 + $0x38] sm:$0xff]  ;;  %v12076_v7 = vld [vmem:[%s16417_s1 + $0x10] sm:$0xff] }
 0x365   : > { %v3837_v59 = vld [vmem:[#allocation2 + $0x38] sm:$0xff]  ;;  %v12039_v55 = vld [vmem:[%s16417_s1 + $0x48] sm:$0xff]  ;;  %v12083_v3 = vld [vmem:[%s16417_s1 + $0x30] sm:$0xff] }
 0x366   : > { %v3839_v10 = vld [vmem:[#allocation2 + $0x48] sm:$0xff]  ;;  %v12045_v12 = vld [vmem:[%s16417_s1 + $0x58] sm:$0xff]  ;;  %v12090_v36 = vld [vmem:[%s16417_s1 + $0x40] sm:$0xff] }
 0x367   : > { %v3841_v1 = vld [vmem:[#allocation2 + $0x58] sm:$0xff]  ;;  %v12051_v50 = vld [vmem:[%s16417_s1 + $0x68] sm:$0xff]  ;;  %v12097_v58 = vld [vmem:[%s16417_s1 + $0x50] sm:$0xff] }
 0x368   : > { %4450 = vperm.xlu0 %10493, %v12021_v41   ;;  %3896 = vperm.xlu1 %10492, %v3833_v45   ;;  %v3843_v38 = vld [vmem:[#allocation2 + $0x68] sm:$0xff]  ;;  %v12057_v15 = vld [vmem:[%s16417_s1 + $0x78] sm:$0xff]  ;;  %v12104_v25 = vld [vmem:[%s16417_s1 + $0x60] sm:$0xff] }
 0x369   : > { %v3845_v42 = vld [vmem:[#allocation2 + $0x78] sm:$0xff]  ;;  %v12063_v17 = vld [vmem:[%s16417_s1 + $0x8] sm:$0xff]  ;;  %v12111_v46 = vld [vmem:[%s16417_s1 + $0x70] sm:$0xff] }
 0x36a   : > { %v3830_v22 = vld [vmem:[#allocation2] sm:$0xff]  ;;  %v3831_v20 = vld [vmem:[#allocation2 + $0x8] sm:$0xff]  ;;  %v3836_v0 = vld [vmem:[#allocation2 + $0x30] sm:$0xff] }
 0x36b   : > { %v3834_v2 = vld [vmem:[#allocation2 + $0x20] sm:$0xff]  ;;  %v3840_v4 = vld [vmem:[#allocation2 + $0x50] sm:$0xff] }
 0x36c   : > { %4460 = vperm.xlu0 %10493, %v12027_v8   ;;  %3906 = vperm.xlu1 %10492, %v3835_v54   ;;  %v3838_v61 = vld [vmem:[#allocation2 + $0x40] sm:$0xff]  ;;  %v3844_v45 = vld [vmem:[#allocation2 + $0x70] sm:$0xff] }
 0x36d   : > { %v3842_v47 = vld [vmem:[#allocation2 + $0x60] sm:$0xff] }
 0x370   : > { %4470 = vperm.xlu0 %10493, %v12033_v32   ;;  %3916 = vperm.xlu1 %10492, %v3837_v59  }
 0x374   : > { %4480 = vperm.xlu0 %10493, %v12039_v55   ;;  %3926 = vperm.xlu1 %10492, %v3839_v10  }
 0x378   : > { %4490 = vperm.xlu0 %10493, %v12045_v12   ;;  %3936 = vperm.xlu1 %10492, %v3841_v1  }
 0x37c   : > { %4500 = vperm.xlu0 %10493, %v12051_v50   ;;  %3946 = vperm.xlu1 %10492, %v3843_v38  }
 0x380   : > { %4510 = vperm.xlu0 %10493, %v12057_v15   ;;  %3956 = vperm.xlu1 %10492, %v3845_v42  }
 0x384   : > { %10496 = vset.pattern.permute.xlu0 %v11021_v52  ;;  %10494 = vset.pattern.permute.xlu1 %v16433_v33 }
 0x385   : > { %4570 = vperm.xlu0 %10496, %v12063_v17   ;;  %4440 = vperm.xlu1 %10494, %v12063_v17  }
 0x389   : > { %4582 = vperm.xlu0 %10496, %v12071_v23   ;;  %4445 = vperm.xlu1 %10494, %v12076_v7  }
 0x38d   : > { %4590 = vperm.xlu0 %10496, %v12083_v3   ;;  %4455 = vperm.xlu1 %10494, %v12071_v23  }
 0x391   : > { %4598 = vperm.xlu0 %10496, %v12090_v36   ;;  %4465 = vperm.xlu1 %10494, %v12083_v3  }
 0x395   : > { %4606 = vperm.xlu0 %10496, %v12097_v58   ;;  %4475 = vperm.xlu1 %10494, %v12090_v36  }
 0x399   : > { %4614 = vperm.xlu0 %10496, %v12104_v25   ;;  %4485 = vperm.xlu1 %10494, %v12097_v58  }
 0x39d   : > { %4622 = vperm.xlu0 %10496, %v12111_v46   ;;  %4495 = vperm.xlu1 %10494, %v12104_v25  }
 0x3a1   : > { %10497 = vset.pattern.permute.xlu0 %v11022_v39  ;;  %4505 = vperm.xlu1 %10494, %v12111_v46  }
 0x3a2   : > { %4682 = vperm.xlu0 %10497, %v12013_v6  }
 0x3a5   : > { %10495 = vset.pattern.permute.xlu1 %v11021_v52 }
 0x3a6   : > { %4694 = vperm.xlu0 %10497, %v12021_v41   ;;  %4566 = vperm.xlu1 %10495, %v12013_v6  }
 0x3aa   : > { %4702 = vperm.xlu0 %10497, %v12027_v8   ;;  %4574 = vperm.xlu1 %10495, %v12076_v7  }
 0x3ae   : > { %4710 = vperm.xlu0 %10497, %v12033_v32   ;;  %4578 = vperm.xlu1 %10495, %v12021_v41  }
 0x3b2   : > { %4718 = vperm.xlu0 %10497, %v12039_v55   ;;  %4586 = vperm.xlu1 %10495, %v12027_v8  }
 0x3b6   : > { %4726 = vperm.xlu0 %10497, %v12045_v12   ;;  %4594 = vperm.xlu1 %10495, %v12033_v32  }
 0x3ba   : > { %4734 = vperm.xlu0 %10497, %v12051_v50   ;;  %4602 = vperm.xlu1 %10495, %v12039_v55  }
 0x3be   : > { %4742 = vperm.xlu0 %10497, %v12057_v15   ;;  %4610 = vperm.xlu1 %10495, %v12045_v12  }
 0x3c2   : > { %10500 = vset.pattern.permute.xlu0 %v11023_v37  ;;  %4618 = vperm.xlu1 %10495, %v12051_v50  }
 0x3c3   : > { %4802 = vperm.xlu0 %10500, %v12063_v17  }
 0x3c6   : > { %4626 = vperm.xlu1 %10495, %v12057_v15  }
 0x3c7   : > { %4814 = vperm.xlu0 %10500, %v12071_v23  }
 0x3ca   : > { %10498 = vset.pattern.permute.xlu1 %v11022_v39 }
 0x3cb   : > { %4822 = vperm.xlu0 %10500, %v12083_v3   ;;  %4686 = vperm.xlu1 %10498, %v12063_v17  }
 0x3cf   : > { %4830 = vperm.xlu0 %10500, %v12090_v36   ;;  %4690 = vperm.xlu1 %10498, %v12076_v7  }
 0x3d3   : > { %4838 = vperm.xlu0 %10500, %v12097_v58   ;;  %4698 = vperm.xlu1 %10498, %v12071_v23  }
 0x3d7   : > { %4846 = vperm.xlu0 %10500, %v12104_v25   ;;  %4706 = vperm.xlu1 %10498, %v12083_v3  }
 0x3db   : > { %4854 = vperm.xlu0 %10500, %v12111_v46   ;;  %4714 = vperm.xlu1 %10498, %v12090_v36  }
 0x3df   : > { %10501 = vset.pattern.permute.xlu0 %v11024_v24  ;;  %4722 = vperm.xlu1 %10498, %v12097_v58  }
 0x3e0   : > { %4914 = vperm.xlu0 %10501, %v12013_v6  }
 0x3e3   : > { %4730 = vperm.xlu1 %10498, %v12104_v25   ;;  %v12148_v11 = vpop.permute.xlu1 %3891  ;;  %v12150_v26 = vpop.permute.xlu0 %4435 }
 0x3e4   : > { %16537 = vst [vmem:[#allocation19_spill] sm:$0xff] %v12148_v11  ;;  %4926 = vperm.xlu0 %10501, %v12021_v41  }
 0x3e7   : > { %4738 = vperm.xlu1 %10498, %v12111_v46   ;;  %v12154_v43 = vpop.permute.xlu1 %3896  ;;  %v12156_v34 = vpop.permute.xlu0 %4450 }
 0x3e8   : > { %16538 = vst [vmem:[#allocation20_spill] sm:$0xff] %v12154_v43  ;;  %4934 = vperm.xlu0 %10501, %v12027_v8  }
 0x3eb   : > { %10499 = vset.pattern.permute.xlu1 %v11023_v37  ;;  %v12159_v9 = vpop.permute.xlu1 %3906  ;;  %v12161_v30 = vpop.permute.xlu0 %4460 }
 0x3ec   : > { %16539 = vst [vmem:[#allocation21_spill] sm:$0xff] %v12159_v9  ;;  %4942 = vperm.xlu0 %10501, %v12033_v32   ;;  %4798 = vperm.xlu1 %10499, %v12013_v6  }
 0x3ef   : > { %v12165_v13 = vpop.permute.xlu1 %3916  ;;  %v12167_v18 = vpop.permute.xlu0 %4470 }
 0x3f0   : > { %16540 = vst [vmem:[#allocation22_spill] sm:$0xff] %v12165_v13  ;;  %4950 = vperm.xlu0 %10501, %v12039_v55   ;;  %4806 = vperm.xlu1 %10499, %v12076_v7  }
 0x3f3   : > { %v12171_v44 = vpop.permute.xlu1 %3926  ;;  %v12173_v28 = vpop.permute.xlu0 %4480 }
 0x3f4   : > { %16541 = vst [vmem:[#allocation23_spill] sm:$0xff] %v12171_v44  ;;  %4958 = vperm.xlu0 %10501, %v12045_v12   ;;  %4810 = vperm.xlu1 %10499, %v12021_v41  }
 0x3f7   : > { %v12177_v19 = vpop.permute.xlu1 %3936  ;;  %v12179_v29 = vpop.permute.xlu0 %4490 }
 0x3f8   : > { %16542 = vst [vmem:[#allocation24_spill] sm:$0xff] %v12177_v19  ;;  %4966 = vperm.xlu0 %10501, %v12051_v50   ;;  %4818 = vperm.xlu1 %10499, %v12027_v8  }
 0x3fb   : > { %v12183_v49 = vpop.permute.xlu1 %3946  ;;  %v12185_v40 = vpop.permute.xlu0 %4500 }
 0x3fc   : > { %16543 = vst [vmem:[#allocation25_spill] sm:$0xff] %v12183_v49  ;;  %4974 = vperm.xlu0 %10501, %v12057_v15   ;;  %4826 = vperm.xlu1 %10499, %v12033_v32  }
 0x3ff   : > { %v12189_v56 = vpop.permute.xlu1 %3956  ;;  %v12191_v62 = vpop.permute.xlu0 %4510 }
 0x400   : > { %16544 = vst [vmem:[#allocation26_spill] sm:$0xff] %v12189_v56  ;;  %10503 = vset.pattern.permute.xlu0 %v11020_v16  ;;  %4834 = vperm.xlu1 %10499, %v12039_v55  }
 0x401   : > { %3881 = vperm.xlu0 %10503, %v3830_v22  }
 0x404   : > { %v12195_v51 = vpop.permute.xlu0 %4570  ;;  %4842 = vperm.xlu1 %10499, %v12045_v12   ;;  %v12198_v35 = vpop.permute.xlu1 %4440 }
 0x405   : > { %3886 = vperm.xlu0 %10503, %v3831_v20  }
 0x408   : > { %4850 = vperm.xlu1 %10499, %v12051_v50   ;;  %v12201_v57 = vpop.permute.xlu1 %4445  ;;  %v12203_v48 = vpop.permute.xlu0 %4582 }
 0x409   : > { %3901 = vperm.xlu0 %10503, %v3834_v2  }
 0x40c   : > { %4858 = vperm.xlu1 %10499, %v12057_v15   ;;  %v12206_v31 = vpop.permute.xlu1 %4455  ;;  %v12208_v21 = vpop.permute.xlu0 %4590 }
 0x40d   : > { %3911 = vperm.xlu0 %10503, %v3836_v0  }
 0x410   : > { %10502 = vset.pattern.permute.xlu1 %v11024_v24  ;;  %v12210_v5 = vpop.permute.xlu1 %4465  ;;  %v12212_v14 = vpop.permute.xlu0 %4598 }
 0x411   : > { %4918 = vperm.xlu1 %10502, %v12063_v17   ;;  %3921 = vperm.xlu0 %10503, %v3838_v61  }
 0x414   : > { %v12215_v63 = vpop.permute.xlu1 %4475  ;;  %v12217_v27 = vpop.permute.xlu0 %4606 }
 0x415   : > { %4922 = vperm.xlu1 %10502, %v12076_v7   ;;  %3931 = vperm.xlu0 %10503, %v3840_v4  }
 0x418   : > { %v12220_v53 = vpop.permute.xlu1 %4485  ;;  %v12222_v60 = vpop.permute.xlu0 %4614 }
 0x419   : > { %4930 = vperm.xlu1 %10502, %v12071_v23   ;;  %3941 = vperm.xlu0 %10503, %v3842_v47   ;;  %v11025_v47 = vmov 6  }
 0x41c   : > { %v12225_v54 = vpop.permute.xlu1 %4495  ;;  %v12227_v59 = vpop.permute.xlu0 %4622 }
 0x41d   : > { %4938 = vperm.xlu1 %10502, %v12083_v3   ;;  %3951 = vperm.xlu0 %10503, %v3844_v45  }
 0x420   : > { %v12230_v10 = vpop.permute.xlu1 %4505 }
 0x421   : > { %4946 = vperm.xlu1 %10502, %v12090_v36   ;;  %5034 = vperm.xlu0 %10503, %v12063_v17   ;;  %v12234_v1 = vpop.permute.xlu0 %4682 }
 0x425   : > { %4954 = vperm.xlu1 %10502, %v12097_v58   ;;  %v12237_v38 = vpop.permute.xlu1 %4566  ;;  %5046 = vperm.xlu0 %10503, %v12071_v23   ;;  %v12240_v42 = vpop.permute.xlu0 %4694 }
 0x429   : > { %4962 = vperm.xlu1 %10502, %v12104_v25   ;;  %v12243_v52 = vpop.permute.xlu1 %4574  ;;  %5054 = vperm.xlu0 %10503, %v12083_v3   ;;  %v12246_v39 = vpop.permute.xlu0 %4702 }
 0x42d   : > { %4970 = vperm.xlu1 %10502, %v12111_v46   ;;  %v12249_v37 = vpop.permute.xlu1 %4578  ;;  %5062 = vperm.xlu0 %10503, %v12090_v36   ;;  %v12252_v24 = vpop.permute.xlu0 %4710 }
 0x431   : > { %10504 = vset.pattern.permute.xlu1 %v11020_v16  ;;  %v12255_v22 = vpop.permute.xlu1 %4586  ;;  %5070 = vperm.xlu0 %10503, %v12097_v58   ;;  %v12258_v20 = vpop.permute.xlu0 %4718 }
 0x432   : > { %5030 = vperm.xlu1 %10504, %v12013_v6  }
 0x435   : > { %v12261_v2 = vpop.permute.xlu1 %4594  ;;  %5078 = vperm.xlu0 %10503, %v12104_v25   ;;  %v12264_v0 = vpop.permute.xlu0 %4726 }
 0x436   : > { %5038 = vperm.xlu1 %10504, %v12076_v7  }
 0x439   : > { %v12267_v61 = vpop.permute.xlu1 %4602  ;;  %5086 = vperm.xlu0 %10503, %v12111_v46   ;;  %v12270_v16 = vpop.permute.xlu0 %4734 }
 0x43a   : > { %5042 = vperm.xlu1 %10504, %v12021_v41  }
 0x43d   : > { %v12273_v4 = vpop.permute.xlu1 %4610  ;;  %10505 = vset.pattern.permute.xlu0 %v11025_v47  ;;  %v12275_v45 = vpop.permute.xlu0 %4742 }
 0x43e   : > { %5050 = vperm.xlu1 %10504, %v12027_v8   ;;  %5146 = vperm.xlu0 %10505, %v12013_v6  }
 0x441   : > { %v12279_v33 = vpop.permute.xlu1 %4618 }
 0x442   : > { %5058 = vperm.xlu1 %10504, %v12033_v32   ;;  %5158 = vperm.xlu0 %10505, %v12021_v41   ;;  %v12283_v56 = vpop.permute.xlu0 %4802 }
 0x443   : > { %16545 = vst [vmem:[#allocation27_spill] sm:$0xff] %v12283_v56 }
 0x445   : > { %v12285_v49 = vpop.permute.xlu1 %4626 }
 0x446   : > { %5066 = vperm.xlu1 %10504, %v12039_v55   ;;  %5166 = vperm.xlu0 %10505, %v12027_v8   ;;  %v12289_v19 = vpop.permute.xlu0 %4814 }
 0x447   : > { %16546 = vst [vmem:[#allocation28_spill] sm:$0xff] %v12289_v19 }
 0x44a   : > { %5074 = vperm.xlu1 %10504, %v12045_v12   ;;  %v12292_v44 = vpop.permute.xlu1 %4686  ;;  %5174 = vperm.xlu0 %10505, %v12033_v32   ;;  %v12295_v13 = vpop.permute.xlu0 %4822 }
 0x44b   : > { %16547 = vst [vmem:[#allocation29_spill] sm:$0xff] %v12292_v44  ;;  %16548 = vst [vmem:[#allocation30_spill] sm:$0xff] %v12295_v13 }
 0x44e   : > { %5082 = vperm.xlu1 %10504, %v12051_v50   ;;  %v12298_v9 = vpop.permute.xlu1 %4690  ;;  %5182 = vperm.xlu0 %10505, %v12039_v55   ;;  %v12301_v43 = vpop.permute.xlu0 %4830 }
 0x44f   : > { %16549 = vst [vmem:[#allocation31_spill] sm:$0xff] %v12298_v9  ;;  %16550 = vst [vmem:[#allocation32_spill] sm:$0xff] %v12301_v43 }
 0x452   : > { %5090 = vperm.xlu1 %10504, %v12057_v15   ;;  %v12304_v11 = vpop.permute.xlu1 %4698  ;;  %5190 = vperm.xlu0 %10505, %v12045_v12   ;;  %v12307_v19 = vpop.permute.xlu0 %4838 }
 0x453   : > { %16551 = vst [vmem:[#allocation33_spill] sm:$0xff] %v12304_v11  ;;  %16552 = vst [vmem:[#allocation34_spill] sm:$0xff] %v12307_v19  ;;  %v11026_v19 = vmov 7  }
 0x456   : > { %10506 = vset.pattern.permute.xlu1 %v11025_v47  ;;  %v12309_v56 = vpop.permute.xlu1 %4706  ;;  %5198 = vperm.xlu0 %10505, %v12051_v50   ;;  %v12312_v13 = vpop.permute.xlu0 %4846 }
 0x457   : > { %16553 = vst [vmem:[#allocation35_spill] sm:$0xff] %v12309_v56  ;;  %16554 = vst [vmem:[#allocation36_spill] sm:$0xff] %v12312_v13  ;;  %5150 = vperm.xlu1 %10506, %v12063_v17  }
 0x45a   : > { %v12315_v9 = vpop.permute.xlu1 %4714  ;;  %5206 = vperm.xlu0 %10505, %v12057_v15   ;;  %v12318_v43 = vpop.permute.xlu0 %4854 }
 0x45b   : > { %16555 = vst [vmem:[#allocation37_spill] sm:$0xff] %v12315_v9  ;;  %16556 = vst [vmem:[#allocation38_spill] sm:$0xff] %v12318_v43  ;;  %5154 = vperm.xlu1 %10506, %v12076_v7  }
 0x45e   : > { %v12321_v11 = vpop.permute.xlu1 %4722  ;;  %10508 = vset.pattern.permute.xlu0 %v11026_v19 }
 0x45f   : > { %16557 = vst [vmem:[#allocation39_spill] sm:$0xff] %v12321_v11  ;;  %5162 = vperm.xlu1 %10506, %v12071_v23   ;;  %5266 = vperm.xlu0 %10508, %v12063_v17   ;;  %v12325_v47 = vpop.permute.xlu0 %4914 }
 0x460   : > { %16558 = vst [vmem:[#allocation40_spill] sm:$0xff] %v12325_v47 }
 0x462   : > { %v12327_v13 = vpop.permute.xlu1 %4730 }
 0x463   : > { %16559 = vst [vmem:[#allocation41_spill] sm:$0xff] %v12327_v13  ;;  %5170 = vperm.xlu1 %10506, %v12083_v3   ;;  %5278 = vperm.xlu0 %10508, %v12071_v23   ;;  %v12331_v9 = vpop.permute.xlu0 %4926 }
 0x464   : > { %16560 = vst [vmem:[#allocation42_spill] sm:$0xff] %v12331_v9 }
 0x466   : > { %v12333_v43 = vpop.permute.xlu1 %4738 }
 0x467   : > { %16561 = vst [vmem:[#allocation43_spill] sm:$0xff] %v12333_v43  ;;  %5178 = vperm.xlu1 %10506, %v12090_v36   ;;  %5286 = vperm.xlu0 %10508, %v12083_v3   ;;  %v12337_v11 = vpop.permute.xlu0 %4934 }
 0x468   : > { %16562 = vst [vmem:[#allocation44_spill] sm:$0xff] %v12337_v11 }
 0x46b   : > { %5186 = vperm.xlu1 %10506, %v12097_v58   ;;  %v12340_v56 = vpop.permute.xlu1 %4798  ;;  %5294 = vperm.xlu0 %10508, %v12090_v36   ;;  %v12343_v47 = vpop.permute.xlu0 %4942 }
 0x46c   : > { %16563 = vst [vmem:[#allocation45_spill] sm:$0xff] %v12340_v56  ;;  %16564 = vst [vmem:[#allocation46_spill] sm:$0xff] %v12343_v47 }
 0x46f   : > { %5194 = vperm.xlu1 %10506, %v12104_v25   ;;  %v12346_v13 = vpop.permute.xlu1 %4806  ;;  %5302 = vperm.xlu0 %10508, %v12097_v58   ;;  %v12349_v9 = vpop.permute.xlu0 %4950 }
 0x470   : > { %16565 = vst [vmem:[#allocation47_spill] sm:$0xff] %v12346_v13  ;;  %16566 = vst [vmem:[#allocation48_spill] sm:$0xff] %v12349_v9  ;;  %v11027_v9 = vmov 8  }
 0x473   : > { %5202 = vperm.xlu1 %10506, %v12111_v46   ;;  %v12352_v43 = vpop.permute.xlu1 %4810  ;;  %5310 = vperm.xlu0 %10508, %v12104_v25   ;;  %v12355_v11 = vpop.permute.xlu0 %4958 }
 0x474   : > { %16567 = vst [vmem:[#allocation49_spill] sm:$0xff] %v12352_v43  ;;  %16568 = vst [vmem:[#allocation50_spill] sm:$0xff] %v12355_v11  ;;  %v11028_v43 = vmov 9  }
 0x477   : > { %10507 = vset.pattern.permute.xlu1 %v11026_v19  ;;  %v12357_v56 = vpop.permute.xlu1 %4818  ;;  %5318 = vperm.xlu0 %10508, %v12111_v46   ;;  %v12360_v47 = vpop.permute.xlu0 %4966 }
 0x478   : > { %16569 = vst [vmem:[#allocation51_spill] sm:$0xff] %v12357_v56  ;;  %16570 = vst [vmem:[#allocation52_spill] sm:$0xff] %v12360_v47  ;;  %5262 = vperm.xlu1 %10507, %v12013_v6  }
 0x47b   : > { %v12363_v13 = vpop.permute.xlu1 %4826  ;;  %10509 = vset.pattern.permute.xlu0 %v11027_v9  ;;  %v12365_v44 = vpop.permute.xlu0 %4974 }
 0x47c   : > { %16571 = vst [vmem:[#allocation53_spill] sm:$0xff] %v12363_v13  ;;  %16572 = vst [vmem:[#allocation54_spill] sm:$0xff] %v12365_v44  ;;  %5270 = vperm.xlu1 %10507, %v12076_v7   ;;  %5378 = vperm.xlu0 %10509, %v12013_v6  }
 0x47f   : > { %v12369_v11 = vpop.permute.xlu1 %4834 }
 0x480   : > { %16573 = vst [vmem:[#allocation55_spill] sm:$0xff] %v12369_v11  ;;  %5274 = vperm.xlu1 %10507, %v12021_v41   ;;  %v12372_v19 = vpop.permute.xlu0 %3881  ;;  %5390 = vperm.xlu0 %10509, %v12021_v41  }
 0x481   : > { %16574 = vst [vmem:[#allocation56_spill] sm:$0xff] %v12372_v19 }
 0x483   : > { %v12375_v47 = vpop.permute.xlu1 %4842 }
 0x484   : > { %16575 = vst [vmem:[#allocation57_spill] sm:$0xff] %v12375_v47  ;;  %5282 = vperm.xlu1 %10507, %v12027_v8   ;;  %v12378_v13 = vpop.permute.xlu0 %3886  ;;  %5398 = vperm.xlu0 %10509, %v12027_v8  }
 0x485   : > { %16576 = vst [vmem:[#allocation58_spill] sm:$0xff] %v12378_v13 }
 0x487   : > { %v12381_v44 = vpop.permute.xlu1 %4850 }
 0x488   : > { %16577 = vst [vmem:[#allocation59_spill] sm:$0xff] %v12381_v44  ;;  %5290 = vperm.xlu1 %10507, %v12033_v32   ;;  %v12384_v56 = vpop.permute.xlu0 %3901  ;;  %5406 = vperm.xlu0 %10509, %v12033_v32  }
 0x489   : > { %16578 = vst [vmem:[#allocation60_spill] sm:$0xff] %v12384_v56 }
 0x48b   : > { %v12387_v11 = vpop.permute.xlu1 %4858 }
 0x48c   : > { %16579 = vst [vmem:[#allocation61_spill] sm:$0xff] %v12387_v11  ;;  %5298 = vperm.xlu1 %10507, %v12039_v55   ;;  %v12390_v19 = vpop.permute.xlu0 %3911  ;;  %5414 = vperm.xlu0 %10509, %v12039_v55  }
 0x48d   : > { %16580 = vst [vmem:[#allocation62_spill] sm:$0xff] %v12390_v19 }
 0x490   : > { %5306 = vperm.xlu1 %10507, %v12045_v12   ;;  %v12394_v13 = vpop.permute.xlu1 %4918  ;;  %v12396_v47 = vpop.permute.xlu0 %3921  ;;  %5422 = vperm.xlu0 %10509, %v12045_v12  }
 0x491   : > { %16581 = vst [vmem:[#allocation63_spill] sm:$0xff] %v12394_v13  ;;  %16582 = vst [vmem:[#allocation64_spill] sm:$0xff] %v12396_v47 }
 0x494   : > { %5314 = vperm.xlu1 %10507, %v12051_v50   ;;  %v12400_v56 = vpop.permute.xlu1 %4922  ;;  %v12402_v44 = vpop.permute.xlu0 %3931  ;;  %5430 = vperm.xlu0 %10509, %v12051_v50  }
 0x495   : > { %16583 = vst [vmem:[#allocation65_spill] sm:$0xff] %v12400_v56  ;;  %16584 = vst [vmem:[#allocation66_spill] sm:$0xff] %v12402_v44 }
 0x498   : > { %5322 = vperm.xlu1 %10507, %v12057_v15   ;;  %v12406_v19 = vpop.permute.xlu1 %4930  ;;  %v12408_v11 = vpop.permute.xlu0 %3941  ;;  %5438 = vperm.xlu0 %10509, %v12057_v15  }
 0x499   : > { %16585 = vst [vmem:[#allocation67_spill] sm:$0xff] %v12406_v19  ;;  %16586 = vst [vmem:[#allocation68_spill] sm:$0xff] %v12408_v11 }
 0x49c   : > { %10510 = vset.pattern.permute.xlu1 %v11027_v9  ;;  %v12411_v47 = vpop.permute.xlu1 %4938  ;;  %v12413_v13 = vpop.permute.xlu0 %3951  ;;  %10512 = vset.pattern.permute.xlu0 %v11028_v43 }
 0x49d   : > { %16587 = vst [vmem:[#allocation69_spill] sm:$0xff] %v12411_v47  ;;  %16588 = vst [vmem:[#allocation70_spill] sm:$0xff] %v12413_v13  ;;  %5382 = vperm.xlu1 %10510, %v12063_v17   ;;  %5498 = vperm.xlu0 %10512, %v12063_v17  }
 0x4a0   : > { %v12417_v44 = vpop.permute.xlu1 %4946  ;;  %v12419_v56 = vpop.permute.xlu0 %5034 }
 0x4a1   : > { %16589 = vst [vmem:[#allocation71_spill] sm:$0xff] %v12417_v44  ;;  %16590 = vst [vmem:[#allocation72_spill] sm:$0xff] %v12419_v56  ;;  %5386 = vperm.xlu1 %10510, %v12076_v7   ;;  %5510 = vperm.xlu0 %10512, %v12071_v23  }
 0x4a4   : > { %v12423_v11 = vpop.permute.xlu1 %4954  ;;  %v12425_v9 = vpop.permute.xlu0 %5046 }
 0x4a5   : > { %16591 = vst [vmem:[#allocation73_spill] sm:$0xff] %v12423_v11  ;;  %16592 = vst [vmem:[#allocation74_spill] sm:$0xff] %v12425_v9  ;;  %5394 = vperm.xlu1 %10510, %v12071_v23   ;;  %5518 = vperm.xlu0 %10512, %v12083_v3  }
 0x4a8   : > { %v12429_v13 = vpop.permute.xlu1 %4962  ;;  %v12431_v47 = vpop.permute.xlu0 %5054 }
 0x4a9   : > { %16593 = vst [vmem:[#allocation75_spill] sm:$0xff] %v12429_v13  ;;  %16594 = vst [vmem:[#allocation76_spill] sm:$0xff] %v12431_v47  ;;  %5402 = vperm.xlu1 %10510, %v12083_v3   ;;  %5526 = vperm.xlu0 %10512, %v12090_v36  }
 0x4ac   : > { %v12435_v56 = vpop.permute.xlu1 %4970  ;;  %v12437_v44 = vpop.permute.xlu0 %5062 }
 0x4ad   : > { %16595 = vst [vmem:[#allocation77_spill] sm:$0xff] %v12435_v56  ;;  %16596 = vst [vmem:[#allocation78_spill] sm:$0xff] %v12437_v44  ;;  %5410 = vperm.xlu1 %10510, %v12090_v36   ;;  %5534 = vperm.xlu0 %10512, %v12097_v58  }
 0x4b0   : > { %v12441_v9 = vpop.permute.xlu0 %5070 }
 0x4b1   : > { %16597 = vst [vmem:[#allocation79_spill] sm:$0xff] %v12441_v9  ;;  %5418 = vperm.xlu1 %10510, %v12097_v58   ;;  %v12444_v11 = vpop.permute.xlu1 %5030  ;;  %5542 = vperm.xlu0 %10512, %v12104_v25   ;;  %v11029_v9 = vmov 10  }
 0x4b2   : > { %16598 = vst [vmem:[#allocation80_spill] sm:$0xff] %v12444_v11 }
 0x4b4   : > { %v12447_v47 = vpop.permute.xlu0 %5078 }
 0x4b5   : > { %16599 = vst [vmem:[#allocation81_spill] sm:$0xff] %v12447_v47  ;;  %5426 = vperm.xlu1 %10510, %v12104_v25   ;;  %v12450_v13 = vpop.permute.xlu1 %5038  ;;  %5550 = vperm.xlu0 %10512, %v12111_v46  }
 0x4b6   : > { %16600 = vst [vmem:[#allocation82_spill] sm:$0xff] %v12450_v13 }
 0x4b8   : > { %v12453_v44 = vpop.permute.xlu0 %5086 }
 0x4b9   : > { %16601 = vst [vmem:[#allocation83_spill] sm:$0xff] %v12453_v44  ;;  %5434 = vperm.xlu1 %10510, %v12111_v46   ;;  %v12456_v56 = vpop.permute.xlu1 %5042  ;;  %10513 = vset.pattern.permute.xlu0 %v11029_v9 }
 0x4ba   : > { %16602 = vst [vmem:[#allocation84_spill] sm:$0xff] %v12456_v56  ;;  %5610 = vperm.xlu0 %10513, %v12013_v6  }
 0x4bd   : > { %10511 = vset.pattern.permute.xlu1 %v11028_v43  ;;  %v12459_v11 = vpop.permute.xlu1 %5050  ;;  %v12461_v47 = vpop.permute.xlu0 %5146 }
 0x4be   : > { %16603 = vst [vmem:[#allocation85_spill] sm:$0xff] %v12459_v11  ;;  %16604 = vst [vmem:[#allocation86_spill] sm:$0xff] %v12461_v47  ;;  %5494 = vperm.xlu1 %10511, %v12013_v6   ;;  %5622 = vperm.xlu0 %10513, %v12021_v41  }
 0x4c1   : > { %v12465_v13 = vpop.permute.xlu1 %5058  ;;  %v12467_v44 = vpop.permute.xlu0 %5158 }
 0x4c2   : > { %16605 = vst [vmem:[#allocation87_spill] sm:$0xff] %v12465_v13  ;;  %16606 = vst [vmem:[#allocation88_spill] sm:$0xff] %v12467_v44  ;;  %5502 = vperm.xlu1 %10511, %v12076_v7   ;;  %5630 = vperm.xlu0 %10513, %v12027_v8  }
 0x4c5   : > { %v12471_v56 = vpop.permute.xlu1 %5066  ;;  %v12473_v19 = vpop.permute.xlu0 %5166 }
 0x4c6   : > { %16607 = vst [vmem:[#allocation89_spill] sm:$0xff] %v12471_v56  ;;  %16608 = vst [vmem:[#allocation90_spill] sm:$0xff] %v12473_v19  ;;  %5506 = vperm.xlu1 %10511, %v12021_v41   ;;  %5638 = vperm.xlu0 %10513, %v12033_v32  }
 0x4c9   : > { %v12477_v43 = vpop.permute.xlu1 %5074  ;;  %v12479_v47 = vpop.permute.xlu0 %5174 }
 0x4ca   : > { %16609 = vst [vmem:[#allocation91_spill] sm:$0xff] %v12477_v43  ;;  %16610 = vst [vmem:[#allocation92_spill] sm:$0xff] %v12479_v47  ;;  %5514 = vperm.xlu1 %10511, %v12027_v8   ;;  %5646 = vperm.xlu0 %10513, %v12039_v55  }
 0x4cd   : > { %v12483_v44 = vpop.permute.xlu1 %5082  ;;  %v12485_v13 = vpop.permute.xlu0 %5182 }
 0x4ce   : > { %16611 = vst [vmem:[#allocation93_spill] sm:$0xff] %v12483_v44  ;;  %16612 = vst [vmem:[#allocation94_spill] sm:$0xff] %v12485_v13  ;;  %5522 = vperm.xlu1 %10511, %v12033_v32   ;;  %5654 = vperm.xlu0 %10513, %v12045_v12  }
 0x4d1   : > { %v12489_v19 = vpop.permute.xlu1 %5090  ;;  %v12491_v56 = vpop.permute.xlu0 %5190 }
 0x4d2   : > { %16613 = vst [vmem:[#allocation95_spill] sm:$0xff] %v12489_v19  ;;  %16614 = vst [vmem:[#allocation96_spill] sm:$0xff] %v12491_v56  ;;  %5530 = vperm.xlu1 %10511, %v12039_v55   ;;  %5662 = vperm.xlu0 %10513, %v12051_v50   ;;  %v11030_v19 = vmov 11  }
 0x4d5   : > { %v12495_v47 = vpop.permute.xlu0 %5198 }
 0x4d6   : > { %16615 = vst [vmem:[#allocation97_spill] sm:$0xff] %v12495_v47  ;;  %5538 = vperm.xlu1 %10511, %v12045_v12   ;;  %v12498_v43 = vpop.permute.xlu1 %5150  ;;  %5670 = vperm.xlu0 %10513, %v12057_v15  }
 0x4d7   : > { %16616 = vst [vmem:[#allocation98_spill] sm:$0xff] %v12498_v43 }
 0x4d9   : > { %v12501_v13 = vpop.permute.xlu0 %5206 }
 0x4da   : > { %16617 = vst [vmem:[#allocation99_spill] sm:$0xff] %v12501_v13  ;;  %5546 = vperm.xlu1 %10511, %v12051_v50   ;;  %v12504_v44 = vpop.permute.xlu1 %5154  ;;  %10516 = vset.pattern.permute.xlu0 %v11030_v19 }
 0x4db   : > { %16618 = vst [vmem:[#allocation100_spill] sm:$0xff] %v12504_v44  ;;  %5730 = vperm.xlu0 %10516, %v12063_v17  }
 0x4de   : > { %5554 = vperm.xlu1 %10511, %v12057_v15   ;;  %v12508_v56 = vpop.permute.xlu1 %5162  ;;  %v12510_v47 = vpop.permute.xlu0 %5266 }
 0x4df   : > { %16619 = vst [vmem:[#allocation101_spill] sm:$0xff] %v12508_v56  ;;  %16620 = vst [vmem:[#allocation102_spill] sm:$0xff] %v12510_v47  ;;  %5742 = vperm.xlu0 %10516, %v12071_v23  }
 0x4e2   : > { %10514 = vset.pattern.permute.xlu1 %v11029_v9  ;;  %v12513_v43 = vpop.permute.xlu1 %5170  ;;  %v12515_v13 = vpop.permute.xlu0 %5278 }
 0x4e3   : > { %16621 = vst [vmem:[#allocation103_spill] sm:$0xff] %v12513_v43  ;;  %16622 = vst [vmem:[#allocation104_spill] sm:$0xff] %v12515_v13  ;;  %5614 = vperm.xlu1 %10514, %v12063_v17   ;;  %5750 = vperm.xlu0 %10516, %v12083_v3  }
 0x4e6   : > { %v12519_v44 = vpop.permute.xlu1 %5178  ;;  %v12521_v11 = vpop.permute.xlu0 %5286 }
 0x4e7   : > { %16623 = vst [vmem:[#allocation105_spill] sm:$0xff] %v12519_v44  ;;  %16624 = vst [vmem:[#allocation106_spill] sm:$0xff] %v12521_v11  ;;  %5618 = vperm.xlu1 %10514, %v12076_v7   ;;  %5758 = vperm.xlu0 %10516, %v12090_v36  }
 0x4ea   : > { %v12525_v47 = vpop.permute.xlu1 %5186  ;;  %v12527_v56 = vpop.permute.xlu0 %5294 }
 0x4eb   : > { %16625 = vst [vmem:[#allocation107_spill] sm:$0xff] %v12525_v47  ;;  %16626 = vst [vmem:[#allocation108_spill] sm:$0xff] %v12527_v56  ;;  %5626 = vperm.xlu1 %10514, %v12071_v23   ;;  %5766 = vperm.xlu0 %10516, %v12097_v58  }
 0x4ee   : > { %v12531_v9 = vpop.permute.xlu1 %5194  ;;  %v12533_v13 = vpop.permute.xlu0 %5302 }
 0x4ef   : > { %16627 = vst [vmem:[#allocation109_spill] sm:$0xff] %v12531_v9  ;;  %16628 = vst [vmem:[#allocation110_spill] sm:$0xff] %v12533_v13  ;;  %5634 = vperm.xlu1 %10514, %v12083_v3   ;;  %5774 = vperm.xlu0 %10516, %v12104_v25   ;;  %v11031_v9 = vmov 12  }
 0x4f2   : > { %v12537_v11 = vpop.permute.xlu1 %5202  ;;  %v12539_v44 = vpop.permute.xlu0 %5310 }
 0x4f3   : > { %16629 = vst [vmem:[#allocation111_spill] sm:$0xff] %v12537_v11  ;;  %16630 = vst [vmem:[#allocation112_spill] sm:$0xff] %v12539_v44  ;;  %5642 = vperm.xlu1 %10514, %v12090_v36   ;;  %5782 = vperm.xlu0 %10516, %v12111_v46  }
 0x4f6   : > { %v12543_v56 = vpop.permute.xlu0 %5318 }
 0x4f7   : > { %16631 = vst [vmem:[#allocation113_spill] sm:$0xff] %v12543_v56  ;;  %5650 = vperm.xlu1 %10514, %v12097_v58   ;;  %v12546_v47 = vpop.permute.xlu1 %5262  ;;  %10517 = vset.pattern.permute.xlu0 %v11031_v9 }
 0x4f8   : > { %16632 = vst [vmem:[#allocation114_spill] sm:$0xff] %v12546_v47  ;;  %5842 = vperm.xlu0 %10517, %v12013_v6  }
 0x4fb   : > { %5658 = vperm.xlu1 %10514, %v12104_v25   ;;  %v12550_v13 = vpop.permute.xlu1 %5270  ;;  %v12552_v11 = vpop.permute.xlu0 %5378 }
 0x4fc   : > { %16633 = vst [vmem:[#allocation115_spill] sm:$0xff] %v12550_v13  ;;  %16634 = vst [vmem:[#allocation116_spill] sm:$0xff] %v12552_v11  ;;  %5854 = vperm.xlu0 %10517, %v12021_v41  }
 0x4ff   : > { %5666 = vperm.xlu1 %10514, %v12111_v46   ;;  %v12556_v44 = vpop.permute.xlu1 %5274  ;;  %v12558_v56 = vpop.permute.xlu0 %5390 }
 0x500   : > { %16635 = vst [vmem:[#allocation117_spill] sm:$0xff] %v12556_v44  ;;  %16636 = vst [vmem:[#allocation118_spill] sm:$0xff] %v12558_v56  ;;  %5862 = vperm.xlu0 %10517, %v12027_v8  }
 0x503   : > { %10515 = vset.pattern.permute.xlu1 %v11030_v19  ;;  %v12561_v47 = vpop.permute.xlu1 %5282  ;;  %v12563_v43 = vpop.permute.xlu0 %5398 }
 0x504   : > { %16637 = vst [vmem:[#allocation119_spill] sm:$0xff] %v12561_v47  ;;  %16638 = vst [vmem:[#allocation120_spill] sm:$0xff] %v12563_v43  ;;  %5726 = vperm.xlu1 %10515, %v12013_v6   ;;  %5870 = vperm.xlu0 %10517, %v12033_v32  }
 0x507   : > { %v12567_v11 = vpop.permute.xlu1 %5290  ;;  %v12569_v13 = vpop.permute.xlu0 %5406 }
 0x508   : > { %16639 = vst [vmem:[#allocation121_spill] sm:$0xff] %v12567_v11  ;;  %16640 = vst [vmem:[#allocation122_spill] sm:$0xff] %v12569_v13  ;;  %5734 = vperm.xlu1 %10515, %v12076_v7   ;;  %5878 = vperm.xlu0 %10517, %v12039_v55  }
 0x50b   : > { %v12573_v56 = vpop.permute.xlu1 %5298  ;;  %v12575_v44 = vpop.permute.xlu0 %5414 }
 0x50c   : > { %16641 = vst [vmem:[#allocation123_spill] sm:$0xff] %v12573_v56  ;;  %16642 = vst [vmem:[#allocation124_spill] sm:$0xff] %v12575_v44  ;;  %5738 = vperm.xlu1 %10515, %v12021_v41   ;;  %5886 = vperm.xlu0 %10517, %v12045_v12  }
 0x50f   : > { %v12579_v19 = vpop.permute.xlu1 %5306  ;;  %v12581_v43 = vpop.permute.xlu0 %5422 }
 0x510   : > { %16643 = vst [vmem:[#allocation125_spill] sm:$0xff] %v12579_v19  ;;  %16644 = vst [vmem:[#allocation126_spill] sm:$0xff] %v12581_v43  ;;  %5746 = vperm.xlu1 %10515, %v12027_v8   ;;  %5894 = vperm.xlu0 %10517, %v12051_v50   ;;  %v11032_v19 = vmov 13  }
 0x513   : > { %v12585_v13 = vpop.permute.xlu1 %5314  ;;  %v12587_v11 = vpop.permute.xlu0 %5430 }
 0x514   : > { %16645 = vst [vmem:[#allocation127_spill] sm:$0xff] %v12585_v13  ;;  %16646 = vst [vmem:[#allocation128_spill] sm:$0xff] %v12587_v11  ;;  %5754 = vperm.xlu1 %10515, %v12033_v32   ;;  %5902 = vperm.xlu0 %10517, %v12057_v15  }
 0x517   : > { %v12591_v44 = vpop.permute.xlu1 %5322  ;;  %v12593_v56 = vpop.permute.xlu0 %5438 }
 0x518   : > { %16647 = vst [vmem:[#allocation129_spill] sm:$0xff] %v12591_v44  ;;  %16648 = vst [vmem:[#allocation130_spill] sm:$0xff] %v12593_v56  ;;  %5762 = vperm.xlu1 %10515, %v12039_v55   ;;  %10520 = vset.pattern.permute.xlu0 %v11032_v19 }
 0x519   : > { %5962 = vperm.xlu0 %10520, %v12063_v17  }
 0x51c   : > { %5770 = vperm.xlu1 %10515, %v12045_v12   ;;  %v12598_v43 = vpop.permute.xlu1 %5382  ;;  %v12600_v13 = vpop.permute.xlu0 %5498 }
 0x51d   : > { %16649 = vst [vmem:[#allocation131_spill] sm:$0xff] %v12598_v43  ;;  %16650 = vst [vmem:[#allocation132_spill] sm:$0xff] %v12600_v13  ;;  %5974 = vperm.xlu0 %10520, %v12071_v23  }
 0x520   : > { %5778 = vperm.xlu1 %10515, %v12051_v50   ;;  %v12604_v11 = vpop.permute.xlu1 %5386  ;;  %v12606_v44 = vpop.permute.xlu0 %5510 }
 0x521   : > { %16651 = vst [vmem:[#allocation133_spill] sm:$0xff] %v12604_v11  ;;  %16652 = vst [vmem:[#allocation134_spill] sm:$0xff] %v12606_v44  ;;  %5982 = vperm.xlu0 %10520, %v12083_v3  }
 0x524   : > { %5786 = vperm.xlu1 %10515, %v12057_v15   ;;  %v12610_v56 = vpop.permute.xlu1 %5394  ;;  %v12612_v47 = vpop.permute.xlu0 %5518 }
 0x525   : > { %16653 = vst [vmem:[#allocation135_spill] sm:$0xff] %v12610_v56  ;;  %16654 = vst [vmem:[#allocation136_spill] sm:$0xff] %v12612_v47  ;;  %5990 = vperm.xlu0 %10520, %v12090_v36  }
 0x528   : > { %10518 = vset.pattern.permute.xlu1 %v11031_v9  ;;  %v12615_v13 = vpop.permute.xlu1 %5402  ;;  %v12618_v43 = vpop.permute.xlu0 %5526 }
 0x529   : > { %16655 = vst [vmem:[#allocation137_spill] sm:$0xff] %v12615_v13  ;;  %5846 = vperm.xlu1 %10518, %v12063_v17   ;;  %16656 = vst [vmem:[#allocation138_spill] sm:$0xff] %v12618_v43  ;;  %5998 = vperm.xlu0 %10520, %v12097_v58  }
 0x52c   : > { %v12621_v44 = vpop.permute.xlu1 %5410  ;;  %v12624_v11 = vpop.permute.xlu0 %5534 }
 0x52d   : > { %16657 = vst [vmem:[#allocation139_spill] sm:$0xff] %v12621_v44  ;;  %5850 = vperm.xlu1 %10518, %v12076_v7   ;;  %16658 = vst [vmem:[#allocation140_spill] sm:$0xff] %v12624_v11  ;;  %6006 = vperm.xlu0 %10520, %v12104_v25   ;;  %v11033_v44 = vmov 14  }
 0x530   : > { %v12627_v47 = vpop.permute.xlu1 %5418  ;;  %v12630_v9 = vpop.permute.xlu0 %5542 }
 0x531   : > { %16659 = vst [vmem:[#allocation141_spill] sm:$0xff] %v12627_v47  ;;  %5858 = vperm.xlu1 %10518, %v12071_v23   ;;  %16660 = vst [vmem:[#allocation142_spill] sm:$0xff] %v12630_v9  ;;  %6014 = vperm.xlu0 %10520, %v12111_v46  }
 0x534   : > { %v12633_v13 = vpop.permute.xlu1 %5426  ;;  %v12636_v43 = vpop.permute.xlu0 %5550 }
 0x535   : > { %16661 = vst [vmem:[#allocation143_spill] sm:$0xff] %v12633_v13  ;;  %5866 = vperm.xlu1 %10518, %v12083_v3   ;;  %16662 = vst [vmem:[#allocation144_spill] sm:$0xff] %v12636_v43  ;;  %10521 = vset.pattern.permute.xlu0 %v11033_v44 }
 0x536   : > { %6074 = vperm.xlu0 %10521, %v12013_v6  }
 0x538   : > { %v12639_v11 = vpop.permute.xlu1 %5434 }
 0x539   : > { %16663 = vst [vmem:[#allocation145_spill] sm:$0xff] %v12639_v11  ;;  %5874 = vperm.xlu1 %10518, %v12090_v36   ;;  %v12642_v47 = vpop.permute.xlu0 %5610 }
 0x53a   : > { %16664 = vst [vmem:[#allocation146_spill] sm:$0xff] %v12642_v47  ;;  %6086 = vperm.xlu0 %10521, %v12021_v41  }
 0x53d   : > { %5882 = vperm.xlu1 %10518, %v12097_v58   ;;  %v12646_v9 = vpop.permute.xlu1 %5494  ;;  %v12648_v13 = vpop.permute.xlu0 %5622 }
 0x53e   : > { %16665 = vst [vmem:[#allocation147_spill] sm:$0xff] %v12646_v9  ;;  %16666 = vst [vmem:[#allocation148_spill] sm:$0xff] %v12648_v13  ;;  %6094 = vperm.xlu0 %10521, %v12027_v8  }
 0x541   : > { %5890 = vperm.xlu1 %10518, %v12104_v25   ;;  %v12652_v43 = vpop.permute.xlu1 %5502  ;;  %v12654_v56 = vpop.permute.xlu0 %5630 }
 0x542   : > { %16667 = vst [vmem:[#allocation149_spill] sm:$0xff] %v12652_v43  ;;  %16668 = vst [vmem:[#allocation150_spill] sm:$0xff] %v12654_v56  ;;  %6102 = vperm.xlu0 %10521, %v12033_v32  }
 0x545   : > { %5898 = vperm.xlu1 %10518, %v12111_v46   ;;  %v12658_v47 = vpop.permute.xlu1 %5506  ;;  %v12660_v11 = vpop.permute.xlu0 %5638 }
 0x546   : > { %16669 = vst [vmem:[#allocation151_spill] sm:$0xff] %v12658_v47  ;;  %16670 = vst [vmem:[#allocation152_spill] sm:$0xff] %v12660_v11  ;;  %6110 = vperm.xlu0 %10521, %v12039_v55  }
 0x549   : > { %10519 = vset.pattern.permute.xlu1 %v11032_v19  ;;  %v12663_v13 = vpop.permute.xlu1 %5514  ;;  %v12666_v9 = vpop.permute.xlu0 %5646 }
 0x54a   : > { %16671 = vst [vmem:[#allocation153_spill] sm:$0xff] %v12663_v13  ;;  %5958 = vperm.xlu1 %10519, %v12013_v6   ;;  %16672 = vst [vmem:[#allocation154_spill] sm:$0xff] %v12666_v9  ;;  %6118 = vperm.xlu0 %10521, %v12045_v12  }
 0x54d   : > { %v12669_v56 = vpop.permute.xlu1 %5522  ;;  %v12672_v43 = vpop.permute.xlu0 %5654 }
 0x54e   : > { %16673 = vst [vmem:[#allocation155_spill] sm:$0xff] %v12669_v56  ;;  %5966 = vperm.xlu1 %10519, %v12076_v7   ;;  %16674 = vst [vmem:[#allocation156_spill] sm:$0xff] %v12672_v43  ;;  %6126 = vperm.xlu0 %10521, %v12051_v50   ;;  %v16435_v56 = vmov 15  }
 0x551   : > { %v12675_v11 = vpop.permute.xlu1 %5530  ;;  %v12678_v19 = vpop.permute.xlu0 %5662 }
 0x552   : > { %16675 = vst [vmem:[#allocation157_spill] sm:$0xff] %v12675_v11  ;;  %5970 = vperm.xlu1 %10519, %v12021_v41   ;;  %16676 = vst [vmem:[#allocation158_spill] sm:$0xff] %v12678_v19  ;;  %6134 = vperm.xlu0 %10521, %v12057_v15  }
 0x555   : > { %v12681_v6 = vpop.permute.xlu1 %5538  ;;  %v12684_v9 = vpop.permute.xlu0 %5670 }
 0x556   : > { %16677 = vst [vmem:[#allocation159_spill] sm:$0xff] %v12681_v6  ;;  %5978 = vperm.xlu1 %10519, %v12027_v8   ;;  %16678 = vst [vmem:[#allocation160_spill] sm:$0xff] %v12684_v9  ;;  %10524 = vset.pattern.permute.xlu0 %v16435_v56  ;;  %v16438_v6 = vmov 18  }
 0x557   : > { %6194 = vperm.xlu0 %10524, %v12063_v17  }
 0x559   : > { %v12688_v43 = vpop.permute.xlu1 %5546 }
 0x55a   : > { %16679 = vst [vmem:[#allocation161_spill] sm:$0xff] %v12688_v43  ;;  %5986 = vperm.xlu1 %10519, %v12033_v32   ;;  %v12691_v41 = vpop.permute.xlu0 %5730  ;;  %v12894_v43 = vld [vmem:[%s16417_s1 + $0x70] sm:$0xff] }
 0x55b   : > { %16680 = vst [vmem:[#allocation162_spill] sm:$0xff] %v12691_v41  ;;  %6206 = vperm.xlu0 %10524, %v12071_v23   ;;  %16729 = vst [vmem:[#allocation210_spill] sm:$0xff] %v12894_v43 }
 0x55d   : > { %v12694_v19 = vpop.permute.xlu1 %5554 }
 0x55e   : > { %16681 = vst [vmem:[#allocation163_spill] sm:$0xff] %v12694_v19  ;;  %5994 = vperm.xlu1 %10519, %v12039_v55   ;;  %v12697_v8 = vpop.permute.xlu0 %5742 }
 0x55f   : > { %16682 = vst [vmem:[#allocation164_spill] sm:$0xff] %v12697_v8  ;;  %6214 = vperm.xlu0 %10524, %v12083_v3  }
 0x562   : > { %6002 = vperm.xlu1 %10519, %v12045_v12   ;;  %v12701_v56 = vpop.permute.xlu1 %5614  ;;  %v12703_v9 = vpop.permute.xlu0 %5750 }
 0x563   : > { %16683 = vst [vmem:[#allocation165_spill] sm:$0xff] %v12701_v56  ;;  %16684 = vst [vmem:[#allocation166_spill] sm:$0xff] %v12703_v9  ;;  %6222 = vperm.xlu0 %10524, %v12090_v36   ;;  %v16436_v9 = vmov 16  }
 0x566   : > { %6010 = vperm.xlu1 %10519, %v12051_v50   ;;  %v12707_v32 = vpop.permute.xlu1 %5618  ;;  %v12709_v41 = vpop.permute.xlu0 %5758 }
 0x567   : > { %16685 = vst [vmem:[#allocation167_spill] sm:$0xff] %v12707_v32  ;;  %16686 = vst [vmem:[#allocation168_spill] sm:$0xff] %v12709_v41  ;;  %6230 = vperm.xlu0 %10524, %v12097_v58  }
 0x56a   : > { %6018 = vperm.xlu1 %10519, %v12057_v15   ;;  %v12713_v55 = vpop.permute.xlu1 %5626  ;;  %v12715_v8 = vpop.permute.xlu0 %5766 }
 0x56b   : > { %16687 = vst [vmem:[#allocation169_spill] sm:$0xff] %v12713_v55  ;;  %16688 = vst [vmem:[#allocation170_spill] sm:$0xff] %v12715_v8  ;;  %6238 = vperm.xlu0 %10524, %v12104_v25   ;;  %v12755_v8 = vld [vmem:[%s16417_s1 + $0x28] sm:$0xff] }
 0x56c   : > { %16699 = vst [vmem:[#allocation181_spill] sm:$0xff] %v12755_v8 }
 0x56e   : > { %10522 = vset.pattern.permute.xlu1 %v11033_v44  ;;  %v12718_v12 = vpop.permute.xlu1 %5634  ;;  %v12721_v50 = vpop.permute.xlu0 %5774  ;;  %v12733_v44 = vld [vmem:[%s16417_s1] sm:$0xff] }
 0x56f   : > { %16689 = vst [vmem:[#allocation171_spill] sm:$0xff] %v12718_v12  ;;  %6078 = vperm.xlu1 %10522, %v12063_v17   ;;  %16690 = vst [vmem:[#allocation172_spill] sm:$0xff] %v12721_v50  ;;  %6246 = vperm.xlu0 %10524, %v12111_v46  }
 0x570   : > { %16693 = vst [vmem:[#allocation175_spill] sm:$0xff] %v12733_v44 }
 0x572   : > { %v12724_v41 = vpop.permute.xlu1 %5642  ;;  %v12727_v15 = vpop.permute.xlu0 %5782 }
 0x573   : > { %16691 = vst [vmem:[#allocation173_spill] sm:$0xff] %v12724_v41  ;;  %6082 = vperm.xlu1 %10522, %v12076_v7   ;;  %16692 = vst [vmem:[#allocation174_spill] sm:$0xff] %v12727_v15  ;;  %10525 = vset.pattern.permute.xlu0 %v16436_v9  ;;  %v12744_v7 = vld [vmem:[%s16417_s1 + $0x18] sm:$0xff] }
 0x574   : > { %6306 = vperm.xlu0 %10525, %v12733_v44   ;;  %16696 = vst [vmem:[#allocation178_spill] sm:$0xff] %v12744_v7 }
 0x576   : > { %v12736_v17 = vpop.permute.xlu1 %5650 }
 0x577   : > { %16694 = vst [vmem:[#allocation176_spill] sm:$0xff] %v12736_v17  ;;  %6090 = vperm.xlu1 %10522, %v12071_v23   ;;  %v12739_v50 = vpop.permute.xlu0 %5842 }
 0x578   : > { %16695 = vst [vmem:[#allocation177_spill] sm:$0xff] %v12739_v50  ;;  %6318 = vperm.xlu0 %10525, %v12744_v7  }
 0x57a   : > { %v12747_v9 = vpop.permute.xlu1 %5658 }
 0x57b   : > { %16697 = vst [vmem:[#allocation179_spill] sm:$0xff] %v12747_v9  ;;  %6098 = vperm.xlu1 %10522, %v12083_v3   ;;  %v12750_v15 = vpop.permute.xlu0 %5854  ;;  %v12766_v9 = vld [vmem:[%s16417_s1 + $0x38] sm:$0xff] }
 0x57c   : > { %16698 = vst [vmem:[#allocation180_spill] sm:$0xff] %v12750_v15  ;;  %6326 = vperm.xlu0 %10525, %v12755_v8   ;;  %16702 = vst [vmem:[#allocation184_spill] sm:$0xff] %v12766_v9 }
 0x57e   : > { %v12758_v23 = vpop.permute.xlu1 %5666 }
 0x57f   : > { %16700 = vst [vmem:[#allocation182_spill] sm:$0xff] %v12758_v23  ;;  %6106 = vperm.xlu1 %10522, %v12090_v36   ;;  %v12761_v50 = vpop.permute.xlu0 %5862  ;;  %v12777_v23 = vld [vmem:[%s16417_s1 + $0x48] sm:$0xff] }
 0x580   : > { %16701 = vst [vmem:[#allocation183_spill] sm:$0xff] %v12761_v50  ;;  %6334 = vperm.xlu0 %10525, %v12766_v9   ;;  %16705 = vst [vmem:[#allocation187_spill] sm:$0xff] %v12777_v23 }
 0x583   : > { %6114 = vperm.xlu1 %10522, %v12097_v58   ;;  %v12770_v3 = vpop.permute.xlu1 %5726  ;;  %v12772_v15 = vpop.permute.xlu0 %5870  ;;  %v12788_v58 = vld [vmem:[%s16417_s1 + $0x58] sm:$0xff] }
 0x584   : > { %16703 = vst [vmem:[#allocation185_spill] sm:$0xff] %v12770_v3  ;;  %16704 = vst [vmem:[#allocation186_spill] sm:$0xff] %v12772_v15  ;;  %6342 = vperm.xlu0 %10525, %v12777_v23  }
 0x585   : > { %16708 = vst [vmem:[#allocation190_spill] sm:$0xff] %v12788_v58 }
 0x587   : > { %6122 = vperm.xlu1 %10522, %v12104_v25   ;;  %v12781_v36 = vpop.permute.xlu1 %5734  ;;  %v12783_v50 = vpop.permute.xlu0 %5878  ;;  %v12799_v25 = vld [vmem:[%s16417_s1 + $0x68] sm:$0xff] }
 0x588   : > { %16706 = vst [vmem:[#allocation188_spill] sm:$0xff] %v12781_v36  ;;  %16707 = vst [vmem:[#allocation189_spill] sm:$0xff] %v12783_v50  ;;  %6350 = vperm.xlu0 %10525, %v12788_v58   ;;  %v16711_v50 = vmov 15  }
 0x58b   : > { %6130 = vperm.xlu1 %10522, %v12111_v46   ;;  %v12792_v15 = vpop.permute.xlu1 %5738  ;;  %v12794_v3 = vpop.permute.xlu0 %5886  ;;  %v12811_v46 = vld [vmem:[%s16417_s1 + $0x78] sm:$0xff] }
 0x58c   : > { %16709 = vst [vmem:[#allocation191_spill] sm:$0xff] %v12792_v15  ;;  %16710 = vst [vmem:[#allocation192_spill] sm:$0xff] %v12794_v3  ;;  %6358 = vperm.xlu0 %10525, %v12799_v25   ;;  %v12819_v15 = vld [vmem:[%s16417_s1 + $0x10] sm:$0xff] }
 0x58d   : > { %16715 = vst [vmem:[#allocation196_spill] sm:$0xff] %v12819_v15 }
 0x58f   : > { %10523 = vset.pattern.permute.xlu1 %v16711_v50  ;;  %v12803_v36 = vpop.permute.xlu1 %5746  ;;  %v12806_v17 = vpop.permute.xlu0 %5894 }
 0x590   : > { %16712 = vst [vmem:[#allocation193_spill] sm:$0xff] %v12803_v36  ;;  %6190 = vperm.xlu1 %10523, %v12733_v44   ;;  %16713 = vst [vmem:[#allocation194_spill] sm:$0xff] %v12806_v17  ;;  %6366 = vperm.xlu0 %10525, %v12811_v46   ;;  %v16437_v36 = vmov 17   ;;  %v12828_v17 = vld [vmem:[%s16417_s1 + $0x8] sm:$0xff] }
 0x593   : > { %v12814_v3 = vpop.permute.xlu1 %5754  ;;  %v12822_v50 = vpop.permute.xlu0 %5902 }
 0x594   : > { %16714 = vst [vmem:[#allocation195_spill] sm:$0xff] %v12814_v3  ;;  %6198 = vperm.xlu1 %10523, %v12819_v15   ;;  %16716 = vst [vmem:[#allocation197_spill] sm:$0xff] %v12822_v50  ;;  %10528 = vset.pattern.permute.xlu0 %v16437_v36  ;;  %v12839_v50 = vld [vmem:[%s16417_s1 + $0x20] sm:$0xff] }
 0x595   : > { %6426 = vperm.xlu0 %10528, %v12828_v17  }
 0x597   : > { %v12831_v3 = vpop.permute.xlu1 %5762 }
 0x598   : > { %16717 = vst [vmem:[#allocation198_spill] sm:$0xff] %v12831_v3  ;;  %6202 = vperm.xlu1 %10523, %v12744_v7   ;;  %v12834_v41 = vpop.permute.xlu0 %5962  ;;  %v12850_v3 = vld [vmem:[%s16417_s1 + $0x30] sm:$0xff] }
 0x599   : > { %16718 = vst [vmem:[#allocation199_spill] sm:$0xff] %v12834_v41  ;;  %6438 = vperm.xlu0 %10528, %v12839_v50  }
 0x59b   : > { %v12842_v36 = vpop.permute.xlu1 %5770 }
 0x59c   : > { %16719 = vst [vmem:[#allocation200_spill] sm:$0xff] %v12842_v36  ;;  %6210 = vperm.xlu1 %10523, %v12755_v8   ;;  %v12845_v32 = vpop.permute.xlu0 %5974  ;;  %v12861_v36 = vld [vmem:[%s16417_s1 + $0x40] sm:$0xff] }
 0x59d   : > { %16720 = vst [vmem:[#allocation201_spill] sm:$0xff] %v12845_v32  ;;  %6446 = vperm.xlu0 %10528, %v12850_v3  }
 0x59f   : > { %v12853_v41 = vpop.permute.xlu1 %5778 }
 0x5a0   : > { %16721 = vst [vmem:[#allocation202_spill] sm:$0xff] %v12853_v41  ;;  %6218 = vperm.xlu1 %10523, %v12766_v9   ;;  %v12856_v12 = vpop.permute.xlu0 %5982  ;;  %v12872_v41 = vld [vmem:[%s16417_s1 + $0x50] sm:$0xff] }
 0x5a1   : > { %16722 = vst [vmem:[#allocation203_spill] sm:$0xff] %v12856_v12  ;;  %6454 = vperm.xlu0 %10528, %v12861_v36  }
 0x5a3   : > { %v12864_v32 = vpop.permute.xlu1 %5786 }
 0x5a4   : > { %16723 = vst [vmem:[#allocation204_spill] sm:$0xff] %v12864_v32  ;;  %6226 = vperm.xlu1 %10523, %v12777_v23   ;;  %v12867_v55 = vpop.permute.xlu0 %5990  ;;  %v12883_v32 = vld [vmem:[%s16417_s1 + $0x60] sm:$0xff] }
 0x5a5   : > { %16724 = vst [vmem:[#allocation205_spill] sm:$0xff] %v12867_v55  ;;  %6462 = vperm.xlu0 %10528, %v12872_v41  }
 0x5a8   : > { %6234 = vperm.xlu1 %10523, %v12788_v58   ;;  %v12876_v12 = vpop.permute.xlu1 %5846  ;;  %v12878_v56 = vpop.permute.xlu0 %5998 }
 0x5a9   : > { %16725 = vst [vmem:[#allocation206_spill] sm:$0xff] %v12876_v12  ;;  %16726 = vst [vmem:[#allocation207_spill] sm:$0xff] %v12878_v56  ;;  %6470 = vperm.xlu0 %10528, %v12883_v32  }
 0x5ac   : > { %6242 = vperm.xlu1 %10523, %v12799_v25   ;;  %v12887_v55 = vpop.permute.xlu1 %5850  ;;  %v12889_v19 = vpop.permute.xlu0 %6006 }
 0x5ad   : > { %16727 = vst [vmem:[#allocation208_spill] sm:$0xff] %v12887_v55  ;;  %16728 = vst [vmem:[#allocation209_spill] sm:$0xff] %v12889_v19  ;;  %6478 = vperm.xlu0 %10528, %v12894_v43   ;;  %v16732_v55 = vmov 16  }
 0x5b0   : > { %6250 = vperm.xlu1 %10523, %v12811_v46   ;;  %v12898_v56 = vpop.permute.xlu1 %5858  ;;  %v12900_v12 = vpop.permute.xlu0 %6014 }
 0x5b1   : > { %16730 = vst [vmem:[#allocation211_spill] sm:$0xff] %v12898_v56  ;;  %16731 = vst [vmem:[#allocation212_spill] sm:$0xff] %v12900_v12  ;;  %10529 = vset.pattern.permute.xlu0 %v16438_v6  ;;  %v16439_v56 = vmov 19  }
 0x5b2   : > { %6538 = vperm.xlu0 %10529, %v12733_v44  }
 0x5b4   : > { %10526 = vset.pattern.permute.xlu1 %v16732_v55  ;;  %v12905_v19 = vpop.permute.xlu1 %5866 }
 0x5b5   : > { %16733 = vst [vmem:[#allocation213_spill] sm:$0xff] %v12905_v19  ;;  %6310 = vperm.xlu1 %10526, %v12828_v17   ;;  %v12908_v11 = vpop.permute.xlu0 %6074 }
 0x5b6   : > { %16734 = vst [vmem:[#allocation214_spill] sm:$0xff] %v12908_v11  ;;  %6550 = vperm.xlu0 %10529, %v12744_v7  }
 0x5b8   : > { %v12911_v13 = vpop.permute.xlu1 %5874 }
 0x5b9   : > { %16735 = vst [vmem:[#allocation215_spill] sm:$0xff] %v12911_v13  ;;  %6314 = vperm.xlu1 %10526, %v12819_v15   ;;  %v12914_v12 = vpop.permute.xlu0 %6086 }
 0x5ba   : > { %16736 = vst [vmem:[#allocation216_spill] sm:$0xff] %v12914_v12  ;;  %6558 = vperm.xlu0 %10529, %v12755_v8  }
 0x5bc   : > { %v12917_v6 = vpop.permute.xlu1 %5882 }
 0x5bd   : > { %16737 = vst [vmem:[#allocation217_spill] sm:$0xff] %v12917_v6  ;;  %6322 = vperm.xlu1 %10526, %v12839_v50   ;;  %v12920_v55 = vpop.permute.xlu0 %6094 }
 0x5be   : > { %16738 = vst [vmem:[#allocation218_spill] sm:$0xff] %v12920_v55  ;;  %6566 = vperm.xlu0 %10529, %v12766_v9  }
 0x5c0   : > { %v12923_v19 = vpop.permute.xlu1 %5890 }
 0x5c1   : > { %16739 = vst [vmem:[#allocation219_spill] sm:$0xff] %v12923_v19  ;;  %6330 = vperm.xlu1 %10526, %v12850_v3   ;;  %v12926_v11 = vpop.permute.xlu0 %6102 }
 0x5c2   : > { %16740 = vst [vmem:[#allocation220_spill] sm:$0xff] %v12926_v11  ;;  %6574 = vperm.xlu0 %10529, %v12777_v23  }
 0x5c4   : > { %v12929_v13 = vpop.permute.xlu1 %5898 }
 0x5c5   : > { %16741 = vst [vmem:[#allocation221_spill] sm:$0xff] %v12929_v13  ;;  %6338 = vperm.xlu1 %10526, %v12861_v36   ;;  %v12932_v12 = vpop.permute.xlu0 %6110 }
 0x5c6   : > { %16742 = vst [vmem:[#allocation222_spill] sm:$0xff] %v12932_v12  ;;  %6582 = vperm.xlu0 %10529, %v12788_v58  }
 0x5c9   : > { %6346 = vperm.xlu1 %10526, %v12872_v41   ;;  %v12936_v55 = vpop.permute.xlu1 %5958  ;;  %v12938_v6 = vpop.permute.xlu0 %6118 }
 0x5ca   : > { %16743 = vst [vmem:[#allocation223_spill] sm:$0xff] %v12936_v55  ;;  %16744 = vst [vmem:[#allocation224_spill] sm:$0xff] %v12938_v6  ;;  %6590 = vperm.xlu0 %10529, %v12799_v25   ;;  %v16749_v6 = vmov 17  }
 0x5cd   : > { %6354 = vperm.xlu1 %10526, %v12883_v32   ;;  %v12942_v11 = vpop.permute.xlu1 %5966  ;;  %v12944_v19 = vpop.permute.xlu0 %6126 }
 0x5ce   : > { %16745 = vst [vmem:[#allocation225_spill] sm:$0xff] %v12942_v11  ;;  %16746 = vst [vmem:[#allocation226_spill] sm:$0xff] %v12944_v19  ;;  %6598 = vperm.xlu0 %10529, %v12811_v46  }
 0x5d1   : > { %6362 = vperm.xlu1 %10526, %v12894_v43   ;;  %v12948_v12 = vpop.permute.xlu1 %5970  ;;  %v12950_v13 = vpop.permute.xlu0 %6134 }
 0x5d2   : > { %16747 = vst [vmem:[#allocation227_spill] sm:$0xff] %v12948_v12  ;;  %16748 = vst [vmem:[#allocation228_spill] sm:$0xff] %v12950_v13  ;;  %10532 = vset.pattern.permute.xlu0 %v16439_v56 }
 0x5d3   : > { %6658 = vperm.xlu0 %10532, %v12828_v17  }
 0x5d5   : > { %10527 = vset.pattern.permute.xlu1 %v16749_v6  ;;  %v12955_v55 = vpop.permute.xlu1 %5978 }
 0x5d6   : > { %16750 = vst [vmem:[#allocation229_spill] sm:$0xff] %v12955_v55  ;;  %6422 = vperm.xlu1 %10527, %v12733_v44   ;;  %v12958_v19 = vpop.permute.xlu0 %6194 }
 0x5d7   : > { %16751 = vst [vmem:[#allocation230_spill] sm:$0xff] %v12958_v19  ;;  %6670 = vperm.xlu0 %10532, %v12839_v50  }
 0x5d9   : > { %v12961_v11 = vpop.permute.xlu1 %5986 }
 0x5da   : > { %16752 = vst [vmem:[#allocation231_spill] sm:$0xff] %v12961_v11  ;;  %6430 = vperm.xlu1 %10527, %v12819_v15   ;;  %v12964_v13 = vpop.permute.xlu0 %6206 }
 0x5db   : > { %16753 = vst [vmem:[#allocation232_spill] sm:$0xff] %v12964_v13  ;;  %6678 = vperm.xlu0 %10532, %v12850_v3  }
 0x5dd   : > { %v12967_v56 = vpop.permute.xlu1 %5994 }
 0x5de   : > { %16754 = vst [vmem:[#allocation233_spill] sm:$0xff] %v12967_v56  ;;  %6434 = vperm.xlu1 %10527, %v12744_v7   ;;  %v12970_v6 = vpop.permute.xlu0 %6214 }
 0x5df   : > { %16755 = vst [vmem:[#allocation234_spill] sm:$0xff] %v12970_v6  ;;  %6686 = vperm.xlu0 %10532, %v12861_v36  }
 0x5e1   : > { %v12973_v55 = vpop.permute.xlu1 %6002 }
 0x5e2   : > { %16756 = vst [vmem:[#allocation235_spill] sm:$0xff] %v12973_v55  ;;  %6442 = vperm.xlu1 %10527, %v12755_v8   ;;  %v12976_v19 = vpop.permute.xlu0 %6222 }
 0x5e3   : > { %16757 = vst [vmem:[#allocation236_spill] sm:$0xff] %v12976_v19  ;;  %6694 = vperm.xlu0 %10532, %v12872_v41  }
 0x5e5   : > { %v12979_v11 = vpop.permute.xlu1 %6010 }
 0x5e6   : > { %16758 = vst [vmem:[#allocation237_spill] sm:$0xff] %v12979_v11  ;;  %6450 = vperm.xlu1 %10527, %v12766_v9   ;;  %v12982_v13 = vpop.permute.xlu0 %6230  ;;  %v16440_v11 = vmov 20  }
 0x5e7   : > { %16759 = vst [vmem:[#allocation238_spill] sm:$0xff] %v12982_v13  ;;  %6702 = vperm.xlu0 %10532, %v12883_v32  }
 0x5e9   : > { %v12985_v56 = vpop.permute.xlu1 %6018 }
 0x5ea   : > { %16760 = vst [vmem:[#allocation239_spill] sm:$0xff] %v12985_v56  ;;  %6458 = vperm.xlu1 %10527, %v12777_v23   ;;  %v12988_v6 = vpop.permute.xlu0 %6238 }
 0x5eb   : > { %16761 = vst [vmem:[#allocation240_spill] sm:$0xff] %v12988_v6  ;;  %6710 = vperm.xlu0 %10532, %v12894_v43  }
 0x5ee   : > { %6466 = vperm.xlu1 %10527, %v12788_v58   ;;  %v12992_v19 = vpop.permute.xlu1 %6078  ;;  %v12994_v55 = vpop.permute.xlu0 %6246 }
 0x5ef   : > { %16762 = vst [vmem:[#allocation241_spill] sm:$0xff] %v12992_v19  ;;  %16763 = vst [vmem:[#allocation242_spill] sm:$0xff] %v12994_v55  ;;  %10533 = vset.pattern.permute.xlu0 %v16440_v11  ;;  %v16768_v55 = vmov 18  }
 0x5f0   : > { %6770 = vperm.xlu0 %10533, %v12733_v44  }
 0x5f2   : > { %6474 = vperm.xlu1 %10527, %v12799_v25   ;;  %v12999_v13 = vpop.permute.xlu1 %6082 }
 0x5f3   : > { %16764 = vst [vmem:[#allocation243_spill] sm:$0xff] %v12999_v13  ;;  %v13001_v56 = vpop.permute.xlu0 %6306 }
 0x5f4   : > { %16765 = vst [vmem:[#allocation244_spill] sm:$0xff] %v13001_v56  ;;  %6782 = vperm.xlu0 %10533, %v12744_v7  }
 0x5f6   : > { %6482 = vperm.xlu1 %10527, %v12811_v46   ;;  %v13005_v6 = vpop.permute.xlu1 %6090 }
 0x5f7   : > { %16766 = vst [vmem:[#allocation245_spill] sm:$0xff] %v13005_v6  ;;  %v13007_v19 = vpop.permute.xlu0 %6318 }
 0x5f8   : > { %16767 = vst [vmem:[#allocation246_spill] sm:$0xff] %v13007_v19  ;;  %6790 = vperm.xlu0 %10533, %v12755_v8  }
 0x5fa   : > { %10530 = vset.pattern.permute.xlu1 %v16768_v55  ;;  %v13011_v11 = vpop.permute.xlu1 %6098 }
 0x5fb   : > { %16769 = vst [vmem:[#allocation247_spill] sm:$0xff] %v13011_v11  ;;  %6542 = vperm.xlu1 %10530, %v12828_v17   ;;  %v13014_v12 = vpop.permute.xlu0 %6326 }
 0x5fc   : > { %16770 = vst [vmem:[#allocation248_spill] sm:$0xff] %v13014_v12  ;;  %6798 = vperm.xlu0 %10533, %v12766_v9  }
 0x5fe   : > { %v13017_v56 = vpop.permute.xlu1 %6106 }
 0x5ff   : > { %16771 = vst [vmem:[#allocation249_spill] sm:$0xff] %v13017_v56  ;;  %6546 = vperm.xlu1 %10530, %v12819_v15   ;;  %v13020_v13 = vpop.permute.xlu0 %6334 }
 0x600   : > { %16772 = vst [vmem:[#allocation250_spill] sm:$0xff] %v13020_v13  ;;  %6806 = vperm.xlu0 %10533, %v12777_v23  }
 0x602   : > { %v13023_v19 = vpop.permute.xlu1 %6114 }
 0x603   : > { %16773 = vst [vmem:[#allocation251_spill] sm:$0xff] %v13023_v19  ;;  %6554 = vperm.xlu1 %10530, %v12839_v50   ;;  %v13026_v55 = vpop.permute.xlu0 %6342 }
 0x604   : > { %16774 = vst [vmem:[#allocation252_spill] sm:$0xff] %v13026_v55  ;;  %6814 = vperm.xlu0 %10533, %v12788_v58  }
 0x606   : > { %v13029_v11 = vpop.permute.xlu1 %6122 }
 0x607   : > { %16775 = vst [vmem:[#allocation253_spill] sm:$0xff] %v13029_v11  ;;  %6562 = vperm.xlu1 %10530, %v12850_v3   ;;  %v13032_v12 = vpop.permute.xlu0 %6350  ;;  %v16441_v11 = vmov 21  }
 0x608   : > { %16776 = vst [vmem:[#allocation254_spill] sm:$0xff] %v13032_v12  ;;  %6822 = vperm.xlu0 %10533, %v12799_v25  }
 0x60a   : > { %v13035_v56 = vpop.permute.xlu1 %6130 }
 0x60b   : > { %16777 = vst [vmem:[#allocation255_spill] sm:$0xff] %v13035_v56  ;;  %6570 = vperm.xlu1 %10530, %v12861_v36   ;;  %v13038_v13 = vpop.permute.xlu0 %6358 }
 0x60c   : > { %16778 = vst [vmem:[#allocation256_spill] sm:$0xff] %v13038_v13  ;;  %6830 = vperm.xlu0 %10533, %v12811_v46  }
 0x60f   : > { %6578 = vperm.xlu1 %10530, %v12872_v41   ;;  %v13042_v55 = vpop.permute.xlu1 %6190  ;;  %v13044_v19 = vpop.permute.xlu0 %6366 }
 0x610   : > { %16779 = vst [vmem:[#allocation257_spill] sm:$0xff] %v13042_v55  ;;  %16780 = vst [vmem:[#allocation258_spill] sm:$0xff] %v13044_v19  ;;  %10536 = vset.pattern.permute.xlu0 %v16441_v11  ;;  %v16785_v19 = vmov 19  }
 0x611   : > { %6890 = vperm.xlu0 %10536, %v12828_v17  }
 0x613   : > { %6586 = vperm.xlu1 %10530, %v12883_v32   ;;  %v13049_v12 = vpop.permute.xlu1 %6198 }
 0x614   : > { %16781 = vst [vmem:[#allocation259_spill] sm:$0xff] %v13049_v12  ;;  %v13051_v56 = vpop.permute.xlu0 %6426 }
 0x615   : > { %16782 = vst [vmem:[#allocation260_spill] sm:$0xff] %v13051_v56  ;;  %6902 = vperm.xlu0 %10536, %v12839_v50  }
 0x617   : > { %6594 = vperm.xlu1 %10530, %v12894_v43   ;;  %v13055_v13 = vpop.permute.xlu1 %6202 }
 0x618   : > { %16783 = vst [vmem:[#allocation261_spill] sm:$0xff] %v13055_v13  ;;  %v13057_v55 = vpop.permute.xlu0 %6438 }
 0x619   : > { %16784 = vst [vmem:[#allocation262_spill] sm:$0xff] %v13057_v55  ;;  %6910 = vperm.xlu0 %10536, %v12850_v3  }
 0x61b   : > { %10531 = vset.pattern.permute.xlu1 %v16785_v19  ;;  %v13061_v11 = vpop.permute.xlu1 %6210 }
 0x61c   : > { %16786 = vst [vmem:[#allocation263_spill] sm:$0xff] %v13061_v11  ;;  %6654 = vperm.xlu1 %10531, %v12733_v44   ;;  %v13064_v6 = vpop.permute.xlu0 %6446 }
 0x61d   : > { %16787 = vst [vmem:[#allocation264_spill] sm:$0xff] %v13064_v6  ;;  %6918 = vperm.xlu0 %10536, %v12861_v36  }
 0x61f   : > { %v13067_v56 = vpop.permute.xlu1 %6218 }
 0x620   : > { %16788 = vst [vmem:[#allocation265_spill] sm:$0xff] %v13067_v56  ;;  %6662 = vperm.xlu1 %10531, %v12819_v15   ;;  %v13070_v12 = vpop.permute.xlu0 %6454 }
 0x621   : > { %16789 = vst [vmem:[#allocation266_spill] sm:$0xff] %v13070_v12  ;;  %6926 = vperm.xlu0 %10536, %v12872_v41  }
 0x623   : > { %v13073_v55 = vpop.permute.xlu1 %6226 }
 0x624   : > { %16790 = vst [vmem:[#allocation267_spill] sm:$0xff] %v13073_v55  ;;  %6666 = vperm.xlu1 %10531, %v12744_v7   ;;  %v13076_v19 = vpop.permute.xlu0 %6462  ;;  %v16442_v55 = vmov 22  }
 0x625   : > { %16791 = vst [vmem:[#allocation268_spill] sm:$0xff] %v13076_v19  ;;  %6934 = vperm.xlu0 %10536, %v12883_v32  }
 0x627   : > { %v13079_v11 = vpop.permute.xlu1 %6234 }
 0x628   : > { %16792 = vst [vmem:[#allocation269_spill] sm:$0xff] %v13079_v11  ;;  %6674 = vperm.xlu1 %10531, %v12755_v8   ;;  %v13082_v6 = vpop.permute.xlu0 %6470  ;;  %v4513_v11 = vlaneseq }
 0x629   : > { %16793 = vst [vmem:[#allocation270_spill] sm:$0xff] %v13082_v6  ;;  %6942 = vperm.xlu0 %10536, %v12894_v43  }
 0x62a   : > { %v13098_v6 = vshrl.u32 %v4513_v11, 7 }
 0x62b   : > { %v13085_v56 = vpop.permute.xlu1 %6242 }
 0x62c   : > { %16794 = vst [vmem:[#allocation271_spill] sm:$0xff] %v13085_v56  ;;  %6682 = vperm.xlu1 %10531, %v12766_v9   ;;  %v13088_v12 = vpop.permute.xlu0 %6478  ;;  %v13115_v11 = vsub.s32 0, %v13098_v6 }
 0x62d   : > { %16795 = vst [vmem:[#allocation272_spill] sm:$0xff] %v13088_v12  ;;  %10537 = vset.pattern.permute.xlu0 %v16442_v55  ;;  %v13107_v55 = vsub.s32 1, %v13098_v6 }
 0x62e   : > { %7002 = vperm.xlu0 %10537, %v12733_v44   ;;  %16802 = vst [vmem:[#allocation279_spill] sm:$0xff] %v13115_v11  ;;  %v16808_v44 = vmov 20  }
 0x62f   : > { %v13091_v19 = vpop.permute.xlu1 %6250  ;;  %16800 = vst [vmem:[#allocation277_spill] sm:$0xff] %v13107_v55 }
 0x630   : > { %16796 = vst [vmem:[#allocation273_spill] sm:$0xff] %v13091_v19  ;;  %6690 = vperm.xlu1 %10531, %v12777_v23  }
 0x631   : > { %v13095_v13 = vpop.permute.xlu0 %6538 }
 0x632   : > { %16797 = vst [vmem:[#allocation274_spill] sm:$0xff] %v13095_v13  ;;  %7014 = vperm.xlu0 %10537, %v12744_v7   ;;  %v13112_v13 = vld [vmem:[#allocation3] sm:$0xff]  ;;  %v13135_v7 = vsub.s32 3, %v13098_v6 }
 0x634   : > { %6698 = vperm.xlu1 %10531, %v12788_v58   ;;  %v13101_v56 = vpop.permute.xlu1 %6310  ;;  %16806 = vst [vmem:[#allocation283_spill] sm:$0xff] %v13135_v7 }
 0x635   : > { %16798 = vst [vmem:[#allocation275_spill] sm:$0xff] %v13101_v56  ;;  %v13103_v12 = vpop.permute.xlu0 %6550 }
 0x636   : > { %16799 = vst [vmem:[#allocation276_spill] sm:$0xff] %v13103_v12  ;;  %7022 = vperm.xlu0 %10537, %v12755_v8   ;;  %v13122_v12 = vrot.slane %v13112_v13, %v13107_v55  ;;  %v13132_v8 = vsub.s32 2, %v13098_v6 }
 0x638   : > { %6706 = vperm.xlu1 %10531, %v12799_v25   ;;  %v13110_v19 = vpop.permute.xlu1 %6314  ;;  %16805 = vst [vmem:[#allocation282_spill] sm:$0xff] %v13132_v8 }
 0x639   : > { %16801 = vst [vmem:[#allocation278_spill] sm:$0xff] %v13110_v19  ;;  %v13117_v47 = vpop.permute.xlu0 %6558  ;;  %v13129_v19 = vrot.slane %v13112_v13, %v13115_v11  ;;  %v4634_v11 = vsub.f32 %v12195_v51, %v13122_v12  ;;  %v13164_v51 = vrot.slane %v13112_v13, %v13135_v7 }
 0x63a   : > { %16803 = vst [vmem:[#allocation280_spill] sm:$0xff] %v13117_v47  ;;  %7030 = vperm.xlu0 %10537, %v12766_v9  }
 0x63b   : > { %v4517_v55 = vsub.f32 %v12150_v26, %v13129_v19  ;;  %v4520_v9 = vsub.f32 %v12156_v34, %v13129_v19  ;;  %v13155_v26 = vrot.slane %v13112_v13, %v13132_v8  ;;  %v4524_v34 = vsub.f32 %v12167_v18, %v13129_v19  ;;  %16810 = vst [vmem:[#allocation286_spill] sm:$0xff] %v13164_v51 }
 0x63c   : > { %6714 = vperm.xlu1 %10531, %v12811_v46   ;;  %v13125_v56 = vpop.permute.xlu1 %6322  ;;  %v4528_v18 = vsub.f32 %v12179_v29, %v13129_v19  ;;  %v4532_v7 = vsub.f32 %v12191_v62, %v13129_v19  ;;  %v4650_v51 = vand.u32 2147483647, %v4634_v11  ;;  %v4639_v29 = vsub.f32 %v12208_v21, %v13122_v12 }
 0x63d   : > { %16804 = vst [vmem:[#allocation281_spill] sm:$0xff] %v13125_v56  ;;  %v13137_v47 = vpop.permute.xlu0 %6566  ;;  %v4522_v56 = vsub.f32 %v12161_v30, %v13129_v19  ;;  %v4526_v30 = vsub.f32 %v12173_v28, %v13129_v19  ;;  %v13173_v8 = vand.u32 2147483647, %v4520_v9  ;;  %v4530_v28 = vsub.f32 %v12185_v40, %v13129_v19 }
 0x63e   : > { %16807 = vst [vmem:[#allocation284_spill] sm:$0xff] %v13137_v47  ;;  %7038 = vperm.xlu0 %10537, %v12777_v23   ;;  %v4518_v47 = vsub.f32 %v12198_v35, %v13129_v19  ;;  %v13195_v40 = vand.u32 2147483647, %v4524_v34  ;;  %v4519_v21 = vsub.f32 %v12201_v57, %v13129_v19  ;;  %v4527_v34 = vsub.f32 %v12220_v53, %v13129_v19 }
 0x63f   : > { %v13175_v23 = vand.u32 2147483647, %v4522_v56  ;;  %v4521_v56 = vsub.f32 %v12206_v31, %v13129_v19  ;;  %v13197_v62 = vand.u32 2147483647, %v4526_v30  ;;  %v13205_v31 = vand.u32 2147483647, %v4528_v18 }
 0x640   : > { %10534 = vset.pattern.permute.xlu1 %v16808_v44  ;;  %v13149_v43 = vpop.permute.xlu1 %6330  ;;  %v13167_v44 = vsub.s32 4, %v13098_v6  ;;  %v4534_v9 = vand.u32 2147483647, %v4518_v47  ;;  %v4525_v47 = vsub.f32 %v12215_v63, %v13129_v19  ;;  %v13214_v30 = vand.u32 2147483647, %v4530_v28 }
 0x641   : > { %16809 = vst [vmem:[#allocation285_spill] sm:$0xff] %v13149_v43  ;;  %6774 = vperm.xlu1 %10534, %v12828_v17   ;;  %v13169_v35 = vpop.permute.xlu0 %6574  ;;  %v13171_v43 = vand.u32 2147483647, %v4517_v55  ;;  %v4637_v55 = vsub.f32 %v12203_v48, %v13122_v12  ;;  %v4641_v48 = vsub.f32 %v12212_v14, %v13122_v12  ;;  %v13216_v14 = vand.u32 2147483647, %v4532_v7 }
 0x642   : > { %16811 = vst [vmem:[#allocation287_spill] sm:$0xff] %v13167_v44  ;;  %16812 = vst [vmem:[#allocation288_spill] sm:$0xff] %v13169_v35  ;;  %7046 = vperm.xlu0 %10537, %v12788_v58   ;;  %v4523_v58 = vsub.f32 %v12210_v5, %v13129_v19  ;;  %v4643_v5 = vsub.f32 %v12217_v27, %v13122_v12  ;;  %v13220_v18 = vrot.slane %v13112_v13, %v13167_v44 }
 0x643   : > { %v4653_v63 = vand.u32 2147483647, %v4637_v55  ;;  %v13224_v57 = vadd.f32 %v4650_v51, %v4534_v9  ;;  %v4655_v27 = vand.u32 2147483647, %v4639_v29  ;;  %v4657_v53 = vand.u32 2147483647, %v4641_v48 }
 0x644   : > { %v13186_v35 = vpop.permute.xlu1 %6338  ;;  %16815 = vst [vmem:[#allocation291_spill] sm:$0xff] %v13220_v18  ;;  %v4645_v7 = vsub.f32 %v12222_v60, %v13122_v12  ;;  %v4633_v28 = vsub.f32 %v12237_v38, %v13122_v12  ;;  %v4535_v44 = vand.u32 2147483647, %v4519_v21  ;;  %v4659_v18 = vand.u32 2147483647, %v4643_v5 }
 0x645   : > { %16813 = vst [vmem:[#allocation289_spill] sm:$0xff] %v13186_v35  ;;  %6778 = vperm.xlu1 %10534, %v12819_v15   ;;  %v13203_v11 = vpop.permute.xlu0 %6582  ;;  %v4537_v35 = vand.u32 2147483647, %v4521_v56  ;;  %v4539_v15 = vand.u32 2147483647, %v4523_v58  ;;  %v4529_v51 = vsub.f32 %v12225_v54, %v13129_v19  ;;  %v4647_v58 = vsub.f32 %v12227_v59, %v13122_v12 }
 0x646   : > { %16814 = vst [vmem:[#allocation290_spill] sm:$0xff] %v13203_v11  ;;  %7054 = vperm.xlu0 %10537, %v12799_v25   ;;  %v4541_v25 = vand.u32 2147483647, %v4525_v47  ;;  %v4531_v9 = vsub.f32 %v12230_v10, %v13129_v19  ;;  %v4636_v60 = vsub.f32 %v12249_v37, %v13122_v12  ;;  %v4749_v54 = vsub.f32 %v12234_v1, %v13155_v26 }
 0x647   : > { %v13244_v56 = vadd.f32 %v4653_v63, %v4537_v35  ;;  %v13246_v29 = vadd.f32 %v4655_v27, %v4539_v15  ;;  %v4661_v10 = vand.u32 2147483647, %v4645_v7  ;;  %v4649_v19 = vand.u32 2147483647, %v4633_v28 }
 0x648   : > { %v13222_v11 = vpop.permute.xlu1 %6346  ;;  %v13253_v59 = vadd.f32 %v4657_v53, %v4541_v25  ;;  %v4635_v37 = vsub.f32 %v12243_v52, %v13122_v12  ;;  %v4545_v15 = vand.u32 2147483647, %v4529_v51  ;;  %v4640_v1 = vsub.f32 %v12261_v2, %v13122_v12 }
 0x649   : > { %16816 = vst [vmem:[#allocation292_spill] sm:$0xff] %v13222_v11  ;;  %6786 = vperm.xlu1 %10534, %v12839_v50   ;;  %v13231_v55 = vpop.permute.xlu0 %6590  ;;  %v4543_v11 = vand.u32 2147483647, %v4527_v34  ;;  %v13264_v47 = vsub.s32 5, %v13098_v6  ;;  %v4663_v21 = vand.u32 2147483647, %v4647_v58  ;;  %v4752_v34 = vsub.f32 %v12240_v42, %v13155_v26 }
 0x64a   : > { %16817 = vst [vmem:[#allocation293_spill] sm:$0xff] %v13231_v55  ;;  %7062 = vperm.xlu0 %10537, %v12811_v46   ;;  %v4638_v46 = vsub.f32 %v12255_v22, %v13122_v12  ;;  %v16468_v22 = vmov 23   ;;  %v4547_v5 = vand.u32 2147483647, %v4531_v9  ;;  %v4652_v52 = vand.u32 2147483647, %v4636_v60 }
 0x64b   : > { %v13259_v35 = vadd.f32 %v4659_v18, %v4543_v11  ;;  %16820 = vst [vmem:[#allocation296_spill] sm:$0xff] %v13264_v47  ;;  %v4765_v11 = vand.u32 2147483647, %v4749_v54  ;;  %v4754_v2 = vsub.f32 %v12246_v39, %v13155_v26  ;;  %v4642_v27 = vsub.f32 %v12267_v61, %v13122_v12 }
 0x64c   : > { %v13242_v38 = vpop.permute.xlu1 %6354  ;;  %v4654_v18 = vand.u32 2147483647, %v4638_v46  ;;  %v4665_v53 = vadd.f32 %v4649_v19, %v13171_v43  ;;  %v4651_v25 = vand.u32 2147483647, %v4635_v37  ;;  %v4756_v42 = vsub.f32 %v12252_v24, %v13155_v26 }
 0x64d   : > { %16818 = vst [vmem:[#allocation294_spill] sm:$0xff] %v13242_v38  ;;  %6794 = vperm.xlu1 %10534, %v12850_v3   ;;  %v13257_v48 = vpop.permute.xlu0 %6598  ;;  %v4644_v7 = vsub.f32 %v12273_v4, %v13122_v12  ;;  %v4656_v28 = vand.u32 2147483647, %v4640_v1  ;;  %v4646_v39 = vsub.f32 %v12279_v33, %v13122_v12  ;;  %v13288_v61 = vrot.slane %v13112_v13, %v13264_v47 }
 0x64e   : > { %16819 = vst [vmem:[#allocation295_spill] sm:$0xff] %v13257_v48  ;;  %10540 = vset.pattern.permute.xlu0 %v16468_v22  ;;  %v13292_v43 = vadd.f32 %v4661_v10, %v4545_v15  ;;  %v4768_v58 = vand.u32 2147483647, %v4752_v34  ;;  %v4668_v24 = vadd.f32 %v4652_v52, %v13173_v8  ;;  %v4760_v4 = vsub.f32 %v12264_v0, %v13155_v26 }
 0x64f   : > { %7122 = vperm.xlu0 %10540, %v12828_v17   ;;  %v4758_v17 = vsub.f32 %v12258_v20, %v13155_v26  ;;  %v13298_v20 = vadd.f32 %v4663_v21, %v4547_v5  ;;  %v4770_v9 = vand.u32 2147483647, %v4754_v2  ;;  %v4670_v33 = vadd.f32 %v4654_v18, %v13175_v23  ;;  %v16828_v2 = vld [vmem:[#allocation286_spill] sm:$0xff]  ;;  %v16829_v18 = vld [vmem:[#allocation27_spill] sm:$0xff] }
 0x650   : > { %v13269_v63 = vpop.permute.xlu1 %6362  ;;  %v4658_v60 = vand.u32 2147483647, %v4642_v27  ;;  %v13304_v46 = vadd.f32 %v4651_v25, %v4535_v44  ;;  %v4772_v10 = vand.u32 2147483647, %v4756_v42  ;;  %v4660_v19 = vand.u32 2147483647, %v4644_v7 }
 0x651   : > { %16821 = vst [vmem:[#allocation297_spill] sm:$0xff] %v13269_v63  ;;  %6802 = vperm.xlu1 %10534, %v12861_v36   ;;  %v13306_v8 = vadd.f32 %v4765_v11, %v4665_v53  ;;  %v4774_v37 = vand.u32 2147483647, %v4758_v17  ;;  %v4672_v0 = vadd.f32 %v4656_v28, %v13195_v40  ;;  %v4662_v15 = vand.u32 2147483647, %v4646_v39  ;;  %v16831_v53 = vld [vmem:[#allocation35_spill] sm:$0xff] }
 0x652   : > { %v13290_v51 = vpop.permute.xlu0 %6658  ;;  %v4776_v23 = vand.u32 2147483647, %v4760_v4  ;;  %v4648_v21 = vsub.f32 %v12285_v49, %v13122_v12  ;;  %v13315_v5 = vadd.f32 %v4768_v58, %v4668_v24  ;;  %v13318_v44 = vsub.s32 6, %v13098_v6  ;;  %v16832_v7 = vld [vmem:[#allocation37_spill] sm:$0xff]  ;;  %v16834_v58 = vld [vmem:[#allocation28_spill] sm:$0xff]  ;;  %v16835_v4 = vld [vmem:[#allocation30_spill] sm:$0xff] }
 0x653   : > { %16822 = vst [vmem:[#allocation298_spill] sm:$0xff] %v13290_v51  ;;  %7134 = vperm.xlu0 %10540, %v12839_v50   ;;  %v4762_v50 = vsub.f32 %v12270_v16, %v13155_v26  ;;  %v4674_v34 = vadd.f32 %v4658_v60, %v13197_v62  ;;  %v4764_v40 = vsub.f32 %v12275_v45, %v13155_v26  ;;  %v16826_v16 = vld [vmem:[#allocation29_spill] sm:$0xff]  ;;  %v16470_v51 = vmov 25  }
 0x654   : > { %16825 = vst [vmem:[#allocation301_spill] sm:$0xff] %v13318_v44  ;;  %v4750_v52 = vsub.f32 %v16826_v16, %v13155_v26  ;;  %v13326_v11 = vadd.f32 %v4770_v9, %v4670_v33  ;;  %v4676_v12 = vadd.f32 %v4660_v19, %v13205_v31  ;;  %v4866_v27 = vsub.f32 %v16829_v18, %v16828_v2 }
 0x655   : > { %6810 = vperm.xlu1 %10534, %v12872_v41   ;;  %v13302_v54 = vpop.permute.xlu1 %6422  ;;  %v4755_v45 = vsub.f32 %v16831_v53, %v13155_v26  ;;  %v4778_v25 = vand.u32 2147483647, %v4762_v50  ;;  %v4678_v42 = vadd.f32 %v4662_v15, %v13214_v30  ;;  %v4757_v17 = vsub.f32 %v16832_v7, %v13155_v26  ;;  %v16837_v50 = vld [vmem:[#allocation210_spill] sm:$0xff]  ;;  %v16839_v53 = vld [vmem:[#allocation32_spill] sm:$0xff] }
 0x656   : > { %16823 = vst [vmem:[#allocation299_spill] sm:$0xff] %v13302_v54  ;;  %v13311_v1 = vpop.permute.xlu0 %6670  ;;  %v13341_v28 = vadd.f32 %v4772_v10, %v4672_v0  ;;  %v4664_v31 = vand.u32 2147483647, %v4648_v21  ;;  %v4869_v24 = vsub.f32 %v16834_v58, %v16828_v2  ;;  %v4871_v9 = vsub.f32 %v16835_v4, %v16828_v2  ;;  %v16836_v10 = vld [vmem:[#allocation31_spill] sm:$0xff] }
 0x657   : > { %16824 = vst [vmem:[#allocation300_spill] sm:$0xff] %v13311_v1  ;;  %7142 = vperm.xlu0 %10540, %v12850_v3   ;;  %v16830_v3 = vld [vmem:[#allocation33_spill] sm:$0xff]  ;;  %v13351_v33 = vrot.slane %v13112_v13, %v13318_v44  ;;  %v4780_v30 = vand.u32 2147483647, %v4764_v40  ;;  %v4766_v60 = vand.u32 2147483647, %v4750_v52  ;;  %v4751_v19 = vsub.f32 %v16836_v10, %v13155_v26 }
 0x658   : > { %v4753_v62 = vsub.f32 %v16830_v3, %v13155_v26  ;;  %v13356_v0 = vadd.f32 %v4774_v37, %v4674_v34  ;;  %v4882_v21 = vand.u32 2147483647, %v4866_v27  ;;  %v4771_v18 = vand.u32 2147483647, %v4755_v45  ;;  %v16840_v40 = vld [vmem:[#allocation39_spill] sm:$0xff]  ;;  %v16842_v27 = vld [vmem:[#allocation41_spill] sm:$0xff] }
 0x659   : > { %6818 = vperm.xlu1 %10534, %v12883_v32   ;;  %v13329_v49 = vpop.permute.xlu1 %6430  ;;  %v13361_v3 = vadd.f32 %v4776_v23, %v4676_v12  ;;  %v4873_v7 = vsub.f32 %v16839_v53, %v16828_v2  ;;  %v4759_v52 = vsub.f32 %v16840_v40, %v13155_v26  ;;  %v13367_v58 = vadd.f32 %v4778_v25, %v4678_v42  ;;  %v16843_v45 = vld [vmem:[#allocation34_spill] sm:$0xff]  ;;  %v16844_v25 = vld [vmem:[#allocation36_spill] sm:$0xff] }
 0x65a   : > { %16827 = vst [vmem:[#allocation29_spill] sm:$0xff] %v13329_v49  ;;  %v13343_v39 = vpop.permute.xlu0 %6678  ;;  %v4769_v16 = vand.u32 2147483647, %v4753_v62  ;;  %v4680_v34 = vadd.f32 %v4664_v31, %v13216_v14  ;;  %v4885_v4 = vand.u32 2147483647, %v4869_v24  ;;  %v4761_v62 = vsub.f32 %v16842_v27, %v13155_v26  ;;  %v16847_v24 = vld [vmem:[#allocation38_spill] sm:$0xff] }
 0x65b   : > { %16833 = vst [vmem:[#allocation286_spill] sm:$0xff] %v13343_v39  ;;  %7150 = vperm.xlu0 %10540, %v12861_v36   ;;  %v4773_v36 = vand.u32 2147483647, %v4757_v17  ;;  %v4887_v10 = vand.u32 2147483647, %v4871_v9  ;;  %v4782_v23 = vadd.f32 %v4766_v60, %v13224_v57  ;;  %v4875_v17 = vsub.f32 %v16843_v45, %v16828_v2  ;;  %v16848_v57 = vld [vmem:[#allocation43_spill] sm:$0xff] }
 0x65c   : > { %v4767_v12 = vand.u32 2147483647, %v4751_v19  ;;  %v4877_v42 = vsub.f32 %v16844_v25, %v16828_v2  ;;  %v16845_v53 = vmov 21   ;;  %v4785_v14 = vadd.f32 %v4769_v16, %v13244_v56  ;;  %v16849_v60 = vld [vmem:[#allocation175_spill] sm:$0xff]  ;;  %v16853_v16 = vld [vmem:[#allocation40_spill] sm:$0xff] }
 0x65d   : > { %6826 = vperm.xlu1 %10534, %v16837_v50   ;;  %v13359_v15 = vpop.permute.xlu1 %6434  ;;  %v4787_v31 = vadd.f32 %v4771_v18, %v13246_v29  ;;  %v4763_v9 = vsub.f32 %v16848_v57, %v13155_v26  ;;  %v4889_v19 = vand.u32 2147483647, %v4873_v7  ;;  %v4789_v27 = vadd.f32 %v4773_v36, %v13253_v59  ;;  %v16852_v56 = vld [vmem:[#allocation291_spill] sm:$0xff] }
 0x65e   : > { %16838 = vst [vmem:[#allocation27_spill] sm:$0xff] %v13359_v15  ;;  %v13369_v37 = vpop.permute.xlu0 %6686  ;;  %v4775_v45 = vand.u32 2147483647, %v4759_v52  ;;  %v13392_v25 = vsub.s32 7, %v13098_v6  ;;  %v4981_v29 = vsub.f32 %v16853_v16, %v16852_v56  ;;  %v4777_v18 = vand.u32 2147483647, %v4761_v62 }
 0x65f   : > { %16841 = vst [vmem:[#allocation33_spill] sm:$0xff] %v13369_v37  ;;  %7158 = vperm.xlu0 %10540, %v12872_v41   ;;  %v4879_v41 = vsub.f32 %v16847_v24, %v16828_v2  ;;  %v16854_v24 = vld [vmem:[#allocation45_spill] sm:$0xff]  ;;  %v13400_v37 = vadd.f32 %v4780_v30, %v4680_v34  ;;  %v13404_v26 = vadd.f32 %v4767_v12, %v13304_v46  ;;  %v4891_v59 = vand.u32 2147483647, %v4875_v17 }
 0x660   : > { %16850 = vst [vmem:[#allocation37_spill] sm:$0xff] %v13392_v25  ;;  %v4865_v22 = vsub.f32 %v16854_v24, %v16828_v2  ;;  %v4893_v7 = vand.u32 2147483647, %v4877_v42  ;;  %v13406_v6 = vadd.f32 %v4882_v21, %v4782_v23  ;;  %v4779_v57 = vand.u32 2147483647, %v4763_v9  ;;  %v16856_v24 = vld [vmem:[#allocation196_spill] sm:$0xff] }
 0x661   : > { %10535 = vset.pattern.permute.xlu1 %v16845_v53  ;;  %v13381_v40 = vpop.permute.xlu1 %6442  ;;  %v4895_v52 = vand.u32 2147483647, %v4879_v41  ;;  %v13410_v16 = vadd.f32 %v4885_v4, %v4785_v14  ;;  %v13412_v62 = vadd.f32 %v4887_v10, %v4787_v31  ;;  %v4791_v30 = vadd.f32 %v4775_v45, %v13259_v35  ;;  %v16859_v10 = vld [vmem:[#allocation44_spill] sm:$0xff]  ;;  %v16860_v35 = vld [vmem:[#allocation46_spill] sm:$0xff]  ;;  %v16861_v31 = vld [vmem:[#allocation47_spill] sm:$0xff] }
 0x662   : > { %16846 = vst [vmem:[#allocation35_spill] sm:$0xff] %v13381_v40  ;;  %6886 = vperm.xlu1 %10535, %v16849_v60   ;;  %v13394_v53 = vpop.permute.xlu0 %6694  ;;  %v13418_v34 = vadd.f32 %v4889_v19, %v4789_v27  ;;  %v13422_v21 = vrot.slane %v13112_v13, %v13392_v25  ;;  %v4997_v12 = vand.u32 2147483647, %v4981_v29  ;;  %v4793_v4 = vadd.f32 %v4777_v18, %v13292_v43  ;;  %v16862_v13 = vld [vmem:[#allocation49_spill] sm:$0xff]  ;;  %v16864_v43 = vld [vmem:[#allocation51_spill] sm:$0xff] }
 0x663   : > { %16851 = vst [vmem:[#allocation28_spill] sm:$0xff] %v13394_v53  ;;  %7166 = vperm.xlu0 %10540, %v12883_v32   ;;  %v16857_v32 = vld [vmem:[#allocation42_spill] sm:$0xff]  ;;  %v4986_v17 = vsub.f32 %v16859_v10, %v16852_v56  ;;  %v4881_v42 = vand.u32 2147483647, %v4865_v22  ;;  %v4988_v14 = vsub.f32 %v16860_v35, %v16852_v56  ;;  %v4867_v41 = vsub.f32 %v16861_v31, %v16828_v2  ;;  %v16865_v22 = vld [vmem:[#allocation53_spill] sm:$0xff]  ;;  %v16869_v31 = vld [vmem:[#allocation59_spill] sm:$0xff] }
 0x664   : > { %v4984_v46 = vsub.f32 %v16857_v32, %v16852_v56  ;;  %v4868_v9 = vsub.f32 %v16862_v13, %v16828_v2  ;;  %v4795_v27 = vadd.f32 %v4779_v57, %v13298_v20  ;;  %v4870_v45 = vsub.f32 %v16864_v43, %v16828_v2  ;;  %v16868_v10 = vld [vmem:[#allocation57_spill] sm:$0xff] }
 0x665   : > { %v13408_v36 = vpop.permute.xlu1 %6450  ;;  %v4872_v29 = vsub.f32 %v16865_v22, %v16828_v2  ;;  %v4876_v35 = vsub.f32 %v16868_v10, %v16828_v2  ;;  %v4878_v13 = vsub.f32 %v16869_v31, %v16828_v2  ;;  %v5002_v57 = vand.u32 2147483647, %v4986_v17  ;;  %v16871_v22 = vld [vmem:[#allocation48_spill] sm:$0xff] }
 0x666   : > { %16855 = vst [vmem:[#allocation30_spill] sm:$0xff] %v13408_v36  ;;  %6894 = vperm.xlu1 %10535, %v16856_v24   ;;  %v13424_v23 = vpop.permute.xlu0 %6702  ;;  %v16867_v24 = vld [vmem:[#allocation178_spill] sm:$0xff]  ;;  %v5000_v32 = vand.u32 2147483647, %v4984_v46  ;;  %v4897_v43 = vadd.f32 %v4881_v42, %v13306_v8  ;;  %v4990_v53 = vsub.f32 %v16871_v22, %v16852_v56  ;;  %v16469_v46 = vmov 24   ;;  %v16874_v22 = vld [vmem:[#allocation181_spill] sm:$0xff] }
 0x667   : > { %16858 = vst [vmem:[#allocation31_spill] sm:$0xff] %v13424_v23  ;;  %7174 = vperm.xlu0 %10540, %v16837_v50   ;;  %v16866_v50 = vld [vmem:[#allocation55_spill] sm:$0xff]  ;;  %v13450_v23 = vadd.f32 %v4891_v59, %v4791_v30  ;;  %v5004_v10 = vand.u32 2147483647, %v4988_v14  ;;  %v4884_v1 = vand.u32 2147483647, %v4868_v9  ;;  %v13460_v31 = vadd.f32 %v4893_v7, %v4793_v4 }
 0x668   : > { %v4874_v18 = vsub.f32 %v16866_v50, %v16828_v2  ;;  %v16872_v50 = vld [vmem:[#allocation61_spill] sm:$0xff]  ;;  %v4886_v30 = vand.u32 2147483647, %v4870_v45  ;;  %v4888_v8 = vand.u32 2147483647, %v4872_v29  ;;  %v13465_v42 = vadd.f32 %v4895_v52, %v4795_v27  ;;  %v16876_v14 = vld [vmem:[#allocation52_spill] sm:$0xff] }
 0x669   : > { %v13436_v19 = vpop.permute.xlu1 %6458  ;;  %v4880_v39 = vsub.f32 %v16872_v50, %v16828_v2  ;;  %v16875_v2 = vld [vmem:[#allocation50_spill] sm:$0xff]  ;;  %v4892_v9 = vand.u32 2147483647, %v4876_v35  ;;  %v4894_v7 = vand.u32 2147483647, %v4878_v13  ;;  %v13474_v45 = vadd.f32 %v4997_v12, %v4897_v43  ;;  %v16879_v27 = vld [vmem:[#allocation63_spill] sm:$0xff] }
 0x66a   : > { %16863 = vst [vmem:[#allocation210_spill] sm:$0xff] %v13436_v19  ;;  %6898 = vperm.xlu1 %10535, %v16867_v24   ;;  %v13452_v20 = vpop.permute.xlu0 %6710  ;;  %v4883_v19 = vand.u32 2147483647, %v4867_v41  ;;  %v4890_v17 = vand.u32 2147483647, %v4874_v18  ;;  %v4992_v50 = vsub.f32 %v16875_v2, %v16852_v56  ;;  %v4994_v41 = vsub.f32 %v16876_v14, %v16852_v56  ;;  %v16880_v2 = vld [vmem:[#allocation65_spill] sm:$0xff] }
 0x66b   : > { %16870 = vst [vmem:[#allocation32_spill] sm:$0xff] %v13452_v20  ;;  %10541 = vset.pattern.permute.xlu0 %v16469_v46  ;;  %v5006_v4 = vand.u32 2147483647, %v4990_v53  ;;  %v16877_v46 = vld [vmem:[#allocation54_spill] sm:$0xff]  ;;  %v4900_v52 = vadd.f32 %v4884_v1, %v13315_v5  ;;  %v4982_v18 = vsub.f32 %v16879_v27, %v16852_v56  ;;  %v16881_v35 = vld [vmem:[#allocation67_spill] sm:$0xff]  ;;  %v4902_v12 = vadd.f32 %v4886_v30, %v13326_v11  ;;  %v16883_v5 = vld [vmem:[#allocation184_spill] sm:$0xff] }
 0x66c   : > { %7234 = vperm.xlu0 %10541, %v16849_v60   ;;  %v4996_v20 = vsub.f32 %v16877_v46, %v16852_v56  ;;  %v4896_v60 = vand.u32 2147483647, %v4880_v39  ;;  %v4985_v13 = vsub.f32 %v16881_v35, %v16852_v56  ;;  %v4899_v39 = vadd.f32 %v4883_v19, %v13404_v26  ;;  %v13495_v35 = vld [vmem:[#allocation3 + $0x8] sm:$0xff]  ;;  %v16884_v26 = vld [vmem:[#allocation69_spill] sm:$0xff] }
 0x66d   : > { %v13462_v59 = vpop.permute.xlu1 %6466  ;;  %v4904_v43 = vadd.f32 %v4888_v8, %v13341_v28  ;;  %v4906_v1 = vadd.f32 %v4890_v17, %v13356_v0  ;;  %v5008_v46 = vand.u32 2147483647, %v4992_v50  ;;  %v5010_v14 = vand.u32 2147483647, %v4994_v41  ;;  %v16885_v28 = vld [vmem:[#allocation71_spill] sm:$0xff] }
 0x66e   : > { %16873 = vst [vmem:[#allocation39_spill] sm:$0xff] %v13462_v59  ;;  %6906 = vperm.xlu1 %10535, %v16874_v22   ;;  %v4983_v59 = vsub.f32 %v16880_v2, %v16852_v56  ;;  %v4908_v27 = vadd.f32 %v4892_v9, %v13361_v3  ;;  %v4910_v2 = vadd.f32 %v4894_v7, %v13367_v58  ;;  %v4998_v30 = vand.u32 2147483647, %v4982_v18  ;;  %v16888_v41 = vld [vmem:[#allocation279_spill] sm:$0xff] }
 0x66f   : > { %v13476_v29 = vpop.permute.xlu0 %6770  ;;  %v4987_v11 = vsub.f32 %v16884_v26, %v16852_v56  ;;  %v4989_v19 = vsub.f32 %v16885_v28, %v16852_v56  ;;  %v5001_v17 = vand.u32 2147483647, %v4985_v13  ;;  %v13504_v50 = vadd.f32 %v5000_v32, %v4900_v52  ;;  %v16889_v7 = vld [vmem:[#allocation187_spill] sm:$0xff] }
 0x670   : > { %16878 = vst [vmem:[#allocation41_spill] sm:$0xff] %v13476_v29  ;;  %7246 = vperm.xlu0 %10541, %v16867_v24   ;;  %v5012_v29 = vand.u32 2147483647, %v4996_v20  ;;  %v4912_v24 = vadd.f32 %v4896_v60, %v13400_v37  ;;  %v4999_v8 = vand.u32 2147483647, %v4983_v59  ;;  %v13509_v58 = vadd.f32 %v5002_v57, %v4902_v12  ;;  %v16890_v59 = vld [vmem:[#allocation72_spill] sm:$0xff] }
 0x671   : > { %v13485_v53 = vpop.permute.xlu1 %6474  ;;  %v13511_v37 = vadd.f32 %v5004_v10, %v4904_v43  ;;  %v13513_v20 = vadd.f32 %v5006_v4, %v4906_v1  ;;  %v13517_v9 = vrot.slane %v13495_v35, %v16888_v41  ;;  %v5098_v32 = vsub.f32 %v16890_v59, %v13288_v61  ;;  %v16891_v60 = vld [vmem:[#allocation73_spill] sm:$0xff]  ;;  %v16892_v4 = vld [vmem:[#allocation74_spill] sm:$0xff]  ;;  %v16902_v59 = vld [vmem:[#allocation80_spill] sm:$0xff] }
 0x672   : > { %16882 = vst [vmem:[#allocation34_spill] sm:$0xff] %v13485_v53  ;;  %6914 = vperm.xlu1 %10535, %v16883_v5   ;;  %v4991_v52 = vsub.f32 %v16891_v60, %v16852_v56  ;;  %v13524_v18 = vadd.f32 %v5008_v46, %v4908_v27  ;;  %v13526_v57 = vadd.f32 %v5010_v14, %v4910_v2  ;;  %v5003_v10 = vand.u32 2147483647, %v4987_v11  ;;  %v16894_v46 = vld [vmem:[#allocation75_spill] sm:$0xff]  ;;  %v16895_v14 = vld [vmem:[#allocation76_spill] sm:$0xff]  ;;  %v16896_v11 = vld [vmem:[#allocation77_spill] sm:$0xff] }
 0x673   : > { %v13502_v0 = vpop.permute.xlu0 %6782  ;;  %v5101_v13 = vsub.f32 %v16892_v4, %v13288_v61  ;;  %v13530_v12 = vadd.f32 %v5012_v29, %v4912_v24  ;;  %v5014_v1 = vadd.f32 %v4998_v30, %v13406_v6  ;;  %v13535_v26 = vadd.f32 %v4999_v8, %v4899_v39  ;;  %v16897_v24 = vld [vmem:[#allocation78_spill] sm:$0xff] }
 0x674   : > { %16886 = vst [vmem:[#allocation36_spill] sm:$0xff] %v13502_v0  ;;  %7254 = vperm.xlu0 %10541, %v16874_v22   ;;  %v5005_v22 = vand.u32 2147483647, %v4989_v19  ;;  %v5017_v28 = vadd.f32 %v5001_v17, %v13410_v16  ;;  %v4993_v27 = vsub.f32 %v16894_v46, %v16852_v56  ;;  %v5103_v2 = vsub.f32 %v16895_v14, %v13288_v61  ;;  %v16899_v39 = vld [vmem:[#allocation190_spill] sm:$0xff]  ;;  %v16903_v14 = vld [vmem:[#allocation81_spill] sm:$0xff]  ;;  %v16907_v0 = vld [vmem:[#allocation84_spill] sm:$0xff] }
 0x675   : > { %v13506_v3 = vpop.permute.xlu1 %6482  ;;  %v4995_v29 = vsub.f32 %v16896_v11, %v16852_v56  ;;  %v5105_v19 = vsub.f32 %v16897_v24, %v13288_v61  ;;  %v5114_v30 = vand.u32 2147483647, %v5098_v32  ;;  %v5007_v8 = vand.u32 2147483647, %v4991_v52  ;;  %v16905_v32 = vld [vmem:[#allocation82_spill] sm:$0xff] }
 0x676   : > { %16887 = vst [vmem:[#allocation38_spill] sm:$0xff] %v13506_v3  ;;  %6922 = vperm.xlu1 %10535, %v16889_v7   ;;  %v16898_v7 = vld [vmem:[#allocation277_spill] sm:$0xff]  ;;  %v5097_v60 = vsub.f32 %v16902_v59, %v13288_v61  ;;  %v5019_v56 = vadd.f32 %v5003_v10, %v13412_v62  ;;  %v5021_v4 = vadd.f32 %v5005_v22, %v13418_v34  ;;  %v5117_v46 = vand.u32 2147483647, %v5101_v13  ;;  %v13573_v62 = vld [vmem:[%s16417_s1 + $0x48] sm:$0xff] }
 0x677   : > { %v13532_v43 = vpop.permute.xlu0 %6790  ;;  %v13549_v6 = vrot.slane %v13495_v35, %v16898_v7  ;;  %v5109_v11 = vsub.f32 %v16903_v14, %v13288_v61  ;;  %v5099_v52 = vsub.f32 %v16905_v32, %v13288_v61  ;;  %v5100_v59 = vsub.f32 %v16907_v0, %v13288_v61  ;;  %v16908_v13 = vld [vmem:[#allocation85_spill] sm:$0xff]  ;;  %v16911_v3 = vld [vmem:[#allocation87_spill] sm:$0xff] }
 0x678   : > { %16893 = vst [vmem:[#allocation43_spill] sm:$0xff] %v13532_v43  ;;  %7262 = vperm.xlu0 %10541, %v16883_v5   ;;  %v16901_v5 = vld [vmem:[#allocation79_spill] sm:$0xff]  ;;  %v5119_v34 = vand.u32 2147483647, %v5103_v2  ;;  %v5011_v10 = vand.u32 2147483647, %v4995_v29  ;;  %v13586_v14 = vadd.f32 %v5114_v30, %v5014_v1  ;;  %v5023_v32 = vadd.f32 %v5007_v8, %v13450_v23 }
 0x679   : > { %v5107_v17 = vsub.f32 %v16901_v5, %v13288_v61  ;;  %v16906_v43 = vld [vmem:[#allocation83_spill] sm:$0xff]  ;;  %v5121_v22 = vand.u32 2147483647, %v5105_v19  ;;  %v5113_v2 = vand.u32 2147483647, %v5097_v60  ;;  %v13589_v29 = vadd.f32 %v5117_v46, %v5017_v28  ;;  %v13601_v23 = vld [vmem:[%s16417_s1 + $0x58] sm:$0xff] }
 0x67a   : > { %6930 = vperm.xlu1 %10535, %v16899_v39   ;;  %v13552_v16 = vpop.permute.xlu1 %6542  ;;  %v5009_v39 = vand.u32 2147483647, %v4993_v27  ;;  %v5111_v5 = vsub.f32 %v16906_v43, %v13288_v61  ;;  %v5102_v27 = vsub.f32 %v16908_v13, %v13288_v61  ;;  %v13581_v43 = vld [vmem:[%s16417_s1 + $0x68] sm:$0xff]  ;;  %v5125_v19 = vand.u32 2147483647, %v5109_v11  ;;  %v16910_v13 = vld [vmem:[#allocation86_spill] sm:$0xff] }
 0x67b   : > { %16900 = vst [vmem:[#allocation175_spill] sm:$0xff] %v13552_v16  ;;  %v13562_v24 = vpop.permute.xlu0 %6798  ;;  %v5213_v16 = vsub.f32 %v16910_v13, %v13351_v33  ;;  %v5104_v53 = vsub.f32 %v16911_v3, %v13288_v61  ;;  %v5116_v30 = vand.u32 2147483647, %v5100_v59  ;;  %v13604_v28 = vadd.f32 %v5119_v34, %v5019_v56  ;;  %v16914_v56 = vld [vmem:[#allocation88_spill] sm:$0xff]  ;;  %v16916_v34 = vld [vmem:[#allocation90_spill] sm:$0xff] }
 0x67c   : > { %16904 = vst [vmem:[#allocation291_spill] sm:$0xff] %v13562_v24  ;;  %7270 = vperm.xlu0 %10541, %v13573_v62   ;;  %v5123_v24 = vand.u32 2147483647, %v5107_v17  ;;  %v5025_v40 = vadd.f32 %v5009_v39, %v13460_v31  ;;  %v5127_v1 = vand.u32 2147483647, %v5111_v5  ;;  %v5027_v8 = vadd.f32 %v5011_v10, %v13465_v42  ;;  %v13612_v31 = vld [vmem:[%s16417_s1 + $0x78] sm:$0xff] }
 0x67d   : > { %v13607_v17 = vadd.f32 %v5121_v22, %v5021_v4  ;;  %v5118_v3 = vand.u32 2147483647, %v5102_v27  ;;  %v5129_v11 = vadd.f32 %v5113_v2, %v13474_v45  ;;  %v5216_v39 = vsub.f32 %v16914_v56, %v13351_v33  ;;  %v16915_v42 = vld [vmem:[#allocation89_spill] sm:$0xff]  ;;  %v16921_v56 = vld [vmem:[#allocation282_spill] sm:$0xff] }
 0x67e   : > { %6938 = vperm.xlu1 %10535, %v13581_v43   ;;  %v13584_v0 = vpop.permute.xlu1 %6546  ;;  %v13617_v46 = vadd.f32 %v5123_v24, %v5023_v32  ;;  %v5106_v4 = vsub.f32 %v16915_v42, %v13288_v61  ;;  %v5229_v5 = vand.u32 2147483647, %v5213_v16  ;;  %v5120_v59 = vand.u32 2147483647, %v5104_v53  ;;  %v16918_v32 = vld [vmem:[#allocation91_spill] sm:$0xff]  ;;  %v16919_v53 = vld [vmem:[#allocation92_spill] sm:$0xff] }
 0x67f   : > { %16909 = vst [vmem:[#allocation40_spill] sm:$0xff] %v13584_v0  ;;  %v13595_v36 = vpop.permute.xlu0 %6806  ;;  %v5115_v0 = vand.u32 2147483647, %v5099_v52  ;;  %v13624_v52 = vadd.f32 %v5125_v19, %v5025_v40  ;;  %v5218_v10 = vsub.f32 %v16916_v34, %v13351_v33  ;;  %v13633_v27 = vadd.f32 %v5127_v1, %v5027_v8  ;;  %v16920_v19 = vld [vmem:[#allocation93_spill] sm:$0xff]  ;;  %v16924_v8 = vld [vmem:[#allocation94_spill] sm:$0xff]  ;;  %v13658_v34 = vld [vmem:[%s16417_s1 + $0x8] sm:$0xff] }
 0x680   : > { %16912 = vst [vmem:[#allocation45_spill] sm:$0xff] %v13595_v36  ;;  %7278 = vperm.xlu0 %10541, %v13601_v23   ;;  %v5132_v45 = vadd.f32 %v5116_v30, %v13504_v50  ;;  %v5108_v2 = vsub.f32 %v16918_v32, %v13288_v61  ;;  %v5134_v40 = vadd.f32 %v5118_v3, %v13509_v58  ;;  %v5232_v1 = vand.u32 2147483647, %v5216_v39  ;;  %v16925_v58 = vld [vmem:[#allocation95_spill] sm:$0xff]  ;;  %v16926_v39 = vld [vmem:[#allocation96_spill] sm:$0xff] }
 0x681   : > { %v13631_v24 = vadd.f32 %v5115_v0, %v13535_v26  ;;  %v5220_v16 = vsub.f32 %v16919_v53, %v13351_v33  ;;  %v5110_v13 = vsub.f32 %v16920_v19, %v13288_v61  ;;  %v13646_v26 = vrot.slane %v13495_v35, %v16921_v56 }
 0x682   : > { %6946 = vperm.xlu1 %10535, %v13612_v31   ;;  %v13615_v60 = vpop.permute.xlu1 %6554  ;;  %v16922_v0 = vmov 22   ;;  %v5122_v30 = vand.u32 2147483647, %v5106_v4  ;;  %v5222_v42 = vsub.f32 %v16924_v8, %v13351_v33  ;;  %v5112_v3 = vsub.f32 %v16925_v58, %v13288_v61  ;;  %v16928_v61 = vld [vmem:[#allocation97_spill] sm:$0xff] }
 0x683   : > { %16913 = vst [vmem:[#allocation196_spill] sm:$0xff] %v13615_v60  ;;  %v13628_v22 = vpop.permute.xlu0 %6814  ;;  %v13661_v32 = vadd.f32 %v5229_v5, %v5129_v11  ;;  %v5136_v53 = vadd.f32 %v5120_v59, %v13511_v37  ;;  %v5234_v19 = vand.u32 2147483647, %v5218_v10  ;;  %v5224_v4 = vsub.f32 %v16926_v39, %v13351_v33  ;;  %v16931_v5 = vld [vmem:[#allocation100_spill] sm:$0xff] }
 0x684   : > { %16917 = vst [vmem:[#allocation42_spill] sm:$0xff] %v13628_v22  ;;  %7286 = vperm.xlu0 %10541, %v13581_v43   ;;  %v5124_v8 = vand.u32 2147483647, %v5108_v2  ;;  %v5226_v58 = vsub.f32 %v16928_v61, %v13351_v33  ;;  %v16929_v22 = vld [vmem:[#allocation98_spill] sm:$0xff]  ;;  %v5236_v11 = vand.u32 2147483647, %v5220_v16  ;;  %v5215_v59 = vsub.f32 %v16931_v5, %v13351_v33 }
 0x685   : > { %v5214_v36 = vsub.f32 %v16929_v22, %v13351_v33  ;;  %v5126_v37 = vand.u32 2147483647, %v5110_v13  ;;  %v13679_v39 = vadd.f32 %v5232_v1, %v5132_v45  ;;  %v5138_v2 = vadd.f32 %v5122_v30, %v13513_v20  ;;  %v13685_v22 = vld [vmem:[%s16417_s1 + $0x10] sm:$0xff]  ;;  %v16934_v45 = vld [vmem:[#allocation102_spill] sm:$0xff] }
 0x686   : > { %10538 = vset.pattern.permute.xlu1 %v16922_v0  ;;  %v13649_v50 = vpop.permute.xlu1 %6562  ;;  %v5238_v61 = vand.u32 2147483647, %v5222_v42  ;;  %v13688_v16 = vadd.f32 %v5234_v19, %v5134_v40  ;;  %v5240_v13 = vand.u32 2147483647, %v5224_v4  ;;  %v5330_v1 = vsub.f32 %v16934_v45, %v13422_v21  ;;  %v16936_v4 = vld [vmem:[#allocation103_spill] sm:$0xff] }
 0x687   : > { %16923 = vst [vmem:[#allocation44_spill] sm:$0xff] %v13649_v50  ;;  %7006 = vperm.xlu1 %10538, %v13658_v34   ;;  %v13666_v0 = vpop.permute.xlu0 %6822  ;;  %v16930_v50 = vld [vmem:[#allocation99_spill] sm:$0xff]  ;;  %v5140_v20 = vadd.f32 %v5124_v8, %v13524_v18  ;;  %v5242_v30 = vand.u32 2147483647, %v5226_v58  ;;  %v5230_v42 = vand.u32 2147483647, %v5214_v36  ;;  %v13698_v15 = vadd.f32 %v5236_v11, %v5136_v53 }
 0x688   : > { %16927 = vst [vmem:[#allocation46_spill] sm:$0xff] %v13666_v0  ;;  %v5228_v60 = vsub.f32 %v16930_v50, %v13351_v33  ;;  %7294 = vperm.xlu0 %10541, %v13612_v31   ;;  %v5128_v0 = vand.u32 2147483647, %v5112_v3  ;;  %v16933_v50 = vld [vmem:[#allocation101_spill] sm:$0xff]  ;;  %v5142_v40 = vadd.f32 %v5126_v37, %v13526_v57  ;;  %v5231_v19 = vand.u32 2147483647, %v5215_v59 }
 0x689   : > { %v5217_v5 = vsub.f32 %v16933_v50, %v13351_v33  ;;  %v5219_v50 = vsub.f32 %v16936_v4, %v13351_v33  ;;  %v13706_v45 = vadd.f32 %v5238_v61, %v5138_v2  ;;  %v16938_v18 = vld [vmem:[#allocation104_spill] sm:$0xff]  ;;  %v16939_v53 = vld [vmem:[#allocation105_spill] sm:$0xff]  ;;  %v13716_v57 = vld [vmem:[%s16417_s1 + $0x20] sm:$0xff]  ;;  %v13719_v58 = vadd.f32 %v5240_v13, %v5140_v20 }
 0x68a   : > { %v13677_v10 = vpop.permute.xlu1 %6570  ;;  %v5244_v3 = vand.u32 2147483647, %v5228_v60  ;;  %v5144_v36 = vadd.f32 %v5128_v0, %v13530_v12  ;;  %v5333_v60 = vsub.f32 %v16938_v18, %v13422_v21  ;;  %v5221_v8 = vsub.f32 %v16939_v53, %v13351_v33  ;;  %v16940_v59 = vld [vmem:[#allocation106_spill] sm:$0xff]  ;;  %v16941_v4 = vld [vmem:[#allocation107_spill] sm:$0xff]  ;;  %v16944_v20 = vld [vmem:[#allocation109_spill] sm:$0xff] }
 0x68b   : > { %16932 = vst [vmem:[#allocation47_spill] sm:$0xff] %v13677_v10  ;;  %7010 = vperm.xlu1 %10538, %v13685_v22   ;;  %v13694_v10 = vpop.permute.xlu0 %6830  ;;  %v5233_v11 = vand.u32 2147483647, %v5217_v5  ;;  %v5346_v37 = vand.u32 2147483647, %v5330_v1  ;;  %v5335_v12 = vsub.f32 %v16940_v59, %v13422_v21  ;;  %v13723_v0 = vadd.f32 %v5242_v30, %v5142_v40  ;;  %v16943_v5 = vld [vmem:[#allocation108_spill] sm:$0xff] }
 0x68c   : > { %16935 = vst [vmem:[#allocation49_spill] sm:$0xff] %v13694_v10  ;;  %10544 = vset.pattern.permute.xlu0 %v16470_v51  ;;  %v5246_v2 = vadd.f32 %v5230_v42, %v13586_v14  ;;  %v13726_v61 = vadd.f32 %v5244_v3, %v5144_v36  ;;  %v5223_v18 = vsub.f32 %v16941_v4, %v13351_v33  ;;  %v5235_v13 = vand.u32 2147483647, %v5219_v50  ;;  %v16946_v3 = vld [vmem:[#allocation110_spill] sm:$0xff]  ;;  %v16947_v59 = vld [vmem:[#allocation111_spill] sm:$0xff] }
 0x68d   : > { %7354 = vperm.xlu0 %10544, %v13658_v34   ;;  %v13733_v51 = vadd.f32 %v5231_v19, %v13631_v24  ;;  %v5337_v1 = vsub.f32 %v16943_v5, %v13422_v21  ;;  %v5225_v30 = vsub.f32 %v16944_v20, %v13351_v33  ;;  %v5349_v14 = vand.u32 2147483647, %v5333_v60  ;;  %v13749_v19 = vld [vmem:[%s16417_s1 + $0x30] sm:$0xff]  ;;  %v16951_v10 = vld [vmem:[#allocation283_spill] sm:$0xff] }
 0x68e   : > { %v13703_v49 = vpop.permute.xlu1 %6578  ;;  %v5237_v42 = vand.u32 2147483647, %v5221_v8  ;;  %v5339_v36 = vsub.f32 %v16946_v3, %v13422_v21  ;;  %v5227_v24 = vsub.f32 %v16947_v59, %v13351_v33  ;;  %v5249_v50 = vadd.f32 %v5233_v11, %v13589_v29  ;;  %v16948_v60 = vld [vmem:[#allocation112_spill] sm:$0xff]  ;;  %v16949_v3 = vld [vmem:[#allocation113_spill] sm:$0xff]  ;;  %v16950_v33 = vld [vmem:[#allocation114_spill] sm:$0xff] }
 0x68f   : > { %16937 = vst [vmem:[#allocation51_spill] sm:$0xff] %v13703_v49  ;;  %7018 = vperm.xlu1 %10538, %v13716_v57   ;;  %v13753_v4 = vadd.f32 %v5346_v37, %v5246_v2  ;;  %v5351_v5 = vand.u32 2147483647, %v5335_v12  ;;  %v5341_v8 = vsub.f32 %v16948_v60, %v13422_v21  ;;  %v5239_v20 = vand.u32 2147483647, %v5223_v18  ;;  %v16953_v12 = vld [vmem:[#allocation115_spill] sm:$0xff] }
 0x690   : > { %v13730_v53 = vpop.permute.xlu0 %6890  ;;  %v5329_v59 = vsub.f32 %v16950_v33, %v13422_v21  ;;  %v5251_v29 = vadd.f32 %v5235_v13, %v13604_v28  ;;  %v5353_v11 = vand.u32 2147483647, %v5337_v1  ;;  %v5241_v37 = vand.u32 2147483647, %v5225_v30  ;;  %v16955_v1 = vld [vmem:[#allocation117_spill] sm:$0xff] }
 0x691   : > { %16942 = vst [vmem:[#allocation53_spill] sm:$0xff] %v13730_v53  ;;  %7366 = vperm.xlu0 %10544, %v13716_v57   ;;  %v5343_v53 = vsub.f32 %v16949_v3, %v13422_v21  ;;  %v5331_v2 = vsub.f32 %v16953_v12, %v13422_v21  ;;  %v13773_v60 = vadd.f32 %v5349_v14, %v5249_v50  ;;  %v5355_v33 = vand.u32 2147483647, %v5339_v36  ;;  %v16956_v14 = vld [vmem:[#allocation119_spill] sm:$0xff] }
 0x692   : > { %v13739_v40 = vpop.permute.xlu1 %6586  ;;  %v5253_v3 = vadd.f32 %v5237_v42, %v13607_v17  ;;  %v5243_v48 = vand.u32 2147483647, %v5227_v24  ;;  %v13782_v28 = vadd.f32 %v5351_v5, %v5251_v29  ;;  %v5357_v13 = vand.u32 2147483647, %v5341_v8  ;;  %v16957_v24 = vld [vmem:[#allocation116_spill] sm:$0xff]  ;;  %v16959_v29 = vld [vmem:[#allocation118_spill] sm:$0xff] }
 0x693   : > { %16945 = vst [vmem:[#allocation55_spill] sm:$0xff] %v13739_v40  ;;  %7026 = vperm.xlu1 %10538, %v13749_v19   ;;  %v13763_v40 = vrot.slane %v13495_v35, %v16951_v10  ;;  %v5332_v30 = vsub.f32 %v16955_v1, %v13422_v21  ;;  %v5334_v50 = vsub.f32 %v16956_v14, %v13422_v21  ;;  %v5359_v42 = vand.u32 2147483647, %v5343_v53  ;;  %v16960_v53 = vld [vmem:[#allocation121_spill] sm:$0xff] }
 0x694   : > { %v13765_v49 = vpop.permute.xlu0 %6902  ;;  %v5255_v17 = vadd.f32 %v5239_v20, %v13617_v46  ;;  %v5345_v36 = vand.u32 2147483647, %v5329_v59  ;;  %v5445_v12 = vsub.f32 %v16957_v24, %v13517_v9  ;;  %v13793_v55 = vadd.f32 %v5353_v11, %v5253_v3  ;;  %v16961_v59 = vld [vmem:[#allocation123_spill] sm:$0xff] }
 0x695   : > { %16952 = vst [vmem:[#allocation178_spill] sm:$0xff] %v13765_v49  ;;  %7374 = vperm.xlu0 %10544, %v13749_v19   ;;  %v13779_v49 = vld [vmem:[%s16417_s1 + $0x40] sm:$0xff]  ;;  %v5257_v5 = vadd.f32 %v5241_v37, %v13624_v52  ;;  %v5347_v8 = vand.u32 2147483647, %v5331_v2  ;;  %v5448_v1 = vsub.f32 %v16959_v29, %v13517_v9  ;;  %v5259_v46 = vadd.f32 %v5243_v48, %v13633_v27  ;;  %v13809_v52 = vld [vmem:[%s16417_s1 + $0x50] sm:$0xff] }
 0x696   : > { %v13770_v18 = vpop.permute.xlu1 %6594  ;;  %v13799_v14 = vadd.f32 %v5355_v33, %v5255_v17  ;;  %v5336_v20 = vsub.f32 %v16960_v53, %v13422_v21  ;;  %v5338_v24 = vsub.f32 %v16961_v59, %v13422_v21  ;;  %v5348_v2 = vand.u32 2147483647, %v5332_v30  ;;  %v16963_v48 = vld [vmem:[#allocation120_spill] sm:$0xff]  ;;  %v16964_v53 = vld [vmem:[#allocation125_spill] sm:$0xff]  ;;  %v16966_v30 = vld [vmem:[#allocation127_spill] sm:$0xff] }
 0x697   : > { %16954 = vst [vmem:[#allocation57_spill] sm:$0xff] %v13770_v18  ;;  %7034 = vperm.xlu1 %10538, %v13779_v49   ;;  %v13814_v37 = vadd.f32 %v5357_v13, %v5257_v5  ;;  %v5350_v3 = vand.u32 2147483647, %v5334_v50  ;;  %v5450_v27 = vsub.f32 %v16963_v48, %v13517_v9  ;;  %v13818_v33 = vadd.f32 %v5359_v42, %v5259_v46  ;;  %v16967_v5 = vld [vmem:[#allocation129_spill] sm:$0xff]  ;;  %v16969_v46 = vld [vmem:[#allocation124_spill] sm:$0xff] }
 0x698   : > { %v13791_v18 = vpop.permute.xlu0 %6910  ;;  %v5361_v17 = vadd.f32 %v5345_v36, %v13661_v32  ;;  %v5461_v29 = vand.u32 2147483647, %v5445_v12  ;;  %v5340_v59 = vsub.f32 %v16964_v53, %v13422_v21  ;;  %v13826_v54 = vadd.f32 %v5347_v8, %v13733_v51  ;;  %v16968_v32 = vld [vmem:[#allocation122_spill] sm:$0xff] }
 0x699   : > { %16958 = vst [vmem:[#allocation59_spill] sm:$0xff] %v13791_v18  ;;  %7382 = vperm.xlu0 %10544, %v13779_v49   ;;  %v5464_v13 = vand.u32 2147483647, %v5448_v1  ;;  %v5342_v50 = vsub.f32 %v16966_v30, %v13422_v21  ;;  %v5344_v48 = vsub.f32 %v16967_v5, %v13422_v21  ;;  %v5352_v42 = vand.u32 2147483647, %v5336_v20  ;;  %v13840_v51 = vld [vmem:[%s16417_s1 + $0x60] sm:$0xff] }
 0x69a   : > { %v5452_v36 = vsub.f32 %v16968_v32, %v13517_v9  ;;  %v5354_v12 = vand.u32 2147483647, %v5338_v24  ;;  %v5454_v53 = vsub.f32 %v16969_v46, %v13517_v9  ;;  %v5364_v21 = vadd.f32 %v5348_v2, %v13679_v39  ;;  %v16971_v30 = vld [vmem:[#allocation131_spill] sm:$0xff]  ;;  %v16972_v46 = vld [vmem:[#allocation126_spill] sm:$0xff] }
 0x69b   : > { %7042 = vperm.xlu1 %10538, %v13809_v52   ;;  %v13812_v11 = vpop.permute.xlu1 %6654  ;;  %v5366_v1 = vadd.f32 %v5350_v3, %v13688_v16  ;;  %v5466_v20 = vand.u32 2147483647, %v5450_v27  ;;  %v5446_v24 = vsub.f32 %v16971_v30, %v13517_v9  ;;  %v13849_v5 = vadd.f32 %v5461_v29, %v5361_v17  ;;  %v16975_v39 = vld [vmem:[#allocation130_spill] sm:$0xff]  ;;  %v16976_v2 = vld [vmem:[#allocation287_spill] sm:$0xff] }
 0x69c   : > { %16962 = vst [vmem:[#allocation48_spill] sm:$0xff] %v13812_v11  ;;  %v13823_v18 = vpop.permute.xlu0 %6918  ;;  %v5356_v32 = vand.u32 2147483647, %v5340_v59  ;;  %v16973_v11 = vld [vmem:[#allocation128_spill] sm:$0xff]  ;;  %v5360_v10 = vand.u32 2147483647, %v5344_v48  ;;  %v5460_v16 = vsub.f32 %v16975_v39, %v13517_v9  ;;  %v13861_v3 = vrot.slane %v13495_v35, %v16976_v2 }
 0x69d   : > { %16965 = vst [vmem:[#allocation61_spill] sm:$0xff] %v13823_v18  ;;  %7390 = vperm.xlu0 %10544, %v13809_v52   ;;  %v5456_v18 = vsub.f32 %v16972_v46, %v13517_v9  ;;  %v5458_v63 = vsub.f32 %v16973_v11, %v13517_v9  ;;  %v5368_v27 = vadd.f32 %v5352_v42, %v13698_v15  ;;  %v5468_v17 = vand.u32 2147483647, %v5452_v36  ;;  %v13869_v11 = vld [vmem:[%s16417_s1 + $0x70] sm:$0xff] }
 0x69e   : > { %v5370_v29 = vadd.f32 %v5354_v12, %v13706_v45  ;;  %v5470_v59 = vand.u32 2147483647, %v5454_v53  ;;  %v13874_v48 = vadd.f32 %v5464_v13, %v5364_v21  ;;  %v13876_v30 = vadd.f32 %v5466_v20, %v5366_v1  ;;  %v16978_v15 = vld [vmem:[#allocation132_spill] sm:$0xff]  ;;  %v16979_v53 = vld [vmem:[#allocation133_spill] sm:$0xff]  ;;  %v16981_v1 = vld [vmem:[#allocation135_spill] sm:$0xff] }
 0x69f   : > { %7050 = vperm.xlu1 %10538, %v13840_v51   ;;  %v13843_v8 = vpop.permute.xlu1 %6662  ;;  %v5462_v46 = vand.u32 2147483647, %v5446_v24  ;;  %v5562_v42 = vsub.f32 %v16978_v15, %v13549_v6  ;;  %v5372_v45 = vadd.f32 %v5356_v32, %v13719_v58  ;;  %v5472_v36 = vand.u32 2147483647, %v5456_v18 }
 0x6a0   : > { %16970 = vst [vmem:[#allocation181_spill] sm:$0xff] %v13843_v8  ;;  %v13855_v38 = vpop.permute.xlu0 %6926  ;;  %v5358_v8 = vand.u32 2147483647, %v5342_v50  ;;  %v5474_v12 = vand.u32 2147483647, %v5458_v63  ;;  %v5447_v39 = vsub.f32 %v16979_v53, %v13517_v9  ;;  %v5376_v13 = vadd.f32 %v5360_v10, %v13726_v61  ;;  %v16982_v63 = vld [vmem:[#allocation137_spill] sm:$0xff] }
 0x6a1   : > { %16974 = vst [vmem:[#allocation50_spill] sm:$0xff] %v13855_v38  ;;  %7398 = vperm.xlu0 %10544, %v13840_v51   ;;  %v5476_v21 = vand.u32 2147483647, %v5460_v16  ;;  %v5449_v20 = vsub.f32 %v16981_v1, %v13517_v9  ;;  %v13890_v24 = vadd.f32 %v5468_v17, %v5368_v27  ;;  %v13892_v58 = vadd.f32 %v5470_v59, %v5370_v29  ;;  %v16985_v61 = vld [vmem:[#allocation139_spill] sm:$0xff]  ;;  %v16986_v16 = vld [vmem:[#allocation141_spill] sm:$0xff]  ;;  %v16987_v59 = vld [vmem:[#allocation134_spill] sm:$0xff] }
 0x6a2   : > { %v5374_v2 = vadd.f32 %v5358_v8, %v13723_v0  ;;  %v5451_v18 = vsub.f32 %v16982_v63, %v13517_v9  ;;  %v16983_v32 = vmov 23   ;;  %v5478_v0 = vadd.f32 %v5462_v46, %v13753_v4  ;;  %v13907_v27 = vld [vmem:[%s16417_s1] sm:$0xff] }
 0x6a3   : > { %7058 = vperm.xlu1 %10538, %v13869_v11   ;;  %v13872_v50 = vpop.permute.xlu1 %6666  ;;  %v5578_v10 = vand.u32 2147483647, %v5562_v42  ;;  %v5453_v8 = vsub.f32 %v16985_v61, %v13517_v9  ;;  %v5455_v53 = vsub.f32 %v16986_v16, %v13517_v9  ;;  %v13910_v17 = vadd.f32 %v5472_v36, %v5372_v45  ;;  %v16988_v46 = vld [vmem:[#allocation143_spill] sm:$0xff]  ;;  %v16990_v16 = vld [vmem:[#allocation145_spill] sm:$0xff]  ;;  %v16991_v36 = vld [vmem:[#allocation136_spill] sm:$0xff] }
 0x6a4   : > { %16977 = vst [vmem:[#allocation52_spill] sm:$0xff] %v13872_v50  ;;  %v13883_v38 = vpop.permute.xlu0 %6934  ;;  %v5463_v29 = vand.u32 2147483647, %v5447_v39  ;;  %v5565_v4 = vsub.f32 %v16987_v59, %v13549_v6  ;;  %v5457_v42 = vsub.f32 %v16988_v46, %v13517_v9  ;;  %v13918_v63 = vadd.f32 %v5474_v12, %v5374_v2  ;;  %v16992_v59 = vld [vmem:[#allocation138_spill] sm:$0xff] }
 0x6a5   : > { %16980 = vst [vmem:[#allocation54_spill] sm:$0xff] %v13883_v38  ;;  %7406 = vperm.xlu0 %10544, %v13869_v11   ;;  %v5465_v61 = vand.u32 2147483647, %v5449_v20  ;;  %v5459_v38 = vsub.f32 %v16990_v16, %v13517_v9  ;;  %v5467_v45 = vand.u32 2147483647, %v5451_v18  ;;  %v5567_v39 = vsub.f32 %v16991_v36, %v13549_v6  ;;  %v16995_v20 = vld [vmem:[#allocation140_spill] sm:$0xff] }
 0x6a6   : > { %v5569_v46 = vsub.f32 %v16992_v59, %v13549_v6  ;;  %v5469_v9 = vand.u32 2147483647, %v5453_v8  ;;  %v5571_v18 = vsub.f32 %v16995_v20, %v13549_v6  ;;  %v13940_v16 = vadd.f32 %v5463_v29, %v13826_v54  ;;  %v16998_v8 = vld [vmem:[#allocation146_spill] sm:$0xff] }
 0x6a7   : > { %10539 = vset.pattern.permute.xlu1 %v16983_v32  ;;  %v13897_v15 = vpop.permute.xlu1 %6674  ;;  %v13920_v32 = vadd.f32 %v5476_v21, %v5376_v13  ;;  %v13934_v13 = vadd.f32 %v5578_v10, %v5478_v0  ;;  %v5471_v21 = vand.u32 2147483647, %v5455_v53  ;;  %v5581_v36 = vand.u32 2147483647, %v5565_v4  ;;  %v16997_v0 = vld [vmem:[#allocation144_spill] sm:$0xff] }
 0x6a8   : > { %16984 = vst [vmem:[#allocation63_spill] sm:$0xff] %v13897_v15  ;;  %7118 = vperm.xlu1 %10539, %v13907_v27   ;;  %v13916_v1 = vpop.permute.xlu0 %6942  ;;  %v16471_v15 = vmov 26   ;;  %v5473_v59 = vand.u32 2147483647, %v5457_v42  ;;  %v5475_v50 = vand.u32 2147483647, %v5459_v38  ;;  %v5575_v10 = vsub.f32 %v16997_v0, %v13549_v6 }
 0x6a9   : > { %16989 = vst [vmem:[#allocation65_spill] sm:$0xff] %v13916_v1  ;;  %10545 = vset.pattern.permute.xlu0 %v16471_v15  ;;  %v16993_v1 = vld [vmem:[#allocation147_spill] sm:$0xff]  ;;  %v5677_v53 = vsub.f32 %v16998_v8, %v13646_v26  ;;  %v5483_v56 = vadd.f32 %v5467_v45, %v13782_v28  ;;  %v5583_v54 = vand.u32 2147483647, %v5567_v39  ;;  %v5585_v29 = vand.u32 2147483647, %v5569_v46 }
 0x6aa   : > { %v5561_v2 = vsub.f32 %v16993_v1, %v13549_v6  ;;  %7466 = vperm.xlu0 %10545, %v13907_v27   ;;  %v16996_v1 = vld [vmem:[#allocation142_spill] sm:$0xff]  ;;  %v5485_v38 = vadd.f32 %v5469_v9, %v13793_v55  ;;  %v17002_v0 = vld [vmem:[#allocation151_spill] sm:$0xff]  ;;  %v5489_v45 = vadd.f32 %v5473_v59, %v13814_v37  ;;  %v17003_v46 = vld [vmem:[#allocation149_spill] sm:$0xff]  ;;  %v13970_v8 = vrot.slane %v13495_v35, %v13264_v47 }
 0x6ab   : > { %v13931_v12 = vpop.permute.xlu1 %6682  ;;  %v5573_v15 = vsub.f32 %v16996_v1, %v13549_v6  ;;  %v5587_v1 = vand.u32 2147483647, %v5571_v18  ;;  %v5564_v28 = vsub.f32 %v17002_v0, %v13549_v6  ;;  %v5491_v55 = vadd.f32 %v5475_v50, %v13818_v33  ;;  %v17005_v37 = vld [vmem:[#allocation148_spill] sm:$0xff]  ;;  %v17006_v59 = vld [vmem:[#allocation153_spill] sm:$0xff] }
 0x6ac   : > { %16994 = vst [vmem:[#allocation67_spill] sm:$0xff] %v13931_v12  ;;  %7126 = vperm.xlu1 %10539, %v13685_v22   ;;  %v5481_v12 = vadd.f32 %v5465_v61, %v13773_v60  ;;  %v5577_v4 = vand.u32 2147483647, %v5561_v2  ;;  %v13957_v60 = vld [vmem:[%s16417_s1 + $0x18] sm:$0xff]  ;;  %v5487_v61 = vadd.f32 %v5471_v21, %v13799_v14  ;;  %v5563_v2 = vsub.f32 %v17003_v46, %v13549_v6  ;;  %v17007_v46 = vld [vmem:[#allocation155_spill] sm:$0xff] }
 0x6ad   : > { %v13949_v20 = vpop.permute.xlu0 %7002  ;;  %17001 = vst [vmem:[#allocation71_spill] sm:$0xff] %v13957_v60  ;;  %v5589_v39 = vand.u32 2147483647, %v5573_v15  ;;  %v5591_v14 = vand.u32 2147483647, %v5575_v10  ;;  %v5680_v15 = vsub.f32 %v17005_v37, %v13646_v26  ;;  %v5566_v0 = vsub.f32 %v17006_v59, %v13549_v6  ;;  %v13989_v33 = vld [vmem:[%s16417_s1 + $0x28] sm:$0xff] }
 0x6ae   : > { %16999 = vst [vmem:[#allocation184_spill] sm:$0xff] %v13949_v20  ;;  %7478 = vperm.xlu0 %10545, %v13957_v60   ;;  %v13972_v20 = vadd.f32 %v5581_v36, %v5481_v12  ;;  %v5693_v9 = vand.u32 2147483647, %v5677_v53  ;;  %v5593_v18 = vadd.f32 %v5577_v4, %v13849_v5  ;;  %17009 = vst [vmem:[#allocation72_spill] sm:$0xff] %v13989_v33  ;;  %v5580_v36 = vand.u32 2147483647, %v5564_v28 }
 0x6af   : > { %v13952_v42 = vpop.permute.xlu1 %6690  ;;  %v13992_v50 = vadd.f32 %v5583_v54, %v5483_v56  ;;  %v13994_v5 = vadd.f32 %v5585_v29, %v5485_v38  ;;  %v13996_v12 = vadd.f32 %v5587_v1, %v5487_v61  ;;  %v13999_v10 = vadd.f32 %v5589_v39, %v5489_v45  ;;  %v17010_v4 = vld [vmem:[#allocation150_spill] sm:$0xff]  ;;  %v17011_v59 = vld [vmem:[#allocation157_spill] sm:$0xff]  ;;  %v17012_v56 = vld [vmem:[#allocation152_spill] sm:$0xff] }
 0x6b0   : > { %17000 = vst [vmem:[#allocation69_spill] sm:$0xff] %v13952_v42  ;;  %7130 = vperm.xlu1 %10539, %v13957_v60   ;;  %v5568_v42 = vsub.f32 %v17007_v46, %v13549_v6  ;;  %v5579_v53 = vand.u32 2147483647, %v5563_v2  ;;  %v5682_v37 = vsub.f32 %v17010_v4, %v13646_v26  ;;  %v5570_v46 = vsub.f32 %v17011_v59, %v13549_v6  ;;  %v17013_v29 = vld [vmem:[#allocation159_spill] sm:$0xff]  ;;  %v17014_v61 = vld [vmem:[#allocation161_spill] sm:$0xff]  ;;  %v17017_v59 = vld [vmem:[#allocation154_spill] sm:$0xff] }
 0x6b1   : > { %v13975_v21 = vpop.permute.xlu0 %7014  ;;  %v5684_v54 = vsub.f32 %v17012_v56, %v13646_v26  ;;  %v5572_v38 = vsub.f32 %v17013_v29, %v13549_v6  ;;  %v5574_v1 = vsub.f32 %v17014_v61, %v13549_v6  ;;  %v14015_v45 = vadd.f32 %v5693_v9, %v5593_v18  ;;  %v17018_v9 = vld [vmem:[#allocation156_spill] sm:$0xff] }
 0x6b2   : > { %17004 = vst [vmem:[#allocation279_spill] sm:$0xff] %v13975_v21  ;;  %7486 = vperm.xlu0 %10545, %v13989_v33   ;;  %v14005_v21 = vadd.f32 %v5591_v14, %v5491_v55  ;;  %v5696_v39 = vand.u32 2147483647, %v5680_v15  ;;  %v5582_v2 = vand.u32 2147483647, %v5566_v0  ;;  %v14022_v55 = vld [vmem:[%s16417_s1 + $0x38] sm:$0xff]  ;;  %v5596_v14 = vadd.f32 %v5580_v36, %v13874_v48 }
 0x6b3   : > { %v13984_v47 = vpop.permute.xlu1 %6698  ;;  %v5584_v4 = vand.u32 2147483647, %v5568_v42  ;;  %v5686_v56 = vsub.f32 %v17017_v59, %v13646_v26  ;;  %v5688_v18 = vsub.f32 %v17018_v9, %v13646_v26  ;;  %v17019_v15 = vld [vmem:[#allocation163_spill] sm:$0xff]  ;;  %v14034_v0 = vadd.f32 %v5579_v53, %v13940_v16  ;;  %v17021_v59 = vld [vmem:[#allocation158_spill] sm:$0xff]  ;;  %v17023_v16 = vld [vmem:[#allocation160_spill] sm:$0xff] }
 0x6b4   : > { %17008 = vst [vmem:[#allocation187_spill] sm:$0xff] %v13984_v47  ;;  %7138 = vperm.xlu1 %10539, %v13989_v33   ;;  %v5576_v42 = vsub.f32 %v17019_v15, %v13549_v6  ;;  %v5698_v29 = vand.u32 2147483647, %v5682_v37  ;;  %v5586_v61 = vand.u32 2147483647, %v5570_v46  ;;  %v5690_v60 = vsub.f32 %v17021_v59, %v13646_v26  ;;  %v17026_v59 = vld [vmem:[#allocation169_spill] sm:$0xff] }
 0x6b5   : > { %v14013_v28 = vpop.permute.xlu0 %7022  ;;  %v5700_v48 = vand.u32 2147483647, %v5684_v54  ;;  %v5588_v36 = vand.u32 2147483647, %v5572_v38  ;;  %v5590_v33 = vand.u32 2147483647, %v5574_v1  ;;  %v5598_v6 = vadd.f32 %v5582_v2, %v13876_v30 }
 0x6b6   : > { %17015 = vst [vmem:[#allocation73_spill] sm:$0xff] %v14013_v28  ;;  %7494 = vperm.xlu0 %10545, %v14022_v55   ;;  %v17020_v28 = vld [vmem:[#allocation165_spill] sm:$0xff]  ;;  %v5600_v15 = vadd.f32 %v5584_v4, %v13890_v24  ;;  %v5692_v53 = vsub.f32 %v17023_v16, %v13646_v26  ;;  %v14048_v37 = vrot.slane %v13495_v35, %v13318_v44  ;;  %v5702_v38 = vand.u32 2147483647, %v5686_v56  ;;  %v17025_v2 = vld [vmem:[#allocation162_spill] sm:$0xff] }
 0x6b7   : > { %v14017_v47 = vpop.permute.xlu1 %6706  ;;  %v14053_v54 = vadd.f32 %v5696_v39, %v5596_v14  ;;  %v5704_v1 = vand.u32 2147483647, %v5688_v18  ;;  %v5602_v30 = vadd.f32 %v5586_v61, %v13892_v58  ;;  %v5794_v4 = vsub.f32 %v17025_v2, %v13763_v40  ;;  %v17027_v14 = vld [vmem:[#allocation171_spill] sm:$0xff]  ;;  %v17032_v2 = vld [vmem:[#allocation173_spill] sm:$0xff] }
 0x6b8   : > { %17016 = vst [vmem:[#allocation74_spill] sm:$0xff] %v14017_v47  ;;  %7146 = vperm.xlu1 %10539, %v14022_v55   ;;  %v5678_v47 = vsub.f32 %v17020_v28, %v13646_v26  ;;  %v5592_v28 = vand.u32 2147483647, %v5576_v42  ;;  %v5681_v16 = vsub.f32 %v17026_v59, %v13646_v26  ;;  %v5706_v39 = vand.u32 2147483647, %v5690_v60  ;;  %v17029_v42 = vld [vmem:[#allocation167_spill] sm:$0xff] }
 0x6b9   : > { %v14040_v9 = vpop.permute.xlu0 %7030  ;;  %v5683_v56 = vsub.f32 %v17027_v14, %v13646_v26  ;;  %v14069_v58 = vadd.f32 %v5700_v48, %v5600_v15  ;;  %v5679_v61 = vsub.f32 %v17029_v42, %v13646_v26  ;;  %v17034_v42 = vld [vmem:[#allocation176_spill] sm:$0xff] }
 0x6ba   : > { %17022 = vst [vmem:[#allocation75_spill] sm:$0xff] %v14040_v9  ;;  %7502 = vperm.xlu0 %10545, %v13573_v62   ;;  %v5694_v24 = vand.u32 2147483647, %v5678_v47  ;;  %v5604_v9 = vadd.f32 %v5588_v36, %v13910_v17  ;;  %v5708_v47 = vand.u32 2147483647, %v5692_v53  ;;  %v5608_v17 = vadd.f32 %v5592_v28, %v13920_v32 }
 0x6bb   : > { %v14050_v46 = vpop.permute.xlu1 %6714  ;;  %v5810_v53 = vand.u32 2147483647, %v5794_v4  ;;  %v5697_v59 = vand.u32 2147483647, %v5681_v16  ;;  %v5699_v14 = vand.u32 2147483647, %v5683_v56 }
 0x6bc   : > { %17024 = vst [vmem:[#allocation76_spill] sm:$0xff] %v14050_v46  ;;  %7154 = vperm.xlu1 %10539, %v13573_v62   ;;  %v5606_v46 = vadd.f32 %v5590_v33, %v13918_v63  ;;  %v14067_v62 = vadd.f32 %v5698_v29, %v5598_v6  ;;  %v17030_v63 = vld [vmem:[#allocation164_spill] sm:$0xff]  ;;  %v17031_v33 = vld [vmem:[#allocation166_spill] sm:$0xff]  ;;  %v5685_v29 = vsub.f32 %v17032_v2, %v13646_v26  ;;  %v5695_v2 = vand.u32 2147483647, %v5679_v61 }
 0x6bd   : > { %v14065_v18 = vpop.permute.xlu0 %7038  ;;  %v5797_v60 = vsub.f32 %v17030_v63, %v13763_v40  ;;  %v5799_v36 = vsub.f32 %v17031_v33, %v13763_v40  ;;  %v14084_v6 = vadd.f32 %v5702_v38, %v5602_v30  ;;  %v5710_v15 = vadd.f32 %v5694_v24, %v13934_v13  ;;  %v17037_v38 = vld [vmem:[#allocation170_spill] sm:$0xff]  ;;  %v17038_v13 = vld [vmem:[#allocation179_spill] sm:$0xff]  ;;  %v17040_v61 = vld [vmem:[#allocation172_spill] sm:$0xff] }
 0x6be   : > { %17028 = vst [vmem:[#allocation77_spill] sm:$0xff] %v14065_v18  ;;  %7510 = vperm.xlu0 %10545, %v13601_v23   ;;  %v14087_v32 = vadd.f32 %v5704_v1, %v5604_v9  ;;  %v14089_v28 = vadd.f32 %v5706_v39, %v5606_v46  ;;  %v5687_v63 = vsub.f32 %v17034_v42, %v13646_v26  ;;  %v5701_v4 = vand.u32 2147483647, %v5685_v29 }
 0x6bf   : > { %v5803_v30 = vsub.f32 %v17037_v38, %v13763_v40  ;;  %v5689_v24 = vsub.f32 %v17038_v13, %v13646_v26  ;;  %v14102_v9 = vadd.f32 %v5708_v47, %v5608_v17  ;;  %v5813_v46 = vand.u32 2147483647, %v5797_v60  ;;  %v17042_v60 = vld [vmem:[#allocation174_spill] sm:$0xff] }
 0x6c0   : > { %7162 = vperm.xlu1 %10539, %v13601_v23   ;;  %v14082_v48 = vpop.permute.xlu1 %6774  ;;  %v17036_v23 = vld [vmem:[#allocation168_spill] sm:$0xff]  ;;  %v5815_v1 = vand.u32 2147483647, %v5799_v36  ;;  %v14107_v39 = vadd.f32 %v5810_v53, %v5710_v15  ;;  %v5713_v56 = vadd.f32 %v5697_v59, %v13972_v20  ;;  %v5805_v42 = vsub.f32 %v17040_v61, %v13763_v40 }
 0x6c1   : > { %17033 = vst [vmem:[#allocation78_spill] sm:$0xff] %v14082_v48  ;;  %v14093_v33 = vpop.permute.xlu0 %7046  ;;  %v5801_v48 = vsub.f32 %v17036_v23, %v13763_v40  ;;  %v17041_v23 = vld [vmem:[#allocation182_spill] sm:$0xff]  ;;  %v5715_v47 = vadd.f32 %v5699_v14, %v13992_v50  ;;  %v5703_v17 = vand.u32 2147483647, %v5687_v63  ;;  %v5807_v36 = vsub.f32 %v17042_v60, %v13763_v40  ;;  %v17045_v50 = vld [vmem:[#allocation177_spill] sm:$0xff] }
 0x6c2   : > { %17035 = vst [vmem:[#allocation190_spill] sm:$0xff] %v14093_v33  ;;  %7518 = vperm.xlu0 %10545, %v13581_v43   ;;  %v5691_v38 = vsub.f32 %v17041_v23, %v13646_v26  ;;  %v5711_v15 = vadd.f32 %v5695_v2, %v14034_v0  ;;  %v5819_v53 = vand.u32 2147483647, %v5803_v30  ;;  %v5705_v59 = vand.u32 2147483647, %v5689_v24  ;;  %v17047_v2 = vld [vmem:[#allocation191_spill] sm:$0xff] }
 0x6c3   : > { %v5817_v20 = vand.u32 2147483647, %v5801_v48  ;;  %v5717_v26 = vadd.f32 %v5701_v4, %v13994_v5  ;;  %v5909_v14 = vsub.f32 %v17045_v50, %v13861_v3  ;;  %v14128_v63 = vrot.slane %v13495_v35, %v13392_v25 }
 0x6c4   : > { %7170 = vperm.xlu1 %10539, %v13581_v43   ;;  %v14105_v16 = vpop.permute.xlu1 %6778  ;;  %v17043_v43 = vld [vmem:[#allocation185_spill] sm:$0xff]  ;;  %v14133_v23 = vadd.f32 %v5813_v46, %v5713_v56  ;;  %v5821_v0 = vand.u32 2147483647, %v5805_v42  ;;  %v5707_v48 = vand.u32 2147483647, %v5691_v38  ;;  %v5796_v30 = vsub.f32 %v17047_v2, %v13763_v40  ;;  %v17050_v46 = vld [vmem:[#allocation180_spill] sm:$0xff] }
 0x6c5   : > { %17039 = vst [vmem:[#allocation79_spill] sm:$0xff] %v14105_v16  ;;  %v5793_v29 = vsub.f32 %v17043_v43, %v13763_v40  ;;  %v14119_v13 = vpop.permute.xlu0 %7054  ;;  %v14137_v24 = vadd.f32 %v5815_v1, %v5715_v47  ;;  %v5719_v5 = vadd.f32 %v5703_v17, %v13996_v12  ;;  %v5823_v4 = vand.u32 2147483647, %v5807_v36  ;;  %v17051_v42 = vld [vmem:[#allocation193_spill] sm:$0xff]  ;;  %v17052_v47 = vld [vmem:[#allocation183_spill] sm:$0xff] }
 0x6c6   : > { %17044 = vst [vmem:[#allocation80_spill] sm:$0xff] %v14119_v13  ;;  %7526 = vperm.xlu0 %10545, %v13612_v31   ;;  %v5721_v35 = vadd.f32 %v5705_v59, %v13999_v10  ;;  %v5912_v56 = vsub.f32 %v17050_v46, %v13861_v3  ;;  %v5798_v38 = vsub.f32 %v17051_v42, %v13763_v40  ;;  %v16478_v2 = vmov 27   ;;  %v17053_v10 = vld [vmem:[#allocation195_spill] sm:$0xff]  ;;  %v17056_v42 = vld [vmem:[#allocation186_spill] sm:$0xff] }
 0x6c7   : > { %v5809_v60 = vand.u32 2147483647, %v5793_v29  ;;  %v14150_v1 = vadd.f32 %v5817_v20, %v5717_v26  ;;  %v5925_v12 = vand.u32 2147483647, %v5909_v14  ;;  %v5914_v17 = vsub.f32 %v17052_v47, %v13861_v3  ;;  %v17057_v26 = vld [vmem:[#allocation198_spill] sm:$0xff] }
 0x6c8   : > { %7178 = vperm.xlu1 %10539, %v13612_v31   ;;  %v14131_v61 = vpop.permute.xlu1 %6786  ;;  %v17049_v31 = vld [vmem:[#allocation188_spill] sm:$0xff]  ;;  %v5800_v36 = vsub.f32 %v17053_v10, %v13763_v40  ;;  %v17054_v29 = vmov 24   ;;  %v5812_v46 = vand.u32 2147483647, %v5796_v30  ;;  %v5916_v20 = vsub.f32 %v17056_v42, %v13861_v3 }
 0x6c9   : > { %17046 = vst [vmem:[#allocation81_spill] sm:$0xff] %v14131_v61  ;;  %v14140_v43 = vpop.permute.xlu0 %7062  ;;  %v5795_v50 = vsub.f32 %v17049_v31, %v13763_v40  ;;  %v5723_v31 = vadd.f32 %v5707_v48, %v14005_v21  ;;  %v5802_v14 = vsub.f32 %v17057_v26, %v13763_v40  ;;  %v14166_v47 = vadd.f32 %v5819_v53, %v5719_v5 }
 0x6ca   : > { %17048 = vst [vmem:[#allocation82_spill] sm:$0xff] %v14140_v43  ;;  %10548 = vset.pattern.permute.xlu0 %v16478_v2  ;;  %v5825_v10 = vadd.f32 %v5809_v60, %v14015_v45  ;;  %v14173_v21 = vadd.f32 %v5821_v0, %v5721_v35  ;;  %v5928_v30 = vand.u32 2147483647, %v5912_v56  ;;  %v5814_v42 = vand.u32 2147483647, %v5798_v38  ;;  %v17062_v45 = vld [vmem:[#allocation202_spill] sm:$0xff] }
 0x6cb   : > { %7586 = vperm.xlu0 %10548, %v13658_v34   ;;  %v5811_v48 = vand.u32 2147483647, %v5795_v50  ;;  %v5930_v26 = vand.u32 2147483647, %v5914_v17  ;;  %v5816_v61 = vand.u32 2147483647, %v5800_v36  ;;  %v5806_v5 = vsub.f32 %v17062_v45, %v13763_v40 }
 0x6cc   : > { %10542 = vset.pattern.permute.xlu1 %v17054_v29  ;;  %v14157_v59 = vpop.permute.xlu1 %6794  ;;  %v17058_v29 = vld [vmem:[#allocation189_spill] sm:$0xff]  ;;  %v5828_v0 = vadd.f32 %v5812_v46, %v14053_v54  ;;  %v5932_v35 = vand.u32 2147483647, %v5916_v20  ;;  %v5818_v50 = vand.u32 2147483647, %v5802_v14  ;;  %v14188_v56 = vadd.f32 %v5925_v12, %v5825_v10  ;;  %v17064_v36 = vld [vmem:[#allocation194_spill] sm:$0xff] }
 0x6cd   : > { %17055 = vst [vmem:[#allocation83_spill] sm:$0xff] %v14157_v59  ;;  %7238 = vperm.xlu1 %10542, %v13658_v34   ;;  %v5918_v2 = vsub.f32 %v17058_v29, %v13861_v3  ;;  %v17059_v59 = vld [vmem:[#allocation200_spill] sm:$0xff]  ;;  %v5922_v29 = vsub.f32 %v17064_v36, %v13861_v3  ;;  %v14194_v45 = vadd.f32 %v5811_v48, %v5711_v15  ;;  %v17066_v46 = vld [vmem:[#allocation197_spill] sm:$0xff]  ;;  %v5822_v12 = vand.u32 2147483647, %v5806_v5  ;;  %v17068_v14 = vld [vmem:[#allocation206_spill] sm:$0xff] }
 0x6ce   : > { %v5804_v43 = vsub.f32 %v17059_v59, %v13763_v40  ;;  %v14175_v13 = vpop.permute.xlu0 %7122  ;;  %v17061_v34 = vld [vmem:[#allocation192_spill] sm:$0xff]  ;;  %v14184_v59 = vadd.f32 %v5823_v4, %v5723_v31  ;;  %v5830_v4 = vadd.f32 %v5814_v42, %v14067_v62  ;;  %v5924_v20 = vsub.f32 %v17066_v46, %v13861_v3  ;;  %v17070_v15 = vld [vmem:[#allocation199_spill] sm:$0xff]  ;;  %v17073_v46 = vld [vmem:[#allocation213_spill] sm:$0xff] }
 0x6cf   : > { %17060 = vst [vmem:[#allocation84_spill] sm:$0xff] %v14175_v13  ;;  %v5920_v53 = vsub.f32 %v17061_v34, %v13861_v3  ;;  %7598 = vperm.xlu0 %10548, %v13716_v57   ;;  %v5934_v38 = vand.u32 2147483647, %v5918_v2  ;;  %v14192_v34 = vld [vmem:[#allocation3 + $0x10] sm:$0xff]  ;;  %v5832_v2 = vadd.f32 %v5816_v61, %v14069_v58  ;;  %v5910_v10 = vsub.f32 %v17068_v14, %v13861_v3 }
 0x6d0   : > { %v14181_v60 = vpop.permute.xlu1 %6802  ;;  %v5820_v17 = vand.u32 2147483647, %v5804_v43  ;;  %v17065_v31 = vld [vmem:[#allocation204_spill] sm:$0xff]  ;;  %v14209_v62 = vadd.f32 %v5928_v30, %v5828_v0  ;;  %v6026_v48 = vsub.f32 %v17070_v15, %v13970_v8  ;;  %v14216_v42 = vrot.slane %v14192_v34, %v16888_v41  ;;  %v17072_v30 = vld [vmem:[#allocation201_spill] sm:$0xff] }
 0x6d1   : > { %17063 = vst [vmem:[#allocation85_spill] sm:$0xff] %v14181_v60  ;;  %7242 = vperm.xlu1 %10542, %v13685_v22   ;;  %v5808_v54 = vsub.f32 %v17065_v31, %v13763_v40  ;;  %v5936_v43 = vand.u32 2147483647, %v5920_v53  ;;  %v5834_v40 = vadd.f32 %v5818_v50, %v14084_v6  ;;  %v5938_v61 = vand.u32 2147483647, %v5922_v29  ;;  %v17071_v53 = vld [vmem:[#allocation211_spill] sm:$0xff] }
 0x6d2   : > { %v14201_v22 = vpop.permute.xlu0 %7134  ;;  %v5836_v58 = vadd.f32 %v5820_v17, %v14087_v32  ;;  %v5913_v5 = vsub.f32 %v17071_v53, %v13861_v3  ;;  %v6029_v0 = vsub.f32 %v17072_v30, %v13970_v8  ;;  %v14224_v31 = vadd.f32 %v5930_v26, %v5830_v4  ;;  %v17075_v17 = vld [vmem:[#allocation203_spill] sm:$0xff]  ;;  %v17078_v30 = vld [vmem:[#allocation205_spill] sm:$0xff]  ;;  %v17185_v13 = vld [vmem:[#allocation284_spill] sm:$0xff] }
 0x6d3   : > { %17067 = vst [vmem:[#allocation86_spill] sm:$0xff] %v14201_v22  ;;  %7606 = vperm.xlu0 %10548, %v13749_v19   ;;  %v5824_v6 = vand.u32 2147483647, %v5808_v54  ;;  %v5940_v50 = vand.u32 2147483647, %v5924_v20  ;;  %v5915_v14 = vsub.f32 %v17073_v46, %v13861_v3  ;;  %v14230_v22 = vadd.f32 %v5932_v35, %v5832_v2  ;;  %v17077_v54 = vld [vmem:[#allocation208_spill] sm:$0xff] }
 0x6d4   : > { %v14206_v36 = vpop.permute.xlu1 %6810  ;;  %v5926_v32 = vand.u32 2147483647, %v5910_v10  ;;  %v6031_v29 = vsub.f32 %v17075_v17, %v13970_v8  ;;  %v14238_v26 = vadd.f32 %v5934_v38, %v5834_v40  ;;  %v6042_v4 = vand.u32 2147483647, %v6026_v48  ;;  %v17079_v10 = vld [vmem:[#allocation215_spill] sm:$0xff]  ;;  %v17080_v40 = vld [vmem:[#allocation217_spill] sm:$0xff] }
 0x6d5   : > { %17069 = vst [vmem:[#allocation87_spill] sm:$0xff] %v14206_v36  ;;  %7250 = vperm.xlu1 %10542, %v13716_v57   ;;  %v5838_v57 = vadd.f32 %v5822_v12, %v14089_v28  ;;  %v5911_v20 = vsub.f32 %v17077_v54, %v13861_v3  ;;  %v6033_v35 = vsub.f32 %v17078_v30, %v13970_v8  ;;  %v5929_v2 = vand.u32 2147483647, %v5913_v5  ;;  %v17081_v54 = vld [vmem:[#allocation207_spill] sm:$0xff] }
 0x6d6   : > { %v14228_v15 = vpop.permute.xlu0 %7142  ;;  %v14245_v28 = vadd.f32 %v5936_v43, %v5836_v58  ;;  %v6045_v12 = vand.u32 2147483647, %v6029_v0  ;;  %v5917_v46 = vsub.f32 %v17079_v10, %v13861_v3  ;;  %v5840_v17 = vadd.f32 %v5824_v6, %v14102_v9  ;;  %v17083_v58 = vld [vmem:[#allocation209_spill] sm:$0xff] }
 0x6d7   : > { %17074 = vst [vmem:[#allocation88_spill] sm:$0xff] %v14228_v15  ;;  %7614 = vperm.xlu0 %10548, %v13779_v49   ;;  %v5931_v38 = vand.u32 2147483647, %v5915_v14  ;;  %v5919_v48 = vsub.f32 %v17080_v40, %v13861_v3  ;;  %v6035_v15 = vsub.f32 %v17081_v54, %v13970_v8  ;;  %v14256_v30 = vadd.f32 %v5938_v61, %v5838_v57  ;;  %v17085_v14 = vld [vmem:[#allocation219_spill] sm:$0xff]  ;;  %v17086_v40 = vld [vmem:[#allocation212_spill] sm:$0xff]  ;;  %v17087_v57 = vld [vmem:[#allocation221_spill] sm:$0xff] }
 0x6d8   : > { %v14235_v53 = vpop.permute.xlu1 %6818  ;;  %v6047_v43 = vand.u32 2147483647, %v6031_v29  ;;  %v6037_v5 = vsub.f32 %v17083_v58, %v13970_v8  ;;  %v5927_v9 = vand.u32 2147483647, %v5911_v20  ;;  %v6049_v6 = vand.u32 2147483647, %v6033_v35 }
 0x6d9   : > { %17076 = vst [vmem:[#allocation89_spill] sm:$0xff] %v14235_v53  ;;  %7258 = vperm.xlu1 %10542, %v13749_v19   ;;  %v5942_v19 = vadd.f32 %v5926_v32, %v14107_v39  ;;  %v5921_v10 = vsub.f32 %v17085_v14, %v13861_v3  ;;  %v6039_v54 = vsub.f32 %v17086_v40, %v13970_v8  ;;  %v5933_v61 = vand.u32 2147483647, %v5917_v46  ;;  %v17088_v29 = vld [vmem:[#allocation214_spill] sm:$0xff]  ;;  %v17091_v46 = vld [vmem:[#allocation216_spill] sm:$0xff] }
 0x6da   : > { %v14254_v53 = vpop.permute.xlu0 %7150  ;;  %v5945_v39 = vadd.f32 %v5929_v2, %v14133_v23  ;;  %v5923_v32 = vsub.f32 %v17087_v57, %v13861_v3  ;;  %v6141_v58 = vsub.f32 %v17088_v29, %v14048_v37  ;;  %v5947_v20 = vadd.f32 %v5931_v38, %v14137_v24  ;;  %v17090_v23 = vld [vmem:[#allocation223_spill] sm:$0xff] }
 0x6db   : > { %17082 = vst [vmem:[#allocation90_spill] sm:$0xff] %v14254_v53  ;;  %7622 = vperm.xlu0 %10548, %v13809_v52   ;;  %v14274_v53 = vadd.f32 %v5940_v50, %v5840_v17  ;;  %v5935_v35 = vand.u32 2147483647, %v5919_v48  ;;  %v6051_v14 = vand.u32 2147483647, %v6035_v15  ;;  %v14279_v40 = vadd.f32 %v6042_v4, %v5942_v19 }
 0x6dc   : > { %v14261_v0 = vpop.permute.xlu1 %6826  ;;  %v6025_v2 = vsub.f32 %v17090_v23, %v13970_v8  ;;  %v6144_v3 = vsub.f32 %v17091_v46, %v14048_v37  ;;  %v5943_v50 = vadd.f32 %v5927_v9, %v14194_v45  ;;  %v5937_v17 = vand.u32 2147483647, %v5921_v10  ;;  %v17093_v9 = vld [vmem:[#allocation227_spill] sm:$0xff] }
 0x6dd   : > { %17084 = vst [vmem:[#allocation91_spill] sm:$0xff] %v14261_v0  ;;  %7266 = vperm.xlu1 %10542, %v13779_v49   ;;  %v6053_v49 = vand.u32 2147483647, %v6037_v5  ;;  %v6055_v57 = vand.u32 2147483647, %v6039_v54  ;;  %v14289_v24 = vrot.slane %v14192_v34, %v16898_v7  ;;  %v14294_v4 = vadd.f32 %v6045_v12, %v5945_v39  ;;  %v17094_v54 = vld [vmem:[#allocation218_spill] sm:$0xff] }
 0x6de   : > { %v14277_v0 = vpop.permute.xlu0 %7158  ;;  %v5949_v38 = vadd.f32 %v5933_v61, %v14150_v1  ;;  %v5939_v48 = vand.u32 2147483647, %v5923_v32  ;;  %v6157_v19 = vand.u32 2147483647, %v6141_v58  ;;  %v14297_v5 = vadd.f32 %v6047_v43, %v5947_v20  ;;  %v17096_v12 = vld [vmem:[#allocation225_spill] sm:$0xff]  ;;  %v17098_v43 = vld [vmem:[#allocation220_spill] sm:$0xff] }
 0x6df   : > { %17089 = vst [vmem:[#allocation92_spill] sm:$0xff] %v14277_v0  ;;  %7630 = vperm.xlu0 %10548, %v13840_v51   ;;  %v5951_v45 = vadd.f32 %v5935_v35, %v14166_v47  ;;  %v6028_v10 = vsub.f32 %v17093_v9, %v13970_v8  ;;  %v6146_v29 = vsub.f32 %v17094_v54, %v14048_v37  ;;  %v6160_v46 = vand.u32 2147483647, %v6144_v3  ;;  %v17097_v1 = vld [vmem:[#allocation229_spill] sm:$0xff]  ;;  %v17099_v58 = vld [vmem:[#allocation222_spill] sm:$0xff]  ;;  %v17101_v9 = vld [vmem:[#allocation231_spill] sm:$0xff] }
 0x6e0   : > { %v6027_v39 = vsub.f32 %v17096_v12, %v13970_v8  ;;  %v6030_v61 = vsub.f32 %v17097_v1, %v13970_v8  ;;  %v5953_v47 = vadd.f32 %v5937_v17, %v14173_v21  ;;  %v6148_v32 = vsub.f32 %v17098_v43, %v14048_v37  ;;  %v17102_v12 = vld [vmem:[#allocation233_spill] sm:$0xff] }
 0x6e1   : > { %7274 = vperm.xlu1 %10542, %v13809_v52   ;;  %v14292_v15 = vpop.permute.xlu1 %6886  ;;  %v6041_v52 = vand.u32 2147483647, %v6025_v2  ;;  %v6150_v20 = vsub.f32 %v17099_v58, %v14048_v37  ;;  %v14319_v2 = vadd.f32 %v6049_v6, %v5949_v38  ;;  %v5955_v3 = vadd.f32 %v5939_v48, %v14184_v59  ;;  %v17103_v58 = vld [vmem:[#allocation224_spill] sm:$0xff]  ;;  %v17105_v59 = vld [vmem:[#allocation235_spill] sm:$0xff] }
 0x6e2   : > { %17092 = vst [vmem:[#allocation93_spill] sm:$0xff] %v14292_v15  ;;  %v14304_v23 = vpop.permute.xlu0 %7166  ;;  %v6032_v54 = vsub.f32 %v17101_v9, %v13970_v8  ;;  %v6034_v21 = vsub.f32 %v17102_v12, %v13970_v8  ;;  %v14326_v17 = vadd.f32 %v6051_v14, %v5951_v45  ;;  %v6044_v1 = vand.u32 2147483647, %v6028_v10  ;;  %v17106_v10 = vld [vmem:[#allocation226_spill] sm:$0xff] }
 0x6e3   : > { %17095 = vst [vmem:[#allocation94_spill] sm:$0xff] %v14304_v23  ;;  %7638 = vperm.xlu0 %10548, %v13869_v11   ;;  %v6162_v43 = vand.u32 2147483647, %v6146_v29  ;;  %v6152_v23 = vsub.f32 %v17103_v58, %v14048_v37  ;;  %v6057_v6 = vadd.f32 %v6041_v52, %v14188_v56  ;;  %v6043_v38 = vand.u32 2147483647, %v6027_v39 }
 0x6e4   : > { %v6036_v48 = vsub.f32 %v17105_v59, %v13970_v8  ;;  %v16479_v9 = vmov 28   ;;  %v14336_v12 = vadd.f32 %v6053_v49, %v5953_v47  ;;  %v6164_v14 = vand.u32 2147483647, %v6148_v32  ;;  %v17109_v32 = vld [vmem:[#allocation237_spill] sm:$0xff] }
 0x6e5   : > { %7282 = vperm.xlu1 %10542, %v13840_v51   ;;  %v14317_v35 = vpop.permute.xlu1 %6894  ;;  %v6166_v45 = vand.u32 2147483647, %v6150_v20  ;;  %v6154_v29 = vsub.f32 %v17106_v10, %v14048_v37  ;;  %v14344_v56 = vadd.f32 %v6055_v57, %v5955_v3  ;;  %v6048_v52 = vand.u32 2147483647, %v6032_v54  ;;  %v17110_v10 = vld [vmem:[#allocation230_spill] sm:$0xff] }
 0x6e6   : > { %17100 = vst [vmem:[#allocation95_spill] sm:$0xff] %v14317_v35  ;;  %v14330_v51 = vpop.permute.xlu0 %7174  ;;  %v6046_v35 = vand.u32 2147483647, %v6030_v61  ;;  %v6050_v39 = vand.u32 2147483647, %v6034_v21  ;;  %v17108_v61 = vld [vmem:[#allocation228_spill] sm:$0xff]  ;;  %v6060_v49 = vadd.f32 %v6044_v1, %v14209_v62  ;;  %v6038_v20 = vsub.f32 %v17109_v32, %v13970_v8 }
 0x6e7   : > { %17104 = vst [vmem:[#allocation96_spill] sm:$0xff] %v14330_v51  ;;  %10549 = vset.pattern.permute.xlu0 %v16479_v9  ;;  %v6156_v59 = vsub.f32 %v17108_v61, %v14048_v37  ;;  %v6168_v47 = vand.u32 2147483647, %v6152_v23  ;;  %v14353_v9 = vadd.f32 %v6157_v19, %v6057_v6  ;;  %v14355_v51 = vadd.f32 %v6043_v38, %v5943_v50  ;;  %v17112_v61 = vld [vmem:[#allocation239_spill] sm:$0xff]  ;;  %v17113_v23 = vld [vmem:[#allocation241_spill] sm:$0xff]  ;;  %v17114_v32 = vld [vmem:[#allocation232_spill] sm:$0xff] }
 0x6e8   : > { %7698 = vperm.xlu0 %10549, %v13907_v27   ;;  %v6062_v57 = vadd.f32 %v6046_v35, %v14224_v31  ;;  %v6052_v3 = vand.u32 2147483647, %v6036_v48  ;;  %v6170_v21 = vand.u32 2147483647, %v6154_v29  ;;  %v6040_v62 = vsub.f32 %v17112_v61, %v13970_v8  ;;  %v17117_v50 = vld [vmem:[#allocation71_spill] sm:$0xff]  ;;  %v17118_v38 = vld [vmem:[#allocation234_spill] sm:$0xff] }
 0x6e9   : > { %7290 = vperm.xlu1 %10542, %v13869_v11   ;;  %v14341_v58 = vpop.permute.xlu1 %6898  ;;  %v6258_v11 = vsub.f32 %v17110_v10, %v14128_v63  ;;  %v6142_v1 = vsub.f32 %v17113_v23, %v14048_v37  ;;  %v17115_v10 = vmov 25   ;;  %v6064_v31 = vadd.f32 %v6048_v52, %v14230_v22  ;;  %v17119_v23 = vld [vmem:[#allocation282_spill] sm:$0xff]  ;;  %v17120_v22 = vld [vmem:[#allocation245_spill] sm:$0xff] }
 0x6ea   : > { %17107 = vst [vmem:[#allocation97_spill] sm:$0xff] %v14341_v58  ;;  %v6261_v58 = vsub.f32 %v17114_v32, %v14128_v63  ;;  %v6066_v35 = vadd.f32 %v6050_v39, %v14238_v26  ;;  %v6172_v6 = vand.u32 2147483647, %v6156_v59  ;;  %v6263_v8 = vsub.f32 %v17118_v38, %v14128_v63  ;;  %v17121_v26 = vld [vmem:[#allocation236_spill] sm:$0xff]  ;;  %v17122_v59 = vld [vmem:[#allocation238_spill] sm:$0xff] }
 0x6eb   : > { %v14358_v54 = vpop.permute.xlu0 %7234  ;;  %v14375_v48 = vadd.f32 %v6160_v46, %v6060_v49  ;;  %v6054_v29 = vand.u32 2147483647, %v6038_v20  ;;  %v6274_v61 = vand.u32 2147483647, %v6258_v11  ;;  %v14379_v32 = vrot.slane %v14192_v34, %v17119_v23 }
 0x6ec   : > { %17111 = vst [vmem:[#allocation98_spill] sm:$0xff] %v14358_v54  ;;  %7710 = vperm.xlu0 %10549, %v17117_v50   ;;  %v6145_v52 = vsub.f32 %v17120_v22, %v14048_v37  ;;  %v6265_v39 = vsub.f32 %v17121_v26, %v14128_v63  ;;  %v6267_v38 = vsub.f32 %v17122_v59, %v14128_v63  ;;  %v6056_v49 = vand.u32 2147483647, %v6040_v62  ;;  %v17125_v54 = vld [vmem:[#allocation72_spill] sm:$0xff]  ;;  %v17126_v22 = vld [vmem:[#allocation243_spill] sm:$0xff] }
 0x6ed   : > { %10543 = vset.pattern.permute.xlu1 %v17115_v10  ;;  %v14367_v19 = vpop.permute.xlu1 %6906  ;;  %v6068_v10 = vadd.f32 %v6052_v3, %v14245_v28  ;;  %v14390_v46 = vadd.f32 %v6162_v43, %v6062_v57  ;;  %v6158_v20 = vand.u32 2147483647, %v6142_v1  ;;  %v6277_v11 = vand.u32 2147483647, %v6261_v58  ;;  %v14406_v43 = vld [vmem:[%s16417_s1 + $0x10] sm:$0xff]  ;;  %v17127_v57 = vld [vmem:[#allocation247_spill] sm:$0xff] }
 0x6ee   : > { %17116 = vst [vmem:[#allocation99_spill] sm:$0xff] %v14367_v19  ;;  %7350 = vperm.xlu1 %10543, %v13907_v27   ;;  %v14395_v28 = vadd.f32 %v6164_v14, %v6064_v31  ;;  %v14397_v3 = vadd.f32 %v6166_v45, %v6066_v35  ;;  %v6143_v26 = vsub.f32 %v17126_v22, %v14048_v37  ;;  %v14401_v19 = vand.u32 2147483647, %v6263_v8  ;;  %v17128_v45 = vld [vmem:[#allocation249_spill] sm:$0xff]  ;;  %v17129_v1 = vld [vmem:[#allocation240_spill] sm:$0xff] }
 0x6ef   : > { %v14388_v27 = vpop.permute.xlu0 %7246  ;;  %v6070_v58 = vadd.f32 %v6054_v29, %v14256_v30  ;;  %v6147_v14 = vsub.f32 %v17127_v57, %v14048_v37  ;;  %v6149_v62 = vsub.f32 %v17128_v45, %v14048_v37  ;;  %v6269_v31 = vsub.f32 %v17129_v1, %v14128_v63  ;;  %v17131_v29 = vld [vmem:[#allocation251_spill] sm:$0xff]  ;;  %v17132_v45 = vld [vmem:[#allocation242_spill] sm:$0xff] }
 0x6f0   : > { %17123 = vst [vmem:[#allocation100_spill] sm:$0xff] %v14388_v27  ;;  %7718 = vperm.xlu0 %10549, %v17125_v54   ;;  %v14416_v35 = vadd.f32 %v6168_v47, %v6068_v10  ;;  %v6161_v8 = vand.u32 2147483647, %v6145_v52  ;;  %v6281_v59 = vand.u32 2147483647, %v6265_v39  ;;  %v6174_v30 = vadd.f32 %v6158_v20, %v14279_v40  ;;  %v17134_v10 = vld [vmem:[#allocation253_spill] sm:$0xff] }
 0x6f1   : > { %v14392_v23 = vpop.permute.xlu1 %6914  ;;  %v14418_v22 = vand.u32 2147483647, %v6267_v38  ;;  %v6151_v57 = vsub.f32 %v17131_v29, %v14048_v37  ;;  %v6271_v0 = vsub.f32 %v17132_v45, %v14128_v63  ;;  %v6159_v47 = vand.u32 2147483647, %v6143_v26  ;;  %v17135_v39 = vld [vmem:[#allocation244_spill] sm:$0xff]  ;;  %v17137_v26 = vld [vmem:[#allocation255_spill] sm:$0xff] }
 0x6f2   : > { %17124 = vst [vmem:[#allocation101_spill] sm:$0xff] %v14392_v23  ;;  %7358 = vperm.xlu1 %10543, %v14406_v43   ;;  %v6072_v23 = vadd.f32 %v6056_v49, %v14274_v53  ;;  %v6153_v52 = vsub.f32 %v17134_v10, %v14048_v37  ;;  %v6373_v38 = vsub.f32 %v17135_v39, %v14216_v42  ;;  %v17136_v53 = vld [vmem:[#allocation246_spill] sm:$0xff]  ;;  %v6163_v20 = vand.u32 2147483647, %v6147_v14  ;;  %v17138_v10 = vld [vmem:[#allocation257_spill] sm:$0xff]  ;;  %v17139_v39 = vld [vmem:[#allocation248_spill] sm:$0xff] }
 0x6f3   : > { %v14420_v27 = vpop.permute.xlu0 %7254  ;;  %v6376_v40 = vsub.f32 %v17136_v53, %v14216_v42  ;;  %v14438_v49 = vadd.f32 %v6170_v21, %v6070_v58  ;;  %v6165_v1 = vand.u32 2147483647, %v6149_v62  ;;  %v6285_v29 = vand.u32 2147483647, %v6269_v31 }
 0x6f4   : > { %17130 = vst [vmem:[#allocation102_spill] sm:$0xff] %v14420_v27  ;;  %7726 = vperm.xlu0 %10549, %v14022_v55   ;;  %v6177_v45 = vadd.f32 %v6161_v8, %v14294_v4  ;;  %v6155_v27 = vsub.f32 %v17137_v26, %v14048_v37  ;;  %v6378_v36 = vsub.f32 %v17139_v39, %v14216_v42  ;;  %v6287_v58 = vand.u32 2147483647, %v6271_v0  ;;  %v14458_v37 = vld [vmem:[%s16417_s1 + $0x48] sm:$0xff] }
 0x6f5   : > { %v14428_v15 = vpop.permute.xlu1 %6922  ;;  %v14449_v53 = vadd.f32 %v6172_v6, %v6072_v23  ;;  %v14451_v21 = vadd.f32 %v6274_v61, %v6174_v30  ;;  %v6175_v4 = vadd.f32 %v6159_v47, %v14355_v51  ;;  %v6169_v62 = vand.u32 2147483647, %v6153_v52  ;;  %v17142_v61 = vld [vmem:[#allocation250_spill] sm:$0xff]  ;;  %v17143_v30 = vld [vmem:[#allocation283_spill] sm:$0xff] }
 0x6f6   : > { %17133 = vst [vmem:[#allocation103_spill] sm:$0xff] %v14428_v15  ;;  %7362 = vperm.xlu1 %10543, %v17117_v50   ;;  %v6257_v15 = vsub.f32 %v17138_v10, %v14128_v63  ;;  %v6167_v50 = vand.u32 2147483647, %v6151_v57  ;;  %v6389_v31 = vand.u32 2147483647, %v6373_v38  ;;  %v6179_v6 = vadd.f32 %v6163_v20, %v14297_v5  ;;  %v17146_v20 = vld [vmem:[#allocation252_spill] sm:$0xff] }
 0x6f7   : > { %v14447_v60 = vpop.permute.xlu0 %7262  ;;  %v14462_v8 = vand.u32 2147483647, %v6376_v40  ;;  %v6181_v0 = vadd.f32 %v6165_v1, %v14319_v2  ;;  %v6380_v23 = vsub.f32 %v17142_v61, %v14216_v42  ;;  %v14471_v57 = vrot.slane %v14192_v34, %v17143_v30  ;;  %v17145_v2 = vld [vmem:[#allocation261_spill] sm:$0xff] }
 0x6f8   : > { %17140 = vst [vmem:[#allocation104_spill] sm:$0xff] %v14447_v60  ;;  %7734 = vperm.xlu0 %10549, %v14458_v37   ;;  %v14473_v26 = vadd.f32 %v6277_v11, %v6177_v45  ;;  %v6171_v51 = vand.u32 2147483647, %v6155_v27  ;;  %v6273_v47 = vand.u32 2147483647, %v6257_v15  ;;  %v6183_v38 = vadd.f32 %v6167_v50, %v14326_v17  ;;  %v17149_v17 = vld [vmem:[#allocation263_spill] sm:$0xff] }
 0x6f9   : > { %v14453_v14 = vpop.permute.xlu1 %6930  ;;  %v14475_v52 = vand.u32 2147483647, %v6378_v36  ;;  %v6260_v40 = vsub.f32 %v17145_v2, %v14128_v63  ;;  %v6382_v1 = vsub.f32 %v17146_v20, %v14216_v42  ;;  %v14491_v36 = vld [vmem:[%s16417_s1 + $0x58] sm:$0xff]  ;;  %v6185_v15 = vadd.f32 %v6169_v62, %v14336_v12  ;;  %v17151_v50 = vld [vmem:[#allocation256_spill] sm:$0xff] }
 0x6fa   : > { %17141 = vst [vmem:[#allocation105_spill] sm:$0xff] %v14453_v14  ;;  %7370 = vperm.xlu1 %10543, %v17125_v54   ;;  %v17144_v54 = vld [vmem:[#allocation259_spill] sm:$0xff]  ;;  %v6262_v27 = vsub.f32 %v17149_v17, %v14128_v63  ;;  %v17150_v11 = vld [vmem:[#allocation254_spill] sm:$0xff]  ;;  %v6386_v61 = vsub.f32 %v17151_v50, %v14216_v42  ;;  %v14505_v2 = vadd.f32 %v6281_v59, %v6181_v0  ;;  %v17152_v20 = vld [vmem:[#allocation265_spill] sm:$0xff]  ;;  %v6396_v12 = vand.u32 2147483647, %v6380_v23 }
 0x6fb   : > { %v6259_v5 = vsub.f32 %v17144_v54, %v14128_v63  ;;  %v14486_v39 = vpop.permute.xlu0 %7270  ;;  %v6384_v45 = vsub.f32 %v17150_v11, %v14216_v42  ;;  %v14503_v54 = vadd.f32 %v14401_v19, %v6179_v6  ;;  %v6264_v30 = vsub.f32 %v17152_v20, %v14128_v63  ;;  %v17153_v11 = vld [vmem:[#allocation267_spill] sm:$0xff]  ;;  %v17154_v50 = vld [vmem:[#allocation258_spill] sm:$0xff] }
 0x6fc   : > { %17148 = vst [vmem:[#allocation107_spill] sm:$0xff] %v14486_v39  ;;  %7742 = vperm.xlu0 %10549, %v14491_v36   ;;  %v6187_v62 = vadd.f32 %v6171_v51, %v14344_v56  ;;  %v6289_v17 = vadd.f32 %v6273_v47, %v14353_v9  ;;  %v6266_v39 = vsub.f32 %v17153_v11, %v14128_v63  ;;  %v6276_v59 = vand.u32 2147483647, %v6260_v40  ;;  %v14523_v56 = vld [vmem:[%s16417_s1 + $0x68] sm:$0xff]  ;;  %v17158_v20 = vld [vmem:[#allocation262_spill] sm:$0xff] }
 0x6fd   : > { %v14484_v10 = vpop.permute.xlu1 %6938  ;;  %v6388_v60 = vsub.f32 %v17154_v50, %v14216_v42  ;;  %v6275_v19 = vand.u32 2147483647, %v6259_v5  ;;  %v6398_v6 = vand.u32 2147483647, %v6382_v1  ;;  %v14526_v9 = vadd.f32 %v6285_v29, %v6185_v15  ;;  %v17157_v40 = vld [vmem:[#allocation260_spill] sm:$0xff] }
 0x6fe   : > { %17147 = vst [vmem:[#allocation106_spill] sm:$0xff] %v14484_v10  ;;  %7378 = vperm.xlu1 %10543, %v14022_v55   ;;  %v14516_v55 = vadd.f32 %v14418_v22, %v6183_v38  ;;  %v6278_v23 = vand.u32 2147483647, %v6262_v27  ;;  %v14528_v51 = vand.u32 2147483647, %v6384_v45  ;;  %v17156_v38 = vld [vmem:[#allocation269_spill] sm:$0xff]  ;;  %v6490_v1 = vsub.f32 %v17157_v40, %v14289_v24 }
 0x6ff   : > { %v14530_v47 = vand.u32 2147483647, %v6386_v61  ;;  %v6280_v22 = vand.u32 2147483647, %v6264_v30  ;;  %v6268_v5 = vsub.f32 %v17156_v38, %v14128_v63  ;;  %v6493_v11 = vsub.f32 %v17158_v20, %v14289_v24  ;;  %v14539_v50 = vpop.permute.xlu0 %7278  ;;  %v17160_v38 = vld [vmem:[#allocation271_spill] sm:$0xff]  ;;  %v17161_v40 = vld [vmem:[#allocation264_spill] sm:$0xff] }
 0x700   : > { %7750 = vperm.xlu0 %10549, %v14523_v56   ;;  %17159 = vst [vmem:[#allocation109_spill] sm:$0xff] %v14539_v50  ;;  %v14541_v29 = vadd.f32 %v6287_v58, %v6187_v62  ;;  %v14543_v15 = vadd.f32 %v6389_v31, %v6289_v17  ;;  %v6282_v27 = vand.u32 2147483647, %v6266_v39  ;;  %v14545_v45 = vand.u32 2147483647, %v6388_v60  ;;  %v14557_v58 = vld [vmem:[%s16417_s1 + $0x78] sm:$0xff] }
 0x701   : > { %v14518_v0 = vpop.permute.xlu1 %6946  ;;  %v14547_v61 = vadd.f32 %v6275_v19, %v6175_v4  ;;  %v6292_v30 = vadd.f32 %v6276_v59, %v14375_v48  ;;  %v6495_v10 = vsub.f32 %v17161_v40, %v14289_v24  ;;  %v6294_v60 = vadd.f32 %v6278_v23, %v14390_v46  ;;  %v17162_v4 = vld [vmem:[#allocation273_spill] sm:$0xff]  ;;  %v17163_v48 = vld [vmem:[#allocation266_spill] sm:$0xff]  ;;  %v17165_v46 = vld [vmem:[#allocation275_spill] sm:$0xff] }
 0x702   : > { %17155 = vst [vmem:[#allocation108_spill] sm:$0xff] %v14518_v0  ;;  %7386 = vperm.xlu1 %10543, %v14458_v37   ;;  %v6270_v0 = vsub.f32 %v17160_v38, %v14128_v63  ;;  %v6272_v31 = vsub.f32 %v17162_v4, %v14128_v63  ;;  %v6497_v39 = vsub.f32 %v17163_v48, %v14289_v24  ;;  %v6284_v19 = vand.u32 2147483647, %v6268_v5  ;;  %v17166_v63 = vld [vmem:[#allocation268_spill] sm:$0xff]  ;;  %v17167_v4 = vld [vmem:[#allocation287_spill] sm:$0xff]  ;;  %v17168_v5 = vld [vmem:[#allocation270_spill] sm:$0xff] }
 0x703   : > { %v6296_v17 = vadd.f32 %v6280_v22, %v14395_v28  ;;  %v14569_v59 = vand.u32 2147483647, %v6490_v1  ;;  %v14571_v20 = vand.u32 2147483647, %v6493_v11  ;;  %v6298_v38 = vadd.f32 %v6282_v27, %v14397_v3  ;;  %v14589_v3 = vpop.permute.xlu0 %7286 }
 0x704   : > { %7758 = vperm.xlu0 %10549, %v14557_v58   ;;  %v6374_v23 = vsub.f32 %v17165_v46, %v14216_v42  ;;  %v6499_v40 = vsub.f32 %v17166_v63, %v14289_v24  ;;  %v14580_v48 = vrot.slane %v14192_v34, %v17167_v4  ;;  %v14583_v50 = vadd.f32 %v14462_v8, %v6292_v30  ;;  %v17170_v63 = vld [vmem:[#allocation281_spill] sm:$0xff] }
 0x705   : > { %v6286_v28 = vand.u32 2147483647, %v6270_v0  ;;  %v14585_v22 = vand.u32 2147483647, %v6495_v10  ;;  %v6501_v1 = vsub.f32 %v17168_v5, %v14289_v24  ;;  %17169 = vst [vmem:[#allocation111_spill] sm:$0xff] %v14589_v3  ;;  %v16480_v11 = vmov 29  }
 0x706   : > { %7394 = vperm.xlu1 %10543, %v14491_v36   ;;  %v14566_v62 = vpop.permute.xlu1 %7006  ;;  %v14593_v27 = vadd.f32 %v14475_v52, %v6294_v60  ;;  %v6288_v46 = vand.u32 2147483647, %v6272_v31  ;;  %v6377_v4 = vsub.f32 %v17170_v63, %v14216_v42  ;;  %v14597_v8 = vand.u32 2147483647, %v6497_v39  ;;  %v14605_v0 = vld [vmem:[%s16417_s1 + $0x8] sm:$0xff]  ;;  %v17173_v60 = vld [vmem:[#allocation285_spill] sm:$0xff] }
 0x707   : > { %17164 = vst [vmem:[#allocation110_spill] sm:$0xff] %v14566_v62  ;;  %17172 = vst [vmem:[#allocation113_spill] sm:$0xff] %v14605_v0  ;;  %v14608_v30 = vadd.f32 %v6396_v12, %v6296_v17  ;;  %v6300_v52 = vadd.f32 %v6284_v19, %v14416_v35  ;;  %v6379_v31 = vsub.f32 %v17173_v60, %v14216_v42  ;;  %v17174_v39 = vld [vmem:[#allocation272_spill] sm:$0xff]  ;;  %v17175_v3 = vld [vmem:[#allocation278_spill] sm:$0xff]  ;;  %v14619_v62 = vand.u32 2147483647, %v6499_v40 }
 0x708   : > { %10552 = vset.pattern.permute.xlu0 %v16480_v11  ;;  %v6503_v5 = vsub.f32 %v17174_v39, %v14289_v24  ;;  %v14615_v63 = vadd.f32 %v6398_v6, %v6298_v38  ;;  %v6390_v11 = vand.u32 2147483647, %v6374_v23  ;;  %v6302_v14 = vadd.f32 %v6286_v28, %v14438_v49  ;;  %v17176_v12 = vld [vmem:[#allocation289_spill] sm:$0xff]  ;;  %v17177_v19 = vld [vmem:[#allocation274_spill] sm:$0xff]  ;;  %v17178_v38 = vld [vmem:[#allocation292_spill] sm:$0xff] }
 0x709   : > { %7818 = vperm.xlu0 %10552, %v14605_v0   ;;  %v6381_v17 = vsub.f32 %v17176_v12, %v14216_v42  ;;  %v14624_v35 = vand.u32 2147483647, %v6501_v1  ;;  %v6605_v60 = vsub.f32 %v17177_v19, %v14379_v32  ;;  %v6304_v39 = vadd.f32 %v6288_v46, %v14449_v53  ;;  %v14639_v28 = vld [vmem:[%s16417_s1 + $0x20] sm:$0xff]  ;;  %v17182_v46 = vld [vmem:[#allocation280_spill] sm:$0xff]  ;;  %v14649_v19 = vpop.permute.xlu0 %7294 }
 0x70a   : > { %7402 = vperm.xlu1 %10543, %v14523_v56   ;;  %v14600_v10 = vpop.permute.xlu1 %7010  ;;  %v6393_v6 = vand.u32 2147483647, %v6377_v4  ;;  %v6383_v23 = vsub.f32 %v17178_v38, %v14216_v42  ;;  %17181 = vst [vmem:[#allocation115_spill] sm:$0xff] %v14639_v28  ;;  %v14643_v53 = vadd.f32 %v14528_v51, %v6300_v52  ;;  %v6395_v4 = vand.u32 2147483647, %v6379_v31  ;;  %17183 = vst [vmem:[#allocation117_spill] sm:$0xff] %v14649_v19 }
 0x70b   : > { %17171 = vst [vmem:[#allocation112_spill] sm:$0xff] %v14600_v10  ;;  %v6375_v10 = vsub.f32 %v17175_v3, %v14216_v42  ;;  %v17179_v3 = vld [vmem:[#allocation276_spill] sm:$0xff]  ;;  %v14645_v1 = vand.u32 2147483647, %v6503_v5  ;;  %v6610_v12 = vsub.f32 %v17182_v46, %v14379_v32  ;;  %v6406_v38 = vadd.f32 %v6390_v11, %v14451_v21  ;;  %v17186_v31 = vld [vmem:[#allocation297_spill] sm:$0xff] }
 0x70c   : > { %v6608_v40 = vsub.f32 %v17179_v3, %v14379_v32  ;;  %v6612_v16 = vsub.f32 %v17185_v13, %v14379_v32  ;;  %v14657_v51 = vadd.f32 %v14530_v47, %v6302_v14  ;;  %v6397_v52 = vand.u32 2147483647, %v6381_v17  ;;  %v14675_v14 = vld [vmem:[%s16417_s1 + $0x30] sm:$0xff]  ;;  %v17190_v47 = vld [vmem:[#allocation299_spill] sm:$0xff] }
 0x70d   : > { %7830 = vperm.xlu0 %10552, %v14639_v28   ;;  %v6391_v3 = vand.u32 2147483647, %v6375_v10  ;;  %v6387_v5 = vsub.f32 %v17186_v31, %v14216_v42  ;;  %v14661_v33 = vand.u32 2147483647, %v6605_v60  ;;  %v14664_v46 = vadd.f32 %v14545_v45, %v6304_v39  ;;  %17189 = vst [vmem:[#allocation116_spill] sm:$0xff] %v14675_v14  ;;  %v17191_v17 = vld [vmem:[#allocation288_spill] sm:$0xff] }
 0x70e   : > { %7410 = vperm.xlu1 %10543, %v14557_v58   ;;  %v14634_v49 = vpop.permute.xlu1 %7018  ;;  %v6409_v21 = vadd.f32 %v6393_v6, %v14473_v26  ;;  %v6399_v11 = vand.u32 2147483647, %v6383_v23  ;;  %v14667_v10 = vand.u32 2147483647, %v6608_v40  ;;  %v6489_v45 = vsub.f32 %v17190_v47, %v14289_v24  ;;  %v17192_v31 = vld [vmem:[#allocation290_spill] sm:$0xff]  ;;  %v17193_v47 = vld [vmem:[#allocation296_spill] sm:$0xff] }
 0x70f   : > { %17180 = vst [vmem:[#allocation114_spill] sm:$0xff] %v14634_v49  ;;  %v17184_v49 = vld [vmem:[#allocation294_spill] sm:$0xff]  ;;  %v14681_v26 = vand.u32 2147483647, %v6610_v12  ;;  %v6614_v60 = vsub.f32 %v17191_v17, %v14379_v32  ;;  %v14687_v39 = vadd.f32 %v14569_v59, %v6406_v38  ;;  %v14690_v6 = vadd.f32 %v6391_v3, %v14547_v61  ;;  %v14704_v38 = vpop.permute.xlu0 %7354  ;;  %v17195_v61 = vld [vmem:[#allocation293_spill] sm:$0xff] }
 0x710   : > { %v6385_v7 = vsub.f32 %v17184_v49, %v14216_v42  ;;  %v17187_v49 = vmov 26   ;;  %v6411_v42 = vadd.f32 %v6395_v4, %v14503_v54  ;;  %v14692_v40 = vand.u32 2147483647, %v6612_v16  ;;  %v4045_v54 = vld [vmem:[%s16416_s0] sm:$0xff]  ;;  %17194 = vst [vmem:[#allocation118_spill] sm:$0xff] %v14704_v38 }
 0x711   : > { %7838 = vperm.xlu0 %10552, %v14675_v14   ;;  %v6413_v4 = vadd.f32 %v6397_v52, %v14505_v2  ;;  %v6403_v12 = vand.u32 2147483647, %v6387_v5  ;;  %v14702_v59 = vrot.slane %v14192_v34, %v17193_v47  ;;  %v6415_v16 = vadd.f32 %v6399_v11, %v14516_v55  ;;  %v14717_v2 = vld [vmem:[%s16417_s1 + $0x40] sm:$0xff] }
 0x712   : > { %10546 = vset.pattern.permute.xlu1 %v17187_v49  ;;  %v14670_v13 = vpop.permute.xlu1 %7026  ;;  %v6401_v23 = vand.u32 2147483647, %v6385_v7  ;;  %v6616_v49 = vsub.f32 %v17192_v31, %v14379_v32  ;;  %v14707_v7 = vadd.f32 %v14571_v20, %v6409_v21  ;;  %v6618_v3 = vsub.f32 %v17195_v61, %v14379_v32  ;;  %17197 = vst [vmem:[#allocation123_spill] sm:$0xff] %v14717_v2  ;;  %v17198_v55 = vld [vmem:[#allocation295_spill] sm:$0xff]  ;;  %v17199_v61 = vld [vmem:[#allocation29_spill] sm:$0xff] }
 0x713   : > { %17188 = vst [vmem:[#allocation119_spill] sm:$0xff] %v14670_v13  ;;  %7470 = vperm.xlu1 %10546, %v14605_v0   ;;  %v8833_v52 = vmul.f32 -1.442695, %v4045_v54  ;;  %v14721_v5 = vadd.f32 %v14585_v22, %v6411_v42  ;;  %v6505_v20 = vand.u32 2147483647, %v6489_v45  ;;  %v6620_v11 = vsub.f32 %v17198_v55, %v14379_v32  ;;  %v17200_v38 = vld [vmem:[#allocation27_spill] sm:$0xff] }
 0x714   : > { %v14723_v21 = vand.u32 2147483647, %v6614_v60  ;;  %v6417_v31 = vadd.f32 %v6401_v23, %v14526_v9  ;;  %v6491_v47 = vsub.f32 %v17199_v61, %v14289_v24  ;;  %v6492_v19 = vsub.f32 %v17200_v38, %v14289_v24  ;;  %v17201_v54 = vld [vmem:[#allocation298_spill] sm:$0xff]  ;;  %v17202_v60 = vld [vmem:[#allocation35_spill] sm:$0xff]  ;;  %v14743_v9 = vpop.permute.xlu0 %7366 }
 0x715   : > { %7846 = vperm.xlu0 %10552, %v14717_v2   ;;  %v6722_v22 = vsub.f32 %v17201_v54, %v14471_v57  ;;  %v14736_v42 = vadd.f32 %v14597_v8, %v6413_v4  ;;  %v6419_v45 = vadd.f32 %v6403_v12, %v14541_v29  ;;  %v6494_v55 = vsub.f32 %v17202_v60, %v14289_v24  ;;  %v4048_v23 = vld [vmem:[%s16416_s0 + $0x18] sm:$0xff]  ;;  %v14758_v29 = vld [vmem:[%s16417_s1 + $0x50] sm:$0xff] }
 0x716   : > { %v14712_v17 = vpop.permute.xlu1 %7034  ;;  %17203 = vst [vmem:[#allocation120_spill] sm:$0xff] %v14743_v9  ;;  %v14749_v38 = vadd.f32 %v14619_v62, %v6415_v16  ;;  %v14751_v61 = vand.u32 2147483647, %v6618_v3  ;;  %17205 = vst [vmem:[#allocation127_spill] sm:$0xff] %v14758_v29  ;;  %10559 = vpow2.f32 %v8833_v52  ;;  %v8836_v4 = vmul.f32 -1.442695, %v4048_v23 }
 0x717   : > { %17196 = vst [vmem:[#allocation121_spill] sm:$0xff] %v14712_v17  ;;  %7474 = vperm.xlu1 %10546, %v14406_v43   ;;  %v14741_v17 = vand.u32 2147483647, %v6616_v49  ;;  %v6521_v12 = vadd.f32 %v6505_v20, %v14543_v15  ;;  %v17206_v49 = vld [vmem:[#allocation30_spill] sm:$0xff]  ;;  %v14764_v62 = vand.u32 2147483647, %v6620_v11  ;;  %v14770_v60 = vadd.f32 %v14624_v35, %v6417_v31 }
 0x718   : > { %v6496_v54 = vsub.f32 %v17206_v49, %v14289_v24  ;;  %v17207_v16 = vld [vmem:[#allocation300_spill] sm:$0xff]  ;;  %v6507_v9 = vand.u32 2147483647, %v6491_v47  ;;  %v14772_v13 = vand.u32 2147483647, %v6722_v22  ;;  %v14775_v52 = vadd.f32 %v14645_v1, %v6419_v45  ;;  %v17208_v20 = vld [vmem:[#allocation210_spill] sm:$0xff] }
 0x719   : > { %7854 = vperm.xlu0 %10552, %v14758_v29   ;;  %v6725_v3 = vsub.f32 %v17207_v16, %v14471_v57  ;;  %v6510_v15 = vand.u32 2147483647, %v6494_v55  ;;  %v6498_v11 = vsub.f32 %v17208_v20, %v14289_v24  ;;  %v17209_v23 = vld [vmem:[#allocation286_spill] sm:$0xff]  ;;  %v4050_v16 = vld [vmem:[%s16416_s0 + $0x28] sm:$0xff]  ;;  %10561 = vpow2.f32 %v8836_v4 }
 0x71a   : > { %v14753_v8 = vpop.permute.xlu1 %7042  ;;  %v6727_v49 = vsub.f32 %v17209_v23, %v14471_v57  ;;  %v17210_v35 = vld [vmem:[#allocation39_spill] sm:$0xff]  ;;  %v8838_v45 = vmul.f32 -1.442695, %v4050_v16  ;;  %v14797_v55 = vadd.f32 %v14661_v33, %v6521_v12  ;;  %v6512_v20 = vand.u32 2147483647, %v6496_v54  ;;  %v17214_v23 = vld [vmem:[#allocation34_spill] sm:$0xff] }
 0x71b   : > { %17204 = vst [vmem:[#allocation125_spill] sm:$0xff] %v14753_v8  ;;  %7482 = vperm.xlu1 %10546, %v14639_v28   ;;  %v6508_v8 = vand.u32 2147483647, %v6492_v19  ;;  %v6500_v47 = vsub.f32 %v17210_v35, %v14289_v24  ;;  %v17211_v19 = vld [vmem:[#allocation33_spill] sm:$0xff]  ;;  %v14793_v1 = vld [vmem:[%s16417_s1 + $0x60] sm:$0xff]  ;;  %v6502_v35 = vsub.f32 %v17214_v23, %v14289_v24  ;;  %v17217_v33 = vld [vmem:[#allocation28_spill] sm:$0xff]  ;;  %v6526_v54 = vadd.f32 %v6510_v15, %v14593_v27 }
 0x71c   : > { %v6729_v31 = vsub.f32 %v17211_v19, %v14471_v57  ;;  %17213 = vst [vmem:[#allocation122_spill] sm:$0xff] %v14793_v1  ;;  %v14801_v28 = vand.u32 2147483647, %v6725_v3  ;;  %v14804_v19 = vpop.permute.xlu0 %7374  ;;  %v17216_v4 = vld [vmem:[#allocation38_spill] sm:$0xff]  ;;  %v6731_v12 = vsub.f32 %v17217_v33, %v14471_v57  ;;  %v6514_v23 = vand.u32 2147483647, %v6498_v11 }
 0x71d   : > { %7862 = vperm.xlu0 %10552, %v14793_v1   ;;  %17215 = vst [vmem:[#allocation124_spill] sm:$0xff] %v14804_v19  ;;  %v6524_v0 = vadd.f32 %v6508_v8, %v14583_v50  ;;  %v6504_v16 = vsub.f32 %v17216_v4, %v14289_v24  ;;  %v14815_v3 = vand.u32 2147483647, %v6727_v49  ;;  %v17219_v50 = vld [vmem:[#allocation175_spill] sm:$0xff]  ;;  %v14831_v27 = vld [vmem:[%s16417_s1 + $0x70] sm:$0xff]  ;;  %10563 = vpow2.f32 %v8838_v45 }
 0x71e   : > { %v14788_v22 = vpop.permute.xlu1 %7050  ;;  %v6606_v8 = vsub.f32 %v17219_v50, %v14379_v32  ;;  %v14824_v24 = vand.u32 2147483647, %v6729_v31  ;;  %17221 = vst [vmem:[#allocation126_spill] sm:$0xff] %v14831_v27  ;;  %v6518_v15 = vand.u32 2147483647, %v6502_v35  ;;  %v14837_v11 = vrot.slane %v14192_v34, %v13318_v44 }
 0x71f   : > { %17212 = vst [vmem:[#allocation129_spill] sm:$0xff] %v14788_v22  ;;  %7490 = vperm.xlu1 %10546, %v14675_v14   ;;  %v14807_v22 = vadd.f32 %v6507_v9, %v14690_v6  ;;  %v17218_v14 = vld [vmem:[#allocation31_spill] sm:$0xff]  ;;  %v4052_v6 = vld [vmem:[%s16416_s0 + $0x38] sm:$0xff]  ;;  %v6516_v9 = vand.u32 2147483647, %v6500_v47  ;;  %v14841_v47 = vadd.f32 %v14667_v10, %v6524_v0  ;;  %v14846_v19 = vadd.f32 %v14681_v26, %v6526_v54  ;;  %v17224_v10 = vld [vmem:[#allocation196_spill] sm:$0xff] }
 0x720   : > { %v6733_v18 = vsub.f32 %v17218_v14, %v14471_v57  ;;  %v6528_v14 = vadd.f32 %v6512_v20, %v14608_v30  ;;  %v10560_v49 = vpop.eup %10559  ;;  %v6520_v31 = vand.u32 2147483647, %v6504_v16  ;;  %v14843_v33 = vand.u32 2147483647, %v6731_v12  ;;  %v17222_v20 = vld [vmem:[#allocation32_spill] sm:$0xff]  ;;  %v14853_v44 = vpop.permute.xlu0 %7382  ;;  %v17225_v12 = vld [vmem:[#allocation41_spill] sm:$0xff] }
 0x721   : > { %7870 = vperm.xlu0 %10552, %v14831_v27   ;;  %v8840_v50 = vmul.f32 -1.442695, %v4052_v6  ;;  %v6530_v30 = vadd.f32 %v6514_v23, %v14615_v63  ;;  %v6735_v35 = vsub.f32 %v17222_v20, %v14471_v57  ;;  %17223 = vst [vmem:[#allocation128_spill] sm:$0xff] %v14853_v44  ;;  %v6622_v0 = vand.u32 2147483647, %v6606_v8  ;;  %v17226_v54 = vld [vmem:[#allocation36_spill] sm:$0xff] }
 0x722   : > { %v14826_v4 = vpop.permute.xlu1 %7058  ;;  %v14849_v45 = vand.u32 2147483647, %v6733_v18  ;;  %v6609_v16 = vsub.f32 %v17224_v10, %v14379_v32  ;;  %v6837_v6 = vsub.f32 %v17225_v12, %v14580_v48  ;;  %v16489_v26 = vmov 30  }
 0x723   : > { %17220 = vst [vmem:[#allocation131_spill] sm:$0xff] %v14826_v4  ;;  %7498 = vperm.xlu1 %10546, %v14717_v2   ;;  %v6532_v4 = vadd.f32 %v6516_v9, %v14643_v53  ;;  %v14862_v18 = vadd.f32 %v14692_v40, %v6528_v14  ;;  %v6534_v63 = vadd.f32 %v6518_v15, %v14657_v51  ;;  %v14873_v9 = vld [vmem:[%s16417_s1] sm:$0xff]  ;;  %v4129_v8 = vadd.f32 1.0, %v10560_v49  ;;  %v10562_v20 = vpop.eup %10561  ;;  %v17229_v51 = vld [vmem:[#allocation40_spill] sm:$0xff] }
 0x724   : > { %v6840_v23 = vsub.f32 %v17226_v54, %v14580_v48  ;;  %17228 = vst [vmem:[#allocation132_spill] sm:$0xff] %v14873_v9  ;;  %v6536_v40 = vadd.f32 %v6520_v31, %v14664_v46  ;;  %v6607_v14 = vsub.f32 %v17229_v51, %v14379_v32  ;;  %v17230_v15 = vld [vmem:[#allocation43_spill] sm:$0xff]  ;;  %10565 = vpow2.f32 %v8840_v50  ;;  %v17231_v54 = vld [vmem:[#allocation44_spill] sm:$0xff] }
 0x725   : > { %10553 = vset.pattern.permute.xlu0 %v16489_v26  ;;  %v6842_v10 = vsub.f32 %v17230_v15, %v14580_v48  ;;  %v14882_v12 = vadd.f32 %v14723_v21, %v6530_v30  ;;  %v6611_v26 = vsub.f32 %v17231_v54, %v14379_v32  ;;  %v14886_v44 = vand.u32 2147483647, %v6735_v35  ;;  %v17232_v49 = vld [vmem:[#allocation291_spill] sm:$0xff] }
 0x726   : > { %7930 = vperm.xlu0 %10553, %v14873_v9   ;;  %v14891_v46 = vadd.f32 %v14741_v17, %v6532_v4  ;;  %v6638_v31 = vadd.f32 %v6622_v0, %v14687_v39  ;;  %v6625_v51 = vand.u32 2147483647, %v6609_v16  ;;  %v4054_v21 = vld [vmem:[%s16416_s0 + $0x48] sm:$0xff]  ;;  %v14900_v50 = vadd.f32 %v14751_v61, %v6534_v63  ;;  %v14907_v17 = vpop.permute.xlu0 %7390  ;;  %v14912_v39 = vld [vmem:[%s16417_s1 + $0x18] sm:$0xff] }
 0x727   : > { %7506 = vperm.xlu1 %10546, %v14758_v29   ;;  %v14868_v53 = vpop.permute.xlu1 %7118  ;;  %v14894_v29 = vand.u32 2147483647, %v6837_v6  ;;  %v14902_v30 = vand.u32 2147483647, %v6840_v23  ;;  %17234 = vst [vmem:[#allocation135_spill] sm:$0xff] %v14907_v17  ;;  %17235 = vst [vmem:[#allocation137_spill] sm:$0xff] %v14912_v39  ;;  %10567 = vrcp.f32 %v4129_v8  ;;  %v10564_v0 = vpop.eup %10563  ;;  %v14916_v61 = vadd.f32 %v14764_v62, %v6536_v40 }
 0x728   : > { %17227 = vst [vmem:[#allocation130_spill] sm:$0xff] %v14868_v53  ;;  %v6844_v53 = vsub.f32 %v17232_v49, %v14580_v48  ;;  %v4132_v4 = vadd.f32 1.0, %v10562_v20  ;;  %v6623_v16 = vand.u32 2147483647, %v6607_v14  ;;  %v17236_v6 = vld [vmem:[#allocation47_spill] sm:$0xff]  ;;  %v17237_v49 = vld [vmem:[#allocation45_spill] sm:$0xff]  ;;  %v14927_v8 = vadd.f32 %v14772_v13, %v6638_v31 }
 0x729   : > { %v6613_v63 = vsub.f32 %v17236_v6, %v14379_v32  ;;  %v14920_v23 = vand.u32 2147483647, %v6842_v10  ;;  %v6627_v15 = vand.u32 2147483647, %v6611_v26  ;;  %v8842_v17 = vmul.f32 -1.442695, %v4054_v21 }
 0x72a   : > { %7942 = vperm.xlu0 %10553, %v14912_v39   ;;  %v14922_v54 = vand.u32 2147483647, %v6844_v53  ;;  %v6641_v20 = vadd.f32 %v6625_v51, %v14707_v7  ;;  %v17238_v62 = vld [vmem:[#allocation51_spill] sm:$0xff]  ;;  %v17239_v14 = vld [vmem:[#allocation42_spill] sm:$0xff]  ;;  %v17241_v53 = vld [vmem:[#allocation57_spill] sm:$0xff]  ;;  %10569 = vrcp.f32 %v4132_v4  ;;  %v4134_v7 = vadd.f32 1.0, %v10564_v0 }
 0x72b   : > { %7514 = vperm.xlu1 %10546, %v14793_v1   ;;  %v14905_v35 = vpop.permute.xlu1 %7126  ;;  %v6615_v40 = vsub.f32 %v17238_v62, %v14379_v32  ;;  %v6848_v6 = vsub.f32 %v17239_v14, %v14580_v48  ;;  %v17240_v10 = vld [vmem:[#allocation55_spill] sm:$0xff]  ;;  %v6619_v1 = vsub.f32 %v17241_v53, %v14379_v32  ;;  %v4056_v31 = vld [vmem:[%s16416_s0 + $0x58] sm:$0xff]  ;;  %v14951_v51 = vadd.f32 %v6623_v16, %v14807_v22 }
 0x72c   : > { %17233 = vst [vmem:[#allocation133_spill] sm:$0xff] %v14905_v35  ;;  %v6846_v35 = vsub.f32 %v17237_v49, %v14580_v48  ;;  %v6617_v26 = vsub.f32 %v17240_v10, %v14379_v32  ;;  %v14944_v13 = vld [vmem:[%s16417_s1 + $0x28] sm:$0xff]  ;;  %v6629_v32 = vand.u32 2147483647, %v6613_v63  ;;  %v17245_v14 = vld [vmem:[#allocation46_spill] sm:$0xff]  ;;  %v6643_v53 = vadd.f32 %v6627_v15, %v14721_v5  ;;  %v17246_v4 = vld [vmem:[#allocation49_spill] sm:$0xff] }
 0x72d   : > { %17243 = vst [vmem:[#allocation141_spill] sm:$0xff] %v14944_v13  ;;  %v17244_v49 = vld [vmem:[#allocation48_spill] sm:$0xff]  ;;  %v6850_v10 = vsub.f32 %v17245_v14, %v14580_v48  ;;  %v6852_v0 = vsub.f32 %v17246_v4, %v14580_v48  ;;  %10571 = vpow2.f32 %v8842_v17  ;;  %v6631_v22 = vand.u32 2147483647, %v6615_v40  ;;  %v14979_v17 = vld [vmem:[%s16417_s1 + $0x38] sm:$0xff] }
 0x72e   : > { %7950 = vperm.xlu0 %10553, %v14944_v13   ;;  %v6721_v62 = vsub.f32 %v17244_v49, %v14471_v57  ;;  %v10566_v2 = vpop.eup %10565  ;;  %v14964_v16 = vand.u32 2147483647, %v6848_v6  ;;  %v14968_v63 = vrot.slane %v14192_v34, %v13392_v25  ;;  %v8844_v49 = vmul.f32 -1.442695, %v4056_v31  ;;  %17250 = vst [vmem:[#allocation145_spill] sm:$0xff] %v14979_v17  ;;  %v17252_v31 = vld [vmem:[#allocation52_spill] sm:$0xff] }
 0x72f   : > { %7522 = vperm.xlu1 %10546, %v14831_v27   ;;  %v14939_v21 = vpop.permute.xlu1 %7130  ;;  %v14962_v27 = vpop.permute.xlu0 %7398  ;;  %v14971_v14 = vadd.f32 %v14801_v28, %v6641_v20  ;;  %v6633_v5 = vand.u32 2147483647, %v6617_v26  ;;  %v17248_v15 = vmov 27   ;;  %10573 = vrcp.f32 %v4134_v7  ;;  %v17251_v28 = vld [vmem:[#allocation181_spill] sm:$0xff] }
 0x730   : > { %17242 = vst [vmem:[#allocation139_spill] sm:$0xff] %v14939_v21  ;;  %v14958_v21 = vand.u32 2147483647, %v6846_v35  ;;  %17247 = vst [vmem:[#allocation134_spill] sm:$0xff] %v14962_v27  ;;  %v6635_v35 = vand.u32 2147483647, %v6619_v1  ;;  %v6645_v34 = vadd.f32 %v6629_v32, %v14736_v42  ;;  %v6723_v20 = vsub.f32 %v17251_v28, %v14471_v57 }
 0x731   : > { %v6737_v40 = vand.u32 2147483647, %v6721_v62  ;;  %v14985_v6 = vand.u32 2147483647, %v6850_v10  ;;  %v14988_v1 = vpop.eup %10567  ;;  %v14991_v26 = vadd.f32 %v14815_v3, %v6643_v53  ;;  %v14995_v25 = vand.u32 2147483647, %v6852_v0 }
 0x732   : > { %7958 = vperm.xlu0 %10553, %v14979_v17   ;;  %v4136_v7 = vadd.f32 1.0, %v10566_v2  ;;  %v6647_v42 = vadd.f32 %v6631_v22, %v14749_v38  ;;  %v17253_v32 = vld [vmem:[#allocation53_spill] sm:$0xff]  ;;  %v17254_v10 = vld [vmem:[#allocation178_spill] sm:$0xff]  ;;  %10575 = vpow2.f32 %v8844_v49  ;;  %v6651_v3 = vadd.f32 %v6635_v35, %v14775_v52  ;;  %v17255_v53 = vld [vmem:[#allocation59_spill] sm:$0xff] }
 0x733   : > { %10547 = vset.pattern.permute.xlu1 %v17248_v15  ;;  %v14974_v4 = vpop.permute.xlu1 %7138  ;;  %v6724_v15 = vsub.f32 %v17252_v31, %v14471_v57  ;;  %v6954_v62 = vsub.f32 %v17253_v32, %v14702_v59  ;;  %v6957_v28 = vsub.f32 %v17254_v10, %v14702_v59  ;;  %v6959_v27 = vsub.f32 %v17255_v53, %v14702_v59  ;;  %v17256_v0 = vld [vmem:[#allocation61_spill] sm:$0xff]  ;;  %v15010_v38 = vpop.permute.xlu0 %7406  ;;  %v17259_v32 = vld [vmem:[#allocation63_spill] sm:$0xff]  ;;  %v17260_v53 = vld [vmem:[#allocation50_spill] sm:$0xff] }
 0x734   : > { %17249 = vst [vmem:[#allocation143_spill] sm:$0xff] %v14974_v4  ;;  %7582 = vperm.xlu1 %10547, %v14873_v9   ;;  %v6649_v4 = vadd.f32 %v6633_v5, %v14770_v60  ;;  %v6961_v31 = vsub.f32 %v17256_v0, %v14702_v59  ;;  %17258 = vst [vmem:[#allocation138_spill] sm:$0xff] %v15010_v38  ;;  %v15014_v22 = vadd.f32 %v14824_v24, %v6645_v34  ;;  %v15021_v5 = vpop.eup %10569 }
 0x735   : > { %v6753_v49 = vadd.f32 %v6737_v40, %v14797_v55  ;;  %v6739_v60 = vand.u32 2147483647, %v6723_v20  ;;  %v15019_v52 = vsub.f32 1.0, %v14988_v1  ;;  %v6740_v35 = vand.u32 2147483647, %v6724_v15 }
 0x736   : > { %7966 = vperm.xlu0 %10553, %v14458_v37   ;;  %v6726_v10 = vsub.f32 %v17259_v32, %v14471_v57  ;;  %v6963_v0 = vsub.f32 %v17260_v53, %v14702_v59  ;;  %10577 = vrcp.f32 %v4136_v7  ;;  %v15028_v24 = vadd.f32 %v14843_v33, %v6647_v42 }
 0x737   : > { %v15008_v2 = vpop.permute.xlu1 %7146  ;;  %v15030_v55 = vand.u32 2147483647, %v6954_v62  ;;  %v15032_v34 = vand.u32 2147483647, %v6957_v28  ;;  %v10572_v20 = vpop.eup %10571  ;;  %v15037_v15 = vadd.f32 %v14849_v45, %v6649_v4  ;;  %v15040_v32 = vadd.f32 %v14886_v44, %v6651_v3  ;;  %v15055_v28 = vld [vmem:[#allocation3 + $0x18] sm:$0xff] }
 0x738   : > { %17257 = vst [vmem:[#allocation136_spill] sm:$0xff] %v15008_v2  ;;  %7590 = vperm.xlu1 %10547, %v14406_v43   ;;  %v17261_v43 = vld [vmem:[#allocation54_spill] sm:$0xff]  ;;  %v15042_v2 = vand.u32 2147483647, %v6959_v27  ;;  %v15044_v7 = vand.u32 2147483647, %v6961_v31  ;;  %v15050_v42 = vadd.f32 %v14894_v29, %v6753_v49  ;;  %v15053_v62 = vadd.f32 %v6739_v60, %v14951_v51  ;;  %v15067_v29 = vpop.permute.xlu0 %7466 }
 0x739   : > { %v6965_v40 = vsub.f32 %v17261_v43, %v14702_v59  ;;  %17262 = vst [vmem:[#allocation147_spill] sm:$0xff] %v15037_v15  ;;  %17263 = vst [vmem:[#allocation140_spill] sm:$0xff] %v15040_v32  ;;  %v4225_v44 = vadd.f32 1e-08, %v15019_v52  ;;  %v15060_v27 = vsub.f32 1.0, %v15021_v5  ;;  %v15062_v45 = vpop.eup %10573  ;;  %v6756_v4 = vadd.f32 %v6740_v35, %v14841_v47  ;;  %v17269_v49 = vld [vmem:[#allocation67_spill] sm:$0xff] }
 0x73a   : > { %17264 = vst [vmem:[#allocation142_spill] sm:$0xff] %v15044_v7  ;;  %7974 = vperm.xlu0 %10553, %v14491_v36   ;;  %17266 = vst [vmem:[#allocation146_spill] sm:$0xff] %v15050_v42  ;;  %v6742_v3 = vand.u32 2147483647, %v6726_v10  ;;  %v15065_v31 = vand.u32 2147483647, %v6963_v0  ;;  %v6728_v60 = vsub.f32 %v17269_v49, %v14471_v57 }
 0x73b   : > { %v15046_v33 = vpop.permute.xlu1 %7154  ;;  %17268 = vst [vmem:[#allocation149_spill] sm:$0xff] %v15067_v29  ;;  %v4337_v51 = vadd.f32 1e-08, %v14988_v1  ;;  %v15072_v53 = vand.u32 2147483647, %v6965_v40  ;;  %v17271_v43 = vld [vmem:[#allocation65_spill] sm:$0xff]  ;;  %10579 = vlog2.f32 %v4225_v44  ;;  %v15104_v32 = vadd.f32 %v14902_v30, %v6756_v4 }
 0x73c   : > { %17265 = vst [vmem:[#allocation144_spill] sm:$0xff] %v15046_v33  ;;  %7594 = vperm.xlu1 %10547, %v14912_v39   ;;  %17267 = vst [vmem:[#allocation151_spill] sm:$0xff] %v15065_v31  ;;  %v6967_v33 = vsub.f32 %v17271_v43, %v14702_v59  ;;  %v4138_v38 = vadd.f32 1.0, %v10572_v20  ;;  %v4058_v47 = vld [vmem:[%s16416_s0 + $0x68] sm:$0xff]  ;;  %v17272_v35 = vld [vmem:[#allocation69_spill] sm:$0xff]  ;;  %v15085_v39 = vrot.slane %v15055_v28, %v16888_v41  ;;  %v10576_v49 = vpop.eup %10575 }
 0x73d   : > { %17270 = vst [vmem:[#allocation148_spill] sm:$0xff] %v15072_v53  ;;  %v6730_v10 = vsub.f32 %v17272_v35, %v14471_v57  ;;  %v17273_v0 = vld [vmem:[#allocation187_spill] sm:$0xff]  ;;  %v4340_v20 = vadd.f32 1e-08, %v15021_v5  ;;  %v17276_v43 = vld [vmem:[#allocation74_spill] sm:$0xff]  ;;  %v6758_v41 = vadd.f32 %v6742_v3, %v14846_v19  ;;  %v15101_v53 = vpop.permute.xlu0 %7478  ;;  %10581 = vlog2.f32 %v4337_v51 }
 0x73e   : > { %v6732_v29 = vsub.f32 %v17273_v0, %v14471_v57  ;;  %17274 = vst [vmem:[#allocation153_spill] sm:$0xff] %v15085_v39  ;;  %7982 = vperm.xlu0 %10553, %v14523_v56   ;;  %v6734_v9 = vsub.f32 %v17276_v43, %v14471_v57  ;;  %v4228_v35 = vadd.f32 1e-08, %v15060_v27  ;;  %v15096_v0 = vsub.f32 1.0, %v15062_v45  ;;  %17278 = vst [vmem:[#allocation150_spill] sm:$0xff] %v15101_v53 }
 0x73f   : > { %v15087_v40 = vpop.permute.xlu1 %7162  ;;  %v8846_v42 = vmul.f32 -1.442695, %v4058_v47  ;;  %v6744_v43 = vand.u32 2147483647, %v6728_v60  ;;  %10583 = vrcp.f32 %v4138_v38  ;;  %v6746_v15 = vand.u32 2147483647, %v6730_v10 }
 0x740   : > { %17275 = vst [vmem:[#allocation155_spill] sm:$0xff] %v15087_v40  ;;  %7602 = vperm.xlu1 %10547, %v14944_v13   ;;  %v17277_v40 = vld [vmem:[#allocation76_spill] sm:$0xff]  ;;  %v15106_v13 = vand.u32 2147483647, %v6967_v33  ;;  %v15108_v44 = vpop.eup %10577  ;;  %v6748_v31 = vand.u32 2147483647, %v6732_v29  ;;  %10585 = vlog2.f32 %v4340_v20  ;;  %v15116_v33 = vadd.f32 %v14920_v23, %v6758_v41 }
 0x741   : > { %v6736_v39 = vsub.f32 %v17277_v40, %v14471_v57  ;;  %v4140_v57 = vadd.f32 1.0, %v10576_v49  ;;  %v6750_v19 = vand.u32 2147483647, %v6734_v9  ;;  %10587 = vlog2.f32 %v4228_v35  ;;  %v17280_v29 = vld [vmem:[#allocation184_spill] sm:$0xff]  ;;  %v17281_v60 = vld [vmem:[#allocation279_spill] sm:$0xff]  ;;  %v4060_v23 = vld [vmem:[%s16416_s0 + $0x78] sm:$0xff]  ;;  %v15136_v20 = vpop.permute.xlu0 %7486 }
 0x742   : > { %7990 = vperm.xlu0 %10553, %v14557_v58   ;;  %v4230_v30 = vadd.f32 1e-08, %v15096_v0  ;;  %v4342_v4 = vadd.f32 1e-08, %v15062_v45  ;;  %10589 = vpow2.f32 %v8846_v42  ;;  %v6760_v3 = vadd.f32 %v6744_v43, %v14862_v18  ;;  %v17282_v42 = vld [vmem:[#allocation73_spill] sm:$0xff]  ;;  %17284 = vst [vmem:[#allocation159_spill] sm:$0xff] %v15136_v20 }
 0x743   : > { %v15110_v7 = vpop.permute.xlu1 %7170  ;;  %v6752_v38 = vand.u32 2147483647, %v6736_v39  ;;  %v7069_v51 = vsub.f32 %v17280_v29, %v14837_v11  ;;  %v7072_v9 = vsub.f32 %v17281_v60, %v14837_v11  ;;  %v15125_v47 = vsub.f32 1.0, %v15108_v44  ;;  %v17285_v41 = vld [vmem:[#allocation75_spill] sm:$0xff]  ;;  %v17288_v29 = vld [vmem:[#allocation78_spill] sm:$0xff] }
 0x744   : > { %17279 = vst [vmem:[#allocation157_spill] sm:$0xff] %v15110_v7  ;;  %7610 = vperm.xlu1 %10547, %v14979_v17   ;;  %v6762_v39 = vadd.f32 %v6746_v15, %v14882_v12  ;;  %v6764_v10 = vadd.f32 %v6748_v31, %v14891_v46  ;;  %v7074_v18 = vsub.f32 %v17282_v42, %v14837_v11  ;;  %v16503_v49 = vmov 31   ;;  %v17286_v12 = vld [vmem:[#allocation77_spill] sm:$0xff] }
 0x745   : > { %10591 = vrcp.f32 %v4140_v57  ;;  %v6766_v35 = vadd.f32 %v6750_v19, %v14900_v50  ;;  %v7076_v43 = vsub.f32 %v17285_v41, %v14837_v11  ;;  %v7078_v15 = vsub.f32 %v17286_v12, %v14837_v11  ;;  %v17287_v46 = vld [vmem:[#allocation113_spill] sm:$0xff]  ;;  %v10580_v42 = vpop.eup %10579  ;;  %v17289_v41 = vld [vmem:[#allocation190_spill] sm:$0xff] }
 0x746   : > { %10556 = vset.pattern.permute.xlu0 %v16503_v49  ;;  %10593 = vlog2.f32 %v4230_v30  ;;  %v6768_v31 = vadd.f32 %v6752_v38, %v14916_v61  ;;  %v6838_v60 = vsub.f32 %v17288_v29, %v14580_v48  ;;  %v8848_v57 = vmul.f32 -1.442695, %v4060_v23 }
 0x747   : > { %v15134_v40 = vpop.permute.xlu1 %7178  ;;  %8050 = vperm.xlu0 %10556, %v17287_v46   ;;  %10595 = vlog2.f32 %v4342_v4  ;;  %v15150_v50 = vadd.f32 %v14922_v54, %v6760_v3  ;;  %v15152_v19 = vand.u32 2147483647, %v7069_v51  ;;  %v7080_v12 = vsub.f32 %v17289_v41, %v14837_v11  ;;  %v10582_v49 = vpop.eup %10581  ;;  %v17293_v51 = vld [vmem:[#allocation79_spill] sm:$0xff] }
 0x748   : > { %17283 = vst [vmem:[#allocation152_spill] sm:$0xff] %v15134_v40  ;;  %7618 = vperm.xlu1 %10547, %v14458_v37   ;;  %v4232_v37 = vadd.f32 1e-08, %v15125_v47  ;;  %v15158_v30 = vadd.f32 %v14958_v21, %v6762_v39  ;;  %v15160_v61 = vand.u32 2147483647, %v7072_v9  ;;  %v15168_v54 = vadd.f32 %v14964_v16, %v6764_v10  ;;  %v17296_v9 = vld [vmem:[#allocation115_spill] sm:$0xff] }
 0x749   : > { %v15162_v38 = vand.u32 2147483647, %v7074_v18  ;;  %v4344_v4 = vadd.f32 1e-08, %v15108_v44  ;;  %v15165_v23 = vpop.eup %10583  ;;  %v15171_v3 = vadd.f32 %v14985_v6, %v6766_v35  ;;  %v6839_v29 = vsub.f32 %v17293_v51, %v14580_v48  ;;  %v15186_v6 = vpop.permute.xlu0 %7494 }
 0x74a   : > { %17290 = vst [vmem:[#allocation161_spill] sm:$0xff] %v15158_v30  ;;  %17291 = vst [vmem:[#allocation154_spill] sm:$0xff] %v15168_v54  ;;  %v15175_v41 = vand.u32 2147483647, %v7076_v43  ;;  %v10586_v39 = vpop.eup %10585  ;;  %v15182_v18 = vadd.f32 %v14995_v25, %v6768_v31  ;;  %v6854_v16 = vand.u32 2147483647, %v6838_v60  ;;  %10597 = vpow2.f32 %v8848_v57 }
 0x74b   : > { %17292 = vst [vmem:[#allocation156_spill] sm:$0xff] %v15171_v3  ;;  %8062 = vperm.xlu0 %10556, %v17296_v9   ;;  %v15184_v10 = vand.u32 2147483647, %v7078_v15  ;;  %17299 = vst [vmem:[#allocation162_spill] sm:$0xff] %v15186_v6  ;;  %v10588_v35 = vpop.eup %10587  ;;  %v15188_v51 = vand.u32 2147483647, %v7080_v12  ;;  %10599 = vlog2.f32 %v4232_v37  ;;  %v9338_v40 = vmul.f32 %v15019_v52, %v15019_v52 }
 0x74c   : > { %17294 = vst [vmem:[#allocation163_spill] sm:$0xff] %v15175_v41  ;;  %7626 = vperm.xlu1 %10547, %v14491_v36   ;;  %v15178_v21 = vpop.permute.xlu1 %7238  ;;  %17297 = vst [vmem:[#allocation158_spill] sm:$0xff] %v15182_v18  ;;  %v9322_v36 = vmul.f32 %v14988_v1, %v14988_v1  ;;  %v4242_v43 = vmul.f32 0.6931472, %v10580_v42  ;;  %v4354_v25 = vmul.f32 0.6931472, %v10582_v49  ;;  %10601 = vlog2.f32 %v4344_v4 }
 0x74d   : > { %17295 = vst [vmem:[#allocation165_spill] sm:$0xff] %v15178_v21  ;;  %17298 = vst [vmem:[#allocation160_spill] sm:$0xff] %v15184_v10  ;;  %v10590_v21 = vpop.eup %10589  ;;  %v15195_v15 = vsub.f32 1.0, %v15165_v23  ;;  %v15197_v31 = vand.u32 2147483647, %v6839_v29  ;;  %v17302_v57 = vld [vmem:[#allocation116_spill] sm:$0xff]  ;;  %v9325_v1 = vmul.f32 %v15021_v5, %v15021_v5  ;;  %v9341_v42 = vmul.f32 %v15060_v27, %v15060_v27  ;;  %v15214_v53 = vpop.permute.xlu0 %7502 }
 0x74e   : > { %17300 = vst [vmem:[#allocation169_spill] sm:$0xff] %v15188_v51  ;;  %v4346_v52 = vadd.f32 1e-08, %v15165_v23  ;;  %v6870_v12 = vadd.f32 %v6854_v16, %v14927_v8  ;;  %v4248_v37 = vmul.f32 0.6931472, %v10588_v35  ;;  %v4193_v7 = vmul.f32 0.75, %v9322_v36 }
 0x74f   : > { %8070 = vperm.xlu0 %10556, %v17302_v57   ;;  %v15208_v49 = vpop.eup %10591  ;;  %v4360_v4 = vmul.f32 0.6931472, %v10586_v39  ;;  %v4142_v5 = vadd.f32 1.0, %v10590_v21  ;;  %17304 = vst [vmem:[#allocation167_spill] sm:$0xff] %v15214_v53  ;;  %v4273_v27 = vsub.f32 0.0, %v4242_v43  ;;  %v4321_v17 = vmul.f32 0.25, %v9338_v40 }
 0x750   : > { %7634 = vperm.xlu1 %10547, %v14523_v56   ;;  %v15200_v60 = vpop.permute.xlu1 %7242  ;;  %v4234_v56 = vadd.f32 1e-08, %v15195_v15  ;;  %v10594_v29 = vpop.eup %10593  ;;  %10603 = vlog2.f32 %v4346_v52  ;;  %v4385_v18 = vsub.f32 0.0, %v4354_v25  ;;  %v17306_v39 = vld [vmem:[#allocation123_spill] sm:$0xff]  ;;  %v4196_v16 = vmul.f32 0.75, %v9325_v1  ;;  %v17308_v51 = vld [vmem:[#allocation82_spill] sm:$0xff] }
 0x751   : > { %17301 = vst [vmem:[#allocation171_spill] sm:$0xff] %v15200_v60  ;;  %v17303_v60 = vld [vmem:[#allocation81_spill] sm:$0xff]  ;;  %v10596_v20 = vpop.eup %10595  ;;  %v4324_v35 = vmul.f32 0.25, %v9341_v42  ;;  %v4348_v21 = vadd.f32 1e-08, %v15208_v49  ;;  %v4276_v36 = vsub.f32 0.0, %v4248_v37  ;;  %v9327_v40 = vmul.f32 %v15062_v45, %v15062_v45 }
 0x752   : > { %v6841_v6 = vsub.f32 %v17303_v60, %v14580_v48  ;;  %10605 = vlog2.f32 %v4234_v56  ;;  %v15221_v60 = vsub.f32 1.0, %v15208_v49  ;;  %v4388_v52 = vsub.f32 0.0, %v4360_v4  ;;  %v17309_v45 = vld [vmem:[#allocation83_spill] sm:$0xff] }
 0x753   : > { %8078 = vperm.xlu0 %10556, %v17306_v39   ;;  %v4252_v43 = vmul.f32 0.6931472, %v10594_v29  ;;  %v4364_v25 = vmul.f32 0.6931472, %v10596_v20  ;;  %10607 = vrcp.f32 %v4142_v5  ;;  %v7084_v37 = vsub.f32 %v17308_v51, %v14837_v11  ;;  %v17312_v20 = vld [vmem:[#allocation127_spill] sm:$0xff] }
 0x754   : > { %7642 = vperm.xlu1 %10547, %v14557_v58   ;;  %v15217_v8 = vpop.permute.xlu1 %7250  ;;  %v9343_v58 = vmul.f32 %v15096_v0, %v15096_v0  ;;  %v4236_v56 = vadd.f32 1e-08, %v15221_v60  ;;  %v10598_v1 = vpop.eup %10597  ;;  %v6857_v42 = vand.u32 2147483647, %v6841_v6  ;;  %10609 = vlog2.f32 %v4348_v21 }
 0x755   : > { %17305 = vst [vmem:[#allocation164_spill] sm:$0xff] %v15217_v8  ;;  %v17307_v8 = vld [vmem:[#allocation80_spill] sm:$0xff]  ;;  %v10600_v4 = vpop.eup %10599  ;;  %v6843_v29 = vsub.f32 %v17309_v45, %v14580_v48  ;;  %v17310_v10 = vmov 28   ;;  %v4289_v5 = vmul.f32 %v4273_v27, %v4193_v7  ;;  %v4401_v3 = vmul.f32 %v4385_v18, %v4321_v17 }
 0x756   : > { %v7082_v53 = vsub.f32 %v17307_v8, %v14837_v11  ;;  %10611 = vlog2.f32 %v4236_v56  ;;  %v10602_v6 = vpop.eup %10601  ;;  %v15240_v8 = vpop.permute.xlu0 %7510  ;;  %v4292_v51 = vmul.f32 %v4276_v36, %v4196_v16  ;;  %v4404_v21 = vmul.f32 %v4388_v52, %v4324_v35  ;;  %v17314_v52 = vld [vmem:[#allocation122_spill] sm:$0xff] }
 0x757   : > { %8086 = vperm.xlu0 %10556, %v17312_v20   ;;  %v4198_v54 = vmul.f32 0.75, %v9327_v40  ;;  %v4278_v41 = vsub.f32 0.0, %v4252_v43  ;;  %v4326_v30 = vmul.f32 0.25, %v9343_v58  ;;  %v4390_v45 = vsub.f32 0.0, %v4364_v25  ;;  %v17315_v40 = vld [vmem:[#allocation84_spill] sm:$0xff] }
 0x758   : > { %10550 = vset.pattern.permute.xlu1 %v17310_v10  ;;  %v15236_v0 = vpop.permute.xlu1 %7258  ;;  %v9329_v10 = vmul.f32 %v15108_v44, %v15108_v44  ;;  %v15247_v17 = vadd.f32 %v15030_v55, %v6870_v12  ;;  %v15251_v7 = vadd.f32 %v15197_v31, %v15053_v62  ;;  %v4368_v18 = vmul.f32 0.6931472, %v10602_v6  ;;  %v15266_v31 = vld [vmem:[%s16417_s1 + $0x10] sm:$0xff] }
 0x759   : > { %17311 = vst [vmem:[#allocation166_spill] sm:$0xff] %v15236_v0  ;;  %7702 = vperm.xlu1 %10550, %v17287_v46   ;;  %v9345_v0 = vmul.f32 %v15125_v47, %v15125_v47  ;;  %v4256_v46 = vmul.f32 0.6931472, %v10600_v4  ;;  %v6873_v16 = vadd.f32 %v6857_v42, %v14971_v14  ;;  %v15254_v35 = vand.u32 2147483647, %v7082_v53  ;;  %17316 = vst [vmem:[#allocation176_spill] sm:$0xff] %v15266_v31 }
 0x75a   : > { %v10604_v27 = vpop.eup %10603  ;;  %v15256_v36 = vand.u32 2147483647, %v7084_v37  ;;  %v4144_v47 = vadd.f32 1.0, %v10598_v1  ;;  %v6859_v12 = vand.u32 2147483647, %v6843_v29  ;;  %v7186_v62 = vsub.f32 %v17315_v40, %v14968_v63  ;;  %v15269_v42 = vpop.permute.xlu0 %7518  ;;  %v17317_v40 = vld [vmem:[#allocation277_spill] sm:$0xff] }
 0x75b   : > { %8094 = vperm.xlu0 %10556, %v17314_v52   ;;  %v4417_v14 = vsub.f32 %v4401_v3, %v4289_v5  ;;  %v4420_v53 = vsub.f32 %v4404_v21, %v4292_v51  ;;  %v4294_v43 = vmul.f32 %v4278_v41, %v4198_v54  ;;  %v4406_v58 = vmul.f32 %v4390_v45, %v4326_v30  ;;  %v17319_v30 = vld [vmem:[#allocation126_spill] sm:$0xff] }
 0x75c   : > { %v15258_v44 = vpop.permute.xlu1 %7266  ;;  %v10606_v55 = vpop.eup %10605  ;;  %v4200_v25 = vmul.f32 0.75, %v9329_v10  ;;  %v4328_v56 = vmul.f32 0.25, %v9345_v0  ;;  %v4280_v1 = vsub.f32 0.0, %v4256_v46  ;;  %v4392_v37 = vsub.f32 0.0, %v4368_v18  ;;  %v17321_v46 = vld [vmem:[#allocation87_spill] sm:$0xff] }
 0x75d   : > { %17313 = vst [vmem:[#allocation173_spill] sm:$0xff] %v15258_v44  ;;  %7706 = vperm.xlu1 %10550, %v15266_v31   ;;  %v9331_v4 = vmul.f32 %v15165_v23, %v15165_v23  ;;  %v9347_v29 = vmul.f32 %v15195_v15, %v15195_v15  ;;  %v15275_v6 = vpop.eup %10607  ;;  %v15279_v3 = vrot.slane %v15055_v28, %v17317_v40  ;;  %v4260_v41 = vmul.f32 0.6931472, %v10606_v55  ;;  %v17320_v15 = vld [vmem:[#allocation85_spill] sm:$0xff] }
 0x75e   : > { %v4372_v0 = vmul.f32 0.6931472, %v10604_v27  ;;  %10613 = vrcp.f32 %v4144_v47  ;;  %v10610_v5 = vpop.eup %10609  ;;  %v15285_v51 = vadd.f32 %v15032_v34, %v6873_v16  ;;  %v6875_v23 = vadd.f32 %v6859_v12, %v14991_v26 }
 0x75f   : > { %8102 = vperm.xlu0 %10556, %v17319_v30   ;;  %v6845_v21 = vsub.f32 %v17320_v15, %v14580_v48  ;;  %v8161_v45 = vmul.f32 2.0, %v4417_v14  ;;  %v6847_v18 = vsub.f32 %v17321_v46, %v14580_v48  ;;  %v15293_v40 = vand.u32 2147483647, %v7186_v62  ;;  %v15301_v62 = vpop.permute.xlu0 %7526 }
 0x760   : > { %v15281_v54 = vpop.permute.xlu1 %7274  ;;  %v10612_v10 = vpop.eup %10611  ;;  %v8164_v27 = vmul.f32 2.0, %v4420_v53  ;;  %v4422_v47 = vsub.f32 %v4406_v58, %v4294_v43  ;;  %v4296_v55 = vmul.f32 %v4280_v1, %v4200_v25  ;;  %v4202_v34 = vmul.f32 0.75, %v9331_v4 }
 0x761   : > { %17318 = vst [vmem:[#allocation168_spill] sm:$0xff] %v15281_v54  ;;  %7714 = vperm.xlu1 %10550, %v17296_v9   ;;  %v4408_v54 = vmul.f32 %v4392_v37, %v4328_v56  ;;  %v4330_v16 = vmul.f32 0.25, %v9347_v29  ;;  %v17323_v26 = vmov 0   ;;  %v4282_v12 = vsub.f32 0.0, %v4260_v41  ;;  %v17324_v37 = vld [vmem:[#allocation86_spill] sm:$0xff]  ;;  %v17325_v41 = vld [vmem:[#allocation89_spill] sm:$0xff] }
 0x762   : > { %v4394_v15 = vsub.f32 0.0, %v4372_v0  ;;  %v4222_v9 = vsub.f32 1.0, %v15275_v6  ;;  %v4350_v14 = vadd.f32 1e-08, %v15275_v6  ;;  %v9333_v53 = vmul.f32 %v15208_v49, %v15208_v49  ;;  %v17326_v0 = vld [vmem:[#allocation91_spill] sm:$0xff] }
 0x763   : > { %10557 = vset.pattern.permute.xlu0 %v17323_v26  ;;  %v4264_v43 = vmul.f32 0.6931472, %v10612_v10  ;;  %v9349_v58 = vmul.f32 %v15221_v60, %v15221_v60  ;;  %v4376_v25 = vmul.f32 0.6931472, %v10610_v5  ;;  %v6861_v56 = vand.u32 2147483647, %v6845_v21 }
 0x764   : > { %v15295_v44 = vpop.permute.xlu1 %7282  ;;  %8195 = vperm.xlu0 %10557, %v8161_v45   ;;  %v6863_v1 = vand.u32 2147483647, %v6847_v18  ;;  %v7189_v4 = vsub.f32 %v17324_v37, %v14968_v63  ;;  %v4238_v29 = vadd.f32 1e-08, %v4222_v9  ;;  %v6851_v45 = vsub.f32 %v17326_v0, %v14580_v48 }
 0x765   : > { %17322 = vst [vmem:[#allocation170_spill] sm:$0xff] %v15295_v44  ;;  %7722 = vperm.xlu1 %10550, %v17302_v57   ;;  %v6849_v57 = vsub.f32 %v17325_v41, %v14580_v48  ;;  %v8166_v46 = vmul.f32 2.0, %v4422_v47  ;;  %10615 = vlog2.f32 %v4350_v14  ;;  %v4424_v10 = vsub.f32 %v4408_v54, %v4296_v55  ;;  %v17328_v54 = vld [vmem:[#allocation88_spill] sm:$0xff]  ;;  %v15331_v14 = vpop.permute.xlu0 %7586 }
 0x766   : > { %v4298_v26 = vmul.f32 %v4282_v12, %v4202_v34  ;;  %v4410_v60 = vmul.f32 %v4394_v15, %v4330_v16  ;;  %10617 = vlog2.f32 %v4238_v29  ;;  %v4204_v5 = vmul.f32 0.75, %v9333_v53  ;;  %v17330_v12 = vld [vmem:[#allocation90_spill] sm:$0xff] }
 0x767   : > { %v4284_v21 = vsub.f32 0.0, %v4264_v43  ;;  %v4332_v18 = vmul.f32 0.25, %v9349_v58  ;;  %v4396_v37 = vsub.f32 0.0, %v4376_v25  ;;  %v15319_v41 = vadd.f32 %v15042_v2, %v6875_v23  ;;  %v17331_v23 = vld [vmem:[#allocation92_spill] sm:$0xff] }
 0x768   : > { %v15313_v49 = vpop.permute.xlu1 %7290  ;;  %8210 = vperm.xlu0 %10557, %v8164_v27   ;;  %v15316_v44 = vpop.eup %10613  ;;  %v6877_v48 = vadd.f32 %v6861_v56, %v15014_v22  ;;  %v6879_v47 = vadd.f32 %v6863_v1, %v15028_v24  ;;  %v7191_v55 = vsub.f32 %v17328_v54, %v14968_v63  ;;  %v6865_v34 = vand.u32 2147483647, %v6849_v57  ;;  %v17334_v57 = vld [vmem:[#allocation151_spill] sm:$0xff] }
 0x769   : > { %17327 = vst [vmem:[#allocation179_spill] sm:$0xff] %v15313_v49  ;;  %7730 = vperm.xlu1 %10550, %v17306_v39   ;;  %v17329_v39 = vld [vmem:[#allocation93_spill] sm:$0xff]  ;;  %v15327_v16 = vand.u32 2147483647, %v7189_v4  ;;  %v7193_v15 = vsub.f32 %v17330_v12, %v14968_v63  ;;  %v6867_v2 = vand.u32 2147483647, %v6851_v45  ;;  %v7195_v22 = vsub.f32 %v17331_v23, %v14968_v63  ;;  %v15349_v54 = vpop.permute.xlu0 %7598 }
 0x76a   : > { %v6953_v27 = vsub.f32 %v17329_v39, %v14702_v59  ;;  %v8168_v53 = vmul.f32 2.0, %v4424_v10  ;;  %v4426_v24 = vsub.f32 %v4410_v60, %v4298_v26  ;;  %v4300_v58 = vmul.f32 %v4284_v21, %v4204_v5  ;;  %v17333_v4 = vld [vmem:[#allocation142_spill] sm:$0xff]  ;;  %v17335_v10 = vld [vmem:[#allocation147_spill] sm:$0xff]  ;;  %v17336_v21 = vld [vmem:[#allocation140_spill] sm:$0xff] }
 0x76b   : > { %v4412_v25 = vmul.f32 %v4396_v37, %v4332_v18  ;;  %v4224_v56 = vsub.f32 1.0, %v15316_v44  ;;  %v4352_v1 = vadd.f32 1e-08, %v15316_v44  ;;  %v15341_v29 = vadd.f32 %v17333_v4, %v6877_v48  ;;  %v17337_v37 = vld [vmem:[#allocation95_spill] sm:$0xff] }
 0x76c   : > { %8220 = vperm.xlu0 %10557, %v8166_v46   ;;  %v15344_v0 = vadd.f32 %v17334_v57, %v6879_v47  ;;  %v15346_v45 = vand.u32 2147483647, %v7191_v55  ;;  %v9351_v26 = vmul.f32 %v4222_v9, %v4222_v9  ;;  %v6969_v60 = vand.u32 2147483647, %v6953_v27  ;;  %v17340_v23 = vld [vmem:[#allocation99_spill] sm:$0xff] }
 0x76d   : > { %7738 = vperm.xlu1 %10550, %v17312_v20   ;;  %v15336_v43 = vpop.permute.xlu1 %7350  ;;  %v6881_v20 = vadd.f32 %v6865_v34, %v17335_v10  ;;  %v9335_v46 = vmul.f32 %v15275_v6, %v15275_v6  ;;  %v4240_v5 = vadd.f32 1e-08, %v4224_v56  ;;  %v6883_v18 = vadd.f32 %v6867_v2, %v17336_v21  ;;  %v4046_v6 = vld [vmem:[%s16416_s0 + $0x8] sm:$0xff] }
 0x76e   : > { %17332 = vst [vmem:[#allocation172_spill] sm:$0xff] %v15336_v43  ;;  %v6955_v48 = vsub.f32 %v17337_v37, %v14702_v59  ;;  %v15356_v39 = vand.u32 2147483647, %v7193_v15  ;;  %10619 = vlog2.f32 %v4352_v1  ;;  %v15358_v55 = vand.u32 2147483647, %v7195_v22  ;;  %v17339_v15 = vld [vmem:[#allocation97_spill] sm:$0xff] }
 0x76f   : > { %v10616_v47 = vpop.eup %10615  ;;  %v8170_v34 = vmul.f32 2.0, %v4426_v24  ;;  %v4428_v27 = vsub.f32 %v4412_v25, %v4300_v58  ;;  %10621 = vlog2.f32 %v4240_v5  ;;  %v6956_v2 = vsub.f32 %v17339_v15, %v14702_v59  ;;  %v17343_v10 = vld [vmem:[#allocation148_spill] sm:$0xff]  ;;  %v17344_v15 = vld [vmem:[#allocation101_spill] sm:$0xff] }
 0x770   : > { %8230 = vperm.xlu0 %10557, %v8168_v53   ;;  %v10618_v12 = vpop.eup %10617  ;;  %v6958_v22 = vsub.f32 %v17340_v23, %v14702_v59  ;;  %v4334_v1 = vmul.f32 0.25, %v9351_v26  ;;  %v4380_v4 = vmul.f32 0.6931472, %v10616_v47  ;;  %v17342_v53 = vld [vmem:[#allocation94_spill] sm:$0xff]  ;;  %v4206_v58 = vmul.f32 0.75, %v9335_v46  ;;  %v17345_v23 = vld [vmem:[#allocation96_spill] sm:$0xff]  ;;  %v15383_v47 = vpop.permute.xlu0 %7606 }
 0x771   : > { %7746 = vperm.xlu1 %10550, %v17314_v52   ;;  %v15361_v9 = vpop.permute.xlu1 %7358  ;;  %v17341_v52 = vld [vmem:[#allocation146_spill] sm:$0xff]  ;;  %v7197_v24 = vsub.f32 %v17342_v53, %v14968_v63  ;;  %v4268_v25 = vmul.f32 0.6931472, %v10618_v12  ;;  %v15374_v21 = vadd.f32 %v17343_v10, %v6881_v20  ;;  %v6971_v5 = vand.u32 2147483647, %v6955_v48 }
 0x772   : > { %17338 = vst [vmem:[#allocation182_spill] sm:$0xff] %v15361_v9  ;;  %v6985_v57 = vadd.f32 %v6969_v60, %v17341_v52  ;;  %v4398_v37 = vsub.f32 0.0, %v4380_v4  ;;  %v8834_v9 = vmul.f32 -1.442695, %v4046_v6  ;;  %v6960_v43 = vsub.f32 %v17344_v15, %v14702_v59 }
 0x773   : > { %v7199_v26 = vsub.f32 %v17345_v23, %v14968_v63  ;;  %v8172_v46 = vmul.f32 2.0, %v4428_v27  ;;  %v4286_v12 = vsub.f32 0.0, %v4268_v25  ;;  %v15386_v20 = vadd.f32 %v15106_v13, %v6883_v18  ;;  %v17352_v25 = vld [vmem:[#allocation98_spill] sm:$0xff] }
 0x774   : > { %8240 = vperm.xlu0 %10557, %v8170_v34   ;;  %v6972_v48 = vand.u32 2147483647, %v6956_v2  ;;  %v6974_v6 = vand.u32 2147483647, %v6958_v22  ;;  %v4414_v4 = vmul.f32 %v4398_v37, %v4334_v1  ;;  %v15389_v52 = vadd.f32 %v15152_v19, %v6985_v57  ;;  %v17347_v34 = vld [vmem:[#allocation103_spill] sm:$0xff]  ;;  %v17348_v2 = vld [vmem:[#allocation105_spill] sm:$0xff] }
 0x775   : > { %7754 = vperm.xlu1 %10550, %v17319_v30   ;;  %v15381_v60 = vpop.permute.xlu1 %7362  ;;  %v15391_v53 = vand.u32 2147483647, %v7197_v24  ;;  %v4302_v10 = vmul.f32 %v4286_v12, %v4206_v58  ;;  %v9353_v30 = vmul.f32 %v4224_v56, %v4224_v56  ;;  %v15394_v15 = vadd.f32 %v6971_v5, %v15251_v7  ;;  %v17351_v58 = vld [vmem:[#allocation153_spill] sm:$0xff]  ;;  %v17354_v37 = vld [vmem:[#allocation132_spill] sm:$0xff] }
 0x776   : > { %17346 = vst [vmem:[#allocation174_spill] sm:$0xff] %v15381_v60  ;;  %v6962_v27 = vsub.f32 %v17347_v34, %v14702_v59  ;;  %10623 = vpow2.f32 %v8834_v9  ;;  %v9337_v13 = vmul.f32 %v15316_v44, %v15316_v44  ;;  %v6976_v18 = vand.u32 2147483647, %v6960_v43  ;;  %v17353_v43 = vld [vmem:[#allocation100_spill] sm:$0xff]  ;;  %v15416_v34 = vpop.permute.xlu0 %7614  ;;  %v17362_v60 = vld [vmem:[#allocation282_spill] sm:$0xff] }
 0x777   : > { %v6964_v22 = vsub.f32 %v17348_v2, %v14702_v59  ;;  %v15402_v19 = vand.u32 2147483647, %v7199_v26  ;;  %v17349_v1 = vmov 29   ;;  %v4430_v7 = vsub.f32 %v4414_v4, %v4302_v10  ;;  %v17355_v26 = vld [vmem:[#allocation106_spill] sm:$0xff]  ;;  %17356 = vst [vmem:[#allocation177_spill] sm:$0xff] %v15416_v34 }
 0x778   : > { %8250 = vperm.xlu0 %10557, %v8172_v46   ;;  %v10620_v56 = vpop.eup %10619  ;;  %v6988_v24 = vadd.f32 %v6972_v48, %v15104_v32  ;;  %v6990_v9 = vadd.f32 %v6974_v6, %v15116_v33  ;;  %v7301_v44 = vsub.f32 %v17352_v25, %v17351_v58  ;;  %v7304_v5 = vsub.f32 %v17353_v43, %v17351_v58  ;;  %v17357_v33 = vld [vmem:[#allocation102_spill] sm:$0xff]  ;;  %v17358_v43 = vld [vmem:[#allocation108_spill] sm:$0xff] }
 0x779   : > { %10551 = vset.pattern.permute.xlu1 %v17349_v1  ;;  %v15405_v57 = vpop.permute.xlu1 %7370  ;;  %v10622_v23 = vpop.eup %10621  ;;  %v6966_v12 = vsub.f32 %v17355_v26, %v14702_v59  ;;  %v8174_v46 = vmul.f32 2.0, %v4430_v7  ;;  %v4336_v4 = vmul.f32 0.25, %v9353_v30  ;;  %v4384_v10 = vmul.f32 0.6931472, %v10620_v56  ;;  %v17360_v7 = vld [vmem:[#allocation110_spill] sm:$0xff] }
 0x77a   : > { %17350 = vst [vmem:[#allocation185_spill] sm:$0xff] %v15405_v57  ;;  %7814 = vperm.xlu1 %10551, %v17354_v37   ;;  %v6978_v32 = vand.u32 2147483647, %v6962_v27  ;;  %v7306_v48 = vsub.f32 %v17357_v33, %v17351_v58  ;;  %v4208_v6 = vmul.f32 0.75, %v9337_v13  ;;  %v4272_v2 = vmul.f32 0.6931472, %v10622_v23 }
 0x77b   : > { %v6992_v1 = vadd.f32 %v6976_v18, %v15150_v50  ;;  %v6980_v25 = vand.u32 2147483647, %v6964_v22  ;;  %v6968_v37 = vsub.f32 %v17358_v43, %v14702_v59  ;;  %v4400_v26 = vsub.f32 0.0, %v4384_v10  ;;  %v17361_v27 = vld [vmem:[#allocation104_spill] sm:$0xff]  ;;  %v17363_v10 = vld [vmem:[#allocation161_spill] sm:$0xff] }
 0x77c   : > { %8260 = vperm.xlu0 %10557, %v8174_v46   ;;  %v7070_v30 = vsub.f32 %v17360_v7, %v14837_v11  ;;  %v7308_v56 = vsub.f32 %v17361_v27, %v17351_v58  ;;  %v15431_v13 = vrot.slane %v15055_v28, %v17362_v60  ;;  %v4288_v50 = vsub.f32 0.0, %v4272_v2  ;;  %v17364_v60 = vld [vmem:[#allocation163_spill] sm:$0xff] }
 0x77d   : > { %v15423_v57 = vpop.permute.xlu1 %7378  ;;  %v15435_v18 = vadd.f32 %v15160_v61, %v6988_v24  ;;  %v6982_v59 = vand.u32 2147483647, %v6966_v12  ;;  %v15437_v22 = vand.u32 2147483647, %v7301_v44  ;;  %v4416_v23 = vmul.f32 %v4400_v26, %v4336_v4  ;;  %v15453_v44 = vpop.permute.xlu0 %7622 }
 0x77e   : > { %17359 = vst [vmem:[#allocation191_spill] sm:$0xff] %v15423_v57  ;;  %7822 = vperm.xlu1 %10551, %v15266_v31   ;;  %v15440_v46 = vadd.f32 %v15162_v38, %v6990_v9  ;;  %v6994_v33 = vadd.f32 %v6978_v32, %v17363_v10  ;;  %v15443_v43 = vand.u32 2147483647, %v7304_v5  ;;  %v4304_v7 = vmul.f32 %v4288_v50, %v4208_v6  ;;  %v17365_v57 = vld [vmem:[#allocation154_spill] sm:$0xff]  ;;  %v17368_v5 = vld [vmem:[#allocation107_spill] sm:$0xff]  ;;  %v17369_v32 = vld [vmem:[#allocation137_spill] sm:$0xff] }
 0x77f   : > { %v15446_v27 = vadd.f32 %v17364_v60, %v6992_v1  ;;  %v6996_v2 = vadd.f32 %v6980_v25, %v17365_v57  ;;  %v6984_v49 = vand.u32 2147483647, %v6968_v37  ;;  %v15449_v61 = vand.u32 2147483647, %v7306_v48  ;;  %17367 = vst [vmem:[#allocation180_spill] sm:$0xff] %v15453_v44  ;;  %v17370_v1 = vld [vmem:[#allocation156_spill] sm:$0xff] }
 0x780   : > { %v10624_v12 = vpop.eup %10623  ;;  %v7086_v38 = vand.u32 2147483647, %v7070_v30  ;;  %v15455_v9 = vand.u32 2147483647, %v7308_v56  ;;  %v7310_v4 = vsub.f32 %v17368_v5, %v17351_v58  ;;  %v4432_v6 = vsub.f32 %v4416_v23, %v4304_v7  ;;  %v17371_v57 = vld [vmem:[#allocation112_spill] sm:$0xff]  ;;  %v17372_v25 = vld [vmem:[#allocation114_spill] sm:$0xff] }
 0x781   : > { %v15451_v24 = vpop.permute.xlu1 %7386  ;;  %v6998_v26 = vadd.f32 %v6982_v59, %v17370_v1  ;;  %v7071_v48 = vsub.f32 %v17371_v57, %v14837_v11  ;;  %v7073_v37 = vsub.f32 %v17372_v25, %v14837_v11  ;;  %v17373_v50 = vld [vmem:[#allocation109_spill] sm:$0xff]  ;;  %v17374_v30 = vld [vmem:[#allocation160_spill] sm:$0xff]  ;;  %v17375_v60 = vld [vmem:[#allocation119_spill] sm:$0xff] }
 0x782   : > { %17366 = vst [vmem:[#allocation188_spill] sm:$0xff] %v15451_v24  ;;  %7826 = vperm.xlu1 %10551, %v17369_v32   ;;  %v7312_v10 = vsub.f32 %v17373_v50, %v17351_v58  ;;  %v15468_v56 = vadd.f32 %v17374_v30, %v6994_v33  ;;  %v7075_v5 = vsub.f32 %v17375_v60, %v14837_v11  ;;  %v17376_v32 = vld [vmem:[#allocation111_spill] sm:$0xff]  ;;  %v8176_v7 = vmul.f32 2.0, %v4432_v6  ;;  %v17377_v59 = vld [vmem:[#allocation169_spill] sm:$0xff]  ;;  %v17378_v57 = vld [vmem:[#allocation158_spill] sm:$0xff] }
 0x783   : > { %v7314_v23 = vsub.f32 %v17376_v32, %v17351_v58  ;;  %v15475_v1 = vadd.f32 %v17377_v59, %v6996_v2  ;;  %v7000_v24 = vadd.f32 %v6984_v49, %v17378_v57  ;;  %v17379_v25 = vld [vmem:[#allocation121_spill] sm:$0xff]  ;;  %v4130_v50 = vadd.f32 1.0, %v10624_v12  ;;  %v15495_v12 = vpop.permute.xlu0 %7630 }
 0x784   : > { %v7077_v44 = vsub.f32 %v17379_v25, %v14837_v11  ;;  %v7102_v33 = vadd.f32 %v7086_v38, %v15247_v17  ;;  %v17381_v30 = vld [vmem:[#allocation125_spill] sm:$0xff]  ;;  %v15485_v31 = vand.u32 2147483647, %v7310_v4  ;;  %8270 = vperm.xlu0 %10557, %v8176_v7   ;;  %v15491_v49 = vadd.f32 %v15254_v35, %v6998_v26  ;;  %v17386_v26 = vld [vmem:[#allocation131_spill] sm:$0xff] }
 0x785   : > { %v15480_v34 = vpop.permute.xlu1 %7394  ;;  %v7079_v60 = vsub.f32 %v17381_v30, %v14837_v11  ;;  %v17382_v6 = vld [vmem:[#allocation117_spill] sm:$0xff]  ;;  %v7087_v59 = vand.u32 2147483647, %v7071_v48  ;;  %v7089_v57 = vand.u32 2147483647, %v7073_v37  ;;  %v15504_v7 = vadd.f32 %v15256_v36, %v7000_v24 }
 0x786   : > { %17380 = vst [vmem:[#allocation193_spill] sm:$0xff] %v15480_v34  ;;  %v7316_v32 = vsub.f32 %v17382_v6, %v17351_v58  ;;  %v17383_v2 = vld [vmem:[#allocation141_spill] sm:$0xff]  ;;  %v15493_v25 = vand.u32 2147483647, %v7312_v10  ;;  %v7091_v17 = vand.u32 2147483647, %v7075_v5  ;;  %v7083_v48 = vsub.f32 %v17386_v26, %v14837_v11 }
 0x787   : > { %7834 = vperm.xlu1 %10551, %v17383_v2   ;;  %v17384_v38 = vld [vmem:[#allocation129_spill] sm:$0xff]  ;;  %v15499_v30 = vand.u32 2147483647, %v7314_v23  ;;  %v17385_v6 = vld [vmem:[#allocation118_spill] sm:$0xff]  ;;  %v7093_v35 = vand.u32 2147483647, %v7077_v44  ;;  %10625 = vrcp.f32 %v4130_v50  ;;  %v15511_v10 = vadd.f32 %v15293_v40, %v7102_v33 }
 0x788   : > { %v7081_v4 = vsub.f32 %v17384_v38, %v14837_v11  ;;  %v7418_v34 = vsub.f32 %v17385_v6, %v15279_v3  ;;  %v7095_v5 = vand.u32 2147483647, %v7079_v60  ;;  %v17388_v23 = vld [vmem:[#allocation130_spill] sm:$0xff]  ;;  %v15515_v38 = vand.u32 2147483647, %v7316_v32  ;;  %v17389_v6 = vld [vmem:[#allocation145_spill] sm:$0xff] }
 0x789   : > { %v15508_v37 = vpop.permute.xlu1 %7402  ;;  %v7185_v2 = vsub.f32 %v17388_v23, %v14968_v63  ;;  %v7103_v36 = vadd.f32 %v7087_v59, %v15394_v15  ;;  %v7105_v24 = vadd.f32 %v7089_v57, %v15285_v51  ;;  %v17390_v11 = vld [vmem:[#allocation120_spill] sm:$0xff]  ;;  %v7107_v40 = vadd.f32 %v7091_v17, %v15319_v41  ;;  %v17393_v15 = vld [vmem:[#allocation135_spill] sm:$0xff] }
 0x78a   : > { %17387 = vst [vmem:[#allocation183_spill] sm:$0xff] %v15508_v37  ;;  %v7421_v44 = vsub.f32 %v17390_v11, %v15279_v3  ;;  %v17391_v50 = vld [vmem:[#allocation124_spill] sm:$0xff]  ;;  %v7097_v33 = vand.u32 2147483647, %v7081_v4  ;;  %v15525_v60 = vand.u32 2147483647, %v7418_v34  ;;  %v7427_v51 = vsub.f32 %v17393_v15, %v15279_v3 }
 0x78b   : > { %7842 = vperm.xlu1 %10551, %v17389_v6   ;;  %v7423_v26 = vsub.f32 %v17391_v50, %v15279_v3  ;;  %v17392_v32 = vld [vmem:[#allocation128_spill] sm:$0xff]  ;;  %v7109_v6 = vadd.f32 %v7093_v35, %v15341_v29  ;;  %v7099_v37 = vand.u32 2147483647, %v7083_v48  ;;  %v17395_v57 = vld [vmem:[#allocation283_spill] sm:$0xff]  ;;  %v15538_v50 = vpop.permute.xlu0 %7638  ;;  %v7111_v41 = vadd.f32 %v7095_v5, %v15344_v0  ;;  %v17397_v29 = vld [vmem:[#allocation134_spill] sm:$0xff] }
 0x78c   : > { %v7425_v23 = vsub.f32 %v17392_v32, %v15279_v3  ;;  %v15536_v11 = vrot.slane %v15055_v28, %v17395_v57  ;;  %v7201_v34 = vand.u32 2147483647, %v7185_v2  ;;  %v17396_v17 = vld [vmem:[#allocation139_spill] sm:$0xff]  ;;  %v7429_v35 = vsub.f32 %v17397_v29, %v15279_v3  ;;  %v17399_v15 = vld [vmem:[#allocation133_spill] sm:$0xff] }
 0x78d   : > { %v15532_v59 = vpop.permute.xlu1 %7410  ;;  %v7188_v4 = vsub.f32 %v17396_v17, %v14968_v63  ;;  %v15548_v48 = vld [vmem:[%s16417_s1 + $0x48] sm:$0xff]  ;;  %v15552_v32 = vadd.f32 %v15327_v16, %v7105_v24  ;;  %v7187_v0 = vsub.f32 %v17399_v15, %v14968_v63  ;;  %v15556_v5 = vand.u32 2147483647, %v7421_v44  ;;  %v17403_v44 = vld [vmem:[#allocation149_spill] sm:$0xff] }
 0x78e   : > { %17394 = vst [vmem:[#allocation195_spill] sm:$0xff] %v15532_v59  ;;  %17398 = vst [vmem:[#allocation186_spill] sm:$0xff] %v15548_v48  ;;  %v15558_v2 = vand.u32 2147483647, %v7423_v26  ;;  %v15561_v57 = vadd.f32 %v15346_v45, %v7107_v40  ;;  %v7113_v17 = vadd.f32 %v7097_v33, %v15374_v21  ;;  %v15564_v29 = vand.u32 2147483647, %v7425_v23 }
 0x78f   : > { %7850 = vperm.xlu1 %10551, %v15548_v48   ;;  %v17401_v59 = vld [vmem:[#allocation138_spill] sm:$0xff]  ;;  %v15569_v16 = vadd.f32 %v15356_v39, %v7109_v6  ;;  %v7115_v24 = vadd.f32 %v7099_v37, %v15386_v20  ;;  %v15572_v15 = vand.u32 2147483647, %v7427_v51  ;;  %v7533_v26 = vsub.f32 %v17403_v44, %v15431_v13  ;;  %v4047_v45 = vld [vmem:[%s16416_s0 + $0x10] sm:$0xff] }
 0x790   : > { %17400 = vst [vmem:[#allocation198_spill] sm:$0xff] %v15564_v29  ;;  %v7431_v48 = vsub.f32 %v17401_v59, %v15279_v3  ;;  %v15580_v21 = vadd.f32 %v15358_v55, %v7111_v41  ;;  %v7217_v40 = vadd.f32 %v7201_v34, %v15389_v52  ;;  %v7204_v33 = vand.u32 2147483647, %v7188_v4  ;;  %v15588_v39 = vld [vmem:[%s16417_s1 + $0x58] sm:$0xff]  ;;  %v17407_v55 = vld [vmem:[#allocation143_spill] sm:$0xff]  ;;  %v17408_v52 = vld [vmem:[#allocation136_spill] sm:$0xff]  ;;  %v15601_v4 = vpop.permute.xlu0 %7698 }
 0x791   : > { %17402 = vst [vmem:[#allocation189_spill] sm:$0xff] %v15572_v15  ;;  %v15583_v23 = vand.u32 2147483647, %v7429_v35  ;;  %17405 = vst [vmem:[#allocation192_spill] sm:$0xff] %v15588_v39  ;;  %v15593_v37 = vpop.eup %10625  ;;  %v7203_v6 = vand.u32 2147483647, %v7187_v0  ;;  %v7190_v51 = vsub.f32 %v17407_v55, %v14968_v63  ;;  %v7192_v59 = vsub.f32 %v17408_v52, %v14968_v63 }
 0x792   : > { %v15591_v20 = vpop.permute.xlu1 %7470  ;;  %v17409_v41 = vld [vmem:[#allocation150_spill] sm:$0xff]  ;;  %17410 = vst [vmem:[#allocation194_spill] sm:$0xff] %v15601_v4  ;;  %v15604_v35 = vadd.f32 %v15391_v53, %v7113_v17  ;;  %v17411_v44 = vld [vmem:[#allocation144_spill] sm:$0xff]  ;;  %v8835_v0 = vmul.f32 -1.442695, %v4047_v45  ;;  %v17413_v55 = vld [vmem:[#allocation155_spill] sm:$0xff]  ;;  %v15623_v17 = vadd.f32 %v15437_v22, %v7217_v40 }
 0x793   : > { %17404 = vst [vmem:[#allocation200_spill] sm:$0xff] %v15583_v23  ;;  %7858 = vperm.xlu1 %10551, %v15588_v39   ;;  %17406 = vst [vmem:[#allocation202_spill] sm:$0xff] %v15591_v20  ;;  %v7536_v34 = vsub.f32 %v17409_v41, %v15431_v13  ;;  %v7194_v39 = vsub.f32 %v17411_v44, %v14968_v63  ;;  %v15608_v20 = vand.u32 2147483647, %v7431_v48  ;;  %v15615_v15 = vand.u32 2147483647, %v7533_v26 }
 0x794   : > { %v15611_v23 = vadd.f32 %v15402_v19, %v7115_v24  ;;  %v7196_v52 = vsub.f32 %v17413_v55, %v14968_v63  ;;  %v17415_v41 = vld [vmem:[#allocation159_spill] sm:$0xff]  ;;  %17416 = vst [vmem:[#allocation206_spill] sm:$0xff] %v15623_v17  ;;  %v7220_v48 = vadd.f32 %v7204_v33, %v15435_v18  ;;  %v17417_v19 = vld [vmem:[#allocation157_spill] sm:$0xff]  ;;  %v15637_v44 = vsub.f32 1.0, %v15593_v37  ;;  %v15643_v33 = vpop.permute.xlu0 %7710 }
 0x795   : > { %17412 = vst [vmem:[#allocation204_spill] sm:$0xff] %v15608_v20  ;;  %17414 = vst [vmem:[#allocation197_spill] sm:$0xff] %v15615_v15  ;;  %v7538_v4 = vsub.f32 %v17415_v41, %v15431_v13  ;;  %v4049_v53 = vld [vmem:[%s16416_s0 + $0x20] sm:$0xff]  ;;  %v7198_v24 = vsub.f32 %v17417_v19, %v14968_v63  ;;  %v15631_v26 = vld [vmem:[%s16417_s1 + $0x68] sm:$0xff]  ;;  %v15639_v55 = vadd.f32 %v7203_v6, %v7103_v36  ;;  %v7206_v22 = vand.u32 2147483647, %v7190_v51 }
 0x796   : > { %17418 = vst [vmem:[#allocation199_spill] sm:$0xff] %v15631_v26  ;;  %v15634_v45 = vpop.permute.xlu1 %7474  ;;  %v7208_v40 = vand.u32 2147483647, %v7192_v59  ;;  %v15641_v18 = vand.u32 2147483647, %v7536_v34  ;;  %v17421_v19 = vld [vmem:[#allocation152_spill] sm:$0xff]  ;;  %10627 = vpow2.f32 %v8835_v0  ;;  %v15655_v6 = vadd.f32 %v15443_v43, %v7220_v48 }
 0x797   : > { %7866 = vperm.xlu1 %10551, %v15631_v26   ;;  %17419 = vst [vmem:[#allocation211_spill] sm:$0xff] %v15634_v45  ;;  %17420 = vst [vmem:[#allocation201_spill] sm:$0xff] %v15639_v55  ;;  %v7210_v41 = vand.u32 2147483647, %v7194_v39  ;;  %v7200_v15 = vsub.f32 %v17421_v19, %v14968_v63  ;;  %v8837_v17 = vmul.f32 -1.442695, %v4049_v53 }
 0x798   : > { %v7212_v26 = vand.u32 2147483647, %v7196_v52  ;;  %v15647_v20 = vand.u32 2147483647, %v7538_v4  ;;  %v17422_v45 = vld [vmem:[#allocation287_spill] sm:$0xff]  ;;  %v17423_v39 = vld [vmem:[#allocation162_spill] sm:$0xff]  ;;  %v7222_v4 = vadd.f32 %v7206_v22, %v15440_v46  ;;  %v7224_v0 = vadd.f32 %v7208_v40, %v15446_v27  ;;  %v15683_v22 = vpop.permute.xlu0 %7718 }
 0x799   : > { %v15651_v29 = vrot.slane %v15055_v28, %v17422_v45  ;;  %v4338_v36 = vadd.f32 1e-08, %v15593_v37  ;;  %v7214_v51 = vand.u32 2147483647, %v7198_v24  ;;  %v7540_v59 = vsub.f32 %v17423_v39, %v15431_v13  ;;  %v15662_v63 = vld [vmem:[%s16417_s1 + $0x78] sm:$0xff]  ;;  %v4051_v43 = vld [vmem:[%s16416_s0 + $0x30] sm:$0xff] }
 0x79a   : > { %v15665_v34 = vpop.permute.xlu1 %7482  ;;  %v4226_v28 = vadd.f32 1e-08, %v15637_v44  ;;  %v17424_v52 = vld [vmem:[#allocation165_spill] sm:$0xff]  ;;  %v17425_v48 = vld [vmem:[#allocation167_spill] sm:$0xff]  ;;  %v7226_v45 = vadd.f32 %v7210_v41, %v15468_v56  ;;  %v7216_v19 = vand.u32 2147483647, %v7200_v15  ;;  %v7544_v39 = vsub.f32 %v15240_v8, %v15431_v13 }
 0x79b   : > { %7874 = vperm.xlu1 %10551, %v15662_v63   ;;  %v7302_v53 = vsub.f32 %v17424_v52, %v17351_v58  ;;  %v7542_v24 = vsub.f32 %v17425_v48, %v15431_v13  ;;  %10629 = vpow2.f32 %v8837_v17  ;;  %v7228_v55 = vadd.f32 %v7212_v26, %v15475_v1 }
 0x79c   : > { %v7546_v46 = vsub.f32 %v15269_v42, %v15431_v13  ;;  %10631 = vlog2.f32 %v4338_v36  ;;  %v8839_v27 = vmul.f32 -1.442695, %v4051_v43  ;;  %v7230_v40 = vadd.f32 %v7214_v51, %v15491_v49  ;;  %v10772_v49 = vld [vmem:[%s16417_s1 + $0x8] sm:$0xff] }
 0x79d   : > { %v15686_v52 = vand.u32 2147483647, %v7540_v59  ;;  %v7548_v56 = vsub.f32 %v15301_v62, %v15431_v13  ;;  %v17426_v15 = vmov 30   ;;  %10633 = vlog2.f32 %v4226_v28  ;;  %v4053_v62 = vld [vmem:[%s16416_s0 + $0x40] sm:$0xff]  ;;  %v4055_v59 = vld [vmem:[%s16416_s0 + $0x50] sm:$0xff] }
 0x79e   : > { %v15691_v8 = vpop.permute.xlu1 %7490  ;;  %v15694_v1 = vadd.f32 %v15449_v61, %v7222_v4  ;;  %v15697_v42 = vadd.f32 %v15455_v9, %v7224_v0  ;;  %v7318_v17 = vand.u32 2147483647, %v7302_v53  ;;  %v15699_v26 = vand.u32 2147483647, %v7542_v24  ;;  %v17427_v9 = vld [vmem:[#allocation164_spill] sm:$0xff] }
 0x79f   : > { %10554 = vset.pattern.permute.xlu1 %v17426_v15  ;;  %v15708_v41 = vadd.f32 %v15485_v31, %v7226_v45  ;;  %v7232_v61 = vadd.f32 %v7216_v19, %v15504_v7  ;;  %v7305_v36 = vsub.f32 %v17427_v9, %v17351_v58  ;;  %v15713_v51 = vand.u32 2147483647, %v7544_v39  ;;  %v4057_v7 = vld [vmem:[%s16416_s0 + $0x60] sm:$0xff]  ;;  %v17429_v39 = vld [vmem:[#allocation176_spill] sm:$0xff] }
 0x7a0   : > { %7934 = vperm.xlu1 %10554, %v10772_v49   ;;  %v15719_v28 = vadd.f32 %v15493_v25, %v7228_v55  ;;  %v15721_v43 = vand.u32 2147483647, %v7546_v46  ;;  %v7650_v31 = vsub.f32 %v15331_v14, %v15536_v11  ;;  %10635 = vpow2.f32 %v8839_v27  ;;  %v10628_v4 = vpop.eup %10627  ;;  %v17428_v14 = vld [vmem:[#allocation171_spill] sm:$0xff]  ;;  %v17432_v49 = vld [vmem:[#allocation168_spill] sm:$0xff] }
 0x7a1   : > { %v15729_v0 = vadd.f32 %v15499_v30, %v7230_v40  ;;  %v15731_v53 = vand.u32 2147483647, %v7548_v56  ;;  %v7653_v25 = vsub.f32 %v15349_v54, %v15536_v11  ;;  %v8841_v48 = vmul.f32 -1.442695, %v4053_v62  ;;  %v15743_v30 = vpop.permute.xlu0 %7726  ;;  %v17430_v40 = vld [vmem:[#allocation166_spill] sm:$0xff] }
 0x7a2   : > { %v15735_v55 = vpop.permute.xlu1 %7498  ;;  %v7334_v24 = vadd.f32 %v7318_v17, %v15511_v10  ;;  %v7303_v45 = vsub.f32 %v17428_v14, %v17351_v58  ;;  %v7655_v19 = vsub.f32 %v15383_v47, %v15536_v11  ;;  %v8843_v46 = vmul.f32 -1.442695, %v4055_v59  ;;  %v17431_v10 = vld [vmem:[#allocation173_spill] sm:$0xff]  ;;  %v17433_v59 = vld [vmem:[#allocation170_spill] sm:$0xff] }
 0x7a3   : > { %v15746_v27 = vadd.f32 %v15515_v38, %v7232_v61  ;;  %v7321_v54 = vand.u32 2147483647, %v7305_v36  ;;  %v7307_v56 = vsub.f32 %v17430_v40, %v17351_v58  ;;  %v8845_v15 = vmul.f32 -1.442695, %v4057_v7  ;;  %v17435_v61 = vld [vmem:[#allocation177_spill] sm:$0xff] }
 0x7a4   : > { %7938 = vperm.xlu1 %10554, %v17429_v39   ;;  %v7309_v17 = vsub.f32 %v17431_v10, %v17351_v58  ;;  %v7311_v62 = vsub.f32 %v17432_v49, %v17351_v58  ;;  %v15754_v47 = vand.u32 2147483647, %v7650_v31  ;;  %v4131_v9 = vadd.f32 1.0, %v10628_v4  ;;  %v10773_v4 = vld [vmem:[%s16417_s1 + $0x20] sm:$0xff] }
 0x7a5   : > { %v10630_v14 = vpop.eup %10629  ;;  %v7313_v39 = vsub.f32 %v17433_v59, %v17351_v58  ;;  %v15758_v38 = vand.u32 2147483647, %v7653_v25  ;;  %v7657_v36 = vsub.f32 %v17435_v61, %v15536_v11  ;;  %10637 = vpow2.f32 %v8841_v48  ;;  %v17439_v48 = vld [vmem:[#allocation179_spill] sm:$0xff] }
 0x7a6   : > { %v15762_v40 = vpop.permute.xlu1 %7506  ;;  %v10632_v7 = vpop.eup %10631  ;;  %v15765_v10 = vadd.f32 %v15525_v60, %v7334_v24  ;;  %v15767_v49 = vand.u32 2147483647, %v7303_v45  ;;  %v15769_v31 = vand.u32 2147483647, %v7655_v19  ;;  %10639 = vpow2.f32 %v8843_v46  ;;  %v17440_v45 = vld [vmem:[#allocation180_spill] sm:$0xff] }
 0x7a7   : > { %17434 = vst [vmem:[#allocation213_spill] sm:$0xff] %v15758_v38  ;;  %17436 = vst [vmem:[#allocation203_spill] sm:$0xff] %v15762_v40  ;;  %v10634_v25 = vpop.eup %10633  ;;  %v7337_v59 = vadd.f32 %v7321_v54, %v15552_v32  ;;  %v7323_v61 = vand.u32 2147483647, %v7307_v56  ;;  %v7315_v38 = vsub.f32 %v17439_v48, %v17351_v58  ;;  %10641 = vpow2.f32 %v8845_v15  ;;  %v17442_v32 = vld [vmem:[#allocation296_spill] sm:$0xff] }
 0x7a8   : > { %17437 = vst [vmem:[#allocation208_spill] sm:$0xff] %v15767_v49  ;;  %17438 = vst [vmem:[#allocation205_spill] sm:$0xff] %v15769_v31  ;;  %7946 = vperm.xlu1 %10554, %v10773_v4   ;;  %v7325_v60 = vand.u32 2147483647, %v7309_v17  ;;  %v7327_v24 = vand.u32 2147483647, %v7311_v62  ;;  %v7659_v19 = vsub.f32 %v17440_v45, %v15536_v11  ;;  %v15779_v49 = vpop.permute.xlu0 %7734  ;;  %10643 = vrcp.f32 %v4131_v9 }
 0x7a9   : > { %v7329_v31 = vand.u32 2147483647, %v7313_v39  ;;  %v15781_v40 = vand.u32 2147483647, %v7657_v36  ;;  %v15785_v4 = vld [vmem:[#allocation3 + $0x18] sm:$0xff]  ;;  %v4133_v58 = vadd.f32 1.0, %v10630_v14  ;;  %v9323_v17 = vmul.f32 %v15593_v37, %v15593_v37 }
 0x7aa   : > { %v15783_v46 = vpop.permute.xlu1 %7514  ;;  %17441 = vst [vmem:[#allocation215_spill] sm:$0xff] %v15785_v4  ;;  %v15789_v54 = vrot.slane %v15785_v4, %v17442_v32  ;;  %v10636_v56 = vpop.eup %10635  ;;  %v10775_v15 = vld [vmem:[%s16417_s1 + $0x30] sm:$0xff]  ;;  %v4244_v62 = vmul.f32 0.6931472, %v10634_v25  ;;  %v9339_v9 = vmul.f32 %v15637_v44, %v15637_v44  ;;  %v4356_v39 = vmul.f32 0.6931472, %v10632_v7 }
 0x7ab   : > { %v15799_v36 = vadd.f32 %v15556_v5, %v7337_v59  ;;  %v7339_v48 = vadd.f32 %v7323_v61, %v15561_v57  ;;  %v7331_v14 = vand.u32 2147483647, %v7315_v38  ;;  %v7661_v45 = vsub.f32 %v15495_v12, %v15536_v11  ;;  %v17444_v5 = vld [vmem:[#allocation174_spill] sm:$0xff] }
 0x7ac   : > { %7954 = vperm.xlu1 %10554, %v10775_v15   ;;  %v7341_v32 = vadd.f32 %v7325_v60, %v15569_v16  ;;  %v7343_v15 = vadd.f32 %v7327_v24, %v15580_v21  ;;  %v15806_v4 = vand.u32 2147483647, %v7659_v19  ;;  %v7663_v37 = vsub.f32 %v15538_v50, %v15536_v11  ;;  %v10776_v12 = vld [vmem:[%s16417_s1 + $0x40] sm:$0xff]  ;;  %v15818_v16 = vpop.permute.xlu0 %7742  ;;  %v17445_v60 = vld [vmem:[#allocation185_spill] sm:$0xff] }
 0x7ad   : > { %v7345_v44 = vadd.f32 %v7329_v31, %v15604_v35  ;;  %v7420_v7 = vsub.f32 %v17444_v5, %v15279_v3  ;;  %10645 = vrcp.f32 %v4133_v58  ;;  %v4135_v57 = vadd.f32 1.0, %v10636_v56  ;;  %v17447_v56 = vld [vmem:[#allocation198_spill] sm:$0xff] }
 0x7ae   : > { %17443 = vst [vmem:[#allocation217_spill] sm:$0xff] %v15806_v4  ;;  %v15813_v25 = vpop.permute.xlu1 %7522  ;;  %v4194_v21 = vmul.f32 0.75, %v9323_v17  ;;  %v4274_v38 = vsub.f32 0.0, %v4244_v62  ;;  %v4322_v59 = vmul.f32 0.25, %v9339_v9  ;;  %v4386_v50 = vsub.f32 0.0, %v4356_v39  ;;  %v17450_v39 = vld [vmem:[#allocation200_spill] sm:$0xff] }
 0x7af   : > { %v10638_v61 = vpop.eup %10637  ;;  %v15821_v35 = vadd.f32 %v15558_v2, %v7339_v48  ;;  %v7347_v31 = vadd.f32 %v7331_v14, %v15611_v23  ;;  %v7422_v24 = vsub.f32 %v17445_v60, %v15279_v3  ;;  %v15826_v19 = vand.u32 2147483647, %v7661_v45 }
 0x7b0   : > { %7962 = vperm.xlu1 %10554, %v10776_v12   ;;  %v10640_v58 = vpop.eup %10639  ;;  %v15829_v5 = vadd.f32 %v17447_v56, %v7341_v32  ;;  %v17448_v12 = vld [vmem:[#allocation189_spill] sm:$0xff]  ;;  %v15834_v62 = vand.u32 2147483647, %v7663_v37  ;;  %v7768_v2 = vsub.f32 %v15643_v33, %v15651_v29  ;;  %v15839_v23 = vadd.f32 %v17450_v39, %v7345_v44  ;;  %v17453_v32 = vld [vmem:[#allocation172_spill] sm:$0xff] }
 0x7b1   : > { %17446 = vst [vmem:[#allocation207_spill] sm:$0xff] %v15826_v19  ;;  %v15832_v17 = vadd.f32 %v17448_v12, %v7343_v15  ;;  %v10642_v9 = vpop.eup %10641  ;;  %v7436_v48 = vand.u32 2147483647, %v7420_v7  ;;  %10647 = vrcp.f32 %v4135_v57  ;;  %v7417_v56 = vsub.f32 %v17453_v32, %v15279_v3  ;;  %v10777_v15 = vld [vmem:[%s16417_s1 + $0x50] sm:$0xff] }
 0x7b2   : > { %17449 = vst [vmem:[#allocation209_spill] sm:$0xff] %v15834_v62  ;;  %17451 = vst [vmem:[#allocation219_spill] sm:$0xff] %v15839_v23  ;;  %v10644_v60 = vpop.eup %10643  ;;  %v4290_v33 = vmul.f32 %v4274_v38, %v4194_v21  ;;  %v4402_v12 = vmul.f32 %v4386_v50, %v4322_v59  ;;  %v4137_v44 = vadd.f32 1.0, %v10638_v61  ;;  %v4059_v7 = vld [vmem:[%s16416_s0 + $0x70] sm:$0xff]  ;;  %v7438_v45 = vand.u32 2147483647, %v7422_v24  ;;  %v7751_v38 = vpop.permute.xlu0 %7750 }
 0x7b3   : > { %v15848_v37 = vpop.permute.xlu1 %7582  ;;  %v17455_v39 = vld [vmem:[#allocation204_spill] sm:$0xff]  ;;  %v7770_v32 = vsub.f32 %v15683_v22, %v15651_v29  ;;  %v4139_v14 = vadd.f32 1.0, %v10640_v58  ;;  %v17457_v62 = vld [vmem:[#allocation191_spill] sm:$0xff]  ;;  %v15860_v19 = vand.u32 2147483647, %v7768_v2  ;;  %v7772_v21 = vsub.f32 %v15743_v30, %v15651_v29 }
 0x7b4   : > { %7970 = vperm.xlu1 %10554, %v10777_v15   ;;  %17454 = vst [vmem:[#allocation212_spill] sm:$0xff] %v15848_v37  ;;  %v15854_v57 = vadd.f32 %v17455_v39, %v7347_v31  ;;  %v7424_v15 = vsub.f32 %v17457_v62, %v15279_v3  ;;  %v4141_v59 = vadd.f32 1.0, %v10642_v9  ;;  %v7452_v50 = vadd.f32 %v7436_v48, %v15655_v6  ;;  %v10778_v22 = vld [vmem:[%s16417_s1 + $0x60] sm:$0xff] }
 0x7b5   : > { %v7774_v61 = vsub.f32 %v15779_v49, %v15651_v29  ;;  %v4211_v31 = vsub.f32 1.0, %v10644_v60  ;;  %v8847_v24 = vmul.f32 -1.442695, %v4059_v7  ;;  %v15867_v39 = vand.u32 2147483647, %v7417_v56  ;;  %v17460_v56 = vld [vmem:[#allocation188_spill] sm:$0xff] }
 0x7b6   : > { %17456 = vst [vmem:[#allocation221_spill] sm:$0xff] %v15854_v57  ;;  %v7776_v30 = vsub.f32 %v15818_v16, %v15651_v29  ;;  %v4418_v62 = vsub.f32 %v4402_v12, %v4290_v33  ;;  %10649 = vrcp.f32 %v4137_v44  ;;  %v7454_v2 = vadd.f32 %v7438_v45, %v15694_v1  ;;  %v10779_v1 = vld [vmem:[%s16417_s1 + $0x70] sm:$0xff]  ;;  %v7759_v12 = vpop.permute.xlu0 %7758 }
 0x7b7   : > { %17458 = vst [vmem:[#allocation214_spill] sm:$0xff] %v15867_v39  ;;  %v15872_v58 = vpop.permute.xlu1 %7590  ;;  %v10646_v6 = vpop.eup %10645  ;;  %v15877_v49 = vand.u32 2147483647, %v7770_v32  ;;  %v9324_v9 = vmul.f32 %v10644_v60, %v10644_v60  ;;  %10651 = vrcp.f32 %v4139_v14  ;;  %v7440_v48 = vand.u32 2147483647, %v7424_v15 }
 0x7b8   : > { %7978 = vperm.xlu1 %10554, %v10778_v22   ;;  %17459 = vst [vmem:[#allocation223_spill] sm:$0xff] %v15872_v58  ;;  %v7426_v7 = vsub.f32 %v17460_v56, %v15279_v3  ;;  %v15881_v57 = vand.u32 2147483647, %v7772_v21  ;;  %10653 = vrcp.f32 %v4141_v59  ;;  %v7568_v22 = vadd.f32 %v15641_v18, %v7452_v50 }
 0x7b9   : > { %v15884_v58 = vand.u32 2147483647, %v7774_v61  ;;  %v4227_v16 = vadd.f32 1e-08, %v4211_v31  ;;  %10655 = vpow2.f32 %v8847_v24  ;;  %v15889_v14 = vand.u32 2147483647, %v7776_v30 }
 0x7ba   : > { %v7778_v33 = vsub.f32 %v7751_v38, %v15651_v29  ;;  %v15892_v44 = vmul.f32 2.0, %v4418_v62  ;;  %v4213_v32 = vsub.f32 1.0, %v10646_v6  ;;  %v7570_v18 = vadd.f32 %v15647_v20, %v7454_v2 }
 0x7bb   : > { %v7595_v45 = vpop.permute.xlu1 %7594  ;;  %v10648_v15 = vpop.eup %10647  ;;  %v15896_v59 = vmul.f32 0.75, %v9324_v9  ;;  %v9340_v50 = vmul.f32 %v4211_v31, %v4211_v31  ;;  %v7456_v61 = vadd.f32 %v7440_v48, %v15697_v42  ;;  %v7442_v24 = vand.u32 2147483647, %v7426_v7 }
 0x7bc   : > { %7986 = vperm.xlu1 %10554, %v10779_v1   ;;  %v7652_v21 = vsub.f32 %v7595_v45, %v15536_v11  ;;  %v4339_v56 = vadd.f32 1e-08, %v10644_v60  ;;  %v9326_v30 = vmul.f32 %v10646_v6, %v10646_v6  ;;  %v17461_v1 = vld [vmem:[#allocation193_spill] sm:$0xff]  ;;  %10657 = vlog2.f32 %v4227_v16  ;;  %v10780_v60 = vld [vmem:[%s16417_s1] sm:$0xff] }
 0x7bd   : > { %v7428_v38 = vsub.f32 %v17461_v1, %v15279_v3  ;;  %v4341_v62 = vadd.f32 1e-08, %v10646_v6  ;;  %v17462_v37 = vmov 31   ;;  %v15902_v20 = vand.u32 2147483647, %v7778_v33  ;;  %v7819_v33 = vpop.permute.xlu0 %7818 }
 0x7be   : > { %v7668_v39 = vand.u32 2147483647, %v7652_v21  ;;  %v7780_v2 = vsub.f32 %v7759_v12, %v15651_v29  ;;  %v4229_v9 = vadd.f32 1e-08, %v4213_v32  ;;  %v4215_v31 = vsub.f32 1.0, %v10648_v15 }
 0x7bf   : > { %v7603_v23 = vpop.permute.xlu1 %7602  ;;  %v15909_v48 = vmul.f32 0.25, %v9340_v50  ;;  %v9328_v6 = vmul.f32 %v10648_v15, %v10648_v15  ;;  %v7458_v16 = vadd.f32 %v7442_v24, %v15708_v41  ;;  %10659 = vlog2.f32 %v4339_v56 }
 0x7c0   : > { %10555 = vset.pattern.permute.xlu1 %v17462_v37  ;;  %v7684_v45 = vadd.f32 %v7668_v39, %v7568_v22  ;;  %v7654_v42 = vsub.f32 %v7603_v23, %v15536_v11  ;;  %v10650_v7 = vpop.eup %10649  ;;  %v7572_v37 = vadd.f32 %v15686_v52, %v7456_v61  ;;  %v15913_v12 = vmul.f32 0.75, %v9326_v30  ;;  %v10781_v30 = vld [vmem:[%s16417_s1 + $0x10] sm:$0xff] }
 0x7c1   : > { %8046 = vperm.xlu1 %10555, %v10780_v60   ;;  %v15915_v39 = vpop.eup %10651  ;;  %v7444_v23 = vand.u32 2147483647, %v7428_v38  ;;  %10661 = vlog2.f32 %v4341_v62  ;;  %v15922_v60 = vand.u32 2147483647, %v7780_v2  ;;  %v9342_v52 = vmul.f32 %v4213_v32, %v4213_v32  ;;  %v17464_v2 = vld [vmem:[#allocation183_spill] sm:$0xff] }
 0x7c2   : > { %v15918_v22 = vadd.f32 %v15860_v19, %v7684_v45  ;;  %v7670_v21 = vand.u32 2147483647, %v7654_v42  ;;  %v15920_v50 = vpop.eup %10653  ;;  %10663 = vlog2.f32 %v4229_v9  ;;  %v4231_v41 = vadd.f32 1e-08, %v4215_v31  ;;  %v15933_v9 = vpop.permute.xlu0 %7830 }
 0x7c3   : > { %v7611_v1 = vpop.permute.xlu1 %7610  ;;  %v10656_v61 = vpop.eup %10655  ;;  %v15928_v19 = vmul.f32 0.75, %v9328_v6  ;;  %v4343_v38 = vadd.f32 1e-08, %v10648_v15  ;;  %v7574_v62 = vadd.f32 %v15699_v26, %v7458_v16  ;;  %v7430_v45 = vsub.f32 %v17464_v2, %v15279_v3  ;;  %v17466_v6 = vld [vmem:[#allocation195_spill] sm:$0xff] }
 0x7c4   : > { %17463 = vst [vmem:[#allocation216_spill] sm:$0xff] %v15918_v22  ;;  %v7686_v24 = vadd.f32 %v7670_v21, %v7570_v18  ;;  %v7656_v56 = vsub.f32 %v7611_v1, %v15536_v11  ;;  %v9344_v32 = vmul.f32 %v4215_v31, %v4215_v31  ;;  %v9330_v42 = vmul.f32 %v10650_v7, %v10650_v7 }
 0x7c5   : > { %8054 = vperm.xlu1 %10555, %v10781_v30   ;;  %v7460_v18 = vadd.f32 %v7444_v23, %v15719_v28  ;;  %v7882_v30 = vsub.f32 %v7819_v33, %v15789_v54  ;;  %v7432_v15 = vsub.f32 %v17466_v6, %v15279_v3  ;;  %10665 = vlog2.f32 %v4231_v41  ;;  %v10782_v28 = vld [vmem:[%s16417_s1 + $0x18] sm:$0xff] }
 0x7c6   : > { %v15937_v21 = vadd.f32 %v15877_v49, %v7686_v24  ;;  %v7672_v1 = vand.u32 2147483647, %v7656_v56  ;;  %v4217_v26 = vsub.f32 1.0, %v10650_v7  ;;  %v4143_v16 = vadd.f32 1.0, %v10656_v61  ;;  %v10658_v2 = vpop.eup %10657 }
 0x7c7   : > { %v7619_v22 = vpop.permute.xlu1 %7618  ;;  %v15946_v49 = vmul.f32 0.25, %v9342_v52  ;;  %10667 = vlog2.f32 %v4343_v38  ;;  %v7446_v33 = vand.u32 2147483647, %v7430_v45  ;;  %v15948_v23 = vmul.f32 0.25, %v9344_v32  ;;  %v15958_v52 = vpop.permute.xlu0 %7838 }
 0x7c8   : > { %17465 = vst [vmem:[#allocation227_spill] sm:$0xff] %v15937_v21  ;;  %v7688_v4 = vadd.f32 %v7672_v1, %v7572_v37  ;;  %v7658_v31 = vsub.f32 %v7619_v22, %v15536_v11  ;;  %v15950_v24 = vmul.f32 0.75, %v9330_v42  ;;  %v4345_v41 = vadd.f32 1e-08, %v10650_v7  ;;  %v17470_v21 = vld [vmem:[#allocation186_spill] sm:$0xff] }
 0x7c9   : > { %8058 = vperm.xlu1 %10555, %v10782_v28   ;;  %v7576_v61 = vadd.f32 %v15713_v51, %v7460_v18  ;;  %v15956_v56 = vand.u32 2147483647, %v7882_v30  ;;  %v10660_v1 = vpop.eup %10659  ;;  %v7448_v6 = vand.u32 2147483647, %v7432_v15  ;;  %v15960_v38 = vmul.f32 0.6931472, %v10658_v2 }
 0x7ca   : > { %v15954_v37 = vadd.f32 %v15881_v57, %v7688_v4  ;;  %v7674_v22 = vand.u32 2147483647, %v7658_v31  ;;  %v4233_v45 = vadd.f32 1e-08, %v4217_v26  ;;  %10669 = vrcp.f32 %v4143_v16  ;;  %v10783_v51 = vld [vmem:[%s16417_s1 + $0x28] sm:$0xff]  ;;  %v17468_v15 = vld [vmem:[#allocation202_spill] sm:$0xff] }
 0x7cb   : > { %v7627_v28 = vpop.permute.xlu1 %7626  ;;  %v10662_v32 = vpop.eup %10661  ;;  %v9346_v4 = vmul.f32 %v4217_v26, %v4217_v26  ;;  %v15967_v57 = vsub.f32 1.0, %v15915_v39  ;;  %v7462_v30 = vadd.f32 %v7446_v33, %v15729_v0  ;;  %v7534_v2 = vsub.f32 %v17468_v15, %v15431_v13 }
 0x7cc   : > { %17467 = vst [vmem:[#allocation218_spill] sm:$0xff] %v15954_v37  ;;  %v7690_v42 = vadd.f32 %v7674_v22, %v7574_v62  ;;  %v7660_v7 = vsub.f32 %v7627_v28, %v15536_v11  ;;  %v10664_v18 = vpop.eup %10663  ;;  %10671 = vlog2.f32 %v4345_v41  ;;  %v9332_v62 = vmul.f32 %v15915_v39, %v15915_v39 }
 0x7cd   : > { %8066 = vperm.xlu1 %10555, %v10783_v51   ;;  %v7885_v26 = vsub.f32 %v15933_v9, %v15789_v54  ;;  %v4358_v22 = vmul.f32 0.6931472, %v10660_v1  ;;  %v7464_v28 = vadd.f32 %v7448_v6, %v15746_v27  ;;  %v4275_v0 = vsub.f32 0.0, %v15960_v38 }
 0x7ce   : > { %v15975_v16 = vadd.f32 %v15884_v58, %v7690_v42  ;;  %v7676_v31 = vand.u32 2147483647, %v7660_v7  ;;  %v4362_v33 = vmul.f32 0.6931472, %v10662_v32  ;;  %10673 = vlog2.f32 %v4233_v45  ;;  %v10784_v58 = vld [vmem:[%s16417_s1 + $0x38] sm:$0xff] }
 0x7cf   : > { %v7635_v51 = vpop.permute.xlu1 %7634  ;;  %v4250_v42 = vmul.f32 0.6931472, %v10664_v18  ;;  %v4235_v7 = vadd.f32 1e-08, %v15967_v57  ;;  %v10666_v9 = vpop.eup %10665  ;;  %v7550_v1 = vand.u32 2147483647, %v7534_v2  ;;  %v7578_v45 = vadd.f32 %v15721_v43, %v7462_v30 }
 0x7d0   : > { %17469 = vst [vmem:[#allocation225_spill] sm:$0xff] %v15975_v16  ;;  %v7692_v15 = vadd.f32 %v7676_v31, %v7576_v61  ;;  %v7662_v41 = vsub.f32 %v7635_v51, %v15536_v11  ;;  %v15986_v16 = vpop.permute.xlu0 %7846  ;;  %v15988_v27 = vmul.f32 0.25, %v9346_v4  ;;  %v15990_v6 = vmul.f32 0.75, %v9332_v62 }
 0x7d1   : > { %8074 = vperm.xlu1 %10555, %v10784_v58   ;;  %v4347_v61 = vadd.f32 1e-08, %v15915_v39  ;;  %v10668_v38 = vpop.eup %10667  ;;  %v15997_v18 = vand.u32 2147483647, %v7885_v26  ;;  %v7580_v51 = vadd.f32 %v15731_v53, %v7464_v28  ;;  %v4387_v58 = vsub.f32 0.0, %v4358_v22 }
 0x7d2   : > { %v15995_v32 = vadd.f32 %v15889_v14, %v7692_v15  ;;  %v7678_v31 = vand.u32 2147483647, %v7662_v41  ;;  %v4389_v37 = vsub.f32 0.0, %v4362_v33  ;;  %v16001_v4 = vsub.f32 1.0, %v15920_v50 }
 0x7d3   : > { %v7643_v2 = vpop.permute.xlu1 %7642  ;;  %v4277_v43 = vsub.f32 0.0, %v4250_v42  ;;  %10675 = vlog2.f32 %v4235_v7  ;;  %v7566_v30 = vadd.f32 %v7550_v1, %v15765_v10  ;;  %v4254_v26 = vmul.f32 0.6931472, %v10666_v9 }
 0x7d4   : > { %v7694_v62 = vadd.f32 %v7678_v31, %v7578_v45  ;;  %v7664_v39 = vsub.f32 %v7643_v2, %v15536_v11  ;;  %v16005_v14 = vpop.eup %10669  ;;  %v4366_v15 = vmul.f32 0.6931472, %v10668_v38  ;;  %10677 = vlog2.f32 %v4347_v61  ;;  %v16017_v7 = vpop.permute.xlu0 %7854 }
 0x7d5   : > { %8082 = vperm.xlu1 %10555, %v17470_v21   ;;  %v7537_v53 = vsub.f32 %v15665_v34, %v15431_v13  ;;  %v4349_v33 = vadd.f32 1e-08, %v15920_v50  ;;  %v7887_v21 = vsub.f32 %v15958_v52, %v15789_v54  ;;  %v4291_v42 = vmul.f32 %v4275_v0, %v15896_v59 }
 0x7d6   : > { %v16011_v22 = vadd.f32 %v15902_v20, %v7694_v62  ;;  %v7680_v28 = vand.u32 2147483647, %v7664_v39  ;;  %v10672_v41 = vpop.eup %10671  ;;  %v16021_v10 = vmul.f32 %v15920_v50, %v15920_v50  ;;  %v4237_v34 = vadd.f32 1e-08, %v16001_v4  ;;  %v17471_v20 = vld [vmem:[#allocation192_spill] sm:$0xff] }
 0x7d7   : > { %v4403_v61 = vmul.f32 %v4387_v58, %v15909_v48  ;;  %v4405_v38 = vmul.f32 %v4389_v37, %v15946_v49  ;;  %v16028_v52 = vsub.f32 1.0, %v16005_v14  ;;  %v4293_v45 = vmul.f32 %v4277_v43, %v15913_v12  ;;  %v17472_v58 = vld [vmem:[#allocation199_spill] sm:$0xff] }
 0x7d8   : > { %v7696_v9 = vadd.f32 %v7680_v28, %v7580_v51  ;;  %v7703_v1 = vpop.permute.xlu1 %7702  ;;  %v10674_v59 = vpop.eup %10673  ;;  %v4279_v50 = vsub.f32 0.0, %v4254_v26  ;;  %v4391_v31 = vsub.f32 0.0, %v4366_v15  ;;  %v7682_v2 = vadd.f32 %v15754_v47, %v7566_v30 }
 0x7d9   : > { %8090 = vperm.xlu1 %10555, %v17471_v20   ;;  %v7766_v0 = vsub.f32 %v7703_v1, %v15651_v29  ;;  %v7553_v51 = vand.u32 2147483647, %v7537_v53  ;;  %10679 = vlog2.f32 %v4349_v33  ;;  %v7539_v48 = vsub.f32 %v15691_v8, %v15431_v13  ;;  %v16049_v53 = vpop.permute.xlu0 %7862 }
 0x7da   : > { %v16034_v62 = vadd.f32 %v15922_v60, %v7696_v9  ;;  %10681 = vlog2.f32 %v4237_v34  ;;  %v4351_v37 = vadd.f32 1e-08, %v16005_v14  ;;  %v4258_v12 = vmul.f32 0.6931472, %v10674_v59 }
 0x7db   : > { %v7782_v49 = vand.u32 2147483647, %v7766_v0  ;;  %v4370_v43 = vmul.f32 0.6931472, %v10672_v41  ;;  %v9348_v47 = vmul.f32 %v15967_v57, %v15967_v57  ;;  %v4239_v60 = vadd.f32 1e-08, %v16028_v52 }
 0x7dc   : > { %v16040_v39 = vpop.permute.xlu1 %7706  ;;  %v16045_v26 = vand.u32 2147483647, %v7887_v21  ;;  %v4419_v15 = vsub.f32 %v4403_v61, %v4291_v42  ;;  %v7889_v8 = vsub.f32 %v15986_v16, %v15789_v54  ;;  %v7541_v33 = vsub.f32 %v15735_v55, %v15431_v13  ;;  %v17473_v0 = vld [vmem:[#allocation203_spill] sm:$0xff] }
 0x7dd   : > { %8098 = vperm.xlu1 %10555, %v17472_v58   ;;  %v7798_v30 = vadd.f32 %v7782_v49, %v7682_v2  ;;  %v10676_v28 = vpop.eup %10675  ;;  %v4421_v34 = vsub.f32 %v4405_v38, %v4293_v45  ;;  %v7891_v41 = vsub.f32 %v16017_v7, %v15789_v54  ;;  %v4295_v57 = vmul.f32 %v4279_v50, %v15928_v19  ;;  %v17474_v2 = vld [vmem:[#allocation213_spill] sm:$0xff] }
 0x7de   : > { %v10678_v9 = vpop.eup %10677  ;;  %v7569_v21 = vadd.f32 %v7553_v51, %v15799_v36  ;;  %v7555_v20 = vand.u32 2147483647, %v7539_v48  ;;  %10683 = vlog2.f32 %v4351_v37  ;;  %v4407_v1 = vmul.f32 %v4391_v31, %v15948_v23  ;;  %v16069_v48 = vpop.permute.xlu0 %7870 }
 0x7df   : > { %v16058_v42 = vadd.f32 %v15956_v56, %v7798_v30  ;;  %v4281_v55 = vsub.f32 0.0, %v4258_v12  ;;  %v4393_v61 = vsub.f32 0.0, %v4370_v43  ;;  %10685 = vlog2.f32 %v4239_v60 }
 0x7e0   : > { %v7715_v16 = vpop.permute.xlu1 %7714  ;;  %v8163_v38 = vmul.f32 2.0, %v4419_v15  ;;  %v16063_v19 = vand.u32 2147483647, %v7889_v8  ;;  %v4262_v59 = vmul.f32 0.6931472, %v10676_v28  ;;  %v7543_v56 = vsub.f32 %v17473_v0, %v15431_v13 }
 0x7e1   : > { %8106 = vperm.xlu1 %10555, %v15662_v63   ;;  %v7769_v7 = vsub.f32 %v7715_v16, %v15651_v29  ;;  %v7557_v36 = vand.u32 2147483647, %v7541_v33  ;;  %v4331_v45 = vmul.f32 0.25, %v9348_v47  ;;  %v4374_v50 = vmul.f32 0.6931472, %v10678_v9 }
 0x7e2   : > { %v7685_v63 = vadd.f32 %v17474_v2, %v7569_v21  ;;  %v7571_v51 = vadd.f32 %v7555_v20, %v15821_v35  ;;  %v8165_v31 = vmul.f32 2.0, %v4421_v34  ;;  %v17475_v37 = vmov 0  }
 0x7e3   : > { %v7785_v23 = vand.u32 2147483647, %v7769_v7  ;;  %v10680_v49 = vpop.eup %10679  ;;  %v16072_v12 = vand.u32 2147483647, %v7891_v41  ;;  %v4423_v43 = vsub.f32 %v4407_v1, %v4295_v57  ;;  %v4297_v60 = vmul.f32 %v4281_v55, %v15950_v24  ;;  %v17476_v24 = vld [vmem:[#allocation205_spill] sm:$0xff] }
 0x7e4   : > { %v7723_v58 = vpop.permute.xlu1 %7722  ;;  %v4409_v47 = vmul.f32 %v4393_v61, %v15988_v27  ;;  %v10682_v30 = vpop.eup %10681  ;;  %v4283_v35 = vsub.f32 0.0, %v4262_v59  ;;  %v9350_v28 = vmul.f32 %v16001_v4, %v16001_v4  ;;  %v7573_v33 = vadd.f32 %v7557_v36, %v15829_v5 }
 0x7e5   : > { %10558 = vset.pattern.permute.xlu1 %v17475_v37  ;;  %v7801_v15 = vadd.f32 %v7785_v23, %v7685_v63  ;;  %v7771_v8 = vsub.f32 %v7723_v58, %v15651_v29  ;;  %v7559_v34 = vand.u32 2147483647, %v7543_v56  ;;  %v7545_v41 = vsub.f32 %v15783_v46, %v15431_v13  ;;  %v16090_v59 = vpop.permute.xlu0 %7930 }
 0x7e6   : > { %8200 = vperm.xlu1 %10558, %v15892_v44   ;;  %v4395_v57 = vsub.f32 0.0, %v4374_v50  ;;  %v7687_v9 = vadd.f32 %v17476_v24, %v7571_v51  ;;  %v4378_v20 = vmul.f32 0.6931472, %v10680_v49  ;;  %v8167_v44 = vmul.f32 2.0, %v4423_v43  ;;  %v17478_v43 = vld [vmem:[#allocation217_spill] sm:$0xff] }
 0x7e7   : > { %v16085_v27 = vadd.f32 %v15997_v18, %v7801_v15  ;;  %v7787_v21 = vand.u32 2147483647, %v7771_v8  ;;  %v4425_v1 = vsub.f32 %v4409_v47, %v4297_v60  ;;  %v4205_v55 = vmul.f32 0.75, %v16021_v10  ;;  %v17479_v47 = vld [vmem:[#allocation219_spill] sm:$0xff] }
 0x7e8   : > { %v7731_v16 = vpop.permute.xlu1 %7730  ;;  %v4266_v4 = vmul.f32 0.6931472, %v10682_v30  ;;  %v10684_v61 = vpop.eup %10683  ;;  %v4299_v46 = vmul.f32 %v4283_v35, %v15990_v6  ;;  %v4333_v36 = vmul.f32 0.25, %v9350_v28  ;;  %v7689_v0 = vadd.f32 %v15781_v40, %v7573_v33  ;;  %v17481_v28 = vld [vmem:[#allocation212_spill] sm:$0xff] }
 0x7e9   : > { %v7803_v5 = vadd.f32 %v7787_v21, %v7687_v9  ;;  %v7773_v7 = vsub.f32 %v7731_v16, %v15651_v29  ;;  %v10686_v18 = vpop.eup %10685  ;;  %v7575_v56 = vadd.f32 %v7559_v34, %v15832_v17  ;;  %v7561_v50 = vand.u32 2147483647, %v7545_v41  ;;  %v16106_v58 = vpop.permute.xlu0 %7942  ;;  %v17482_v16 = vld [vmem:[#allocation206_spill] sm:$0xff] }
 0x7ea   : > { %8205 = vperm.xlu1 %10558, %v8163_v38   ;;  %v4411_v2 = vmul.f32 %v4395_v57, %v4331_v45  ;;  %v7547_v10 = vsub.f32 %v15813_v25, %v15431_v13  ;;  %v4397_v38 = vsub.f32 0.0, %v4378_v20  ;;  %v7893_v6 = vsub.f32 %v16049_v53, %v15789_v54 }
 0x7eb   : > { %v16097_v63 = vadd.f32 %v16045_v26, %v7803_v5  ;;  %v7789_v51 = vand.u32 2147483647, %v7773_v7  ;;  %v4285_v49 = vsub.f32 0.0, %v4266_v4  ;;  %v9336_v40 = vmul.f32 %v16005_v14, %v16005_v14 }
 0x7ec   : > { %v7739_v23 = vpop.permute.xlu1 %7738  ;;  %v9352_v17 = vmul.f32 %v16028_v52, %v16028_v52  ;;  %v4270_v25 = vmul.f32 0.6931472, %v10686_v18  ;;  %v4382_v26 = vmul.f32 0.6931472, %v10684_v61  ;;  %v7691_v60 = vadd.f32 %v17478_v43, %v7575_v56 }
 0x7ed   : > { %17477 = vst [vmem:[#allocation229_spill] sm:$0xff] %v16097_v63  ;;  %v7805_v45 = vadd.f32 %v7789_v51, %v7689_v0  ;;  %v7775_v37 = vsub.f32 %v7739_v23, %v15651_v29  ;;  %v7577_v30 = vadd.f32 %v7561_v50, %v17479_v47  ;;  %v8169_v53 = vmul.f32 2.0, %v4425_v1  ;;  %v17483_v1 = vld [vmem:[#allocation214_spill] sm:$0xff]  ;;  %v16127_v56 = vpop.permute.xlu0 %7950  ;;  %v17488_v50 = vld [vmem:[#allocation211_spill] sm:$0xff] }
 0x7ee   : > { %8215 = vperm.xlu1 %10558, %v8165_v31   ;;  %v4427_v15 = vsub.f32 %v4411_v2, %v4299_v46  ;;  %v7563_v8 = vand.u32 2147483647, %v7547_v10  ;;  %v4413_v52 = vmul.f32 %v4397_v38, %v4333_v36  ;;  %v7649_v33 = vsub.f32 %v17481_v28, %v15536_v11  ;;  %v17485_v46 = vld [vmem:[#allocation207_spill] sm:$0xff]  ;;  %v17486_v36 = vld [vmem:[#allocation221_spill] sm:$0xff] }
 0x7ef   : > { %v16111_v14 = vadd.f32 %v16063_v19, %v7805_v45  ;;  %v7791_v35 = vand.u32 2147483647, %v7775_v37  ;;  %v4301_v34 = vmul.f32 %v4285_v49, %v4205_v55  ;;  %v4207_v41 = vmul.f32 0.75, %v9336_v40  ;;  %v17484_v19 = vld [vmem:[#allocation182_spill] sm:$0xff]  ;;  %v17489_v40 = vld [vmem:[#allocation201_spill] sm:$0xff] }
 0x7f0   : > { %v7747_v31 = vpop.permute.xlu1 %7746  ;;  %v4335_v57 = vmul.f32 0.25, %v9352_v17  ;;  %v4287_v21 = vsub.f32 0.0, %v4270_v25  ;;  %v4399_v20 = vsub.f32 0.0, %v4382_v26  ;;  %v7449_v4 = vadd.f32 %v17483_v1, %v17482_v16  ;;  %v17490_v17 = vld [vmem:[#allocation208_spill] sm:$0xff]  ;;  %v17491_v45 = vld [vmem:[#allocation197_spill] sm:$0xff]  ;;  %v17492_v26 = vld [vmem:[#allocation223_spill] sm:$0xff] }
 0x7f1   : > { %17480 = vst [vmem:[#allocation220_spill] sm:$0xff] %v16111_v14  ;;  %v7807_v24 = vadd.f32 %v7791_v35, %v7691_v60  ;;  %v7777_v9 = vsub.f32 %v7747_v31, %v15651_v29  ;;  %v7419_v61 = vsub.f32 %v17484_v19, %v15279_v3  ;;  %v7909_v5 = vand.u32 2147483647, %v7893_v6 }
 0x7f2   : > { %8225 = vperm.xlu1 %10558, %v8167_v44   ;;  %v7895_v7 = vsub.f32 %v16069_v48, %v15789_v54  ;;  %v7693_v55 = vadd.f32 %v17485_v46, %v7577_v30  ;;  %v7579_v18 = vadd.f32 %v7563_v8, %v17486_v36  ;;  %v7535_v2 = vsub.f32 %v17488_v50, %v15431_v13  ;;  %v17493_v13 = vld [vmem:[#allocation209_spill] sm:$0xff] }
 0x7f3   : > { %v16125_v0 = vadd.f32 %v16072_v12, %v7807_v24  ;;  %v7793_v44 = vand.u32 2147483647, %v7777_v9  ;;  %v7665_v10 = vand.u32 2147483647, %v7649_v33  ;;  %v8171_v3 = vmul.f32 2.0, %v4427_v15 }
 0x7f4   : > { %v7755_v51 = vpop.permute.xlu1 %7754  ;;  %v4429_v38 = vsub.f32 %v4413_v52, %v4301_v34  ;;  %v4303_v6 = vmul.f32 %v4287_v21, %v4207_v41  ;;  %v4415_v49 = vmul.f32 %v4399_v20, %v4335_v57  ;;  %v7335_v12 = vadd.f32 %v17490_v17, %v17489_v40  ;;  %v16145_v57 = vpop.permute.xlu0 %7958 }
 0x7f5   : > { %17487 = vst [vmem:[#allocation222_spill] sm:$0xff] %v16125_v0  ;;  %v7809_v23 = vadd.f32 %v7793_v44, %v7693_v55  ;;  %v7779_v48 = vsub.f32 %v7755_v51, %v15651_v29  ;;  %v7565_v37 = vadd.f32 %v17491_v45, %v7449_v4  ;;  %v7435_v25 = vand.u32 2147483647, %v7419_v61  ;;  %v10795_v0 = vld [vmem:[#allocation2 + $0x20] sm:$0xff] }
 0x7f6   : > { %8235 = vperm.xlu1 %10558, %v8169_v53   ;;  %v7651_v43 = vsub.f32 %v17492_v26, %v15536_v11  ;;  %v7695_v60 = vadd.f32 %v17493_v13, %v7579_v18  ;;  %v7911_v15 = vand.u32 2147483647, %v7895_v7  ;;  %v7551_v8 = vand.u32 2147483647, %v7535_v2  ;;  %v17495_v53 = vld [vmem:[#allocation194_spill] sm:$0xff] }
 0x7f7   : > { %v16138_v47 = vadd.f32 %v7909_v5, %v7809_v23  ;;  %v7795_v30 = vand.u32 2147483647, %v7779_v48  ;;  %v7681_v35 = vadd.f32 %v7665_v10, %v7565_v37  ;;  %v17496_v52 = vsub.f32 %v17495_v53, %v15651_v29 }
 0x7f8   : > { %v7767_v33 = vsub.f32 %v16040_v39, %v15651_v29  ;;  %v8173_v41 = vmul.f32 2.0, %v4429_v38  ;;  %v4431_v11 = vsub.f32 %v4415_v49, %v4303_v6  ;;  %v7451_v24 = vadd.f32 %v7435_v25, %v7335_v12  ;;  %v16153_v46 = vpop.permute.xlu0 %7966  ;;  %v17499_v49 = vld [vmem:[#allocation227_spill] sm:$0xff]  ;;  %v17500_v25 = vld [vmem:[#allocation218_spill] sm:$0xff] }
 0x7f9   : > { %17494 = vst [vmem:[#allocation231_spill] sm:$0xff] %v16138_v47  ;;  %v7781_v28 = vand.u32 2147483647, %v17496_v52  ;;  %v7811_v31 = vadd.f32 %v7795_v30, %v7695_v60  ;;  %v7815_v34 = vpop.permute.xlu1 %7814  ;;  %v7667_v9 = vand.u32 2147483647, %v7651_v43 }
 0x7fa   : > { %8245 = vperm.xlu1 %10558, %v8171_v3   ;;  %v7881_v21 = vsub.f32 %v7815_v34, %v15789_v54  ;;  %v7567_v16 = vadd.f32 %v7551_v8, %v7451_v24  ;;  %v7783_v4 = vand.u32 2147483647, %v7767_v33  ;;  %v8175_v29 = vmul.f32 2.0, %v4431_v11  ;;  %v17498_v3 = vld [vmem:[#allocation216_spill] sm:$0xff] }
 0x7fb   : > { %v16148_v20 = vadd.f32 %v7911_v15, %v7811_v31  ;;  %v7797_v1 = vadd.f32 %v7781_v28, %v7681_v35  ;;  %v17501_v15 = vld [vmem:[#allocation225_spill] sm:$0xff] }
 0x7fc   : > { %v7897_v19 = vand.u32 2147483647, %v7881_v21  ;;  %v7683_v39 = vadd.f32 %v7667_v9, %v7567_v16  ;;  %v16158_v51 = vpop.permute.xlu0 %7974 }
 0x7fd   : > { %17497 = vst [vmem:[#allocation233_spill] sm:$0xff] %v16148_v20  ;;  %v7823_v61 = vpop.permute.xlu1 %7822  ;;  %v17520_v20 = vld [vmem:[#allocation37_spill] sm:$0xff] }
 0x7fe   : > { %8255 = vperm.xlu1 %10558, %v8173_v41   ;;  %v16150_v5 = vadd.f32 %v7897_v19, %v7797_v1  ;;  %v7883_v7 = vsub.f32 %v7823_v61, %v15789_v54  ;;  %v7799_v55 = vadd.f32 %v7783_v4, %v7683_v39 }
 0x800   : > { %v7899_v36 = vand.u32 2147483647, %v7883_v7  ;;  %v16168_v12 = vpop.permute.xlu0 %7982  ;;  %v17504_v7 = vld [vmem:[#allocation19_spill] sm:$0xff] }
 0x801   : > { %v7827_v18 = vpop.permute.xlu1 %7826 }
 0x802   : > { %8265 = vperm.xlu1 %10558, %v8175_v29   ;;  %v16155_v44 = vadd.f32 %v7899_v36, %v7799_v55  ;;  %v7884_v50 = vsub.f32 %v7827_v18, %v15789_v54  ;;  %v17506_v36 = vld [vmem:[#allocation20_spill] sm:$0xff] }
 0x804   : > { %v7900_v2 = vand.u32 2147483647, %v7884_v50  ;;  %v16174_v30 = vpop.permute.xlu0 %7990 }
 0x806   : > { %v7835_v10 = vpop.permute.xlu1 %7834  ;;  %v16161_v38 = vadd.f32 %v7900_v2, %v17498_v3  ;;  %v17507_v3 = vld [vmem:[#allocation21_spill] sm:$0xff] }
 0x807   : > { %v7886_v23 = vsub.f32 %v7835_v10, %v15789_v54 }
 0x808   : > { %v16184_v31 = vpop.permute.xlu0 %8050 }
 0x809   : > { %v7902_v48 = vand.u32 2147483647, %v7886_v23 }
 0x80a   : > { %v7843_v6 = vpop.permute.xlu1 %7842 }
 0x80b   : > { %v16165_v40 = vadd.f32 %v7902_v48, %v17499_v49  ;;  %v7888_v17 = vsub.f32 %v7843_v6, %v15789_v54  ;;  %v17508_v48 = vld [vmem:[#allocation22_spill] sm:$0xff] }
 0x80c   : > { %v16190_v9 = vpop.permute.xlu0 %8062 }
 0x80d   : > { %v7904_v45 = vand.u32 2147483647, %v7888_v17  ;;  %v17509_v17 = vld [vmem:[#allocation23_spill] sm:$0xff] }
 0x80e   : > { %v7851_v37 = vpop.permute.xlu1 %7850 }
 0x80f   : > { %v16171_v26 = vadd.f32 %v7904_v45, %v17500_v25  ;;  %v7890_v43 = vsub.f32 %v7851_v37, %v15789_v54  ;;  %v17511_v25 = vld [vmem:[#allocation24_spill] sm:$0xff] }
 0x811   : > { %v7906_v13 = vand.u32 2147483647, %v7890_v43 }
 0x812   : > { %v7859_v60 = vpop.permute.xlu1 %7858 }
 0x813   : > { %v16177_v8 = vadd.f32 %v7906_v13, %v17501_v15  ;;  %v7892_v35 = vsub.f32 %v7859_v60, %v15789_v54  ;;  %v17513_v15 = vld [vmem:[#allocation25_spill] sm:$0xff] }
 0x815   : > { %v7908_v53 = vand.u32 2147483647, %v7892_v35 }
 0x816   : > { %v7867_v52 = vpop.permute.xlu1 %7866 }
 0x817   : > { %v16181_v28 = vadd.f32 %v7908_v53, %v15995_v32  ;;  %v7894_v33 = vsub.f32 %v7867_v52, %v15789_v54  ;;  %v16197_v32 = vpop.permute.xlu0 %8070 }
 0x819   : > { %v7910_v34 = vand.u32 2147483647, %v7894_v33  ;;  %v17514_v33 = vld [vmem:[#allocation301_spill] sm:$0xff] }
 0x81a   : > { %v7875_v41 = vpop.permute.xlu1 %7874 }
 0x81b   : > { %v16187_v11 = vadd.f32 %v7910_v34, %v16011_v22  ;;  %v7896_v24 = vsub.f32 %v7875_v41, %v15789_v54  ;;  %v16203_v61 = vpop.permute.xlu0 %8078  ;;  %v16205_v22 = vld [vmem:[#allocation6] ss:$0 sm:$0xff]  ;;  %v17503_v54 = vld [vmem:[#allocation56_spill] sm:$0xff]  ;;  %v17515_v34 = vld [vmem:[#allocation215_spill] sm:$0xff] }
 0x81c   : > { %17502 = vst [vmem:[#allocation224_spill] sm:$0xff] %v16203_v61  ;;  %v3965_v39 = vadd.f32 %v16205_v22, %v17503_v54  ;;  %v3968_v18 = vadd.f32 %v16205_v22, %v17506_v36  ;;  %v3970_v23 = vadd.f32 %v16205_v22, %v17507_v3  ;;  %v3972_v6 = vadd.f32 %v16205_v22, %v17508_v48  ;;  %v10789_v48 = vld [vmem:[#allocation2 + $0x38] sm:$0xff] }
 0x81d   : > { %v7912_v21 = vand.u32 2147483647, %v7896_v24  ;;  %v3974_v45 = vadd.f32 %v16205_v22, %v17509_v17  ;;  %v3976_v43 = vadd.f32 %v16205_v22, %v17511_v25  ;;  %v3978_v35 = vadd.f32 %v16205_v22, %v17513_v15 }
 0x81e   : > { %v3981_v2 = vadd.f32 1.0, %v3965_v39  ;;  %v3984_v49 = vadd.f32 1.0, %v3968_v18  ;;  %v3986_v60 = vadd.f32 1.0, %v3970_v23  ;;  %v3988_v53 = vadd.f32 1.0, %v3972_v6  ;;  %v10785_v39 = vld [vmem:[#allocation2] sm:$0xff]  ;;  %v10787_v18 = vld [vmem:[#allocation2 + $0x18] sm:$0xff] }
 0x81f   : > { %v16193_v16 = vadd.f32 %v7912_v21, %v16034_v62  ;;  %v16195_v1 = vpop.permute.xlu1 %7934  ;;  %v3967_v62 = vadd.f32 %v16205_v22, %v17504_v7  ;;  %v16213_v55 = vpop.permute.xlu0 %8086  ;;  %v3990_v52 = vadd.f32 1.0, %v3974_v45  ;;  %v16235_v41 = vrot.slane %v17515_v34, %v17514_v33  ;;  %v10790_v45 = vld [vmem:[#allocation2 + $0x48] sm:$0xff] }
 0x820   : > { %17505 = vst [vmem:[#allocation235_spill] sm:$0xff] %v16213_v55  ;;  %10687 = vrcp.f32 %v3981_v2  ;;  %v3992_v21 = vadd.f32 1.0, %v3976_v43  ;;  %v3994_v54 = vadd.f32 1.0, %v3978_v35  ;;  %v3847_v7 = vmul.f32 2.0, %v10785_v39 }
 0x821   : > { %v3983_v10 = vadd.f32 1.0, %v3967_v62  ;;  %v10786_v62 = vld [vmem:[#allocation2 + $0x10] sm:$0xff]  ;;  %v3850_v2 = vmul.f32 2.0, %v10787_v18  ;;  %v3854_v6 = vmul.f32 2.0, %v10789_v48  ;;  %v3856_v25 = vmul.f32 2.0, %v10790_v45  ;;  %v10793_v45 = vld [vmem:[#allocation2 + $0x78] sm:$0xff] }
 0x822   : > { %v3849_v36 = vmul.f32 2.0, %v10786_v62  ;;  %v3863_v43 = vadd.f32 1.0, %v3847_v7  ;;  %v16249_v47 = vrot.slane %v17515_v34, %v17520_v20  ;;  %v10796_v20 = vld [vmem:[#allocation2 + $0x30] sm:$0xff] }
 0x823   : > { %v16199_v4 = vpop.permute.xlu1 %7938  ;;  %v16229_v13 = vpop.permute.xlu0 %8094  ;;  %10689 = vrcp.f32 %v3983_v10  ;;  %v10788_v10 = vld [vmem:[#allocation2 + $0x28] sm:$0xff]  ;;  %v3866_v35 = vadd.f32 1.0, %v3850_v2  ;;  %v17521_v2 = vld [vmem:[#allocation58_spill] sm:$0xff]  ;;  %v3853_v34 = vmul.f32 2.0, %v10796_v20 }
 0x824   : > { %17512 = vst [vmem:[#allocation228_spill] sm:$0xff] %v16229_v13  ;;  %10691 = vrcp.f32 %v3984_v49  ;;  %v3852_v3 = vmul.f32 2.0, %v10788_v10  ;;  %v7997_v49 = vsub.f32 %v16090_v59, %v16235_v41  ;;  %v3865_v15 = vadd.f32 1.0, %v3849_v36 }
 0x825   : > { %10693 = vrcp.f32 %v3986_v60  ;;  %v3870_v10 = vadd.f32 1.0, %v3854_v6  ;;  %v3862_v36 = vmul.f32 2.0, %v10793_v45  ;;  %v3851_v13 = vmul.f32 2.0, %v10795_v0 }
 0x826   : > { %10695 = vrcp.f32 %v3988_v53  ;;  %v3868_v33 = vadd.f32 1.0, %v3852_v3  ;;  %v10791_v53 = vld [vmem:[#allocation2 + $0x58] sm:$0xff]  ;;  %v8013_v59 = vand.u32 2147483647, %v7997_v49  ;;  %v3966_v3 = vadd.f32 %v16205_v22, %v17521_v2 }
 0x827   : > { %v16201_v19 = vpop.permute.xlu1 %7946  ;;  %v16239_v23 = vpop.permute.xlu0 %8102  ;;  %10697 = vrcp.f32 %v3990_v52  ;;  %v3858_v39 = vmul.f32 2.0, %v10791_v53  ;;  %v17519_v52 = vld [vmem:[#allocation26_spill] sm:$0xff]  ;;  %v8000_v2 = vsub.f32 %v16106_v58, %v16235_v41  ;;  %v16257_v0 = vadd.f32 1.0, %v3862_v36 }
 0x828   : > { %17517 = vst [vmem:[#allocation230_spill] sm:$0xff] %v16239_v23  ;;  %10699 = vrcp.f32 %v3992_v21  ;;  %v3980_v48 = vadd.f32 %v16205_v22, %v17519_v52  ;;  %v3872_v21 = vadd.f32 1.0, %v3856_v25  ;;  %v10797_v25 = vld [vmem:[#allocation2 + $0x40] sm:$0xff] }
 0x829   : > { %10701 = vrcp.f32 %v3994_v54  ;;  %v10792_v54 = vld [vmem:[#allocation2 + $0x68] sm:$0xff]  ;;  %v3855_v55 = vmul.f32 2.0, %v10797_v25 }
 0x82a   : > { %v10688_v60 = vpop.eup %10687  ;;  %v3860_v7 = vmul.f32 2.0, %v10792_v54  ;;  %v3996_v45 = vadd.f32 1.0, %v3980_v48 }
 0x82b   : > { %v16207_v29 = vpop.permute.xlu1 %7954  ;;  %v8196_v62 = vpop.permute.xlu0 %8195  ;;  %v3998_v52 = vmul.f32 %v10688_v60, %v3863_v43  ;;  %v16267_v58 = vadd.f32 1.0, %v3855_v55 }
 0x82c   : > { %v3876_v61 = vadd.f32 1.0, %v3860_v7  ;;  %v8002_v7 = vsub.f32 %v16127_v56, %v16235_v41  ;;  %10703 = vrcp.f32 %v3996_v45 }
 0x82d   : > { %v10690_v18 = vpop.eup %10689  ;;  %17524 = vst [vmem:[#allocation71_spill] sm:$0xff] %v16267_v58  ;;  %v10798_v58 = vld [vmem:[#allocation2 + $0x50] sm:$0xff] }
 0x82e   : > { %v10692_v23 = vpop.eup %10691  ;;  %v4002_v54 = vmul.f32 %v10690_v18, %v3865_v15  ;;  %v16263_v15 = vadd.f32 1.0, %v3851_v13  ;;  %v8018_v56 = vand.u32 2147483647, %v8002_v7 }
 0x82f   : > { %v16217_v50 = vpop.permute.xlu1 %7962  ;;  %v10694_v14 = vpop.eup %10693  ;;  %v4004_v60 = vmul.f32 %v10692_v23, %v3866_v35  ;;  %v8016_v23 = vand.u32 2147483647, %v8000_v2 }
 0x830   : > { %17522 = vst [vmem:[#allocation241_spill] sm:$0xff] %v16263_v15  ;;  %v4008_v36 = vmul.f32 %v10694_v14, %v3868_v33 }
 0x831   : > { %v4032_v13 = vsub.f32 1.0, %v4004_v60  ;;  %v8032_v2 = vadd.f32 %v8016_v23, %v16161_v38  ;;  %v17526_v38 = vld [vmem:[#allocation62_spill] sm:$0xff] }
 0x832   : > { %v4034_v14 = vsub.f32 1.0, %v4008_v36 }
 0x833   : > { %v16225_v37 = vpop.permute.xlu1 %7970 }
 0x834   : > { %17510 = vst [vmem:[#allocation226_spill] sm:$0xff] %v16225_v37  ;;  %v8029_v37 = vadd.f32 %v8013_v59, %v16150_v5  ;;  %v4029_v5 = vsub.f32 1.0, %v3998_v52  ;;  %v16265_v59 = vadd.f32 1.0, %v3853_v34  ;;  %v8294_v7 = vmul.f32 2.0, %v4034_v14 }
 0x836   : > { %17523 = vst [vmem:[#allocation232_spill] sm:$0xff] %v16265_v59  ;;  %v8289_v34 = vmul.f32 2.0, %v4029_v5  ;;  %v16272_v59 = vmul.f32 2.0, %v10798_v58  ;;  %v3971_v58 = vadd.f32 %v16205_v22, %v17526_v38 }
 0x837   : > { %v16237_v24 = vpop.permute.xlu1 %7978 }
 0x838   : > { %17516 = vst [vmem:[#allocation237_spill] sm:$0xff] %v16237_v24  ;;  %v3874_v24 = vadd.f32 1.0, %v3858_v39  ;;  %v8211_v39 = vpop.permute.xlu0 %8210 }
 0x83b   : > { %v16243_v17 = vpop.permute.xlu1 %7986 }
 0x83c   : > { %17518 = vst [vmem:[#allocation239_spill] sm:$0xff] %v16243_v17  ;;  %v10794_v17 = vld [vmem:[#allocation2 + $0x8] sm:$0xff]  ;;  %v8221_v33 = vpop.permute.xlu0 %8220 }
 0x83d   : > { %v3848_v6 = vmul.f32 2.0, %v10794_v17  ;;  %v10696_v17 = vpop.eup %10695 }
 0x83e   : > { %v10698_v20 = vpop.eup %10697  ;;  %v4012_v15 = vmul.f32 %v10696_v17, %v3870_v10 }
 0x83f   : > { %v16261_v25 = vadd.f32 1.0, %v3848_v6  ;;  %v10700_v48 = vpop.eup %10699 }
 0x840   : > { %v8047_v53 = vpop.permute.xlu1 %8046  ;;  %v4020_v55 = vmul.f32 %v10700_v48, %v3874_v24  ;;  %v4036_v60 = vsub.f32 1.0, %v4012_v15 }
 0x841   : > { %v8113_v49 = vsub.f32 %v8047_v53, %v16249_v47  ;;  %v3982_v53 = vadd.f32 1.0, %v3966_v3  ;;  %v10702_v3 = vpop.eup %10701 }
 0x842   : > { %v4024_v45 = vmul.f32 %v10702_v3, %v3876_v61  ;;  %v8292_v61 = vmul.f32 2.0, %v4032_v13  ;;  %v4040_v48 = vsub.f32 1.0, %v4020_v55  ;;  %v8034_v3 = vadd.f32 %v8018_v56, %v16165_v40  ;;  %v10704_v55 = vpop.eup %10703 }
 0x843   : > { %v8129_v63 = vand.u32 2147483647, %v8113_v49  ;;  %v4031_v49 = vsub.f32 1.0, %v4002_v54  ;;  %10705 = vrcp.f32 %v3982_v53  ;;  %v8004_v54 = vsub.f32 %v16145_v57, %v16235_v41 }
 0x844   : > { %v16259_v43 = vpop.permute.xlu1 %8054  ;;  %v8006_v57 = vsub.f32 %v16153_v46, %v16235_v41  ;;  %v4042_v36 = vsub.f32 1.0, %v4024_v45  ;;  %v8296_v13 = vmul.f32 2.0, %v4036_v60  ;;  %v16292_v45 = vmul.f32 2.0, %v4040_v48 }
 0x845   : > { %v8145_v18 = vadd.f32 %v8129_v63, %v8029_v37  ;;  %v4016_v63 = vmul.f32 %v10698_v20, %v3872_v21  ;;  %v17525_v21 = vld [vmem:[#allocation60_spill] sm:$0xff]  ;;  %v16279_v20 = vmul.f32 2.0, %v4031_v49  ;;  %v8020_v15 = vand.u32 2147483647, %v8004_v54 }
 0x846   : > { %v3969_v17 = vadd.f32 %v16205_v22, %v17525_v21  ;;  %v3987_v56 = vadd.f32 1.0, %v3971_v58  ;;  %v8022_v54 = vand.u32 2147483647, %v8006_v57 }
 0x847   : > { %v8177_v35 = vmul.f32 5.0, %v8145_v18  ;;  %v4038_v24 = vsub.f32 1.0, %v4016_v63  ;;  %v8036_v21 = vadd.f32 %v8020_v15, %v16171_v26  ;;  %v17528_v26 = vld [vmem:[#allocation66_spill] sm:$0xff] }
 0x848   : > { %v8059_v6 = vpop.permute.xlu1 %8058  ;;  %v3985_v49 = vadd.f32 1.0, %v3969_v17 }
 0x849   : > { %v8116_v37 = vsub.f32 %v8059_v6, %v16249_v47  ;;  %v8273_v52 = vadd.f32 %v8196_v62, %v8177_v35  ;;  %v17527_v6 = vld [vmem:[#allocation64_spill] sm:$0xff] }
 0x84a   : > { %v3973_v63 = vadd.f32 %v16205_v22, %v17527_v6  ;;  %10707 = vrcp.f32 %v3985_v49 }
 0x84b   : > { %v8132_v53 = vand.u32 2147483647, %v8116_v37  ;;  %v8305_v10 = vadd.f32 %v8289_v34, %v8273_v52  ;;  %v8231_v52 = vpop.permute.xlu0 %8230  ;;  %v16289_v34 = vmul.f32 2.0, %v4038_v24  ;;  %v7998_v24 = vsub.f32 %v16195_v1, %v16235_v41 }
 0x84c   : > { %v8067_v62 = vpop.permute.xlu1 %8066  ;;  %10709 = vrcp.f32 %v3987_v56 }
 0x84d   : > { %8321 = vst [vmem:[#allocation10] sm:$0xff] %v8305_v10  ;;  %v8118_v18 = vsub.f32 %v8067_v62, %v16249_v47  ;;  %v8148_v5 = vadd.f32 %v8132_v53, %v8032_v2  ;;  %v10706_v40 = vpop.eup %10705  ;;  %v8008_v53 = vsub.f32 %v16158_v51, %v16235_v41  ;;  %v16296_v10 = vmul.f32 2.0, %v4042_v36 }
 0x84e   : > { %v4000_v58 = vmul.f32 %v10706_v40, %v16261_v25  ;;  %v8010_v36 = vsub.f32 %v16168_v12, %v16235_v41 }
 0x84f   : > { %v8134_v23 = vand.u32 2147483647, %v8118_v18  ;;  %v8180_v35 = vmul.f32 5.0, %v8148_v5  ;;  %v16302_v5 = vmul.f32 %v10704_v55, %v16257_v0  ;;  %v8024_v57 = vand.u32 2147483647, %v8008_v53  ;;  %v8241_v1 = vpop.permute.xlu0 %8240 }
 0x850   : > { %v8075_v37 = vpop.permute.xlu1 %8074  ;;  %v4030_v12 = vsub.f32 1.0, %v4000_v58  ;;  %v8115_v53 = vsub.f32 %v16259_v43, %v16249_v47 }
 0x851   : > { %v8276_v2 = vadd.f32 %v8211_v39, %v8180_v35  ;;  %v8120_v46 = vsub.f32 %v8075_v37, %v16249_v47  ;;  %v8150_v14 = vadd.f32 %v8134_v23, %v8034_v3  ;;  %v3989_v39 = vadd.f32 1.0, %v3973_v63 }
 0x852   : > { %v8038_v3 = vadd.f32 %v8022_v54, %v16177_v8  ;;  %v8114_v35 = vsub.f32 %v16184_v31, %v16249_v47  ;;  %v4044_v49 = vsub.f32 1.0, %v16302_v5  ;;  %v8012_v8 = vsub.f32 %v16174_v30, %v16235_v41 }
 0x853   : > { %v8308_v17 = vadd.f32 %v8292_v61, %v8276_v2  ;;  %v8136_v62 = vand.u32 2147483647, %v8120_v46  ;;  %v8182_v60 = vmul.f32 5.0, %v8150_v14  ;;  %v3975_v61 = vadd.f32 %v16205_v22, %v17528_v26 }
 0x854   : > { %v8083_v18 = vpop.permute.xlu1 %8082  ;;  %10711 = vrcp.f32 %v3989_v39  ;;  %v8026_v2 = vand.u32 2147483647, %v8010_v36  ;;  %v8040_v46 = vadd.f32 %v8024_v57, %v16181_v28  ;;  %v8001_v54 = vsub.f32 %v16201_v19, %v16235_v41  ;;  %v17529_v57 = vld [vmem:[#allocation68_spill] sm:$0xff] }
 0x855   : > { %8324 = vst [vmem:[#allocation10 + $0x18] sm:$0xff] %v8308_v17  ;;  %v8278_v48 = vadd.f32 %v8221_v33, %v8182_v60  ;;  %v8122_v51 = vsub.f32 %v8083_v18, %v16249_v47  ;;  %v8152_v38 = vadd.f32 %v8136_v62, %v8036_v21  ;;  %v8014_v33 = vand.u32 2147483647, %v7998_v24  ;;  %v8251_v17 = vpop.permute.xlu0 %8250 }
 0x856   : > { %v3991_v55 = vadd.f32 1.0, %v3975_v61  ;;  %v8290_v28 = vmul.f32 2.0, %v4030_v12  ;;  %v8028_v60 = vand.u32 2147483647, %v8012_v8  ;;  %v8042_v19 = vadd.f32 %v8026_v2, %v16187_v11  ;;  %v17530_v2 = vld [vmem:[#allocation70_spill] sm:$0xff] }
 0x857   : > { %v8310_v0 = vadd.f32 %v8294_v7, %v8278_v48  ;;  %v8138_v15 = vand.u32 2147483647, %v8122_v51  ;;  %v8184_v23 = vmul.f32 5.0, %v8152_v38  ;;  %v7999_v7 = vsub.f32 %v16199_v4, %v16235_v41 }
 0x858   : > { %v8091_v25 = vpop.permute.xlu1 %8090  ;;  %v8030_v56 = vadd.f32 %v8014_v33, %v16058_v42  ;;  %10713 = vrcp.f32 %v3991_v55  ;;  %v8003_v42 = vsub.f32 %v16207_v29, %v16235_v41  ;;  %v8017_v51 = vand.u32 2147483647, %v8001_v54 }
 0x859   : > { %8326 = vst [vmem:[#allocation10 + $0x28] sm:$0xff] %v8310_v0  ;;  %v8280_v6 = vadd.f32 %v8231_v52, %v8184_v23  ;;  %v8124_v63 = vsub.f32 %v8091_v25, %v16249_v47  ;;  %v8154_v37 = vadd.f32 %v8138_v15, %v8038_v3  ;;  %v8130_v52 = vand.u32 2147483647, %v8114_v35  ;;  %v8261_v23 = vpop.permute.xlu0 %8260 }
 0x85a   : > { %v8015_v39 = vand.u32 2147483647, %v7999_v7  ;;  %v8117_v38 = vsub.f32 %v16190_v9, %v16249_v47  ;;  %v8131_v58 = vand.u32 2147483647, %v8115_v53  ;;  %v3977_v36 = vadd.f32 %v16205_v22, %v17529_v57 }
 0x85b   : > { %v8312_v31 = vadd.f32 %v8296_v13, %v8280_v6  ;;  %v8140_v14 = vand.u32 2147483647, %v8124_v63  ;;  %v8186_v40 = vmul.f32 5.0, %v8154_v37  ;;  %v10708_v13 = vpop.eup %10707  ;;  %v8146_v61 = vadd.f32 %v8130_v52, %v8030_v56  ;;  %v17533_v56 = vld [vmem:[#allocation229_spill] sm:$0xff] }
 0x85c   : > { %v8099_v21 = vpop.permute.xlu1 %8098  ;;  %v10710_v48 = vpop.eup %10709  ;;  %v8031_v0 = vadd.f32 %v8015_v39, %v16155_v44  ;;  %v8019_v15 = vand.u32 2147483647, %v8003_v42  ;;  %v8119_v9 = vsub.f32 %v16197_v32, %v16249_v47  ;;  %v8005_v33 = vsub.f32 %v16217_v50, %v16235_v41  ;;  %v17531_v50 = vld [vmem:[#allocation224_spill] sm:$0xff] }
 0x85d   : > { %8328 = vst [vmem:[#allocation10 + $0x38] sm:$0xff] %v8312_v31  ;;  %v8282_v30 = vadd.f32 %v8241_v1, %v8186_v40  ;;  %v8126_v4 = vsub.f32 %v8099_v21, %v16249_v47  ;;  %v8156_v62 = vadd.f32 %v8140_v14, %v8040_v46  ;;  %v8033_v63 = vadd.f32 %v8017_v51, %v16085_v27  ;;  %v17532_v14 = vld [vmem:[#allocation241_spill] sm:$0xff] }
 0x85e   : > { %v16335_v3 = vpop.eup %10711  ;;  %v8133_v37 = vand.u32 2147483647, %v8117_v38  ;;  %v8178_v12 = vmul.f32 5.0, %v8146_v61  ;;  %v8147_v55 = vadd.f32 %v8131_v58, %v8031_v0  ;;  %v3979_v44 = vadd.f32 %v16205_v22, %v17530_v2  ;;  %v17534_v22 = vld [vmem:[#allocation226_spill] sm:$0xff]  ;;  %v17536_v38 = vld [vmem:[#allocation220_spill] sm:$0xff] }
 0x85f   : > { %v8314_v24 = vadd.f32 %v16289_v34, %v8282_v30  ;;  %v8142_v43 = vand.u32 2147483647, %v8126_v4  ;;  %v8188_v18 = vmul.f32 5.0, %v8156_v62  ;;  %v8044_v34 = vadd.f32 %v8028_v60, %v16193_v16  ;;  %v8271_v4 = vpop.permute.xlu0 %8270 }
 0x860   : > { %v8107_v26 = vpop.permute.xlu1 %8106  ;;  %v3993_v16 = vadd.f32 1.0, %v3977_v36  ;;  %v8135_v46 = vand.u32 2147483647, %v8119_v9  ;;  %v8121_v31 = vsub.f32 %v17531_v50, %v16249_v47  ;;  %v4006_v40 = vmul.f32 %v10708_v13, %v17532_v14 }
 0x861   : > { %8330 = vst [vmem:[#allocation10 + $0x48] sm:$0xff] %v8314_v24  ;;  %v8284_v1 = vadd.f32 %v8251_v17, %v8188_v18  ;;  %v8128_v29 = vsub.f32 %v8107_v26, %v16249_v47  ;;  %v8158_v11 = vadd.f32 %v8142_v43, %v8042_v19  ;;  %v8035_v27 = vadd.f32 %v8019_v15, %v17533_v56  ;;  %v17535_v18 = vld [vmem:[#allocation232_spill] sm:$0xff]  ;;  %v17543_v56 = vld [vmem:[#allocation230_spill] sm:$0xff] }
 0x862   : > { %v8021_v52 = vand.u32 2147483647, %v8005_v33  ;;  %v10714_v21 = vpop.eup %10713  ;;  %v8007_v17 = vsub.f32 %v17534_v22, %v16235_v41  ;;  %v8179_v62 = vmul.f32 5.0, %v8147_v55  ;;  %v8149_v60 = vadd.f32 %v8133_v37, %v8033_v63  ;;  %v17539_v33 = vld [vmem:[#allocation71_spill] sm:$0xff] }
 0x863   : > { %v8316_v35 = vadd.f32 %v16292_v45, %v8284_v1  ;;  %v8144_v25 = vand.u32 2147483647, %v8128_v29  ;;  %v8190_v6 = vmul.f32 5.0, %v8158_v11  ;;  %10715 = vrcp.f32 %v3993_v16  ;;  %v17538_v1 = vld [vmem:[#allocation237_spill] sm:$0xff]  ;;  %v17542_v16 = vld [vmem:[#allocation239_spill] sm:$0xff] }
 0x864   : > { %v3995_v39 = vadd.f32 1.0, %v3979_v44  ;;  %v8304_v13 = vmul.f32 2.0, %v4044_v49  ;;  %v8137_v24 = vand.u32 2147483647, %v8121_v31  ;;  %v4033_v43 = vsub.f32 1.0, %v4006_v40 }
 0x865   : > { %8332 = vst [vmem:[#allocation10 + $0x58] sm:$0xff] %v8316_v35  ;;  %v8286_v8 = vadd.f32 %v8261_v23, %v8190_v6  ;;  %v8201_v32 = vpop.permute.xlu1 %8200  ;;  %v8160_v7 = vadd.f32 %v8144_v25, %v8044_v34  ;;  %v4010_v51 = vmul.f32 %v10710_v48, %v17535_v18  ;;  %v8037_v58 = vadd.f32 %v8021_v52, %v17536_v38  ;;  %v10799_v34 = vld [vmem:[#allocation2 + $0x60] sm:$0xff]  ;;  %v17540_v6 = vld [vmem:[#allocation228_spill] sm:$0xff] }
 0x866   : > { %v8274_v45 = vadd.f32 %v8201_v32, %v8178_v12  ;;  %v8151_v57 = vadd.f32 %v8135_v46, %v8035_v27  ;;  %v8023_v36 = vand.u32 2147483647, %v8007_v17  ;;  %v8009_v5 = vsub.f32 %v17538_v1, %v16235_v41  ;;  %v17541_v12 = vld [vmem:[#allocation222_spill] sm:$0xff]  ;;  %v10800_v32 = vld [vmem:[#allocation2 + $0x70] sm:$0xff] }
 0x867   : > { %v8318_v54 = vadd.f32 %v16296_v10, %v8286_v8  ;;  %v8192_v53 = vmul.f32 5.0, %v8160_v7  ;;  %v8181_v29 = vmul.f32 5.0, %v8149_v60  ;;  %v3873_v11 = vadd.f32 1.0, %v16272_v59 }
 0x868   : > { %v8306_v30 = vadd.f32 %v8290_v28, %v8274_v45  ;;  %v17537_v28 = vld [vmem:[#allocation235_spill] sm:$0xff]  ;;  %v3859_v0 = vmul.f32 2.0, %v10799_v34  ;;  %10717 = vrcp.f32 %v3995_v39  ;;  %v8293_v9 = vmul.f32 2.0, %v4033_v43 }
 0x869   : > { %8334 = vst [vmem:[#allocation10 + $0x68] sm:$0xff] %v8318_v54  ;;  %v8288_v42 = vadd.f32 %v8271_v4, %v8192_v53  ;;  %v8206_v19 = vpop.permute.xlu1 %8205  ;;  %v8123_v26 = vsub.f32 %v17537_v28, %v16249_v47  ;;  %v4035_v23 = vsub.f32 1.0, %v4010_v51  ;;  %v4014_v35 = vmul.f32 %v16335_v3, %v17539_v33  ;;  %v17544_v54 = vld [vmem:[#allocation231_spill] sm:$0xff] }
 0x86a   : > { %8322 = vst [vmem:[#allocation10 + $0x8] sm:$0xff] %v8306_v30  ;;  %v8275_v10 = vadd.f32 %v8206_v19, %v8179_v62  ;;  %v8125_v63 = vsub.f32 %v17540_v6, %v16249_v47  ;;  %v8153_v37 = vadd.f32 %v8137_v24, %v8037_v58  ;;  %v8039_v59 = vadd.f32 %v8023_v36, %v17541_v12  ;;  %v17545_v19 = vld [vmem:[#allocation233_spill] sm:$0xff] }
 0x86b   : > { %v8320_v61 = vadd.f32 %v8304_v13, %v8288_v42  ;;  %v8139_v25 = vand.u32 2147483647, %v8123_v26  ;;  %v8025_v55 = vand.u32 2147483647, %v8009_v5  ;;  %v8011_v2 = vsub.f32 %v17542_v16, %v16235_v41 }
 0x86c   : > { %v8307_v49 = vadd.f32 %v16279_v20, %v8275_v10  ;;  %v8183_v20 = vmul.f32 5.0, %v8151_v57  ;;  %v3875_v8 = vadd.f32 1.0, %v3859_v0  ;;  %v3861_v7 = vmul.f32 2.0, %v10800_v32 }
 0x86d   : > { %8336 = vst [vmem:[#allocation10 + $0x78] sm:$0xff] %v8320_v61  ;;  %v8216_v48 = vpop.permute.xlu1 %8215  ;;  %v8295_v3 = vmul.f32 2.0, %v4035_v23  ;;  %v4037_v31 = vsub.f32 1.0, %v4014_v35  ;;  %v4018_v45 = vmul.f32 %v10714_v21, %v3873_v11  ;;  %v10716_v14 = vpop.eup %10715  ;;  %v8141_v40 = vand.u32 2147483647, %v8125_v63 }
 0x86e   : > { %8323 = vst [vmem:[#allocation10 + $0x10] sm:$0xff] %v8307_v49  ;;  %v8277_v15 = vadd.f32 %v8216_v48, %v8181_v29  ;;  %v8127_v27 = vsub.f32 %v17543_v56, %v16249_v47  ;;  %v8185_v52 = vmul.f32 5.0, %v8153_v37  ;;  %v8041_v53 = vadd.f32 %v8025_v55, %v17544_v54 }
 0x86f   : > { %v8027_v22 = vand.u32 2147483647, %v8011_v2  ;;  %v8155_v17 = vadd.f32 %v8139_v25, %v8039_v59  ;;  %v3877_v30 = vadd.f32 1.0, %v3861_v7  ;;  %v8297_v60 = vmul.f32 2.0, %v4037_v31 }
 0x870   : > { %v8309_v44 = vadd.f32 %v8293_v9, %v8277_v15  ;;  %v4039_v39 = vsub.f32 1.0, %v4018_v45  ;;  %v4022_v13 = vmul.f32 %v10716_v14, %v3875_v8  ;;  %v8143_v21 = vand.u32 2147483647, %v8127_v27 }
 0x871   : > { %v8226_v46 = vpop.permute.xlu1 %8225  ;;  %v8043_v24 = vadd.f32 %v8027_v22, %v17545_v19  ;;  %v8187_v43 = vmul.f32 5.0, %v8155_v17  ;;  %v8157_v47 = vadd.f32 %v8141_v40, %v8041_v53 }
 0x872   : > { %8325 = vst [vmem:[#allocation10 + $0x20] sm:$0xff] %v8309_v44  ;;  %v8279_v50 = vadd.f32 %v8226_v46, %v8183_v20  ;;  %v10718_v42 = vpop.eup %10717  ;;  %v8299_v38 = vmul.f32 2.0, %v4039_v39  ;;  %v4041_v58 = vsub.f32 1.0, %v4022_v13 }
 0x873   : > { %v4026_v28 = vmul.f32 %v10718_v42, %v3877_v30  ;;  %v8189_v61 = vmul.f32 5.0, %v8157_v47  ;;  %v8159_v57 = vadd.f32 %v8143_v21, %v8043_v24 }
 0x874   : > { %v8311_v41 = vadd.f32 %v8295_v3, %v8279_v50  ;;  %v8301_v5 = vmul.f32 2.0, %v4041_v58 }
 0x875   : > { %v8236_v4 = vpop.permute.xlu1 %8235  ;;  %v4043_v49 = vsub.f32 1.0, %v4026_v28  ;;  %v8191_v11 = vmul.f32 5.0, %v8159_v57 }
 0x876   : > { %8327 = vst [vmem:[#allocation10 + $0x30] sm:$0xff] %v8311_v41  ;;  %v8281_v62 = vadd.f32 %v8236_v4, %v8185_v52 }
 0x877   : > { %v8303_v48 = vmul.f32 2.0, %v4043_v49 }
 0x878   : > { %v8313_v10 = vadd.f32 %v8297_v60, %v8281_v62 }
 0x879   : > { %v8246_v18 = vpop.permute.xlu1 %8245 }
 0x87a   : > { %8329 = vst [vmem:[#allocation10 + $0x40] sm:$0xff] %v8313_v10  ;;  %v8283_v51 = vadd.f32 %v8246_v18, %v8187_v43 }
 0x87c   : > { %v8315_v26 = vadd.f32 %v8299_v38, %v8283_v51 }
 0x87d   : > { %v8256_v36 = vpop.permute.xlu1 %8255 }
 0x87e   : > { %8331 = vst [vmem:[#allocation10 + $0x50] sm:$0xff] %v8315_v26  ;;  %v8285_v1 = vadd.f32 %v8256_v36, %v8189_v61 }
 0x880   : > { %v8317_v29 = vadd.f32 %v8301_v5, %v8285_v1 }
 0x881   : > { %v8266_v34 = vpop.permute.xlu1 %8265 }
 0x882   : > { %8333 = vst [vmem:[#allocation10 + $0x60] sm:$0xff] %v8317_v29  ;;  %v8287_v0 = vadd.f32 %v8266_v34, %v8191_v11 }
 0x884   : > { %v8319_v15 = vadd.f32 %v8303_v48, %v8287_v0 }
 0x886   : > { %8335 = vst [vmem:[#allocation10 + $0x70] sm:$0xff] %v8319_v15 }
 0x887 PF: > { %p9389_p0 = scmp.eq.s32.totalorder %s11118_s27, 6  ;;  %s11051_s21 = smov [#allocation10]  }
 0x888   : > { %s8346_s2 = sshll.u32 %s11051_s21, 4  ;;  %s8347_s2 = int_to_ptr.vmem [resolvable:$true] %s8346_s2 }
 0x889   : > { %s10917_s13 = scalar_lea.vmem %s8347_s2, 2048  ;;  %p10924_p11 = scmp.lt.s32.totalorder %s8347_s2, %s8347_s2 }
 0x88a   : > { %p10918_p8 = scmp.ne.s32.totalorder %s8347_s2, %s10917_s13  ;;  %p10925_p13 = scmp.lt.s32.totalorder %s10917_s13, %s10917_s13 }
 0x88c   : > { %p10919_p2 = pnand %p10918_p8, %p9389_p0  ;;  %p10926_p10 = por %p10925_p13, %p10924_p11 }
 0x88e   : > { %p10920_p9 = pneg %p10919_p2 }
 0x890   : > { %p10927_p3 = pnand %p10926_p10, %p10920_p9 }
 0x892   : > { %10930 = shalt.err (!%p10927_p3)
}
 0x893   : > { %s10931_s15 = scalar_lea.hbm %s16422_s6, 2048 }
 0x894   : > { %p10932_p6 = scmp.ne.s32.totalorder %s16422_s6, %s10931_s15  ;;  %p10937_p12 = scmp.lt.u32.totalorder %s10931_s15, %s16422_s6 }
 0x896   : > { %p10933_p1 = pnand %p10932_p6, %p9389_p0 }
 0x898   : > { %p10934_p4 = pneg %p10933_p1 }
 0x89a   : > { %p10939_p5 = pnand %p10937_p12, %p10934_p4 }
 0x89c   : > { %10942 = shalt.err (!%p10939_p5)
}
 0x89d   : > { %s11052_s30 = smov 128   ;;  %s11053_s23 = smov 8  }
 0x89e   : > { %9367 = dma.vmem_to_hbm [thread:$0]  (%p9389_p0), %s8347_s2, 2048, %s16422_s6, [#allocation5], %s11052_s30, %s11052_s30, %s11053_s23  }
 0x89f   : > { %10980 = dma.done.wait (%p9389_p0), [#allocation5], 2048  }
 0x8a0   : > { %10982 = vsyncadd (%p9389_p0), [#allocation5], 4294965248 }
 0x8a1 PF: > { %s17546_s11 = sld [smem:[#allocation16_spill]]  ;;  %s17547_s20 = sld [smem:[#allocation15_spill]] }
 0x8a2   : > { %s17548_s23 = sld [smem:[#allocation18_spill]]  ;;  %s17549_s7 = sld [smem:[#allocation17_spill]] }
 0x8a3   : > { %s17550_s21 = smov %s10989_s22  ;;  %s17552_s24 = smov %s11001_s25 }
 0x8a7   : > { %s19_s26 = sadd.s32 1, %s17546_s11   ;;  %s17551_s22 = smov %s17547_s20 }
 0x8a8   : > { %p16_p7 = scmp.ge.s32.totalorder %s19_s26, 9   ;;  %s17553_s25 = smov %s17549_s7 }
 0x8aa   :  { %18 = sbr.rel (!%p16_p7) target bundleno = 8 (0x8), region = 114 }
 0x8b1   :  { %8362 = vsyncpa [#allocation4], 1 }
 0x8b2   :  { %8364 = vsyncpa [#allocation4 + $0x1], 1 }
 0x8b3   :  { %8365 = vsyncpa [#allocation7], 1 }
 0x8b4   :  { %8366 = vsyncpa [#allocation5], 1 }
 0x8b5   :  { %8368 = vsyncpa [#allocation5 + $0x1], 1 }

</bundles_post_ra>
